<compile_context>
chip_gen: v7x
topology: tpu7x:2x2x1
jax: 0.10.0
libtpu: 0.0.40
codegen_flags: <defaults>
</compile_context>

<pallas_src>
from typing import NamedTuple

import jax
import jax.numpy as jnp
from jax.experimental import pallas as pl
from jax.experimental.pallas import tpu as pltpu

# ----------------------------------------------------------------------------
# Small hyperparameters (MUNIT 'gen' config, shrunk)
# ----------------------------------------------------------------------------
INPUT_DIM_A = 3
INPUT_DIM_B = 3
DIM = 8            # base channel count (64 in the paper)
STYLE_DIM = 8
N_DOWNSAMPLE = 2   # content-encoder downsamples / decoder upsamples
N_RES = 2          # residual blocks (4 in the paper)
MLP_DIM = 32
DISPLAY_SIZE = 2   # batch size of the fixed styles s_a / s_b
IMG_H = IMG_W = 16

CPAD = 128         # lane-dense padded channel count (one MXU tile)
LANE = 128

assert INPUT_DIM_A == INPUT_DIM_B, "generator batching assumes equal input dims"


def conv_arch(input_dim):
    """Ordered conv-layer table: name -> (kernel, cin, cout)."""
    A = {}
    # StyleEncoder(4, in, dim, style_dim, norm='none')
    sd = DIM
    A["s_conv0"] = (7, input_dim, sd)
    A["s_down0"] = (4, sd, 2 * sd); sd *= 2
    A["s_down1"] = (4, sd, 2 * sd); sd *= 2
    A["s_down2"] = (4, sd, sd)
    A["s_down3"] = (4, sd, sd)
    A["s_out"] = (1, sd, STYLE_DIM)        # 1x1 conv on pooled 1x1 map == matmul (XLA)
    # ContentEncoder(n_down, n_res, in, dim, norm='in')
    cd = DIM
    A["c_conv0"] = (7, input_dim, cd)
    for i in range(N_DOWNSAMPLE):
        A[f"c_down{i}"] = (4, cd, 2 * cd); cd *= 2
    for r in range(N_RES):
        A[f"c_res{r}_0"] = (3, cd, cd)
        A[f"c_res{r}_1"] = (3, cd, cd)
    # Decoder
    dd = cd
    for r in range(N_RES):
        A[f"d_res{r}_0"] = (3, dd, dd)
        A[f"d_res{r}_1"] = (3, dd, dd)
    for u in range(N_DOWNSAMPLE):
        A[f"d_up{u}"] = (5, dd, dd // 2); dd //= 2
    A["d_out"] = (7, dd, input_dim)
    return A, cd


ARCH, CONTENT_DIM = conv_arch(INPUT_DIM_A)
NUM_ADAIN = N_RES * 2 * 2 * CONTENT_DIM     # mean+std per AdaIN layer


# ----------------------------------------------------------------------------
# Fused conv kernel: matmul + bias + {none,in,adain,ln} + (residual) + act
# ----------------------------------------------------------------------------
def _make_conv_kernel(*, norm, act, npg, cout, has_res, eps=1e-5):
    """Kernel factory.  One grid step == one generator.

      cols_ref : (1, npg*M, Kpad) bf16  im2col patches (K zero-padded)
      w_ref    : (1, Kpad, CPAD)  bf16  weights, Cout zero-padded to 128 lanes
      b_ref    : (1, 1, CPAD)     f32
      [scale/shift_ref]           f32   adain: (1,npg,1,CPAD)  ln: (1,1,CPAD)
      [res_ref : (1, npg*M, CPAD) bf16] fused residual add
      o_ref    : (1, npg*M, CPAD) bf16
    """
    def kernel(*refs):
        i = 0
        cols_ref = refs[i]; i += 1
        w_ref = refs[i]; i += 1
        b_ref = refs[i]; i += 1
        scale_ref = shift_ref = res_ref = None
        if norm in ("adain", "ln"):
            scale_ref = refs[i]; i += 1
            shift_ref = refs[i]; i += 1
        if has_res:
            res_ref = refs[i]; i += 1
        o_ref = refs[i]

        y = jnp.dot(cols_ref[0], w_ref[0],
                    preferred_element_type=jnp.float32)        # MXU, f32 acc
        y = y + b_ref[0]                                        # (npg*M, CPAD)
        m_total = y.shape[0]
        m = m_total // npg

        if norm in ("in", "adain"):
            # Per-(sample, channel) stats over H*W.  Padded lanes are exactly 0
            # (zero weight columns + zero bias) and stay 0 after the affine.
            y3 = y.reshape(npg, m, CPAD)
            mu = jnp.mean(y3, axis=1, keepdims=True)            # (npg, 1, CPAD)
            d = y3 - mu
            var = jnp.mean(d * d, axis=1, keepdims=True)        # biased (PyTorch IN/AdaIN)
            y3 = d * jax.lax.rsqrt(var + eps)
            if norm == "adain":
                y3 = y3 * scale_ref[0] + shift_ref[0]           # (npg,1,CPAD) bcast
            y = y3.reshape(m_total, CPAD)
        elif norm == "ln":
            # MUNIT LayerNorm: per-sample stats over (C,H,W), unbiased std,
            # divide by (std + eps).  Two-pass + lane mask so the 128-lane
            # padding never perturbs the statistics.
            y3 = y.reshape(npg, m, CPAD)
            cnt = float(m * cout)
            s1 = jnp.sum(jnp.sum(y3, axis=2, keepdims=True), axis=1, keepdims=True)
            mean = s1 / cnt                                     # (npg, 1, 1)
            lane = jax.lax.broadcasted_iota(jnp.int32, (1, 1, CPAD), 2)
            d = jnp.where(lane < cout, y3 - mean, 0.0)
            ssq = jnp.sum(jnp.sum(d * d, axis=2, keepdims=True), axis=1, keepdims=True)
            var = ssq / max(cnt - 1.0, 1.0)                     # unbiased
            inv = 1.0 / (jnp.sqrt(var) + eps)
            y3 = d * inv * scale_ref[0] + shift_ref[0]          # (1,CPAD) bcast
            y = y3.reshape(m_total, CPAD)

        if has_res:
            y = y + res_ref[0].astype(jnp.float32)              # fused skip-add
        if act == "relu":
            y = jnp.maximum(y, 0.0)
        elif act == "tanh":
            y = jnp.tanh(y)
        o_ref[0] = y.astype(o_ref.dtype)                        # bf16 writeback
    return kernel


# ----------------------------------------------------------------------------
# Glue: lane-padded activation container, reflect-pad + im2col (XLA)
# ----------------------------------------------------------------------------
class Act(NamedTuple):
    data: jax.Array   # (2, npg*M, CPAD) bf16, lane-padded, generator-major
    h: int
    w: int
    c: int


def act_to_nhwc(a: Act, npg: int):
    """(2, npg*M, CPAD) -> (2*npg, H, W, c) bf16 (channel slice fuses downstream)."""
    x = a.data.reshape(2 * npg, a.h, a.w, CPAD)
    return x[..., :a.c]


def pad_last(x, target):
    p = target - x.shape[-1]
    if p <= 0:
        return x
    return jnp.pad(x, [(0, 0)] * (x.ndim - 1) + [(0, p)])


def im2col(x, k, stride):
    """x: (B, Hp, Wp, C) already padded -> (B, Ho*Wo, k*k*C), feature order (kh, kw, C)."""
    # TODO(synk): patch extraction stays in XLA; folding it into the kernel
    # (accumulate over (kh, kw) with pl.ds offsets) would drop the k^2 HBM blow-up.
    B, H, W, C = x.shape
    Ho = (H - k) // stride + 1
    Wo = (W - k) // stride + 1
    patches = []
    for i in range(k):
        for j in range(k):
            patches.append(
                x[:, i:i + stride * (Ho - 1) + 1:stride,
                    j:j + stride * (Wo - 1) + 1:stride, :])
    cols = jnp.concatenate(patches, axis=-1).reshape(B, Ho * Wo, k * k * C)
    return cols, Ho, Wo


def conv_block(x_nhwc, P, name, *, stride, pad, norm, act, npg,
               scale=None, shift=None, residual=None):
    """MUNIT Conv2dBlock for the stacked (gen_a || gen_b) batch.

    x_nhwc: (2*npg, H, W, cin) bf16, rows [:npg] belong to generator 0.
    Returns Act with lane-padded bf16 data (2, npg*M, CPAD).
    """
    k, _cin, cout = ARCH[name]
    w, b = P[name]["w"], P[name]["b"]          # (2, Kpad, CPAD) bf16, (2, 1, CPAD) f32
    kpad = w.shape[1]
    if pad > 0:
        x_nhwc = jnp.pad(x_nhwc, ((0, 0), (pad, pad), (pad, pad), (0, 0)), mode="reflect")
    cols, Ho, Wo = im2col(x_nhwc, k, stride)                    # bf16
    M = Ho * Wo
    cols = pad_last(cols, kpad).reshape(2, npg * M, kpad)       # fold npg into M

    in_arrays = [cols, w, b]
    in_specs = [
        pl.BlockSpec((1, npg * M, kpad), lambda g: (g, 0, 0)),
        pl.BlockSpec((1, kpad, CPAD), lambda g: (g, 0, 0)),
        pl.BlockSpec((1, 1, CPAD), lambda g: (g, 0, 0)),
    ]
    if norm == "adain":                          # per-(sample, channel) std/mean
        in_arrays += [scale, shift]              # (2, npg, 1, CPAD) f32
        in_specs += [pl.BlockSpec((1, npg, 1, CPAD), lambda g: (g, 0, 0, 0)),
                     pl.BlockSpec((1, npg, 1, CPAD), lambda g: (g, 0, 0, 0))]
    elif norm == "ln":                           # per-(generator, channel) gamma/beta
        in_arrays += [scale, shift]              # (2, 1, CPAD) f32
        in_specs += [pl.BlockSpec((1, 1, CPAD), lambda g: (g, 0, 0)),
                     pl.BlockSpec((1, 1, CPAD), lambda g: (g, 0, 0))]
    has_res = residual is not None
    if has_res:
        in_arrays.append(residual)               # (2, npg*M, CPAD) bf16
        in_specs.append(pl.BlockSpec((1, npg * M, CPAD), lambda g: (g, 0, 0)))

    y = pl.pallas_call(
        _make_conv_kernel(norm=norm, act=act, npg=npg, cout=cout, has_res=has_res),
        out_shape=jax.ShapeDtypeStruct((2, npg * M, CPAD), jnp.bfloat16),
        grid=(2,),                               # one step per generator
        in_specs=in_specs,
        out_specs=pl.BlockSpec((1, npg * M, CPAD), lambda g: (g, 0, 0)),
        compiler_params=pltpu.CompilerParams(
            # TODO(synk): pltpu.CORE_PARALLEL on v7x to shard over both TCs.
            dimension_semantics=("parallel",)),
    )(*in_arrays)
    return Act(y, Ho, Wo, cout)


# ----------------------------------------------------------------------------
# AdaINGen encode / decode over the stacked (gen_a || gen_b) batch
# ----------------------------------------------------------------------------
def gen_encode(x_nhwc, P, npg):
    # --- StyleEncoder(4, in, dim, style_dim, norm='none') ---
    # (forward() discards this style; computed to mirror encode() faithfully)
    s = conv_block(x_nhwc, P, "s_conv0", stride=1, pad=3, norm="none", act="relu", npg=npg)
    for nm in ("s_down0", "s_down1", "s_down2", "s_down3"):
        s = conv_block(act_to_nhwc(s, npg), P, nm, stride=2, pad=1,
                       norm="none", act="relu", npg=npg)
    # global average pool + 1x1 conv == matmul; kept in XLA (M=1 per sample).
    sp = jnp.mean(act_to_nhwc(s, npg).astype(jnp.float32), axis=(1, 2))   # (2*npg, sd)
    sp = sp.reshape(2, npg, -1)
    style = jnp.einsum("gnk,gkc->gnc", sp, P["s_out_w"]) + P["s_out_b"][:, None, :]
    style = style.reshape(2 * npg, STYLE_DIM)

    # --- ContentEncoder(n_down, n_res, in, dim, norm='in') ---
    c = conv_block(x_nhwc, P, "c_conv0", stride=1, pad=3, norm="in", act="relu", npg=npg)
    for i in range(N_DOWNSAMPLE):
        c = conv_block(act_to_nhwc(c, npg), P, f"c_down{i}", stride=2, pad=1,
                       norm="in", act="relu", npg=npg)
    for r in range(N_RES):
        h = conv_block(act_to_nhwc(c, npg), P, f"c_res{r}_0", stride=1, pad=1,
                       norm="in", act="relu", npg=npg)
        # second conv: residual add fused into the kernel epilogue
        c = conv_block(act_to_nhwc(h, npg), P, f"c_res{r}_1", stride=1, pad=1,
                       norm="in", act="none", npg=npg, residual=c.data)
    return c, style


def _adain_affine(adain, off, C):
    """Slice (mean, std) for one AdaIN layer; pad to 128 lanes; shape (2,npg,1,CPAD)."""
    mean = pad_last(adain[..., off:off + C], CPAD)[:, :, None, :].astype(jnp.float32)
    std = pad_last(adain[..., off + C:off + 2 * C], CPAD)[:, :, None, :].astype(jnp.float32)
    return std, mean


def gen_decode(content: Act, style, P, npg):
    # style: (2, npg, STYLE_DIM) f32 - row 0 is s_a (used by gen_a), row 1 s_b.
    # AdaIN MLP: three tiny dense layers -> plain XLA dots (matvec scale).
    h = jnp.maximum(jnp.einsum("gns,gsm->gnm", style, P["mlp0_w"])
                    + P["mlp0_b"][:, None, :], 0.0)
    h = jnp.maximum(jnp.einsum("gnm,gmk->gnk", h, P["mlp1_w"])
                    + P["mlp1_b"][:, None, :], 0.0)
    adain = jnp.einsum("gnm,gmk->gnk", h, P["mlp2_w"]) + P["mlp2_b"][:, None, :]

    C = CONTENT_DIM
    off = 0
    y = content
    for r in range(N_RES):
        res = y.data
        std0, mean0 = _adain_affine(adain, off, C); off += 2 * C
        y = conv_block(act_to_nhwc(y, npg), P, f"d_res{r}_0", stride=1, pad=1,
                       norm="adain", act="relu", npg=npg, scale=std0, shift=mean0)
        std1, mean1 = _adain_affine(adain, off, C); off += 2 * C
        y = conv_block(act_to_nhwc(y, npg), P, f"d_res{r}_1", stride=1, pad=1,
                       norm="adain", act="none", npg=npg, scale=std1, shift=mean1,
                       residual=res)
    for u in range(N_DOWNSAMPLE):
        # TODO(synk): nearest x2 upsample kept in XLA; folding it into the d_up
        # conv's patch indexing would remove the 4x activation round trip.
        xu = act_to_nhwc(y, npg)
        xu = jnp.repeat(jnp.repeat(xu, 2, axis=1), 2, axis=2)
        y = conv_block(xu, P, f"d_up{u}", stride=1, pad=2, norm="ln", act="relu",
                       npg=npg, scale=P[f"d_up{u}_gamma"], shift=P[f"d_up{u}_beta"])
    y = conv_block(act_to_nhwc(y, npg), P, "d_out", stride=1, pad=3,
                   norm="none", act="tanh", npg=npg)
    return y


# ----------------------------------------------------------------------------
# Parameter init (deterministic, synthetic) + one-time generator packing
# ----------------------------------------------------------------------------
class KeyGen:
    def __init__(self, key):
        self._key = key

    def __call__(self):
        self._key, sub = jax.random.split(self._key)
        return sub


def init_linear(kg, din, dout):
    return {"w": 0.02 * jax.random.normal(kg(), (din, dout), jnp.float32),
            "b": jnp.zeros((dout,), jnp.float32)}


def init_gen(kg, input_dim):
    arch, cdim = conv_arch(input_dim)
    P = {}
    for name, (k, cin, cout) in arch.items():
        P[name] = {"w": 0.02 * jax.random.normal(kg(), (k * k * cin, cout), jnp.float32),
                   "b": jnp.zeros((cout,), jnp.float32)}
    for u in range(N_DOWNSAMPLE):
        co = arch[f"d_up{u}"][2]
        P[f"d_up{u}_gamma"] = jax.random.uniform(kg(), (co,), jnp.float32)
        P[f"d_up{u}_beta"] = jnp.zeros((co,), jnp.float32)
    P["mlp0"] = init_linear(kg, STYLE_DIM, MLP_DIM)
    P["mlp1"] = init_linear(kg, MLP_DIM, MLP_DIM)
    P["mlp2"] = init_linear(kg, MLP_DIM, N_RES * 2 * 2 * cdim)
    return P


def prepare_stacked_params(params):
    """One-time packing (OUTSIDE the jitted forward): stack gen_a/gen_b per layer,
    pad Cout to 128 lanes, pad K to a multiple of 128, cast conv weights to bf16."""
    Pa, Pb = params["gen_a"], params["gen_b"]
    P = {}
    for name, (k, cin, cout) in ARCH.items():
        if name == "s_out":
            P["s_out_w"] = jnp.stack([Pa[name]["w"], Pb[name]["w"]])
            P["s_out_b"] = jnp.stack([Pa[name]["b"], Pb[name]["b"]])
            continue
        K = k * k * cin
        kpad = ((K + LANE - 1) // LANE) * LANE
        w = jnp.stack([Pa[name]["w"], Pb[name]["w"]])                      # (2, K, cout)
        w = jnp.pad(w, ((0, 0), (0, kpad - K), (0, CPAD - cout)))          # (2, Kpad, 128)
        b = jnp.stack([Pa[name]["b"], Pb[name]["b"]])
        b = jnp.pad(b, ((0, 0), (0, CPAD - cout)))[:, None, :]             # (2, 1, 128)
        P[name] = {"w": w.astype(jnp.bfloat16), "b": b.astype(jnp.float32)}
    for u in range(N_DOWNSAMPLE):
        co = ARCH[f"d_up{u}"][2]
        g = jnp.stack([Pa[f"d_up{u}_gamma"], Pb[f"d_up{u}_gamma"]])
        bt = jnp.stack([Pa[f"d_up{u}_beta"], Pb[f"d_up{u}_beta"]])
        P[f"d_up{u}_gamma"] = jnp.pad(g, ((0, 0), (0, CPAD - co)))[:, None, :]
        P[f"d_up{u}_beta"] = jnp.pad(bt, ((0, 0), (0, CPAD - co)))[:, None, :]
    for i in range(3):
        P[f"mlp{i}_w"] = jnp.stack([Pa[f"mlp{i}"]["w"], Pb[f"mlp{i}"]["w"]])
        P[f"mlp{i}_b"] = jnp.stack([Pa[f"mlp{i}"]["b"], Pb[f"mlp{i}"]["b"]])
    return P


# ----------------------------------------------------------------------------
# MUNIT_Trainer.forward
# ----------------------------------------------------------------------------
@jax.jit
def munit_forward(P, s_a, s_b, x_a_nchw, x_b_nchw):
    npg = x_a_nchw.shape[0]
    x_a = jnp.transpose(x_a_nchw, (0, 2, 3, 1)).astype(jnp.bfloat16)   # NCHW -> NHWC, bf16
    x_b = jnp.transpose(x_b_nchw, (0, 2, 3, 1)).astype(jnp.bfloat16)
    # Encode both domains in one stacked pass (gen_a on rows [:npg], gen_b on [npg:]).
    x_enc = jnp.concatenate([x_a, x_b], axis=0)
    c, _s_fake = gen_encode(x_enc, P, npg)
    # Decode: gen_a.decode(c_b, s_a) and gen_b.decode(c_a, s_b) -> swap generator blocks.
    content_dec = Act(c.data[::-1], c.h, c.w, c.c)
    style = jnp.stack([s_a, s_b]).astype(jnp.float32)                  # (2, npg, style_dim)
    y = gen_decode(content_dec, style, P, npg)
    out = act_to_nhwc(y, npg).astype(jnp.float32)                      # (2*npg, H, W, 3)
    x_ba, x_ab = out[:npg], out[npg:]
    return (jnp.transpose(x_ab, (0, 3, 1, 2)),                         # NHWC -> NCHW
            jnp.transpose(x_ba, (0, 3, 1, 2)))


if __name__ == "__main__":
    kg = KeyGen(jax.random.PRNGKey(0))
    params = {
        "gen_a": init_gen(kg, INPUT_DIM_A),
        "gen_b": init_gen(kg, INPUT_DIM_B),
        # fixed styles (self.s_a / self.s_b), shape (display_size, style_dim)
        "s_a": jax.random.normal(kg(), (DISPLAY_SIZE, STYLE_DIM), jnp.float32),
        "s_b": jax.random.normal(kg(), (DISPLAY_SIZE, STYLE_DIM), jnp.float32),
    }
    # One-time weight packing (stack / pad / bf16) outside the jitted path.
    P = prepare_stacked_params(params)

    x_a = jax.random.normal(kg(), (DISPLAY_SIZE, INPUT_DIM_A, IMG_H, IMG_W), jnp.float32)
    x_b = jax.random.normal(kg(), (DISPLAY_SIZE, INPUT_DIM_B, IMG_H, IMG_W), jnp.float32)

    x_ab, x_ba = munit_forward(P, params["s_a"], params["s_b"], x_a, x_b)
    x_ab = jax.block_until_ready(x_ab)
    x_ba = jax.block_until_ready(x_ba)
    assert x_ab.shape == (DISPLAY_SIZE, INPUT_DIM_B, IMG_H, IMG_W)
    assert x_ba.shape == (DISPLAY_SIZE, INPUT_DIM_A, IMG_H, IMG_W)
    assert bool(jnp.all(jnp.isfinite(x_ab))) and bool(jnp.all(jnp.isfinite(x_ba)))
    print("KERNEL_OK")
</pallas_src>

<mosaic_0001>
module attributes {stable_mosaic.version = 11 : i64} {
  func.func @kernel(%arg0: i32, %arg1: memref<1x512x256xbf16, #tpu.memory_space<vmem>>, %arg2: memref<1x256x128xbf16, #tpu.memory_space<vmem>>, %arg3: memref<1x1x128xf32, #tpu.memory_space<vmem>>, %arg4: memref<1x512x128xbf16, #tpu.memory_space<vmem>>) attributes {dimension_semantics = [#tpu.dimension_semantics<parallel>], iteration_bounds = array<i64: 2>, scalar_prefetch = 0 : i64, scratch_operands = 0 : i64, tpu.core_type = #tpu.core_type<tc>, window_params = [{transform_indices = @transform_0, window_bounds = array<i64: 1, 512, 256>}, {transform_indices = @transform_1, window_bounds = array<i64: 1, 256, 128>}, {transform_indices = @transform_2, window_bounds = array<i64: 1, 1, 128>}, {transform_indices = @transform_3, window_bounds = array<i64: 1, 512, 128>}]} {
    %c0 = arith.constant 0 : index
    %c0_0 = arith.constant 0 : index
    %c0_1 = arith.constant 0 : index
    %0 = vector.load %arg1[%c0, %c0_0, %c0_1] : memref<1x512x256xbf16, #tpu.memory_space<vmem>>, vector<1x512x256xbf16>
    %1 = vector.shape_cast %0 : vector<1x512x256xbf16> to vector<512x256xbf16>
    %c0_2 = arith.constant 0 : index
    %c0_3 = arith.constant 0 : index
    %c0_4 = arith.constant 0 : index
    %2 = vector.load %arg2[%c0_2, %c0_3, %c0_4] : memref<1x256x128xbf16, #tpu.memory_space<vmem>>, vector<1x256x128xbf16>
    %3 = vector.shape_cast %2 : vector<1x256x128xbf16> to vector<256x128xbf16>
    %cst = arith.constant dense<0.000000e+00> : vector<512x128xf32>
    %4 = tpu.matmul %1, %3, %cst {dimension_numbers = #tpu.dot_dimension_numbers<[1], [0], [0], [1], [0, 0, 1, 1], [], []>} : vector<512x256xbf16>, vector<256x128xbf16>, vector<512x128xf32> -> vector<512x128xf32>
    %c0_5 = arith.constant 0 : index
    %c0_6 = arith.constant 0 : index
    %c0_7 = arith.constant 0 : index
    %5 = vector.load %arg3[%c0_5, %c0_6, %c0_7] : memref<1x1x128xf32, #tpu.memory_space<vmem>>, vector<1x1x128xf32>
    %6 = vector.shape_cast %5 : vector<1x1x128xf32> to vector<1x128xf32>
    %7 = vector.broadcast %6 : vector<1x128xf32> to vector<512x128xf32>
    %8 = arith.addf %4, %7 : vector<512x128xf32>
    %9 = vector.shape_cast %8 : vector<512x128xf32> to vector<2x256x128xf32>
    %cst_8 = arith.constant dense<0.000000e+00> : vector<2x128xf32>
    %10 = vector.multi_reduction <add>, %9, %cst_8 [1] : vector<2x256x128xf32> to vector<2x128xf32>
    %11 = vector.shape_cast %10 : vector<2x128xf32> to vector<2x1x128xf32>
    %cst_9 = arith.constant 2.560000e+02 : f32
    %12 = vector.broadcast %cst_9 : f32 to vector<2x1x128xf32>
    %13 = arith.divf %11, %12 : vector<2x1x128xf32>
    %14 = vector.broadcast %13 : vector<2x1x128xf32> to vector<2x256x128xf32>
    %15 = arith.subf %9, %14 : vector<2x256x128xf32>
    %16 = arith.mulf %15, %15 : vector<2x256x128xf32>
    %cst_10 = arith.constant dense<0.000000e+00> : vector<2x128xf32>
    %17 = vector.multi_reduction <add>, %16, %cst_10 [1] : vector<2x256x128xf32> to vector<2x128xf32>
    %18 = vector.shape_cast %17 : vector<2x128xf32> to vector<2x1x128xf32>
    %cst_11 = arith.constant 2.560000e+02 : f32
    %19 = vector.broadcast %cst_11 : f32 to vector<2x1x128xf32>
    %20 = arith.divf %18, %19 : vector<2x1x128xf32>
    %cst_12 = arith.constant 9.99999974E-6 : f32
    %21 = vector.broadcast %cst_12 : f32 to vector<2x1x128xf32>
    %22 = arith.addf %20, %21 : vector<2x1x128xf32>
    %23 = math.rsqrt %22 : vector<2x1x128xf32>
    %24 = vector.broadcast %23 : vector<2x1x128xf32> to vector<2x256x128xf32>
    %25 = arith.mulf %15, %24 : vector<2x256x128xf32>
    %26 = vector.shape_cast %25 : vector<2x256x128xf32> to vector<512x128xf32>
    %cst_13 = arith.constant 0.000000e+00 : f32
    %27 = vector.broadcast %cst_13 : f32 to vector<512x128xf32>
    %28 = arith.maximumf %26, %27 : vector<512x128xf32>
    %29 = arith.truncf %28 : vector<512x128xf32> to vector<512x128xbf16>
    %c0_14 = arith.constant 0 : index
    %c0_15 = arith.constant 0 : index
    %c0_16 = arith.constant 0 : index
    %30 = vector.load %arg4[%c0_14, %c0_15, %c0_16] : memref<1x512x128xbf16, #tpu.memory_space<vmem>>, vector<1x512x128xbf16>
    %31 = vector.shape_cast %30 : vector<1x512x128xbf16> to vector<512x128xbf16>
    %32 = vector.shape_cast %29 : vector<512x128xbf16> to vector<1x512x128xbf16>
    tpu.vector_store %arg4[%c0_14, %c0_15, %c0_16], %32 {strides = array<i32>} : memref<1x512x128xbf16, #tpu.memory_space<vmem>>, vector<1x512x128xbf16>,
    return
  }
  func.func @transform_0(%arg0: i32) -> (i32, i32, i32) {
    %c0_i32 = arith.constant 0 : i32
    %c0_i32_0 = arith.constant 0 : i32
    %c0_i32_1 = arith.constant 0 : i32
    return %arg0, %c0_i32, %c0_i32_0 : i32, i32, i32
  }
  func.func @transform_1(%arg0: i32) -> (i32, i32, i32) {
    %c0_i32 = arith.constant 0 : i32
    %c0_i32_0 = arith.constant 0 : i32
    %c0_i32_1 = arith.constant 0 : i32
    return %arg0, %c0_i32, %c0_i32_0 : i32, i32, i32
  }
  func.func @transform_2(%arg0: i32) -> (i32, i32, i32) {
    %c0_i32 = arith.constant 0 : i32
    %c0_i32_0 = arith.constant 0 : i32
    %c0_i32_1 = arith.constant 0 : i32
    return %arg0, %c0_i32, %c0_i32_0 : i32, i32, i32
  }
  func.func @transform_3(%arg0: i32) -> (i32, i32, i32) {
    %c0_i32 = arith.constant 0 : i32
    %c0_i32_0 = arith.constant 0 : i32
    %c0_i32_1 = arith.constant 0 : i32
    return %arg0, %c0_i32, %c0_i32_0 : i32, i32, i32
  }
}

module attributes {stable_mosaic.version = 11 : i64} {
  func.func @kernel(%arg0: i32, %arg1: memref<1x128x128xbf16, #tpu.memory_space<vmem>>, %arg2: memref<1x128x128xbf16, #tpu.memory_space<vmem>>, %arg3: memref<1x1x128xf32, #tpu.memory_space<vmem>>, %arg4: memref<1x128x128xbf16, #tpu.memory_space<vmem>>) attributes {dimension_semantics = [#tpu.dimension_semantics<parallel>], iteration_bounds = array<i64: 2>, scalar_prefetch = 0 : i64, scratch_operands = 0 : i64, tpu.core_type = #tpu.core_type<tc>, window_params = [{transform_indices = @transform_0, window_bounds = array<i64: 1, 128, 128>}, {transform_indices = @transform_1, window_bounds = array<i64: 1, 128, 128>}, {transform_indices = @transform_2, window_bounds = array<i64: 1, 1, 128>}, {transform_indices = @transform_3, window_bounds = array<i64: 1, 128, 128>}]} {
    %c0 = arith.constant 0 : index
    %c0_0 = arith.constant 0 : index
    %c0_1 = arith.constant 0 : index
    %0 = vector.load %arg1[%c0, %c0_0, %c0_1] : memref<1x128x128xbf16, #tpu.memory_space<vmem>>, vector<1x128x128xbf16>
    %1 = vector.shape_cast %0 : vector<1x128x128xbf16> to vector<128x128xbf16>
    %c0_2 = arith.constant 0 : index
    %c0_3 = arith.constant 0 : index
    %c0_4 = arith.constant 0 : index
    %2 = vector.load %arg2[%c0_2, %c0_3, %c0_4] : memref<1x128x128xbf16, #tpu.memory_space<vmem>>, vector<1x128x128xbf16>
    %3 = vector.shape_cast %2 : vector<1x128x128xbf16> to vector<128x128xbf16>
    %cst = arith.constant dense<0.000000e+00> : vector<128x128xf32>
    %4 = tpu.matmul %1, %3, %cst {dimension_numbers = #tpu.dot_dimension_numbers<[1], [0], [0], [1], [0, 0, 1, 1], [], []>} : vector<128x128xbf16>, vector<128x128xbf16>, vector<128x128xf32> -> vector<128x128xf32>
    %c0_5 = arith.constant 0 : index
    %c0_6 = arith.constant 0 : index
    %c0_7 = arith.constant 0 : index
    %5 = vector.load %arg3[%c0_5, %c0_6, %c0_7] : memref<1x1x128xf32, #tpu.memory_space<vmem>>, vector<1x1x128xf32>
    %6 = vector.shape_cast %5 : vector<1x1x128xf32> to vector<1x128xf32>
    %7 = vector.broadcast %6 : vector<1x128xf32> to vector<128x128xf32>
    %8 = arith.addf %4, %7 : vector<128x128xf32>
    %9 = vector.shape_cast %8 : vector<128x128xf32> to vector<2x64x128xf32>
    %cst_8 = arith.constant dense<0.000000e+00> : vector<2x128xf32>
    %10 = vector.multi_reduction <add>, %9, %cst_8 [1] : vector<2x64x128xf32> to vector<2x128xf32>
    %11 = vector.shape_cast %10 : vector<2x128xf32> to vector<2x1x128xf32>
    %cst_9 = arith.constant 6.400000e+01 : f32
    %12 = vector.broadcast %cst_9 : f32 to vector<2x1x128xf32>
    %13 = arith.divf %11, %12 : vector<2x1x128xf32>
    %14 = vector.broadcast %13 : vector<2x1x128xf32> to vector<2x64x128xf32>
    %15 = arith.subf %9, %14 : vector<2x64x128xf32>
    %16 = arith.mulf %15, %15 : vector<2x64x128xf32>
    %cst_10 = arith.constant dense<0.000000e+00> : vector<2x128xf32>
    %17 = vector.multi_reduction <add>, %16, %cst_10 [1] : vector<2x64x128xf32> to vector<2x128xf32>
    %18 = vector.shape_cast %17 : vector<2x128xf32> to vector<2x1x128xf32>
    %cst_11 = arith.constant 6.400000e+01 : f32
    %19 = vector.broadcast %cst_11 : f32 to vector<2x1x128xf32>
    %20 = arith.divf %18, %19 : vector<2x1x128xf32>
    %cst_12 = arith.constant 9.99999974E-6 : f32
    %21 = vector.broadcast %cst_12 : f32 to vector<2x1x128xf32>
    %22 = arith.addf %20, %21 : vector<2x1x128xf32>
    %23 = math.rsqrt %22 : vector<2x1x128xf32>
    %24 = vector.broadcast %23 : vector<2x1x128xf32> to vector<2x64x128xf32>
    %25 = arith.mulf %15, %24 : vector<2x64x128xf32>
    %26 = vector.shape_cast %25 : vector<2x64x128xf32> to vector<128x128xf32>
    %cst_13 = arith.constant 0.000000e+00 : f32
    %27 = vector.broadcast %cst_13 : f32 to vector<128x128xf32>
    %28 = arith.maximumf %26, %27 : vector<128x128xf32>
    %29 = arith.truncf %28 : vector<128x128xf32> to vector<128x128xbf16>
    %c0_14 = arith.constant 0 : index
    %c0_15 = arith.constant 0 : index
    %c0_16 = arith.constant 0 : index
    %30 = vector.load %arg4[%c0_14, %c0_15, %c0_16] : memref<1x128x128xbf16, #tpu.memory_space<vmem>>, vector<1x128x128xbf16>
    %31 = vector.shape_cast %30 : vector<1x128x128xbf16> to vector<128x128xbf16>
    %32 = vector.shape_cast %29 : vector<128x128xbf16> to vector<1x128x128xbf16>
    tpu.vector_store %arg4[%c0_14, %c0_15, %c0_16], %32 {strides = array<i32>} : memref<1x128x128xbf16, #tpu.memory_space<vmem>>, vector<1x128x128xbf16>,
    return
  }
  func.func @transform_0(%arg0: i32) -> (i32, i32, i32) {
    %c0_i32 = arith.constant 0 : i32
    %c0_i32_0 = arith.constant 0 : i32
    %c0_i32_1 = arith.constant 0 : i32
    return %arg0, %c0_i32, %c0_i32_0 : i32, i32, i32
  }
  func.func @transform_1(%arg0: i32) -> (i32, i32, i32) {
    %c0_i32 = arith.constant 0 : i32
    %c0_i32_0 = arith.constant 0 : i32
    %c0_i32_1 = arith.constant 0 : i32
    return %arg0, %c0_i32, %c0_i32_0 : i32, i32, i32
  }
  func.func @transform_2(%arg0: i32) -> (i32, i32, i32) {
    %c0_i32 = arith.constant 0 : i32
    %c0_i32_0 = arith.constant 0 : i32
    %c0_i32_1 = arith.constant 0 : i32
    return %arg0, %c0_i32, %c0_i32_0 : i32, i32, i32
  }
  func.func @transform_3(%arg0: i32) -> (i32, i32, i32) {
    %c0_i32 = arith.constant 0 : i32
    %c0_i32_0 = arith.constant 0 : i32
    %c0_i32_1 = arith.constant 0 : i32
    return %arg0, %c0_i32, %c0_i32_0 : i32, i32, i32
  }
}

module attributes {stable_mosaic.version = 11 : i64} {
  func.func @kernel(%arg0: i32, %arg1: memref<1x32x256xbf16, #tpu.memory_space<vmem>>, %arg2: memref<1x256x128xbf16, #tpu.memory_space<vmem>>, %arg3: memref<1x1x128xf32, #tpu.memory_space<vmem>>, %arg4: memref<1x32x128xbf16, #tpu.memory_space<vmem>>) attributes {dimension_semantics = [#tpu.dimension_semantics<parallel>], iteration_bounds = array<i64: 2>, scalar_prefetch = 0 : i64, scratch_operands = 0 : i64, tpu.core_type = #tpu.core_type<tc>, window_params = [{transform_indices = @transform_0, window_bounds = array<i64: 1, 32, 256>}, {transform_indices = @transform_1, window_bounds = array<i64: 1, 256, 128>}, {transform_indices = @transform_2, window_bounds = array<i64: 1, 1, 128>}, {transform_indices = @transform_3, window_bounds = array<i64: 1, 32, 128>}]} {
    %c0 = arith.constant 0 : index
    %c0_0 = arith.constant 0 : index
    %c0_1 = arith.constant 0 : index
    %0 = vector.load %arg1[%c0, %c0_0, %c0_1] : memref<1x32x256xbf16, #tpu.memory_space<vmem>>, vector<1x32x256xbf16>
    %1 = vector.shape_cast %0 : vector<1x32x256xbf16> to vector<32x256xbf16>
    %c0_2 = arith.constant 0 : index
    %c0_3 = arith.constant 0 : index
    %c0_4 = arith.constant 0 : index
    %2 = vector.load %arg2[%c0_2, %c0_3, %c0_4] : memref<1x256x128xbf16, #tpu.memory_space<vmem>>, vector<1x256x128xbf16>
    %3 = vector.shape_cast %2 : vector<1x256x128xbf16> to vector<256x128xbf16>
    %cst = arith.constant dense<0.000000e+00> : vector<32x128xf32>
    %4 = tpu.matmul %1, %3, %cst {dimension_numbers = #tpu.dot_dimension_numbers<[1], [0], [0], [1], [0, 0, 1, 1], [], []>} : vector<32x256xbf16>, vector<256x128xbf16>, vector<32x128xf32> -> vector<32x128xf32>
    %c0_5 = arith.constant 0 : index
    %c0_6 = arith.constant 0 : index
    %c0_7 = arith.constant 0 : index
    %5 = vector.load %arg3[%c0_5, %c0_6, %c0_7] : memref<1x1x128xf32, #tpu.memory_space<vmem>>, vector<1x1x128xf32>
    %6 = vector.shape_cast %5 : vector<1x1x128xf32> to vector<1x128xf32>
    %7 = vector.broadcast %6 : vector<1x128xf32> to vector<32x128xf32>
    %8 = arith.addf %4, %7 : vector<32x128xf32>
    %9 = vector.shape_cast %8 : vector<32x128xf32> to vector<2x16x128xf32>
    %cst_8 = arith.constant dense<0.000000e+00> : vector<2x128xf32>
    %10 = vector.multi_reduction <add>, %9, %cst_8 [1] : vector<2x16x128xf32> to vector<2x128xf32>
    %11 = vector.shape_cast %10 : vector<2x128xf32> to vector<2x1x128xf32>
    %cst_9 = arith.constant 1.600000e+01 : f32
    %12 = vector.broadcast %cst_9 : f32 to vector<2x1x128xf32>
    %13 = arith.divf %11, %12 : vector<2x1x128xf32>
    %14 = vector.broadcast %13 : vector<2x1x128xf32> to vector<2x16x128xf32>
    %15 = arith.subf %9, %14 : vector<2x16x128xf32>
    %16 = arith.mulf %15, %15 : vector<2x16x128xf32>
    %cst_10 = arith.constant dense<0.000000e+00> : vector<2x128xf32>
    %17 = vector.multi_reduction <add>, %16, %cst_10 [1] : vector<2x16x128xf32> to vector<2x128xf32>
    %18 = vector.shape_cast %17 : vector<2x128xf32> to vector<2x1x128xf32>
    %cst_11 = arith.constant 1.600000e+01 : f32
    %19 = vector.broadcast %cst_11 : f32 to vector<2x1x128xf32>
    %20 = arith.divf %18, %19 : vector<2x1x128xf32>
    %cst_12 = arith.constant 9.99999974E-6 : f32
    %21 = vector.broadcast %cst_12 : f32 to vector<2x1x128xf32>
    %22 = arith.addf %20, %21 : vector<2x1x128xf32>
    %23 = math.rsqrt %22 : vector<2x1x128xf32>
    %24 = vector.broadcast %23 : vector<2x1x128xf32> to vector<2x16x128xf32>
    %25 = arith.mulf %15, %24 : vector<2x16x128xf32>
    %26 = vector.shape_cast %25 : vector<2x16x128xf32> to vector<32x128xf32>
    %cst_13 = arith.constant 0.000000e+00 : f32
    %27 = vector.broadcast %cst_13 : f32 to vector<32x128xf32>
    %28 = arith.maximumf %26, %27 : vector<32x128xf32>
    %29 = arith.truncf %28 : vector<32x128xf32> to vector<32x128xbf16>
    %c0_14 = arith.constant 0 : index
    %c0_15 = arith.constant 0 : index
    %c0_16 = arith.constant 0 : index
    %30 = vector.load %arg4[%c0_14, %c0_15, %c0_16] : memref<1x32x128xbf16, #tpu.memory_space<vmem>>, vector<1x32x128xbf16>
    %31 = vector.shape_cast %30 : vector<1x32x128xbf16> to vector<32x128xbf16>
    %32 = vector.shape_cast %29 : vector<32x128xbf16> to vector<1x32x128xbf16>
    tpu.vector_store %arg4[%c0_14, %c0_15, %c0_16], %32 {strides = array<i32>} : memref<1x32x128xbf16, #tpu.memory_space<vmem>>, vector<1x32x128xbf16>,
    return
  }
  func.func @transform_0(%arg0: i32) -> (i32, i32, i32) {
    %c0_i32 = arith.constant 0 : i32
    %c0_i32_0 = arith.constant 0 : i32
    %c0_i32_1 = arith.constant 0 : i32
    return %arg0, %c0_i32, %c0_i32_0 : i32, i32, i32
  }
  func.func @transform_1(%arg0: i32) -> (i32, i32, i32) {
    %c0_i32 = arith.constant 0 : i32
    %c0_i32_0 = arith.constant 0 : i32
    %c0_i32_1 = arith.constant 0 : i32
    return %arg0, %c0_i32, %c0_i32_0 : i32, i32, i32
  }
  func.func @transform_2(%arg0: i32) -> (i32, i32, i32) {
    %c0_i32 = arith.constant 0 : i32
    %c0_i32_0 = arith.constant 0 : i32
    %c0_i32_1 = arith.constant 0 : i32
    return %arg0, %c0_i32, %c0_i32_0 : i32, i32, i32
  }
  func.func @transform_3(%arg0: i32) -> (i32, i32, i32) {
    %c0_i32 = arith.constant 0 : i32
    %c0_i32_0 = arith.constant 0 : i32
    %c0_i32_1 = arith.constant 0 : i32
    return %arg0, %c0_i32, %c0_i32_0 : i32, i32, i32
  }
}

module attributes {stable_mosaic.version = 11 : i64} {
  func.func @kernel(%arg0: i32, %arg1: memref<1x32x384xbf16, #tpu.memory_space<vmem>>, %arg2: memref<1x384x128xbf16, #tpu.memory_space<vmem>>, %arg3: memref<1x1x128xf32, #tpu.memory_space<vmem>>, %arg4: memref<1x32x128xbf16, #tpu.memory_space<vmem>>, %arg5: memref<1x32x128xbf16, #tpu.memory_space<vmem>>) attributes {dimension_semantics = [#tpu.dimension_semantics<parallel>], iteration_bounds = array<i64: 2>, scalar_prefetch = 0 : i64, scratch_operands = 0 : i64, tpu.core_type = #tpu.core_type<tc>, window_params = [{transform_indices = @transform_0, window_bounds = array<i64: 1, 32, 384>}, {transform_indices = @transform_1, window_bounds = array<i64: 1, 384, 128>}, {transform_indices = @transform_2, window_bounds = array<i64: 1, 1, 128>}, {transform_indices = @transform_3, window_bounds = array<i64: 1, 32, 128>}, {transform_indices = @transform_4, window_bounds = array<i64: 1, 32, 128>}]} {
    %c0 = arith.constant 0 : index
    %c0_0 = arith.constant 0 : index
    %c0_1 = arith.constant 0 : index
    %0 = vector.load %arg1[%c0, %c0_0, %c0_1] : memref<1x32x384xbf16, #tpu.memory_space<vmem>>, vector<1x32x384xbf16>
    %1 = vector.shape_cast %0 : vector<1x32x384xbf16> to vector<32x384xbf16>
    %c0_2 = arith.constant 0 : index
    %c0_3 = arith.constant 0 : index
    %c0_4 = arith.constant 0 : index
    %2 = vector.load %arg2[%c0_2, %c0_3, %c0_4] : memref<1x384x128xbf16, #tpu.memory_space<vmem>>, vector<1x384x128xbf16>
    %3 = vector.shape_cast %2 : vector<1x384x128xbf16> to vector<384x128xbf16>
    %cst = arith.constant dense<0.000000e+00> : vector<32x128xf32>
    %4 = tpu.matmul %1, %3, %cst {dimension_numbers = #tpu.dot_dimension_numbers<[1], [0], [0], [1], [0, 0, 1, 1], [], []>} : vector<32x384xbf16>, vector<384x128xbf16>, vector<32x128xf32> -> vector<32x128xf32>
    %c0_5 = arith.constant 0 : index
    %c0_6 = arith.constant 0 : index
    %c0_7 = arith.constant 0 : index
    %5 = vector.load %arg3[%c0_5, %c0_6, %c0_7] : memref<1x1x128xf32, #tpu.memory_space<vmem>>, vector<1x1x128xf32>
    %6 = vector.shape_cast %5 : vector<1x1x128xf32> to vector<1x128xf32>
    %7 = vector.broadcast %6 : vector<1x128xf32> to vector<32x128xf32>
    %8 = arith.addf %4, %7 : vector<32x128xf32>
    %9 = vector.shape_cast %8 : vector<32x128xf32> to vector<2x16x128xf32>
    %cst_8 = arith.constant dense<0.000000e+00> : vector<2x128xf32>
    %10 = vector.multi_reduction <add>, %9, %cst_8 [1] : vector<2x16x128xf32> to vector<2x128xf32>
    %11 = vector.shape_cast %10 : vector<2x128xf32> to vector<2x1x128xf32>
    %cst_9 = arith.constant 1.600000e+01 : f32
    %12 = vector.broadcast %cst_9 : f32 to vector<2x1x128xf32>
    %13 = arith.divf %11, %12 : vector<2x1x128xf32>
    %14 = vector.broadcast %13 : vector<2x1x128xf32> to vector<2x16x128xf32>
    %15 = arith.subf %9, %14 : vector<2x16x128xf32>
    %16 = arith.mulf %15, %15 : vector<2x16x128xf32>
    %cst_10 = arith.constant dense<0.000000e+00> : vector<2x128xf32>
    %17 = vector.multi_reduction <add>, %16, %cst_10 [1] : vector<2x16x128xf32> to vector<2x128xf32>
    %18 = vector.shape_cast %17 : vector<2x128xf32> to vector<2x1x128xf32>
    %cst_11 = arith.constant 1.600000e+01 : f32
    %19 = vector.broadcast %cst_11 : f32 to vector<2x1x128xf32>
    %20 = arith.divf %18, %19 : vector<2x1x128xf32>
    %cst_12 = arith.constant 9.99999974E-6 : f32
    %21 = vector.broadcast %cst_12 : f32 to vector<2x1x128xf32>
    %22 = arith.addf %20, %21 : vector<2x1x128xf32>
    %23 = math.rsqrt %22 : vector<2x1x128xf32>
    %24 = vector.broadcast %23 : vector<2x1x128xf32> to vector<2x16x128xf32>
    %25 = arith.mulf %15, %24 : vector<2x16x128xf32>
    %26 = vector.shape_cast %25 : vector<2x16x128xf32> to vector<32x128xf32>
    %c0_13 = arith.constant 0 : index
    %c0_14 = arith.constant 0 : index
    %c0_15 = arith.constant 0 : index
    %27 = vector.load %arg4[%c0_13, %c0_14, %c0_15] : memref<1x32x128xbf16, #tpu.memory_space<vmem>>, vector<1x32x128xbf16>
    %28 = vector.shape_cast %27 : vector<1x32x128xbf16> to vector<32x128xbf16>
    %29 = arith.extf %28 : vector<32x128xbf16> to vector<32x128xf32>
    %30 = arith.addf %26, %29 : vector<32x128xf32>
    %31 = arith.truncf %30 : vector<32x128xf32> to vector<32x128xbf16>
    %c0_16 = arith.constant 0 : index
    %c0_17 = arith.constant 0 : index
    %c0_18 = arith.constant 0 : index
    %32 = vector.load %arg5[%c0_16, %c0_17, %c0_18] : memref<1x32x128xbf16, #tpu.memory_space<vmem>>, vector<1x32x128xbf16>
    %33 = vector.shape_cast %32 : vector<1x32x128xbf16> to vector<32x128xbf16>
    %34 = vector.shape_cast %31 : vector<32x128xbf16> to vector<1x32x128xbf16>
    tpu.vector_store %arg5[%c0_16, %c0_17, %c0_18], %34 {strides = array<i32>} : memref<1x32x128xbf16, #tpu.memory_space<vmem>>, vector<1x32x128xbf16>,
    return
  }
  func.func @transform_0(%arg0: i32) -> (i32, i32, i32) {
    %c0_i32 = arith.constant 0 : i32
    %c0_i32_0 = arith.constant 0 : i32
    %c0_i32_1 = arith.constant 0 : i32
    return %arg0, %c0_i32, %c0_i32_0 : i32, i32, i32
  }
  func.func @transform_1(%arg0: i32) -> (i32, i32, i32) {
    %c0_i32 = arith.constant 0 : i32
    %c0_i32_0 = arith.constant 0 : i32
    %c0_i32_1 = arith.constant 0 : i32
    return %arg0, %c0_i32, %c0_i32_0 : i32, i32, i32
  }
  func.func @transform_2(%arg0: i32) -> (i32, i32, i32) {
    %c0_i32 = arith.constant 0 : i32
    %c0_i32_0 = arith.constant 0 : i32
    %c0_i32_1 = arith.constant 0 : i32
    return %arg0, %c0_i32, %c0_i32_0 : i32, i32, i32
  }
  func.func @transform_3(%arg0: i32) -> (i32, i32, i32) {
    %c0_i32 = arith.constant 0 : i32
    %c0_i32_0 = arith.constant 0 : i32
    %c0_i32_1 = arith.constant 0 : i32
    return %arg0, %c0_i32, %c0_i32_0 : i32, i32, i32
  }
  func.func @transform_4(%arg0: i32) -> (i32, i32, i32) {
    %c0_i32 = arith.constant 0 : i32
    %c0_i32_0 = arith.constant 0 : i32
    %c0_i32_1 = arith.constant 0 : i32
    return %arg0, %c0_i32, %c0_i32_0 : i32, i32, i32
  }
}

module attributes {stable_mosaic.version = 11 : i64} {
  func.func @kernel(%arg0: i32, %arg1: memref<1x32x384xbf16, #tpu.memory_space<vmem>>, %arg2: memref<1x384x128xbf16, #tpu.memory_space<vmem>>, %arg3: memref<1x1x128xf32, #tpu.memory_space<vmem>>, %arg4: memref<1x32x128xbf16, #tpu.memory_space<vmem>>) attributes {dimension_semantics = [#tpu.dimension_semantics<parallel>], iteration_bounds = array<i64: 2>, scalar_prefetch = 0 : i64, scratch_operands = 0 : i64, tpu.core_type = #tpu.core_type<tc>, window_params = [{transform_indices = @transform_0, window_bounds = array<i64: 1, 32, 384>}, {transform_indices = @transform_1, window_bounds = array<i64: 1, 384, 128>}, {transform_indices = @transform_2, window_bounds = array<i64: 1, 1, 128>}, {transform_indices = @transform_3, window_bounds = array<i64: 1, 32, 128>}]} {
    %c0 = arith.constant 0 : index
    %c0_0 = arith.constant 0 : index
    %c0_1 = arith.constant 0 : index
    %0 = vector.load %arg1[%c0, %c0_0, %c0_1] : memref<1x32x384xbf16, #tpu.memory_space<vmem>>, vector<1x32x384xbf16>
    %1 = vector.shape_cast %0 : vector<1x32x384xbf16> to vector<32x384xbf16>
    %c0_2 = arith.constant 0 : index
    %c0_3 = arith.constant 0 : index
    %c0_4 = arith.constant 0 : index
    %2 = vector.load %arg2[%c0_2, %c0_3, %c0_4] : memref<1x384x128xbf16, #tpu.memory_space<vmem>>, vector<1x384x128xbf16>
    %3 = vector.shape_cast %2 : vector<1x384x128xbf16> to vector<384x128xbf16>
    %cst = arith.constant dense<0.000000e+00> : vector<32x128xf32>
    %4 = tpu.matmul %1, %3, %cst {dimension_numbers = #tpu.dot_dimension_numbers<[1], [0], [0], [1], [0, 0, 1, 1], [], []>} : vector<32x384xbf16>, vector<384x128xbf16>, vector<32x128xf32> -> vector<32x128xf32>
    %c0_5 = arith.constant 0 : index
    %c0_6 = arith.constant 0 : index
    %c0_7 = arith.constant 0 : index
    %5 = vector.load %arg3[%c0_5, %c0_6, %c0_7] : memref<1x1x128xf32, #tpu.memory_space<vmem>>, vector<1x1x128xf32>
    %6 = vector.shape_cast %5 : vector<1x1x128xf32> to vector<1x128xf32>
    %7 = vector.broadcast %6 : vector<1x128xf32> to vector<32x128xf32>
    %8 = arith.addf %4, %7 : vector<32x128xf32>
    %9 = vector.shape_cast %8 : vector<32x128xf32> to vector<2x16x128xf32>
    %cst_8 = arith.constant dense<0.000000e+00> : vector<2x128xf32>
    %10 = vector.multi_reduction <add>, %9, %cst_8 [1] : vector<2x16x128xf32> to vector<2x128xf32>
    %11 = vector.shape_cast %10 : vector<2x128xf32> to vector<2x1x128xf32>
    %cst_9 = arith.constant 1.600000e+01 : f32
    %12 = vector.broadcast %cst_9 : f32 to vector<2x1x128xf32>
    %13 = arith.divf %11, %12 : vector<2x1x128xf32>
    %14 = vector.broadcast %13 : vector<2x1x128xf32> to vector<2x16x128xf32>
    %15 = arith.subf %9, %14 : vector<2x16x128xf32>
    %16 = arith.mulf %15, %15 : vector<2x16x128xf32>
    %cst_10 = arith.constant dense<0.000000e+00> : vector<2x128xf32>
    %17 = vector.multi_reduction <add>, %16, %cst_10 [1] : vector<2x16x128xf32> to vector<2x128xf32>
    %18 = vector.shape_cast %17 : vector<2x128xf32> to vector<2x1x128xf32>
    %cst_11 = arith.constant 1.600000e+01 : f32
    %19 = vector.broadcast %cst_11 : f32 to vector<2x1x128xf32>
    %20 = arith.divf %18, %19 : vector<2x1x128xf32>
    %cst_12 = arith.constant 9.99999974E-6 : f32
    %21 = vector.broadcast %cst_12 : f32 to vector<2x1x128xf32>
    %22 = arith.addf %20, %21 : vector<2x1x128xf32>
    %23 = math.rsqrt %22 : vector<2x1x128xf32>
    %24 = vector.broadcast %23 : vector<2x1x128xf32> to vector<2x16x128xf32>
    %25 = arith.mulf %15, %24 : vector<2x16x128xf32>
    %26 = vector.shape_cast %25 : vector<2x16x128xf32> to vector<32x128xf32>
    %cst_13 = arith.constant 0.000000e+00 : f32
    %27 = vector.broadcast %cst_13 : f32 to vector<32x128xf32>
    %28 = arith.maximumf %26, %27 : vector<32x128xf32>
    %29 = arith.truncf %28 : vector<32x128xf32> to vector<32x128xbf16>
    %c0_14 = arith.constant 0 : index
    %c0_15 = arith.constant 0 : index
    %c0_16 = arith.constant 0 : index
    %30 = vector.load %arg4[%c0_14, %c0_15, %c0_16] : memref<1x32x128xbf16, #tpu.memory_space<vmem>>, vector<1x32x128xbf16>
    %31 = vector.shape_cast %30 : vector<1x32x128xbf16> to vector<32x128xbf16>
    %32 = vector.shape_cast %29 : vector<32x128xbf16> to vector<1x32x128xbf16>
    tpu.vector_store %arg4[%c0_14, %c0_15, %c0_16], %32 {strides = array<i32>} : memref<1x32x128xbf16, #tpu.memory_space<vmem>>, vector<1x32x128xbf16>,
    return
  }
  func.func @transform_0(%arg0: i32) -> (i32, i32, i32) {
    %c0_i32 = arith.constant 0 : i32
    %c0_i32_0 = arith.constant 0 : i32
    %c0_i32_1 = arith.constant 0 : i32
    return %arg0, %c0_i32, %c0_i32_0 : i32, i32, i32
  }
  func.func @transform_1(%arg0: i32) -> (i32, i32, i32) {
    %c0_i32 = arith.constant 0 : i32
    %c0_i32_0 = arith.constant 0 : i32
    %c0_i32_1 = arith.constant 0 : i32
    return %arg0, %c0_i32, %c0_i32_0 : i32, i32, i32
  }
  func.func @transform_2(%arg0: i32) -> (i32, i32, i32) {
    %c0_i32 = arith.constant 0 : i32
    %c0_i32_0 = arith.constant 0 : i32
    %c0_i32_1 = arith.constant 0 : i32
    return %arg0, %c0_i32, %c0_i32_0 : i32, i32, i32
  }
  func.func @transform_3(%arg0: i32) -> (i32, i32, i32) {
    %c0_i32 = arith.constant 0 : i32
    %c0_i32_0 = arith.constant 0 : i32
    %c0_i32_1 = arith.constant 0 : i32
    return %arg0, %c0_i32, %c0_i32_0 : i32, i32, i32
  }
}

module attributes {stable_mosaic.version = 11 : i64} {
  func.func @kernel(%arg0: i32, %arg1: memref<1x32x384xbf16, #tpu.memory_space<vmem>>, %arg2: memref<1x384x128xbf16, #tpu.memory_space<vmem>>, %arg3: memref<1x1x128xf32, #tpu.memory_space<vmem>>, %arg4: memref<1x2x1x128xf32, #tpu.memory_space<vmem>>, %arg5: memref<1x2x1x128xf32, #tpu.memory_space<vmem>>, %arg6: memref<1x32x128xbf16, #tpu.memory_space<vmem>>, %arg7: memref<1x32x128xbf16, #tpu.memory_space<vmem>>) attributes {dimension_semantics = [#tpu.dimension_semantics<parallel>], iteration_bounds = array<i64: 2>, scalar_prefetch = 0 : i64, scratch_operands = 0 : i64, tpu.core_type = #tpu.core_type<tc>, window_params = [{transform_indices = @transform_0, window_bounds = array<i64: 1, 32, 384>}, {transform_indices = @transform_1, window_bounds = array<i64: 1, 384, 128>}, {transform_indices = @transform_2, window_bounds = array<i64: 1, 1, 128>}, {transform_indices = @transform_3, window_bounds = array<i64: 1, 2, 1, 128>}, {transform_indices = @transform_4, window_bounds = array<i64: 1, 2, 1, 128>}, {transform_indices = @transform_5, window_bounds = array<i64: 1, 32, 128>}, {transform_indices = @transform_6, window_bounds = array<i64: 1, 32, 128>}]} {
    %c0 = arith.constant 0 : index
    %c0_0 = arith.constant 0 : index
    %c0_1 = arith.constant 0 : index
    %0 = vector.load %arg1[%c0, %c0_0, %c0_1] : memref<1x32x384xbf16, #tpu.memory_space<vmem>>, vector<1x32x384xbf16>
    %1 = vector.shape_cast %0 : vector<1x32x384xbf16> to vector<32x384xbf16>
    %c0_2 = arith.constant 0 : index
    %c0_3 = arith.constant 0 : index
    %c0_4 = arith.constant 0 : index
    %2 = vector.load %arg2[%c0_2, %c0_3, %c0_4] : memref<1x384x128xbf16, #tpu.memory_space<vmem>>, vector<1x384x128xbf16>
    %3 = vector.shape_cast %2 : vector<1x384x128xbf16> to vector<384x128xbf16>
    %cst = arith.constant dense<0.000000e+00> : vector<32x128xf32>
    %4 = tpu.matmul %1, %3, %cst {dimension_numbers = #tpu.dot_dimension_numbers<[1], [0], [0], [1], [0, 0, 1, 1], [], []>} : vector<32x384xbf16>, vector<384x128xbf16>, vector<32x128xf32> -> vector<32x128xf32>
    %c0_5 = arith.constant 0 : index
    %c0_6 = arith.constant 0 : index
    %c0_7 = arith.constant 0 : index
    %5 = vector.load %arg3[%c0_5, %c0_6, %c0_7] : memref<1x1x128xf32, #tpu.memory_space<vmem>>, vector<1x1x128xf32>
    %6 = vector.shape_cast %5 : vector<1x1x128xf32> to vector<1x128xf32>
    %7 = vector.broadcast %6 : vector<1x128xf32> to vector<32x128xf32>
    %8 = arith.addf %4, %7 : vector<32x128xf32>
    %9 = vector.shape_cast %8 : vector<32x128xf32> to vector<2x16x128xf32>
    %cst_8 = arith.constant dense<0.000000e+00> : vector<2x128xf32>
    %10 = vector.multi_reduction <add>, %9, %cst_8 [1] : vector<2x16x128xf32> to vector<2x128xf32>
    %11 = vector.shape_cast %10 : vector<2x128xf32> to vector<2x1x128xf32>
    %cst_9 = arith.constant 1.600000e+01 : f32
    %12 = vector.broadcast %cst_9 : f32 to vector<2x1x128xf32>
    %13 = arith.divf %11, %12 : vector<2x1x128xf32>
    %14 = vector.broadcast %13 : vector<2x1x128xf32> to vector<2x16x128xf32>
    %15 = arith.subf %9, %14 : vector<2x16x128xf32>
    %16 = arith.mulf %15, %15 : vector<2x16x128xf32>
    %cst_10 = arith.constant dense<0.000000e+00> : vector<2x128xf32>
    %17 = vector.multi_reduction <add>, %16, %cst_10 [1] : vector<2x16x128xf32> to vector<2x128xf32>
    %18 = vector.shape_cast %17 : vector<2x128xf32> to vector<2x1x128xf32>
    %cst_11 = arith.constant 1.600000e+01 : f32
    %19 = vector.broadcast %cst_11 : f32 to vector<2x1x128xf32>
    %20 = arith.divf %18, %19 : vector<2x1x128xf32>
    %cst_12 = arith.constant 9.99999974E-6 : f32
    %21 = vector.broadcast %cst_12 : f32 to vector<2x1x128xf32>
    %22 = arith.addf %20, %21 : vector<2x1x128xf32>
    %23 = math.rsqrt %22 : vector<2x1x128xf32>
    %24 = vector.broadcast %23 : vector<2x1x128xf32> to vector<2x16x128xf32>
    %25 = arith.mulf %15, %24 : vector<2x16x128xf32>
    %c0_13 = arith.constant 0 : index
    %c0_14 = arith.constant 0 : index
    %c0_15 = arith.constant 0 : index
    %c0_16 = arith.constant 0 : index
    %26 = vector.load %arg4[%c0_13, %c0_14, %c0_15, %c0_16] : memref<1x2x1x128xf32, #tpu.memory_space<vmem>>, vector<1x2x1x128xf32>
    %27 = vector.shape_cast %26 : vector<1x2x1x128xf32> to vector<2x1x128xf32>
    %28 = vector.broadcast %27 : vector<2x1x128xf32> to vector<2x16x128xf32>
    %29 = arith.mulf %25, %28 : vector<2x16x128xf32>
    %c0_17 = arith.constant 0 : index
    %c0_18 = arith.constant 0 : index
    %c0_19 = arith.constant 0 : index
    %c0_20 = arith.constant 0 : index
    %30 = vector.load %arg5[%c0_17, %c0_18, %c0_19, %c0_20] : memref<1x2x1x128xf32, #tpu.memory_space<vmem>>, vector<1x2x1x128xf32>
    %31 = vector.shape_cast %30 : vector<1x2x1x128xf32> to vector<2x1x128xf32>
    %32 = vector.broadcast %31 : vector<2x1x128xf32> to vector<2x16x128xf32>
    %33 = arith.addf %29, %32 : vector<2x16x128xf32>
    %34 = vector.shape_cast %33 : vector<2x16x128xf32> to vector<32x128xf32>
    %c0_21 = arith.constant 0 : index
    %c0_22 = arith.constant 0 : index
    %c0_23 = arith.constant 0 : index
    %35 = vector.load %arg6[%c0_21, %c0_22, %c0_23] : memref<1x32x128xbf16, #tpu.memory_space<vmem>>, vector<1x32x128xbf16>
    %36 = vector.shape_cast %35 : vector<1x32x128xbf16> to vector<32x128xbf16>
    %37 = arith.extf %36 : vector<32x128xbf16> to vector<32x128xf32>
    %38 = arith.addf %34, %37 : vector<32x128xf32>
    %39 = arith.truncf %38 : vector<32x128xf32> to vector<32x128xbf16>
    %c0_24 = arith.constant 0 : index
    %c0_25 = arith.constant 0 : index
    %c0_26 = arith.constant 0 : index
    %40 = vector.load %arg7[%c0_24, %c0_25, %c0_26] : memref<1x32x128xbf16, #tpu.memory_space<vmem>>, vector<1x32x128xbf16>
    %41 = vector.shape_cast %40 : vector<1x32x128xbf16> to vector<32x128xbf16>
    %42 = vector.shape_cast %39 : vector<32x128xbf16> to vector<1x32x128xbf16>
    tpu.vector_store %arg7[%c0_24, %c0_25, %c0_26], %42 {strides = array<i32>} : memref<1x32x128xbf16, #tpu.memory_space<vmem>>, vector<1x32x128xbf16>,
    return
  }
  func.func @transform_0(%arg0: i32) -> (i32, i32, i32) {
    %c0_i32 = arith.constant 0 : i32
    %c0_i32_0 = arith.constant 0 : i32
    %c0_i32_1 = arith.constant 0 : i32
    return %arg0, %c0_i32, %c0_i32_0 : i32, i32, i32
  }
  func.func @transform_1(%arg0: i32) -> (i32, i32, i32) {
    %c0_i32 = arith.constant 0 : i32
    %c0_i32_0 = arith.constant 0 : i32
    %c0_i32_1 = arith.constant 0 : i32
    return %arg0, %c0_i32, %c0_i32_0 : i32, i32, i32
  }
  func.func @transform_2(%arg0: i32) -> (i32, i32, i32) {
    %c0_i32 = arith.constant 0 : i32
    %c0_i32_0 = arith.constant 0 : i32
    %c0_i32_1 = arith.constant 0 : i32
    return %arg0, %c0_i32, %c0_i32_0 : i32, i32, i32
  }
  func.func @transform_3(%arg0: i32) -> (i32, i32, i32, i32) {
    %c0_i32 = arith.constant 0 : i32
    %c0_i32_0 = arith.constant 0 : i32
    %c0_i32_1 = arith.constant 0 : i32
    %c0_i32_2 = arith.constant 0 : i32
    return %arg0, %c0_i32, %c0_i32_0, %c0_i32_1 : i32, i32, i32, i32
  }
  func.func @transform_4(%arg0: i32) -> (i32, i32, i32, i32) {
    %c0_i32 = arith.constant 0 : i32
    %c0_i32_0 = arith.constant 0 : i32
    %c0_i32_1 = arith.constant 0 : i32
    %c0_i32_2 = arith.constant 0 : i32
    return %arg0, %c0_i32, %c0_i32_0, %c0_i32_1 : i32, i32, i32, i32
  }
  func.func @transform_5(%arg0: i32) -> (i32, i32, i32) {
    %c0_i32 = arith.constant 0 : i32
    %c0_i32_0 = arith.constant 0 : i32
    %c0_i32_1 = arith.constant 0 : i32
    return %arg0, %c0_i32, %c0_i32_0 : i32, i32, i32
  }
  func.func @transform_6(%arg0: i32) -> (i32, i32, i32) {
    %c0_i32 = arith.constant 0 : i32
    %c0_i32_0 = arith.constant 0 : i32
    %c0_i32_1 = arith.constant 0 : i32
    return %arg0, %c0_i32, %c0_i32_0 : i32, i32, i32
  }
}

module attributes {stable_mosaic.version = 11 : i64} {
  func.func @kernel(%arg0: i32, %arg1: memref<1x32x384xbf16, #tpu.memory_space<vmem>>, %arg2: memref<1x384x128xbf16, #tpu.memory_space<vmem>>, %arg3: memref<1x1x128xf32, #tpu.memory_space<vmem>>, %arg4: memref<1x2x1x128xf32, #tpu.memory_space<vmem>>, %arg5: memref<1x2x1x128xf32, #tpu.memory_space<vmem>>, %arg6: memref<1x32x128xbf16, #tpu.memory_space<vmem>>) attributes {dimension_semantics = [#tpu.dimension_semantics<parallel>], iteration_bounds = array<i64: 2>, scalar_prefetch = 0 : i64, scratch_operands = 0 : i64, tpu.core_type = #tpu.core_type<tc>, window_params = [{transform_indices = @transform_0, window_bounds = array<i64: 1, 32, 384>}, {transform_indices = @transform_1, window_bounds = array<i64: 1, 384, 128>}, {transform_indices = @transform_2, window_bounds = array<i64: 1, 1, 128>}, {transform_indices = @transform_3, window_bounds = array<i64: 1, 2, 1, 128>}, {transform_indices = @transform_4, window_bounds = array<i64: 1, 2, 1, 128>}, {transform_indices = @transform_5, window_bounds = array<i64: 1, 32, 128>}]} {
    %c0 = arith.constant 0 : index
    %c0_0 = arith.constant 0 : index
    %c0_1 = arith.constant 0 : index
    %0 = vector.load %arg1[%c0, %c0_0, %c0_1] : memref<1x32x384xbf16, #tpu.memory_space<vmem>>, vector<1x32x384xbf16>
    %1 = vector.shape_cast %0 : vector<1x32x384xbf16> to vector<32x384xbf16>
    %c0_2 = arith.constant 0 : index
    %c0_3 = arith.constant 0 : index
    %c0_4 = arith.constant 0 : index
    %2 = vector.load %arg2[%c0_2, %c0_3, %c0_4] : memref<1x384x128xbf16, #tpu.memory_space<vmem>>, vector<1x384x128xbf16>
    %3 = vector.shape_cast %2 : vector<1x384x128xbf16> to vector<384x128xbf16>
    %cst = arith.constant dense<0.000000e+00> : vector<32x128xf32>
    %4 = tpu.matmul %1, %3, %cst {dimension_numbers = #tpu.dot_dimension_numbers<[1], [0], [0], [1], [0, 0, 1, 1], [], []>} : vector<32x384xbf16>, vector<384x128xbf16>, vector<32x128xf32> -> vector<32x128xf32>
    %c0_5 = arith.constant 0 : index
    %c0_6 = arith.constant 0 : index
    %c0_7 = arith.constant 0 : index
    %5 = vector.load %arg3[%c0_5, %c0_6, %c0_7] : memref<1x1x128xf32, #tpu.memory_space<vmem>>, vector<1x1x128xf32>
    %6 = vector.shape_cast %5 : vector<1x1x128xf32> to vector<1x128xf32>
    %7 = vector.broadcast %6 : vector<1x128xf32> to vector<32x128xf32>
    %8 = arith.addf %4, %7 : vector<32x128xf32>
    %9 = vector.shape_cast %8 : vector<32x128xf32> to vector<2x16x128xf32>
    %cst_8 = arith.constant dense<0.000000e+00> : vector<2x128xf32>
    %10 = vector.multi_reduction <add>, %9, %cst_8 [1] : vector<2x16x128xf32> to vector<2x128xf32>
    %11 = vector.shape_cast %10 : vector<2x128xf32> to vector<2x1x128xf32>
    %cst_9 = arith.constant 1.600000e+01 : f32
    %12 = vector.broadcast %cst_9 : f32 to vector<2x1x128xf32>
    %13 = arith.divf %11, %12 : vector<2x1x128xf32>
    %14 = vector.broadcast %13 : vector<2x1x128xf32> to vector<2x16x128xf32>
    %15 = arith.subf %9, %14 : vector<2x16x128xf32>
    %16 = arith.mulf %15, %15 : vector<2x16x128xf32>
    %cst_10 = arith.constant dense<0.000000e+00> : vector<2x128xf32>
    %17 = vector.multi_reduction <add>, %16, %cst_10 [1] : vector<2x16x128xf32> to vector<2x128xf32>
    %18 = vector.shape_cast %17 : vector<2x128xf32> to vector<2x1x128xf32>
    %cst_11 = arith.constant 1.600000e+01 : f32
    %19 = vector.broadcast %cst_11 : f32 to vector<2x1x128xf32>
    %20 = arith.divf %18, %19 : vector<2x1x128xf32>
    %cst_12 = arith.constant 9.99999974E-6 : f32
    %21 = vector.broadcast %cst_12 : f32 to vector<2x1x128xf32>
    %22 = arith.addf %20, %21 : vector<2x1x128xf32>
    %23 = math.rsqrt %22 : vector<2x1x128xf32>
    %24 = vector.broadcast %23 : vector<2x1x128xf32> to vector<2x16x128xf32>
    %25 = arith.mulf %15, %24 : vector<2x16x128xf32>
    %c0_13 = arith.constant 0 : index
    %c0_14 = arith.constant 0 : index
    %c0_15 = arith.constant 0 : index
    %c0_16 = arith.constant 0 : index
    %26 = vector.load %arg4[%c0_13, %c0_14, %c0_15, %c0_16] : memref<1x2x1x128xf32, #tpu.memory_space<vmem>>, vector<1x2x1x128xf32>
    %27 = vector.shape_cast %26 : vector<1x2x1x128xf32> to vector<2x1x128xf32>
    %28 = vector.broadcast %27 : vector<2x1x128xf32> to vector<2x16x128xf32>
    %29 = arith.mulf %25, %28 : vector<2x16x128xf32>
    %c0_17 = arith.constant 0 : index
    %c0_18 = arith.constant 0 : index
    %c0_19 = arith.constant 0 : index
    %c0_20 = arith.constant 0 : index
    %30 = vector.load %arg5[%c0_17, %c0_18, %c0_19, %c0_20] : memref<1x2x1x128xf32, #tpu.memory_space<vmem>>, vector<1x2x1x128xf32>
    %31 = vector.shape_cast %30 : vector<1x2x1x128xf32> to vector<2x1x128xf32>
    %32 = vector.broadcast %31 : vector<2x1x128xf32> to vector<2x16x128xf32>
    %33 = arith.addf %29, %32 : vector<2x16x128xf32>
    %34 = vector.shape_cast %33 : vector<2x16x128xf32> to vector<32x128xf32>
    %cst_21 = arith.constant 0.000000e+00 : f32
    %35 = vector.broadcast %cst_21 : f32 to vector<32x128xf32>
    %36 = arith.maximumf %34, %35 : vector<32x128xf32>
    %37 = arith.truncf %36 : vector<32x128xf32> to vector<32x128xbf16>
    %c0_22 = arith.constant 0 : index
    %c0_23 = arith.constant 0 : index
    %c0_24 = arith.constant 0 : index
    %38 = vector.load %arg6[%c0_22, %c0_23, %c0_24] : memref<1x32x128xbf16, #tpu.memory_space<vmem>>, vector<1x32x128xbf16>
    %39 = vector.shape_cast %38 : vector<1x32x128xbf16> to vector<32x128xbf16>
    %40 = vector.shape_cast %37 : vector<32x128xbf16> to vector<1x32x128xbf16>
    tpu.vector_store %arg6[%c0_22, %c0_23, %c0_24], %40 {strides = array<i32>} : memref<1x32x128xbf16, #tpu.memory_space<vmem>>, vector<1x32x128xbf16>,
    return
  }
  func.func @transform_0(%arg0: i32) -> (i32, i32, i32) {
    %c0_i32 = arith.constant 0 : i32
    %c0_i32_0 = arith.constant 0 : i32
    %c0_i32_1 = arith.constant 0 : i32
    return %arg0, %c0_i32, %c0_i32_0 : i32, i32, i32
  }
  func.func @transform_1(%arg0: i32) -> (i32, i32, i32) {
    %c0_i32 = arith.constant 0 : i32
    %c0_i32_0 = arith.constant 0 : i32
    %c0_i32_1 = arith.constant 0 : i32
    return %arg0, %c0_i32, %c0_i32_0 : i32, i32, i32
  }
  func.func @transform_2(%arg0: i32) -> (i32, i32, i32) {
    %c0_i32 = arith.constant 0 : i32
    %c0_i32_0 = arith.constant 0 : i32
    %c0_i32_1 = arith.constant 0 : i32
    return %arg0, %c0_i32, %c0_i32_0 : i32, i32, i32
  }
  func.func @transform_3(%arg0: i32) -> (i32, i32, i32, i32) {
    %c0_i32 = arith.constant 0 : i32
    %c0_i32_0 = arith.constant 0 : i32
    %c0_i32_1 = arith.constant 0 : i32
    %c0_i32_2 = arith.constant 0 : i32
    return %arg0, %c0_i32, %c0_i32_0, %c0_i32_1 : i32, i32, i32, i32
  }
  func.func @transform_4(%arg0: i32) -> (i32, i32, i32, i32) {
    %c0_i32 = arith.constant 0 : i32
    %c0_i32_0 = arith.constant 0 : i32
    %c0_i32_1 = arith.constant 0 : i32
    %c0_i32_2 = arith.constant 0 : i32
    return %arg0, %c0_i32, %c0_i32_0, %c0_i32_1 : i32, i32, i32, i32
  }
  func.func @transform_5(%arg0: i32) -> (i32, i32, i32) {
    %c0_i32 = arith.constant 0 : i32
    %c0_i32_0 = arith.constant 0 : i32
    %c0_i32_1 = arith.constant 0 : i32
    return %arg0, %c0_i32, %c0_i32_0 : i32, i32, i32
  }
}

module attributes {stable_mosaic.version = 11 : i64} {
  func.func @kernel(%arg0: i32, %arg1: memref<1x128x896xbf16, #tpu.memory_space<vmem>>, %arg2: memref<1x896x128xbf16, #tpu.memory_space<vmem>>, %arg3: memref<1x1x128xf32, #tpu.memory_space<vmem>>, %arg4: memref<1x1x128xf32, #tpu.memory_space<vmem>>, %arg5: memref<1x1x128xf32, #tpu.memory_space<vmem>>, %arg6: memref<1x128x128xbf16, #tpu.memory_space<vmem>>) attributes {dimension_semantics = [#tpu.dimension_semantics<parallel>], iteration_bounds = array<i64: 2>, scalar_prefetch = 0 : i64, scratch_operands = 0 : i64, tpu.core_type = #tpu.core_type<tc>, window_params = [{transform_indices = @transform_0, window_bounds = array<i64: 1, 128, 896>}, {transform_indices = @transform_1, window_bounds = array<i64: 1, 896, 128>}, {transform_indices = @transform_2, window_bounds = array<i64: 1, 1, 128>}, {transform_indices = @transform_3, window_bounds = array<i64: 1, 1, 128>}, {transform_indices = @transform_4, window_bounds = array<i64: 1, 1, 128>}, {transform_indices = @transform_5, window_bounds = array<i64: 1, 128, 128>}]} {
    %c0 = arith.constant 0 : index
    %c0_0 = arith.constant 0 : index
    %c0_1 = arith.constant 0 : index
    %0 = vector.load %arg1[%c0, %c0_0, %c0_1] : memref<1x128x896xbf16, #tpu.memory_space<vmem>>, vector<1x128x896xbf16>
    %1 = vector.shape_cast %0 : vector<1x128x896xbf16> to vector<128x896xbf16>
    %c0_2 = arith.constant 0 : index
    %c0_3 = arith.constant 0 : index
    %c0_4 = arith.constant 0 : index
    %2 = vector.load %arg2[%c0_2, %c0_3, %c0_4] : memref<1x896x128xbf16, #tpu.memory_space<vmem>>, vector<1x896x128xbf16>
    %3 = vector.shape_cast %2 : vector<1x896x128xbf16> to vector<896x128xbf16>
    %cst = arith.constant dense<0.000000e+00> : vector<128x128xf32>
    %4 = tpu.matmul %1, %3, %cst {dimension_numbers = #tpu.dot_dimension_numbers<[1], [0], [0], [1], [0, 0, 1, 1], [], []>} : vector<128x896xbf16>, vector<896x128xbf16>, vector<128x128xf32> -> vector<128x128xf32>
    %c0_5 = arith.constant 0 : index
    %c0_6 = arith.constant 0 : index
    %c0_7 = arith.constant 0 : index
    %5 = vector.load %arg3[%c0_5, %c0_6, %c0_7] : memref<1x1x128xf32, #tpu.memory_space<vmem>>, vector<1x1x128xf32>
    %6 = vector.shape_cast %5 : vector<1x1x128xf32> to vector<1x128xf32>
    %7 = vector.broadcast %6 : vector<1x128xf32> to vector<128x128xf32>
    %8 = arith.addf %4, %7 : vector<128x128xf32>
    %9 = vector.shape_cast %8 : vector<128x128xf32> to vector<2x64x128xf32>
    %cst_8 = arith.constant dense<0.000000e+00> : vector<2x64xf32>
    %10 = vector.multi_reduction <add>, %9, %cst_8 [2] : vector<2x64x128xf32> to vector<2x64xf32>
    %11 = vector.shape_cast %10 : vector<2x64xf32> to vector<2x64x1xf32>
    %cst_9 = arith.constant dense<0.000000e+00> : vector<2x1xf32>
    %12 = vector.multi_reduction <add>, %11, %cst_9 [1] : vector<2x64x1xf32> to vector<2x1xf32>
    %13 = vector.shape_cast %12 : vector<2x1xf32> to vector<2x1x1xf32>
    %cst_10 = arith.constant 1.024000e+03 : f32
    %14 = vector.broadcast %cst_10 : f32 to vector<2x1x1xf32>
    %15 = arith.divf %13, %14 : vector<2x1x1xf32>
    %16 = tpu.iota {dimensions = array<i32: 2>} : vector<1x1x128xi32>
    %c16_i32 = arith.constant 16 : i32
    %17 = vector.broadcast %c16_i32 : i32 to vector<1x1x128xi32>
    %18 = arith.cmpi slt, %16, %17 : vector<1x1x128xi32>
    %19 = vector.broadcast %15 : vector<2x1x1xf32> to vector<2x64x128xf32>
    %20 = arith.subf %9, %19 : vector<2x64x128xf32>
    %cst_11 = arith.constant 0.000000e+00 : f32
    %21 = vector.shape_cast %18 : vector<1x1x128xi1> to vector<1x1x128xi1>
    %22 = vector.broadcast %21 : vector<1x1x128xi1> to vector<2x64x128xi1>
    %23 = vector.broadcast %cst_11 : f32 to vector<2x64x128xf32>
    %24 = arith.select %22, %20, %23 : vector<2x64x128xi1>, vector<2x64x128xf32>
    %25 = arith.mulf %24, %24 : vector<2x64x128xf32>
    %cst_12 = arith.constant dense<0.000000e+00> : vector<2x64xf32>
    %26 = vector.multi_reduction <add>, %25, %cst_12 [2] : vector<2x64x128xf32> to vector<2x64xf32>
    %27 = vector.shape_cast %26 : vector<2x64xf32> to vector<2x64x1xf32>
    %cst_13 = arith.constant dense<0.000000e+00> : vector<2x1xf32>
    %28 = vector.multi_reduction <add>, %27, %cst_13 [1] : vector<2x64x1xf32> to vector<2x1xf32>
    %29 = vector.shape_cast %28 : vector<2x1xf32> to vector<2x1x1xf32>
    %cst_14 = arith.constant 1.023000e+03 : f32
    %30 = vector.broadcast %cst_14 : f32 to vector<2x1x1xf32>
    %31 = arith.divf %29, %30 : vector<2x1x1xf32>
    %32 = math.sqrt %31 : vector<2x1x1xf32>
    %cst_15 = arith.constant 9.99999974E-6 : f32
    %33 = vector.broadcast %cst_15 : f32 to vector<2x1x1xf32>
    %34 = arith.addf %32, %33 : vector<2x1x1xf32>
    %cst_16 = arith.constant 1.000000e+00 : f32
    %35 = vector.broadcast %cst_16 : f32 to vector<2x1x1xf32>
    %36 = arith.divf %35, %34 : vector<2x1x1xf32>
    %37 = vector.broadcast %36 : vector<2x1x1xf32> to vector<2x64x128xf32>
    %38 = arith.mulf %24, %37 : vector<2x64x128xf32>
    %c0_17 = arith.constant 0 : index
    %c0_18 = arith.constant 0 : index
    %c0_19 = arith.constant 0 : index
    %39 = vector.load %arg4[%c0_17, %c0_18, %c0_19] : memref<1x1x128xf32, #tpu.memory_space<vmem>>, vector<1x1x128xf32>
    %40 = vector.shape_cast %39 : vector<1x1x128xf32> to vector<1x128xf32>
    %41 = vector.shape_cast %40 : vector<1x128xf32> to vector<1x1x128xf32>
    %42 = vector.broadcast %41 : vector<1x1x128xf32> to vector<2x64x128xf32>
    %43 = arith.mulf %38, %42 : vector<2x64x128xf32>
    %c0_20 = arith.constant 0 : index
    %c0_21 = arith.constant 0 : index
    %c0_22 = arith.constant 0 : index
    %44 = vector.load %arg5[%c0_20, %c0_21, %c0_22] : memref<1x1x128xf32, #tpu.memory_space<vmem>>, vector<1x1x128xf32>
    %45 = vector.shape_cast %44 : vector<1x1x128xf32> to vector<1x128xf32>
    %46 = vector.shape_cast %45 : vector<1x128xf32> to vector<1x1x128xf32>
    %47 = vector.broadcast %46 : vector<1x1x128xf32> to vector<2x64x128xf32>
    %48 = arith.addf %43, %47 : vector<2x64x128xf32>
    %49 = vector.shape_cast %48 : vector<2x64x128xf32> to vector<128x128xf32>
    %cst_23 = arith.constant 0.000000e+00 : f32
    %50 = vector.broadcast %cst_23 : f32 to vector<128x128xf32>
    %51 = arith.maximumf %49, %50 : vector<128x128xf32>
    %52 = arith.truncf %51 : vector<128x128xf32> to vector<128x128xbf16>
    %c0_24 = arith.constant 0 : index
    %c0_25 = arith.constant 0 : index
    %c0_26 = arith.constant 0 : index
    %53 = vector.load %arg6[%c0_24, %c0_25, %c0_26] : memref<1x128x128xbf16, #tpu.memory_space<vmem>>, vector<1x128x128xbf16>
    %54 = vector.shape_cast %53 : vector<1x128x128xbf16> to vector<128x128xbf16>
    %55 = vector.shape_cast %52 : vector<128x128xbf16> to vector<1x128x128xbf16>
    tpu.vector_store %arg6[%c0_24, %c0_25, %c0_26], %55 {strides = array<i32>} : memref<1x128x128xbf16, #tpu.memory_space<vmem>>, vector<1x128x128xbf16>,
    return
  }
  func.func @transform_0(%arg0: i32) -> (i32, i32, i32) {
    %c0_i32 = arith.constant 0 : i32
    %c0_i32_0 = arith.constant 0 : i32
    %c0_i32_1 = arith.constant 0 : i32
    return %arg0, %c0_i32, %c0_i32_0 : i32, i32, i32
  }
  func.func @transform_1(%arg0: i32) -> (i32, i32, i32) {
    %c0_i32 = arith.constant 0 : i32
    %c0_i32_0 = arith.constant 0 : i32
    %c0_i32_1 = arith.constant 0 : i32
    return %arg0, %c0_i32, %c0_i32_0 : i32, i32, i32
  }
  func.func @transform_2(%arg0: i32) -> (i32, i32, i32) {
    %c0_i32 = arith.constant 0 : i32
    %c0_i32_0 = arith.constant 0 : i32
    %c0_i32_1 = arith.constant 0 : i32
    return %arg0, %c0_i32, %c0_i32_0 : i32, i32, i32
  }
  func.func @transform_3(%arg0: i32) -> (i32, i32, i32) {
    %c0_i32 = arith.constant 0 : i32
    %c0_i32_0 = arith.constant 0 : i32
    %c0_i32_1 = arith.constant 0 : i32
    return %arg0, %c0_i32, %c0_i32_0 : i32, i32, i32
  }
  func.func @transform_4(%arg0: i32) -> (i32, i32, i32) {
    %c0_i32 = arith.constant 0 : i32
    %c0_i32_0 = arith.constant 0 : i32
    %c0_i32_1 = arith.constant 0 : i32
    return %arg0, %c0_i32, %c0_i32_0 : i32, i32, i32
  }
  func.func @transform_5(%arg0: i32) -> (i32, i32, i32) {
    %c0_i32 = arith.constant 0 : i32
    %c0_i32_0 = arith.constant 0 : i32
    %c0_i32_1 = arith.constant 0 : i32
    return %arg0, %c0_i32, %c0_i32_0 : i32, i32, i32
  }
}

module attributes {stable_mosaic.version = 11 : i64} {
  func.func @kernel(%arg0: i32, %arg1: memref<1x512x512xbf16, #tpu.memory_space<vmem>>, %arg2: memref<1x512x128xbf16, #tpu.memory_space<vmem>>, %arg3: memref<1x1x128xf32, #tpu.memory_space<vmem>>, %arg4: memref<1x1x128xf32, #tpu.memory_space<vmem>>, %arg5: memref<1x1x128xf32, #tpu.memory_space<vmem>>, %arg6: memref<1x512x128xbf16, #tpu.memory_space<vmem>>) attributes {dimension_semantics = [#tpu.dimension_semantics<parallel>], iteration_bounds = array<i64: 2>, scalar_prefetch = 0 : i64, scratch_operands = 0 : i64, tpu.core_type = #tpu.core_type<tc>, window_params = [{transform_indices = @transform_0, window_bounds = array<i64: 1, 512, 512>}, {transform_indices = @transform_1, window_bounds = array<i64: 1, 512, 128>}, {transform_indices = @transform_2, window_bounds = array<i64: 1, 1, 128>}, {transform_indices = @transform_3, window_bounds = array<i64: 1, 1, 128>}, {transform_indices = @transform_4, window_bounds = array<i64: 1, 1, 128>}, {transform_indices = @transform_5, window_bounds = array<i64: 1, 512, 128>}]} {
    %c0 = arith.constant 0 : index
    %c0_0 = arith.constant 0 : index
    %c0_1 = arith.constant 0 : index
    %0 = vector.load %arg1[%c0, %c0_0, %c0_1] : memref<1x512x512xbf16, #tpu.memory_space<vmem>>, vector<1x512x512xbf16>
    %1 = vector.shape_cast %0 : vector<1x512x512xbf16> to vector<512x512xbf16>
    %c0_2 = arith.constant 0 : index
    %c0_3 = arith.constant 0 : index
    %c0_4 = arith.constant 0 : index
    %2 = vector.load %arg2[%c0_2, %c0_3, %c0_4] : memref<1x512x128xbf16, #tpu.memory_space<vmem>>, vector<1x512x128xbf16>
    %3 = vector.shape_cast %2 : vector<1x512x128xbf16> to vector<512x128xbf16>
    %cst = arith.constant dense<0.000000e+00> : vector<512x128xf32>
    %4 = tpu.matmul %1, %3, %cst {dimension_numbers = #tpu.dot_dimension_numbers<[1], [0], [0], [1], [0, 0, 1, 1], [], []>} : vector<512x512xbf16>, vector<512x128xbf16>, vector<512x128xf32> -> vector<512x128xf32>
    %c0_5 = arith.constant 0 : index
    %c0_6 = arith.constant 0 : index
    %c0_7 = arith.constant 0 : index
    %5 = vector.load %arg3[%c0_5, %c0_6, %c0_7] : memref<1x1x128xf32, #tpu.memory_space<vmem>>, vector<1x1x128xf32>
    %6 = vector.shape_cast %5 : vector<1x1x128xf32> to vector<1x128xf32>
    %7 = vector.broadcast %6 : vector<1x128xf32> to vector<512x128xf32>
    %8 = arith.addf %4, %7 : vector<512x128xf32>
    %9 = vector.shape_cast %8 : vector<512x128xf32> to vector<2x256x128xf32>
    %cst_8 = arith.constant dense<0.000000e+00> : vector<2x256xf32>
    %10 = vector.multi_reduction <add>, %9, %cst_8 [2] : vector<2x256x128xf32> to vector<2x256xf32>
    %11 = vector.shape_cast %10 : vector<2x256xf32> to vector<2x256x1xf32>
    %cst_9 = arith.constant dense<0.000000e+00> : vector<2x1xf32>
    %12 = vector.multi_reduction <add>, %11, %cst_9 [1] : vector<2x256x1xf32> to vector<2x1xf32>
    %13 = vector.shape_cast %12 : vector<2x1xf32> to vector<2x1x1xf32>
    %cst_10 = arith.constant 2.048000e+03 : f32
    %14 = vector.broadcast %cst_10 : f32 to vector<2x1x1xf32>
    %15 = arith.divf %13, %14 : vector<2x1x1xf32>
    %16 = tpu.iota {dimensions = array<i32: 2>} : vector<1x1x128xi32>
    %c8_i32 = arith.constant 8 : i32
    %17 = vector.broadcast %c8_i32 : i32 to vector<1x1x128xi32>
    %18 = arith.cmpi slt, %16, %17 : vector<1x1x128xi32>
    %19 = vector.broadcast %15 : vector<2x1x1xf32> to vector<2x256x128xf32>
    %20 = arith.subf %9, %19 : vector<2x256x128xf32>
    %cst_11 = arith.constant 0.000000e+00 : f32
    %21 = vector.shape_cast %18 : vector<1x1x128xi1> to vector<1x1x128xi1>
    %22 = vector.broadcast %21 : vector<1x1x128xi1> to vector<2x256x128xi1>
    %23 = vector.broadcast %cst_11 : f32 to vector<2x256x128xf32>
    %24 = arith.select %22, %20, %23 : vector<2x256x128xi1>, vector<2x256x128xf32>
    %25 = arith.mulf %24, %24 : vector<2x256x128xf32>
    %cst_12 = arith.constant dense<0.000000e+00> : vector<2x256xf32>
    %26 = vector.multi_reduction <add>, %25, %cst_12 [2] : vector<2x256x128xf32> to vector<2x256xf32>
    %27 = vector.shape_cast %26 : vector<2x256xf32> to vector<2x256x1xf32>
    %cst_13 = arith.constant dense<0.000000e+00> : vector<2x1xf32>
    %28 = vector.multi_reduction <add>, %27, %cst_13 [1] : vector<2x256x1xf32> to vector<2x1xf32>
    %29 = vector.shape_cast %28 : vector<2x1xf32> to vector<2x1x1xf32>
    %cst_14 = arith.constant 2.047000e+03 : f32
    %30 = vector.broadcast %cst_14 : f32 to vector<2x1x1xf32>
    %31 = arith.divf %29, %30 : vector<2x1x1xf32>
    %32 = math.sqrt %31 : vector<2x1x1xf32>
    %cst_15 = arith.constant 9.99999974E-6 : f32
    %33 = vector.broadcast %cst_15 : f32 to vector<2x1x1xf32>
    %34 = arith.addf %32, %33 : vector<2x1x1xf32>
    %cst_16 = arith.constant 1.000000e+00 : f32
    %35 = vector.broadcast %cst_16 : f32 to vector<2x1x1xf32>
    %36 = arith.divf %35, %34 : vector<2x1x1xf32>
    %37 = vector.broadcast %36 : vector<2x1x1xf32> to vector<2x256x128xf32>
    %38 = arith.mulf %24, %37 : vector<2x256x128xf32>
    %c0_17 = arith.constant 0 : index
    %c0_18 = arith.constant 0 : index
    %c0_19 = arith.constant 0 : index
    %39 = vector.load %arg4[%c0_17, %c0_18, %c0_19] : memref<1x1x128xf32, #tpu.memory_space<vmem>>, vector<1x1x128xf32>
    %40 = vector.shape_cast %39 : vector<1x1x128xf32> to vector<1x128xf32>
    %41 = vector.shape_cast %40 : vector<1x128xf32> to vector<1x1x128xf32>
    %42 = vector.broadcast %41 : vector<1x1x128xf32> to vector<2x256x128xf32>
    %43 = arith.mulf %38, %42 : vector<2x256x128xf32>
    %c0_20 = arith.constant 0 : index
    %c0_21 = arith.constant 0 : index
    %c0_22 = arith.constant 0 : index
    %44 = vector.load %arg5[%c0_20, %c0_21, %c0_22] : memref<1x1x128xf32, #tpu.memory_space<vmem>>, vector<1x1x128xf32>
    %45 = vector.shape_cast %44 : vector<1x1x128xf32> to vector<1x128xf32>
    %46 = vector.shape_cast %45 : vector<1x128xf32> to vector<1x1x128xf32>
    %47 = vector.broadcast %46 : vector<1x1x128xf32> to vector<2x256x128xf32>
    %48 = arith.addf %43, %47 : vector<2x256x128xf32>
    %49 = vector.shape_cast %48 : vector<2x256x128xf32> to vector<512x128xf32>
    %cst_23 = arith.constant 0.000000e+00 : f32
    %50 = vector.broadcast %cst_23 : f32 to vector<512x128xf32>
    %51 = arith.maximumf %49, %50 : vector<512x128xf32>
    %52 = arith.truncf %51 : vector<512x128xf32> to vector<512x128xbf16>
    %c0_24 = arith.constant 0 : index
    %c0_25 = arith.constant 0 : index
    %c0_26 = arith.constant 0 : index
    %53 = vector.load %arg6[%c0_24, %c0_25, %c0_26] : memref<1x512x128xbf16, #tpu.memory_space<vmem>>, vector<1x512x128xbf16>
    %54 = vector.shape_cast %53 : vector<1x512x128xbf16> to vector<512x128xbf16>
    %55 = vector.shape_cast %52 : vector<512x128xbf16> to vector<1x512x128xbf16>
    tpu.vector_store %arg6[%c0_24, %c0_25, %c0_26], %55 {strides = array<i32>} : memref<1x512x128xbf16, #tpu.memory_space<vmem>>, vector<1x512x128xbf16>,
    return
  }
  func.func @transform_0(%arg0: i32) -> (i32, i32, i32) {
    %c0_i32 = arith.constant 0 : i32
    %c0_i32_0 = arith.constant 0 : i32
    %c0_i32_1 = arith.constant 0 : i32
    return %arg0, %c0_i32, %c0_i32_0 : i32, i32, i32
  }
  func.func @transform_1(%arg0: i32) -> (i32, i32, i32) {
    %c0_i32 = arith.constant 0 : i32
    %c0_i32_0 = arith.constant 0 : i32
    %c0_i32_1 = arith.constant 0 : i32
    return %arg0, %c0_i32, %c0_i32_0 : i32, i32, i32
  }
  func.func @transform_2(%arg0: i32) -> (i32, i32, i32) {
    %c0_i32 = arith.constant 0 : i32
    %c0_i32_0 = arith.constant 0 : i32
    %c0_i32_1 = arith.constant 0 : i32
    return %arg0, %c0_i32, %c0_i32_0 : i32, i32, i32
  }
  func.func @transform_3(%arg0: i32) -> (i32, i32, i32) {
    %c0_i32 = arith.constant 0 : i32
    %c0_i32_0 = arith.constant 0 : i32
    %c0_i32_1 = arith.constant 0 : i32
    return %arg0, %c0_i32, %c0_i32_0 : i32, i32, i32
  }
  func.func @transform_4(%arg0: i32) -> (i32, i32, i32) {
    %c0_i32 = arith.constant 0 : i32
    %c0_i32_0 = arith.constant 0 : i32
    %c0_i32_1 = arith.constant 0 : i32
    return %arg0, %c0_i32, %c0_i32_0 : i32, i32, i32
  }
  func.func @transform_5(%arg0: i32) -> (i32, i32, i32) {
    %c0_i32 = arith.constant 0 : i32
    %c0_i32_0 = arith.constant 0 : i32
    %c0_i32_1 = arith.constant 0 : i32
    return %arg0, %c0_i32, %c0_i32_0 : i32, i32, i32
  }
}

module attributes {stable_mosaic.version = 11 : i64} {
  func.func @kernel(%arg0: i32, %arg1: memref<1x512x512xbf16, #tpu.memory_space<vmem>>, %arg2: memref<1x512x128xbf16, #tpu.memory_space<vmem>>, %arg3: memref<1x1x128xf32, #tpu.memory_space<vmem>>, %arg4: memref<1x512x128xbf16, #tpu.memory_space<vmem>>) attributes {dimension_semantics = [#tpu.dimension_semantics<parallel>], iteration_bounds = array<i64: 2>, scalar_prefetch = 0 : i64, scratch_operands = 0 : i64, tpu.core_type = #tpu.core_type<tc>, window_params = [{transform_indices = @transform_0, window_bounds = array<i64: 1, 512, 512>}, {transform_indices = @transform_1, window_bounds = array<i64: 1, 512, 128>}, {transform_indices = @transform_2, window_bounds = array<i64: 1, 1, 128>}, {transform_indices = @transform_3, window_bounds = array<i64: 1, 512, 128>}]} {
    %c0 = arith.constant 0 : index
    %c0_0 = arith.constant 0 : index
    %c0_1 = arith.constant 0 : index
    %0 = vector.load %arg1[%c0, %c0_0, %c0_1] : memref<1x512x512xbf16, #tpu.memory_space<vmem>>, vector<1x512x512xbf16>
    %1 = vector.shape_cast %0 : vector<1x512x512xbf16> to vector<512x512xbf16>
    %c0_2 = arith.constant 0 : index
    %c0_3 = arith.constant 0 : index
    %c0_4 = arith.constant 0 : index
    %2 = vector.load %arg2[%c0_2, %c0_3, %c0_4] : memref<1x512x128xbf16, #tpu.memory_space<vmem>>, vector<1x512x128xbf16>
    %3 = vector.shape_cast %2 : vector<1x512x128xbf16> to vector<512x128xbf16>
    %cst = arith.constant dense<0.000000e+00> : vector<512x128xf32>
    %4 = tpu.matmul %1, %3, %cst {dimension_numbers = #tpu.dot_dimension_numbers<[1], [0], [0], [1], [0, 0, 1, 1], [], []>} : vector<512x512xbf16>, vector<512x128xbf16>, vector<512x128xf32> -> vector<512x128xf32>
    %c0_5 = arith.constant 0 : index
    %c0_6 = arith.constant 0 : index
    %c0_7 = arith.constant 0 : index
    %5 = vector.load %arg3[%c0_5, %c0_6, %c0_7] : memref<1x1x128xf32, #tpu.memory_space<vmem>>, vector<1x1x128xf32>
    %6 = vector.shape_cast %5 : vector<1x1x128xf32> to vector<1x128xf32>
    %7 = vector.broadcast %6 : vector<1x128xf32> to vector<512x128xf32>
    %8 = arith.addf %4, %7 : vector<512x128xf32>
    %9 = math.tanh %8 : vector<512x128xf32>
    %10 = arith.truncf %9 : vector<512x128xf32> to vector<512x128xbf16>
    %c0_8 = arith.constant 0 : index
    %c0_9 = arith.constant 0 : index
    %c0_10 = arith.constant 0 : index
    %11 = vector.load %arg4[%c0_8, %c0_9, %c0_10] : memref<1x512x128xbf16, #tpu.memory_space<vmem>>, vector<1x512x128xbf16>
    %12 = vector.shape_cast %11 : vector<1x512x128xbf16> to vector<512x128xbf16>
    %13 = vector.shape_cast %10 : vector<512x128xbf16> to vector<1x512x128xbf16>
    tpu.vector_store %arg4[%c0_8, %c0_9, %c0_10], %13 {strides = array<i32>} : memref<1x512x128xbf16, #tpu.memory_space<vmem>>, vector<1x512x128xbf16>,
    return
  }
  func.func @transform_0(%arg0: i32) -> (i32, i32, i32) {
    %c0_i32 = arith.constant 0 : i32
    %c0_i32_0 = arith.constant 0 : i32
    %c0_i32_1 = arith.constant 0 : i32
    return %arg0, %c0_i32, %c0_i32_0 : i32, i32, i32
  }
  func.func @transform_1(%arg0: i32) -> (i32, i32, i32) {
    %c0_i32 = arith.constant 0 : i32
    %c0_i32_0 = arith.constant 0 : i32
    %c0_i32_1 = arith.constant 0 : i32
    return %arg0, %c0_i32, %c0_i32_0 : i32, i32, i32
  }
  func.func @transform_2(%arg0: i32) -> (i32, i32, i32) {
    %c0_i32 = arith.constant 0 : i32
    %c0_i32_0 = arith.constant 0 : i32
    %c0_i32_1 = arith.constant 0 : i32
    return %arg0, %c0_i32, %c0_i32_0 : i32, i32, i32
  }
  func.func @transform_3(%arg0: i32) -> (i32, i32, i32) {
    %c0_i32 = arith.constant 0 : i32
    %c0_i32_0 = arith.constant 0 : i32
    %c0_i32_1 = arith.constant 0 : i32
    return %arg0, %c0_i32, %c0_i32_0 : i32, i32, i32
  }
}

</mosaic_0001>

<bundles_post_ra>
// kernel: munit_forward.14
= control target key start
LH: loop header
LB: loop body
LE: loop exit
PB: predicated region body
PF: predicated region fallthrough
CT: control target
= control target key end

     0   :  { %s2425_s12 = smov 0   ;;  %s3344_s0 = inlined_call_operand.vmem [shape: bf16[2,512,256], index: 0, kind: input, shape index: {}]   ;;  %s3345_s1 = inlined_call_operand.vmem [shape: bf16[2,256,128], index: 1, kind: input, shape index: {}]   ;;  %s3346_s2 = inlined_call_operand.vmem [shape: f32[2,1,128], index: 2, kind: input, shape index: {}]   ;;  %s3347_s3 = inlined_call_operand.vmem [shape: bf16[2,512,128], index: 3, kind: output, shape index: {}]  }
   0x1 LB: > { %s1823_s13 = sadd.s32 4294967295, %s2402_s12   ;;  %p1827_p0 = scmp.ge.s32.totalorder %s2402_s12, 1  ;;  %s2402_s12 = sphi %s2425_s12, %s13_s12  }
   0x2   : > { %p155_p1 = scmp.lt.s32.totalorder %s2402_s12, 3 }
   0x4   : > { %p156_p2 = pnand %p1827_p0, %p155_p1 }
   0x6   : > { %159 = sbr.rel (%p156_p2) target bundleno = 593 (0x251), region = 32 }
   0xd   : > { %p187_p3 = scmp.lt.s32.totalorder %s1823_s13, 1  ;;  %v2404_v0 = vmov 0  }
   0xe   : > { %725 = vmatprep.subr.bf16.mxu0 %v2404_v0  ;;  %2239 = vmatprep.subr.bf16.mxu1 %v2404_v0 }
   0xf   : > { %s3464_s13 = smov (!%p187_p3, %s1823_s13), 1 }
  0x10   : > { %s1982_s14 = sshll.u32 %s3464_s13, 7  ;;  %s1981_s18 = sshll.u32 %s3464_s13, 9 }
  0x11   : > { %s2441_s17 = scalar_lea.vmem %s3345_s1, %s1982_s14  ;;  %s2458_s21 = scalar_lea.vmem %s3344_s0, %s1981_s18 }
  0x12   : > { %v2280_v1 = vld [vmem:[%s2441_s17] sm:$0xff]   ;;  %v2281_v2 = vld [vmem:[%s2441_s17 + $0x8] sm:$0xff]   ;;  %v2282_v3 = vld [vmem:[%s2441_s17 + $0x10] sm:$0xff]   ;;  %s199_s24 = scalar_lea.vmem %s3346_s2, %s3464_s13  ;;  %s1983_s25 = sshll.u32 %s3464_s13, 8 }
  0x13   : > { %726 = vmatpush1.bf16.msra.mxu0 %v2280_v1  ;;  %2255 = vmatpush1.bf16.msra.mxu1 %v2280_v1  ;;  %v2283_v4 = vld [vmem:[%s2441_s17 + $0x18] sm:$0xff]   ;;  %v2284_v5 = vld [vmem:[%s2441_s17 + $0x20] sm:$0xff]   ;;  %v2285_v7 = vld [vmem:[%s2441_s17 + $0x28] sm:$0xff]   ;;  %s3257_s28 = scalar_lea.vmem %s3347_s3, %s1983_s25 }
  0x14   : > { %727 = vmatprep.subr.bf16.mxu0 %v2404_v0  ;;  %2240 = vmatprep.subr.bf16.mxu1 %v2404_v0  ;;  %v2298_v6 = vld [vmem:[%s2458_s21 + $0x4] ss:$8 sps:$4 sm:$0xff]   ;;  %v2286_v9 = vld [vmem:[%s2441_s17 + $0x30] sm:$0xff]   ;;  %v2287_v10 = vld [vmem:[%s2441_s17 + $0x38] sm:$0xff]  }
  0x15   : > { %v2301_v8 = vld [vmem:[%s2458_s21 + $0x104] ss:$8 sps:$4 sm:$0xff]   ;;  %757 = vmatprep.mubr.bf16.mxu0 %v2298_v6  ;;  %v2290_v13 = vld [vmem:[%s2441_s17 + $0x50] sm:$0xff]   ;;  %v2291_v14 = vld [vmem:[%s2441_s17 + $0x58] sm:$0xff]  }
  0x16   : > { %885 = vmatprep.mubr.bf16.mxu1 %v2301_v8  ;;  %v2288_v11 = vld [vmem:[%s2441_s17 + $0x40] sm:$0xff]   ;;  %v2289_v12 = vld [vmem:[%s2441_s17 + $0x48] sm:$0xff]   ;;  %v2294_v17 = vld [vmem:[%s2441_s17 + $0x70] sm:$0xff]  }
  0x17   : > { %728 = vmatpush1.bf16.msra.mxu0 %v2281_v2  ;;  %2256 = vmatpush1.bf16.msra.mxu1 %v2281_v2  ;;  %v2292_v15 = vld [vmem:[%s2441_s17 + $0x60] sm:$0xff]   ;;  %v2293_v16 = vld [vmem:[%s2441_s17 + $0x68] sm:$0xff]   ;;  %v2295_v18 = vld [vmem:[%s2441_s17 + $0x78] sm:$0xff]  }
  0x18   : > { %729 = vmatprep.subr.bf16.mxu0 %v2404_v0  ;;  %2241 = vmatprep.subr.bf16.mxu1 %v2404_v0  ;;  %v2296_v19 = vld [vmem:[%s2458_s21] ss:$8 sps:$4 sm:$0xff]   ;;  %v2302_v21 = vld [vmem:[%s2458_s21 + $0x14] ss:$8 sps:$4 sm:$0xff]   ;;  %v2306_v23 = vld [vmem:[%s2458_s21 + $0x10] ss:$8 sps:$4 sm:$0xff]  }
  0x19   : > { %v2299_v20 = vld [vmem:[%s2458_s21 + $0x100] ss:$8 sps:$4 sm:$0xff]   ;;  %v2304_v22 = vld [vmem:[%s2458_s21 + $0x114] ss:$8 sps:$4 sm:$0xff]   ;;  %v2307_v24 = vld [vmem:[%s2458_s21 + $0x110] ss:$8 sps:$4 sm:$0xff]  }
  0x1a   : > { %v2308_v25 = vld [vmem:[%s2458_s21 + $0x24] ss:$8 sps:$4 sm:$0xff]   ;;  %v2312_v27 = vld [vmem:[%s2458_s21 + $0x20] ss:$8 sps:$4 sm:$0xff]   ;;  %v2314_v29 = vld [vmem:[%s2458_s21 + $0x34] ss:$8 sps:$4 sm:$0xff]  }
  0x1b   : > { %730 = vmatpush1.bf16.msra.mxu0 %v2282_v3  ;;  %2257 = vmatpush1.bf16.msra.mxu1 %v2282_v3  ;;  %v2310_v26 = vld [vmem:[%s2458_s21 + $0x124] ss:$8 sps:$4 sm:$0xff]   ;;  %v2313_v28 = vld [vmem:[%s2458_s21 + $0x120] ss:$8 sps:$4 sm:$0xff]   ;;  %v2316_v30 = vld [vmem:[%s2458_s21 + $0x134] ss:$8 sps:$4 sm:$0xff]  }
  0x1c   : > { %731 = vmatprep.subr.bf16.mxu0 %v2404_v0  ;;  %2242 = vmatprep.subr.bf16.mxu1 %v2404_v0  ;;  %v2318_v31 = vld [vmem:[%s2458_s21 + $0x30] ss:$8 sps:$4 sm:$0xff]   ;;  %v2320_v33 = vld [vmem:[%s2458_s21 + $0x44] ss:$8 sps:$4 sm:$0xff]   ;;  %v2324_v35 = vld [vmem:[%s2458_s21 + $0x40] ss:$8 sps:$4 sm:$0xff]  }
  0x1d   : > { %v2319_v32 = vld [vmem:[%s2458_s21 + $0x130] ss:$8 sps:$4 sm:$0xff]   ;;  %v2322_v34 = vld [vmem:[%s2458_s21 + $0x144] ss:$8 sps:$4 sm:$0xff]   ;;  %v2325_v36 = vld [vmem:[%s2458_s21 + $0x140] ss:$8 sps:$4 sm:$0xff]  }
  0x1e   : > { %v2326_v37 = vld [vmem:[%s2458_s21 + $0x54] ss:$8 sps:$4 sm:$0xff]   ;;  %v2330_v39 = vld [vmem:[%s2458_s21 + $0x50] ss:$8 sps:$4 sm:$0xff]   ;;  %v2332_v41 = vld [vmem:[%s2458_s21 + $0x64] ss:$8 sps:$4 sm:$0xff]  }
  0x1f   : > { %732 = vmatpush1.bf16.msra.mxu0 %v2283_v4  ;;  %2258 = vmatpush1.bf16.msra.mxu1 %v2283_v4  ;;  %v2328_v38 = vld [vmem:[%s2458_s21 + $0x154] ss:$8 sps:$4 sm:$0xff]   ;;  %v2331_v40 = vld [vmem:[%s2458_s21 + $0x150] ss:$8 sps:$4 sm:$0xff]   ;;  %v2334_v42 = vld [vmem:[%s2458_s21 + $0x164] ss:$8 sps:$4 sm:$0xff]  }
  0x20   : > { %733 = vmatprep.subr.bf16.mxu0 %v2404_v0  ;;  %2243 = vmatprep.subr.bf16.mxu1 %v2404_v0  ;;  %v2336_v43 = vld [vmem:[%s2458_s21 + $0x60] ss:$8 sps:$4 sm:$0xff]   ;;  %v2338_v45 = vld [vmem:[%s2458_s21 + $0x74] ss:$8 sps:$4 sm:$0xff]   ;;  %v2342_v47 = vld [vmem:[%s2458_s21 + $0x70] ss:$8 sps:$4 sm:$0xff]  }
  0x21   : > { %v2337_v44 = vld [vmem:[%s2458_s21 + $0x160] ss:$8 sps:$4 sm:$0xff]   ;;  %v2340_v46 = vld [vmem:[%s2458_s21 + $0x174] ss:$8 sps:$4 sm:$0xff]   ;;  %v2343_v48 = vld [vmem:[%s2458_s21 + $0x170] ss:$8 sps:$4 sm:$0xff]  }
  0x22   : > { %v2344_v49 = vld [vmem:[%s2458_s21 + $0x84] ss:$8 sps:$4 sm:$0xff]   ;;  %v2348_v51 = vld [vmem:[%s2458_s21 + $0x80] ss:$8 sps:$4 sm:$0xff]   ;;  %v2350_v53 = vld [vmem:[%s2458_s21 + $0x94] ss:$8 sps:$4 sm:$0xff]  }
  0x23   : > { %734 = vmatpush1.bf16.msra.mxu0 %v2284_v5  ;;  %2259 = vmatpush1.bf16.msra.mxu1 %v2284_v5  ;;  %v2346_v50 = vld [vmem:[%s2458_s21 + $0x184] ss:$8 sps:$4 sm:$0xff]   ;;  %v2349_v52 = vld [vmem:[%s2458_s21 + $0x180] ss:$8 sps:$4 sm:$0xff]   ;;  %v2352_v54 = vld [vmem:[%s2458_s21 + $0x194] ss:$8 sps:$4 sm:$0xff]  }
  0x24   : > { %735 = vmatprep.subr.bf16.mxu0 %v2404_v0  ;;  %2244 = vmatprep.subr.bf16.mxu1 %v2404_v0  ;;  %v2354_v55 = vld [vmem:[%s2458_s21 + $0x90] ss:$8 sps:$4 sm:$0xff]   ;;  %v2356_v57 = vld [vmem:[%s2458_s21 + $0xa4] ss:$8 sps:$4 sm:$0xff]   ;;  %v2360_v59 = vld [vmem:[%s2458_s21 + $0xa0] ss:$8 sps:$4 sm:$0xff]  }
  0x25   : > { %v2355_v56 = vld [vmem:[%s2458_s21 + $0x190] ss:$8 sps:$4 sm:$0xff]   ;;  %v2358_v58 = vld [vmem:[%s2458_s21 + $0x1a4] ss:$8 sps:$4 sm:$0xff]   ;;  %v2361_v60 = vld [vmem:[%s2458_s21 + $0x1a0] ss:$8 sps:$4 sm:$0xff]  }
  0x26   : > { %v2362_v61 = vld [vmem:[%s2458_s21 + $0xb4] ss:$8 sps:$4 sm:$0xff]   ;;  %v2366_v63 = vld [vmem:[%s2458_s21 + $0xb0] ss:$8 sps:$4 sm:$0xff]   ;;  %v2368_v1 = vld [vmem:[%s2458_s21 + $0xc4] ss:$8 sps:$4 sm:$0xff]  }
  0x27   : > { %736 = vmatpush1.bf16.msra.mxu0 %v2285_v7  ;;  %2260 = vmatpush1.bf16.msra.mxu1 %v2285_v7  ;;  %v2364_v62 = vld [vmem:[%s2458_s21 + $0x1b4] ss:$8 sps:$4 sm:$0xff]   ;;  %v2370_v2 = vld [vmem:[%s2458_s21 + $0x1c4] ss:$8 sps:$4 sm:$0xff]   ;;  %v2372_v3 = vld [vmem:[%s2458_s21 + $0xc0] ss:$8 sps:$4 sm:$0xff]  }
  0x28   : > { %737 = vmatprep.subr.bf16.mxu0 %v2404_v0  ;;  %2245 = vmatprep.subr.bf16.mxu1 %v2404_v0  ;;  %v2373_v4 = vld [vmem:[%s2458_s21 + $0x1c0] ss:$8 sps:$4 sm:$0xff]   ;;  %v2374_v5 = vld [vmem:[%s2458_s21 + $0xd4] ss:$8 sps:$4 sm:$0xff]   ;;  %v2378_v7 = vld [vmem:[%s2458_s21 + $0xd0] ss:$8 sps:$4 sm:$0xff]  }
  0x29   : > { %v2376_v6 = vld [vmem:[%s2458_s21 + $0x1d4] ss:$8 sps:$4 sm:$0xff]   ;;  %v2379_v8 = vld [vmem:[%s2458_s21 + $0x1d0] ss:$8 sps:$4 sm:$0xff]  }
  0x2b   : > { %738 = vmatpush1.bf16.msra.mxu0 %v2286_v9  ;;  %2261 = vmatpush1.bf16.msra.mxu1 %v2286_v9  ;;  %v2380_v9 = vld [vmem:[%s2458_s21 + $0xe4] ss:$8 sps:$4 sm:$0xff]  }
  0x2c   : > { %739 = vmatprep.subr.bf16.mxu0 %v2404_v0  ;;  %2246 = vmatprep.subr.bf16.mxu1 %v2404_v0 }
  0x2f   : > { %740 = vmatpush1.bf16.msra.mxu0 %v2287_v10  ;;  %2262 = vmatpush1.bf16.msra.mxu1 %v2287_v10  ;;  %v2382_v10 = vld [vmem:[%s2458_s21 + $0x1e4] ss:$8 sps:$4 sm:$0xff]  }
  0x30   : > { %741 = vmatprep.subr.bf16.mxu0 %v2404_v0  ;;  %2247 = vmatprep.subr.bf16.mxu1 %v2404_v0 }
  0x33   : > { %742 = vmatpush1.bf16.msra.mxu0 %v2288_v11  ;;  %2263 = vmatpush1.bf16.msra.mxu1 %v2288_v11  ;;  %v2384_v11 = vld [vmem:[%s2458_s21 + $0xe0] ss:$8 sps:$4 sm:$0xff]  }
  0x34   : > { %743 = vmatprep.subr.bf16.mxu0 %v2404_v0  ;;  %2248 = vmatprep.subr.bf16.mxu1 %v2404_v0 }
  0x37   : > { %744 = vmatpush1.bf16.msra.mxu0 %v2289_v12  ;;  %2264 = vmatpush1.bf16.msra.mxu1 %v2289_v12  ;;  %v2385_v12 = vld [vmem:[%s2458_s21 + $0x1e0] ss:$8 sps:$4 sm:$0xff]  }
  0x38   : > { %745 = vmatprep.subr.bf16.mxu0 %v2404_v0  ;;  %2249 = vmatprep.subr.bf16.mxu1 %v2404_v0 }
  0x3b   : > { %746 = vmatpush1.bf16.msra.mxu0 %v2290_v13  ;;  %2265 = vmatpush1.bf16.msra.mxu1 %v2290_v13  ;;  %v2386_v13 = vld [vmem:[%s2458_s21 + $0xf4] ss:$8 sps:$4 sm:$0xff]  }
  0x3c   : > { %747 = vmatprep.subr.bf16.mxu0 %v2404_v0  ;;  %2250 = vmatprep.subr.bf16.mxu1 %v2404_v0 }
  0x3f   : > { %748 = vmatpush1.bf16.msra.mxu0 %v2291_v14  ;;  %2266 = vmatpush1.bf16.msra.mxu1 %v2291_v14  ;;  %v2388_v14 = vld [vmem:[%s2458_s21 + $0x1f4] ss:$8 sps:$4 sm:$0xff]  }
  0x40   : > { %749 = vmatprep.subr.bf16.mxu0 %v2404_v0  ;;  %2251 = vmatprep.subr.bf16.mxu1 %v2404_v0 }
  0x43   : > { %750 = vmatpush1.bf16.msra.mxu0 %v2292_v15  ;;  %2267 = vmatpush1.bf16.msra.mxu1 %v2292_v15  ;;  %v2390_v15 = vld [vmem:[%s2458_s21 + $0xf0] ss:$8 sps:$4 sm:$0xff]  }
  0x44   : > { %751 = vmatprep.subr.bf16.mxu0 %v2404_v0  ;;  %2252 = vmatprep.subr.bf16.mxu1 %v2404_v0 }
  0x47   : > { %752 = vmatpush1.bf16.msra.mxu0 %v2293_v16  ;;  %2268 = vmatpush1.bf16.msra.mxu1 %v2293_v16  ;;  %v2391_v16 = vld [vmem:[%s2458_s21 + $0x1f0] ss:$8 sps:$4 sm:$0xff]  }
  0x48   : > { %753 = vmatprep.subr.bf16.mxu0 %v2404_v0  ;;  %2253 = vmatprep.subr.bf16.mxu1 %v2404_v0 }
  0x4b   : > { %754 = vmatpush1.bf16.msra.mxu0 %v2294_v17  ;;  %2269 = vmatpush1.bf16.msra.mxu1 %v2294_v17 }
  0x4c   : > { %755 = vmatprep.subr.bf16.mxu0 %v2404_v0  ;;  %2254 = vmatprep.subr.bf16.mxu1 %v2404_v0  ;;  %v2367_v0 = vld [vmem:[%s2458_s21 + $0x1b0] ss:$8 sps:$4 sm:$0xff]  }
  0x4f   : > { %756 = vmatpush1.bf16.msra.mxu0 %v2295_v18  ;;  %2270 = vmatpush1.bf16.msra.mxu1 %v2295_v18 }
  0x52   : > { %758 = vmatmul.mubr.bf16.vlgmr.msra.gmra.mrb[0].mxu0 %v2296_v19  ;;  %886 = vmatmul.mubr.bf16.vlgmr.msra.gmra.mrb[0].mxu1 %v2299_v20 }
  0x53   : > { %765 = vmatprep.mubr.bf16.mxu0 %v2302_v21  ;;  %893 = vmatprep.mubr.bf16.mxu1 %v2304_v22 }
  0x5a   : > { %766 = vmatmul.mubr.bf16.gmra.mrb[4].mxu0 %v2306_v23  ;;  %894 = vmatmul.mubr.bf16.gmra.mrb[4].mxu1 %v2307_v24 }
  0x5b   : > { %773 = vmatprep.mubr.bf16.mxu0 %v2308_v25  ;;  %901 = vmatprep.mubr.bf16.mxu1 %v2310_v26 }
  0x62   : > { %774 = vmatmul.mubr.bf16.gmra.mrb[8].mxu0 %v2312_v27  ;;  %902 = vmatmul.mubr.bf16.gmra.mrb[8].mxu1 %v2313_v28 }
  0x63   : > { %781 = vmatprep.mubr.bf16.mxu0 %v2314_v29  ;;  %909 = vmatprep.mubr.bf16.mxu1 %v2316_v30 }
  0x6a   : > { %782 = vmatmul.mubr.bf16.gmra.mrb[12].mxu0 %v2318_v31  ;;  %910 = vmatmul.mubr.bf16.gmra.mrb[12].mxu1 %v2319_v32 }
  0x6b   : > { %789 = vmatprep.mubr.bf16.mxu0 %v2320_v33  ;;  %917 = vmatprep.mubr.bf16.mxu1 %v2322_v34 }
  0x72   : > { %790 = vmatmul.mubr.bf16.gmra.mrb[16].mxu0 %v2324_v35  ;;  %918 = vmatmul.mubr.bf16.gmra.mrb[16].mxu1 %v2325_v36 }
  0x73   : > { %797 = vmatprep.mubr.bf16.mxu0 %v2326_v37  ;;  %925 = vmatprep.mubr.bf16.mxu1 %v2328_v38 }
  0x7a   : > { %798 = vmatmul.mubr.bf16.gmra.mrb[20].mxu0 %v2330_v39  ;;  %926 = vmatmul.mubr.bf16.gmra.mrb[20].mxu1 %v2331_v40 }
  0x7b   : > { %805 = vmatprep.mubr.bf16.mxu0 %v2332_v41  ;;  %933 = vmatprep.mubr.bf16.mxu1 %v2334_v42  ;;  %v2563_v41 = vld [vmem:[%s199_s24] ss:$0 sm:$0xff] }
  0x82   : > { %806 = vmatmul.mubr.bf16.gmra.mrb[24].mxu0 %v2336_v43  ;;  %934 = vmatmul.mubr.bf16.gmra.mrb[24].mxu1 %v2337_v44 }
  0x83   : > { %813 = vmatprep.mubr.bf16.mxu0 %v2338_v45  ;;  %941 = vmatprep.mubr.bf16.mxu1 %v2340_v46 }
  0x8a   : > { %814 = vmatmul.mubr.bf16.gmra.mrb[28].mxu0 %v2342_v47  ;;  %942 = vmatmul.mubr.bf16.gmra.mrb[28].mxu1 %v2343_v48 }
  0x8b   : > { %821 = vmatprep.mubr.bf16.mxu0 %v2344_v49  ;;  %949 = vmatprep.mubr.bf16.mxu1 %v2346_v50 }
  0x92   : > { %822 = vmatmul.mubr.bf16.gmra.mrb[32].mxu0 %v2348_v51  ;;  %950 = vmatmul.mubr.bf16.gmra.mrb[32].mxu1 %v2349_v52 }
  0x93   : > { %829 = vmatprep.mubr.bf16.mxu0 %v2350_v53  ;;  %957 = vmatprep.mubr.bf16.mxu1 %v2352_v54 }
  0x9a   : > { %830 = vmatmul.mubr.bf16.gmra.mrb[36].mxu0 %v2354_v55  ;;  %958 = vmatmul.mubr.bf16.gmra.mrb[36].mxu1 %v2355_v56 }
  0x9b   : > { %837 = vmatprep.mubr.bf16.mxu0 %v2356_v57  ;;  %965 = vmatprep.mubr.bf16.mxu1 %v2358_v58 }
  0xa2   : > { %838 = vmatmul.mubr.bf16.gmra.mrb[40].mxu0 %v2360_v59  ;;  %966 = vmatmul.mubr.bf16.gmra.mrb[40].mxu1 %v2361_v60 }
  0xa3   : > { %845 = vmatprep.mubr.bf16.mxu0 %v2362_v61  ;;  %973 = vmatprep.mubr.bf16.mxu1 %v2364_v62 }
  0xaa   : > { %846 = vmatmul.mubr.bf16.gmra.mrb[44].mxu0 %v2366_v63  ;;  %974 = vmatmul.mubr.bf16.gmra.mrb[44].mxu1 %v2367_v0 }
  0xab   : > { %853 = vmatprep.mubr.bf16.mxu0 %v2368_v1  ;;  %981 = vmatprep.mubr.bf16.mxu1 %v2370_v2 }
  0xb2   : > { %854 = vmatmul.mubr.bf16.gmra.mrb[48].mxu0 %v2372_v3  ;;  %982 = vmatmul.mubr.bf16.gmra.mrb[48].mxu1 %v2373_v4 }
  0xb3   : > { %861 = vmatprep.mubr.bf16.mxu0 %v2374_v5  ;;  %989 = vmatprep.mubr.bf16.mxu1 %v2376_v6 }
  0xba   : > { %862 = vmatmul.mubr.bf16.gmra.mrb[52].mxu0 %v2378_v7  ;;  %990 = vmatmul.mubr.bf16.gmra.mrb[52].mxu1 %v2379_v8 }
  0xbb   : > { %869 = vmatprep.mubr.bf16.mxu0 %v2380_v9  ;;  %997 = vmatprep.mubr.bf16.mxu1 %v2382_v10 }
  0xc2   : > { %870 = vmatmul.mubr.bf16.gmra.mrb[56].mxu0 %v2384_v11  ;;  %998 = vmatmul.mubr.bf16.gmra.mrb[56].mxu1 %v2385_v12 }
  0xc3   : > { %877 = vmatprep.mubr.bf16.mxu0 %v2386_v13  ;;  %1005 = vmatprep.mubr.bf16.mxu1 %v2388_v14 }
  0xca   : > { %878 = vmatmul.mubr.bf16.gmra.mrb[60].mxu0 %v2390_v15  ;;  %1006 = vmatmul.mubr.bf16.gmra.mrb[60].mxu1 %v2391_v16 }
 0x125   : > { %v759_v17 = vpop.f32.mrb[0].mxu0  ;;  %v887_v18 = vpop.f32.mrb[0].mxu1 }
 0x126   : > { %v761_v19 = vpop.f32.mrb[1].mxu0  ;;  %v889_v20 = vpop.f32.mrb[1].mxu1  ;;  %v2569_v45 = vadd.f32 %v2563_v41, %v759_v17  ;;  %v2584_v57 = vadd.f32 %v2563_v41, %v887_v18 }
 0x127   : > { %v762_v21 = vpop.f32.mrb[2].mxu0  ;;  %v890_v22 = vpop.f32.mrb[2].mxu1 }
 0x128   : > { %v764_v23 = vpop.f32.mrb[3].mxu0  ;;  %v892_v24 = vpop.f32.mrb[3].mxu1  ;;  %v2566_v42 = vadd.f32 %v2563_v41, %v762_v21  ;;  %v2577_v54 = vadd.f32 %v2563_v41, %v890_v22 }
 0x12a   : > { %v1014_v51 = vadd.f32 %v2566_v42, %v2569_v45  ;;  %v1051_v62 = vadd.f32 %v2577_v54, %v2584_v57 }
 0x12d   : > { %v767_v25 = vpop.f32.mrb[4].mxu0  ;;  %v895_v26 = vpop.f32.mrb[4].mxu1 }
 0x12e   : > { %v769_v27 = vpop.f32.mrb[5].mxu0  ;;  %v897_v28 = vpop.f32.mrb[5].mxu1  ;;  %v2572_v46 = vadd.f32 %v2563_v41, %v767_v25  ;;  %v2587_v58 = vadd.f32 %v2563_v41, %v895_v26 }
 0x12f   : > { %v770_v29 = vpop.f32.mrb[6].mxu0  ;;  %v898_v30 = vpop.f32.mrb[6].mxu1 }
 0x130   : > { %v772_v31 = vpop.f32.mrb[7].mxu0  ;;  %v900_v32 = vpop.f32.mrb[7].mxu1  ;;  %v1015_v55 = vadd.f32 %v1014_v51, %v2572_v46  ;;  %v2581_v56 = vadd.f32 %v2563_v41, %v770_v29  ;;  %v1052_v4 = vadd.f32 %v1051_v62, %v2587_v58  ;;  %v2597_v5 = vadd.f32 %v2563_v41, %v898_v30 }
 0x132   : > { %v1016_v63 = vadd.f32 %v1015_v55, %v2581_v56  ;;  %v1053_v12 = vadd.f32 %v1052_v4, %v2597_v5 }
 0x135   : > { %v775_v33 = vpop.f32.mrb[8].mxu0  ;;  %v903_v34 = vpop.f32.mrb[8].mxu1 }
 0x136   : > { %v777_v35 = vpop.f32.mrb[9].mxu0  ;;  %v905_v36 = vpop.f32.mrb[9].mxu1  ;;  %v2590_v59 = vadd.f32 %v2563_v41, %v775_v33  ;;  %v2604_v10 = vadd.f32 %v2563_v41, %v903_v34 }
 0x137   : > { %v778_v37 = vpop.f32.mrb[10].mxu0  ;;  %v906_v38 = vpop.f32.mrb[10].mxu1 }
 0x138   : > { %v780_v39 = vpop.f32.mrb[11].mxu0  ;;  %v908_v40 = vpop.f32.mrb[11].mxu1  ;;  %v1017_v6 = vadd.f32 %v1016_v63, %v2590_v59  ;;  %v2601_v7 = vadd.f32 %v2563_v41, %v778_v37  ;;  %v1054_v16 = vadd.f32 %v1053_v12, %v2604_v10  ;;  %v2613_v17 = vadd.f32 %v2563_v41, %v906_v38 }
 0x13a   : > { %v1018_v13 = vadd.f32 %v1017_v6, %v2601_v7  ;;  %v1055_v28 = vadd.f32 %v1054_v16, %v2613_v17 }
 0x13d   : > { %v783_v43 = vpop.f32.mrb[12].mxu0  ;;  %v911_v44 = vpop.f32.mrb[12].mxu1 }
 0x13e   : > { %v785_v47 = vpop.f32.mrb[13].mxu0  ;;  %v913_v48 = vpop.f32.mrb[13].mxu1  ;;  %v2607_v11 = vadd.f32 %v2563_v41, %v783_v43  ;;  %v2620_v24 = vadd.f32 %v2563_v41, %v911_v44 }
 0x13f   : > { %v786_v49 = vpop.f32.mrb[14].mxu0  ;;  %v914_v50 = vpop.f32.mrb[14].mxu1 }
 0x140   : > { %v788_v52 = vpop.f32.mrb[15].mxu0  ;;  %v916_v53 = vpop.f32.mrb[15].mxu1  ;;  %v1019_v18 = vadd.f32 %v1018_v13, %v2607_v11  ;;  %v2617_v19 = vadd.f32 %v2563_v41, %v786_v49  ;;  %v1056_v30 = vadd.f32 %v1055_v28, %v2620_v24  ;;  %v2629_v31 = vadd.f32 %v2563_v41, %v914_v50 }
 0x142   : > { %v1020_v29 = vadd.f32 %v1019_v18, %v2617_v19  ;;  %v1057_v44 = vadd.f32 %v1056_v30, %v2629_v31 }
 0x145   : > { %v791_v60 = vpop.f32.mrb[16].mxu0  ;;  %v919_v61 = vpop.f32.mrb[16].mxu1 }
 0x146   : > { %v793_v0 = vpop.f32.mrb[17].mxu0  ;;  %v921_v1 = vpop.f32.mrb[17].mxu1  ;;  %v2623_v25 = vadd.f32 %v2563_v41, %v791_v60  ;;  %v2636_v36 = vadd.f32 %v2563_v41, %v919_v61 }
 0x147   : > { %v794_v2 = vpop.f32.mrb[18].mxu0  ;;  %v922_v3 = vpop.f32.mrb[18].mxu1 }
 0x148   : > { %v796_v8 = vpop.f32.mrb[19].mxu0  ;;  %v924_v9 = vpop.f32.mrb[19].mxu1  ;;  %v1021_v32 = vadd.f32 %v1020_v29, %v2623_v25  ;;  %v2633_v33 = vadd.f32 %v2563_v41, %v794_v2  ;;  %3386 = vst [vmem:[#allocation2_spill] sm:$0xff] %v2636_v36  ;;  %v1058_v50 = vadd.f32 %v1057_v44, %v2636_v36  ;;  %v2645_v51 = vadd.f32 %v2563_v41, %v922_v3 }
 0x14a   : > { %v1022_v47 = vadd.f32 %v1021_v32, %v2633_v33  ;;  %3387 = vst [vmem:[#allocation3_spill] sm:$0xff] %v2645_v51  ;;  %v1059_v63 = vadd.f32 %v1058_v50, %v2645_v51 }
 0x14d   : > { %v799_v14 = vpop.f32.mrb[20].mxu0  ;;  %v927_v15 = vpop.f32.mrb[20].mxu1 }
 0x14e   : > { %v801_v20 = vpop.f32.mrb[21].mxu0  ;;  %v929_v21 = vpop.f32.mrb[21].mxu1  ;;  %v2639_v37 = vadd.f32 %v2563_v41, %v799_v14  ;;  %v2652_v55 = vadd.f32 %v2563_v41, %v927_v15 }
 0x14f   : > { %v802_v22 = vpop.f32.mrb[22].mxu0  ;;  %v930_v23 = vpop.f32.mrb[22].mxu1 }
 0x150   : > { %v804_v26 = vpop.f32.mrb[23].mxu0  ;;  %v932_v27 = vpop.f32.mrb[23].mxu1  ;;  %v1023_v52 = vadd.f32 %v1022_v47, %v2639_v37  ;;  %v2649_v53 = vadd.f32 %v2563_v41, %v802_v22  ;;  %3388 = vst [vmem:[#allocation4_spill] sm:$0xff] %v2652_v55  ;;  %v1060_v6 = vadd.f32 %v1059_v63, %v2652_v55  ;;  %v2661_v8 = vadd.f32 %v2563_v41, %v930_v23 }
 0x152   : > { %v1024_v0 = vadd.f32 %v1023_v52, %v2649_v53  ;;  %3389 = vst [vmem:[#allocation5_spill] sm:$0xff] %v2661_v8  ;;  %v1061_v18 = vadd.f32 %v1060_v6, %v2661_v8 }
 0x155   : > { %v807_v34 = vpop.f32.mrb[24].mxu0  ;;  %v935_v35 = vpop.f32.mrb[24].mxu1 }
 0x156   : > { %v809_v38 = vpop.f32.mrb[25].mxu0  ;;  %v937_v39 = vpop.f32.mrb[25].mxu1  ;;  %v2655_v60 = vadd.f32 %v2563_v41, %v807_v34  ;;  %v2668_v15 = vadd.f32 %v2563_v41, %v935_v35 }
 0x157   : > { %v810_v40 = vpop.f32.mrb[26].mxu0  ;;  %v938_v43 = vpop.f32.mrb[26].mxu1 }
 0x158   : > { %v812_v48 = vpop.f32.mrb[27].mxu0  ;;  %v940_v49 = vpop.f32.mrb[27].mxu1  ;;  %v1025_v9 = vadd.f32 %v1024_v0, %v2655_v60  ;;  %v2665_v12 = vadd.f32 %v2563_v41, %v810_v40  ;;  %3390 = vst [vmem:[#allocation6_spill] sm:$0xff] %v2668_v15  ;;  %v1062_v23 = vadd.f32 %v1061_v18, %v2668_v15  ;;  %v2677_v26 = vadd.f32 %v2563_v41, %v938_v43 }
 0x15a   : > { %v1026_v20 = vadd.f32 %v1025_v9, %v2665_v12  ;;  %3391 = vst [vmem:[#allocation7_spill] sm:$0xff] %v2677_v26  ;;  %v1063_v43 = vadd.f32 %v1062_v23, %v2677_v26 }
 0x15d   : > { %v815_v61 = vpop.f32.mrb[28].mxu0  ;;  %v943_v62 = vpop.f32.mrb[28].mxu1 }
 0x15e   : > { %v817_v1 = vpop.f32.mrb[29].mxu0  ;;  %v945_v2 = vpop.f32.mrb[29].mxu1  ;;  %v2671_v16 = vadd.f32 %v2563_v41, %v815_v61  ;;  %v2684_v35 = vadd.f32 %v2563_v41, %v943_v62 }
 0x15f   : > { %v818_v3 = vpop.f32.mrb[30].mxu0  ;;  %v946_v4 = vpop.f32.mrb[30].mxu1 }
 0x160   : > { %v820_v13 = vpop.f32.mrb[31].mxu0  ;;  %v948_v14 = vpop.f32.mrb[31].mxu1  ;;  %v1027_v27 = vadd.f32 %v1026_v20, %v2671_v16  ;;  %v2681_v28 = vadd.f32 %v2563_v41, %v818_v3  ;;  %3392 = vst [vmem:[#allocation8_spill] sm:$0xff] %v2684_v35  ;;  %v1064_v47 = vadd.f32 %v1063_v43, %v2684_v35  ;;  %v2693_v48 = vadd.f32 %v2563_v41, %v946_v4 }
 0x162   : > { %v1028_v44 = vadd.f32 %v1027_v27, %v2681_v28  ;;  %3393 = vst [vmem:[#allocation9_spill] sm:$0xff] %v2693_v48  ;;  %v1065_v4 = vadd.f32 %v1064_v47, %v2693_v48 }
 0x165   : > { %v823_v21 = vpop.f32.mrb[32].mxu0  ;;  %v951_v22 = vpop.f32.mrb[32].mxu1 }
 0x166   : > { %v825_v29 = vpop.f32.mrb[33].mxu0  ;;  %v953_v30 = vpop.f32.mrb[33].mxu1  ;;  %v2687_v38 = vadd.f32 %v2563_v41, %v823_v21  ;;  %v2700_v62 = vadd.f32 %v2563_v41, %v951_v22 }
 0x167   : > { %v826_v32 = vpop.f32.mrb[34].mxu0  ;;  %v954_v34 = vpop.f32.mrb[34].mxu1 }
 0x168   : > { %v828_v39 = vpop.f32.mrb[35].mxu0  ;;  %v956_v40 = vpop.f32.mrb[35].mxu1  ;;  %v1029_v49 = vadd.f32 %v1028_v44, %v2687_v38  ;;  %v2697_v50 = vadd.f32 %v2563_v41, %v826_v32  ;;  %3395 = vst [vmem:[#allocation11_spill] sm:$0xff] %v2700_v62  ;;  %v1066_v14 = vadd.f32 %v1065_v4, %v2700_v62  ;;  %v2709_v18 = vadd.f32 %v2563_v41, %v954_v34 }
 0x16a   : > { %3394 = vst [vmem:[#allocation10_spill] sm:$0xff] %v2697_v50  ;;  %v1030_v6 = vadd.f32 %v1029_v49, %v2697_v50  ;;  %3397 = vst [vmem:[#allocation13_spill] sm:$0xff] %v2709_v18  ;;  %v1067_v29 = vadd.f32 %v1066_v14, %v2709_v18 }
 0x16d   : > { %v831_v52 = vpop.f32.mrb[36].mxu0  ;;  %v959_v61 = vpop.f32.mrb[36].mxu1 }
 0x16e   : > { %v2703_v63 = vadd.f32 %v2563_v41, %v831_v52  ;;  %v833_v0 = vpop.f32.mrb[37].mxu0  ;;  %v961_v1 = vpop.f32.mrb[37].mxu1  ;;  %v2716_v22 = vadd.f32 %v2563_v41, %v959_v61 }
 0x16f   : > { %v834_v2 = vpop.f32.mrb[38].mxu0  ;;  %v962_v3 = vpop.f32.mrb[38].mxu1 }
 0x170   : > { %3396 = vst [vmem:[#allocation12_spill] sm:$0xff] %v2703_v63  ;;  %v836_v9 = vpop.f32.mrb[39].mxu0  ;;  %v964_v13 = vpop.f32.mrb[39].mxu1  ;;  %v1031_v20 = vadd.f32 %v1030_v6, %v2703_v63  ;;  %v2713_v21 = vadd.f32 %v2563_v41, %v834_v2  ;;  %3399 = vst [vmem:[#allocation15_spill] sm:$0xff] %v2716_v22  ;;  %v1068_v44 = vadd.f32 %v1067_v29, %v2716_v22 }
 0x171   : > { %v2725_v47 = vadd.f32 %v2563_v41, %v962_v3 }
 0x172   : > { %3398 = vst [vmem:[#allocation14_spill] sm:$0xff] %v2713_v21  ;;  %v1032_v30 = vadd.f32 %v1031_v20, %v2713_v21 }
 0x173   : > { %3400 = vst [vmem:[#allocation16_spill] sm:$0xff] %v2725_v47  ;;  %v1069_v4 = vadd.f32 %v1068_v44, %v2725_v47 }
 0x175   : > { %v839_v23 = vpop.f32.mrb[40].mxu0  ;;  %v967_v27 = vpop.f32.mrb[40].mxu1 }
 0x176   : > { %v2721_v32 = vadd.f32 %v2563_v41, %v839_v23  ;;  %v841_v39 = vpop.f32.mrb[41].mxu0  ;;  %v969_v34 = vpop.f32.mrb[41].mxu1  ;;  %v2732_v1 = vadd.f32 %v2563_v41, %v967_v27 }
 0x177   : > { %v842_v40 = vpop.f32.mrb[42].mxu0  ;;  %v970_v43 = vpop.f32.mrb[42].mxu1 }
 0x178   : > { %v1033_v49 = vadd.f32 %v1032_v30, %v2721_v32  ;;  %v2729_v52 = vadd.f32 %v2563_v41, %v842_v40  ;;  %v844_v61 = vpop.f32.mrb[43].mxu0  ;;  %v972_v0 = vpop.f32.mrb[43].mxu1  ;;  %3401 = vst [vmem:[#allocation17_spill] sm:$0xff] %v2732_v1  ;;  %v1070_v13 = vadd.f32 %v1069_v4, %v2732_v1  ;;  %v2738_v3 = vadd.f32 %v2563_v41, %v970_v43 }
 0x17a   : > { %v1034_v2 = vadd.f32 %v1033_v49, %v2729_v52  ;;  %3402 = vst [vmem:[#allocation18_spill] sm:$0xff] %v2738_v3  ;;  %v1071_v43 = vadd.f32 %v1070_v13, %v2738_v3 }
 0x17d   : > { %v847_v6 = vpop.f32.mrb[44].mxu0  ;;  %v975_v9 = vpop.f32.mrb[44].mxu1 }
 0x17e   : > { %v2741_v14 = vadd.f32 %v2563_v41, %v847_v6  ;;  %v849_v20 = vpop.f32.mrb[45].mxu0  ;;  %v977_v23 = vpop.f32.mrb[45].mxu1  ;;  %v2745_v39 = vadd.f32 %v2563_v41, %v975_v9 }
 0x17f   : > { %v850_v29 = vpop.f32.mrb[46].mxu0  ;;  %v978_v30 = vpop.f32.mrb[46].mxu1 }
 0x180   : > { %v1035_v27 = vadd.f32 %v1034_v2, %v2741_v14  ;;  %3403 = vst [vmem:[#allocation19_spill] sm:$0xff] %v2745_v39  ;;  %v2748_v34 = vadd.f32 %v2563_v41, %v850_v29  ;;  %v852_v40 = vpop.f32.mrb[47].mxu0  ;;  %v980_v44 = vpop.f32.mrb[47].mxu1  ;;  %v1072_v61 = vadd.f32 %v1071_v43, %v2745_v39  ;;  %v2754_v0 = vadd.f32 %v2563_v41, %v978_v30 }
 0x182   : > { %v1036_v49 = vadd.f32 %v1035_v27, %v2748_v34  ;;  %3404 = vst [vmem:[#allocation20_spill] sm:$0xff] %v2754_v0  ;;  %v1073_v13 = vadd.f32 %v1072_v61, %v2754_v0 }
 0x185   : > { %v855_v4 = vpop.f32.mrb[48].mxu0  ;;  %v983_v6 = vpop.f32.mrb[48].mxu1 }
 0x186   : > { %v2757_v2 = vadd.f32 %v2563_v41, %v855_v4  ;;  %v2760_v9 = vadd.f32 %v2563_v41, %v983_v6  ;;  %v857_v20 = vpop.f32.mrb[49].mxu0  ;;  %v985_v23 = vpop.f32.mrb[49].mxu1 }
 0x187   : > { %v858_v29 = vpop.f32.mrb[50].mxu0  ;;  %v986_v40 = vpop.f32.mrb[50].mxu1 }
 0x188   : > { %3405 = vst [vmem:[#allocation21_spill] sm:$0xff] %v2760_v9  ;;  %v1037_v27 = vadd.f32 %v1036_v49, %v2757_v2  ;;  %v2765_v44 = vadd.f32 %v2563_v41, %v858_v29  ;;  %v860_v30 = vpop.f32.mrb[51].mxu0  ;;  %v988_v43 = vpop.f32.mrb[51].mxu1  ;;  %v1074_v39 = vadd.f32 %v1073_v13, %v2760_v9  ;;  %v2770_v6 = vadd.f32 %v2563_v41, %v986_v40 }
 0x18a   : > { %v1038_v4 = vadd.f32 %v1037_v27, %v2765_v44  ;;  %v1075_v3 = vadd.f32 %v1074_v39, %v2770_v6 }
 0x18d   : > { %v863_v20 = vpop.f32.mrb[52].mxu0  ;;  %v991_v23 = vpop.f32.mrb[52].mxu1 }
 0x18e   : > { %v2774_v61 = vadd.f32 %v2563_v41, %v863_v20  ;;  %v2777_v49 = vadd.f32 %v2563_v41, %v991_v23  ;;  %v865_v29 = vpop.f32.mrb[53].mxu0  ;;  %v993_v30 = vpop.f32.mrb[53].mxu1 }
 0x18f   : > { %v866_v43 = vpop.f32.mrb[54].mxu0  ;;  %v994_v0 = vpop.f32.mrb[54].mxu1 }
 0x190   : > { %v1039_v13 = vadd.f32 %v1038_v4, %v2774_v61  ;;  %v1076_v27 = vadd.f32 %v1075_v3, %v2777_v49  ;;  %v867_v40 = vadd.f32 %v2563_v41, %v866_v43  ;;  %v2783_v9 = vadd.f32 %v2563_v41, %v994_v0  ;;  %v868_v39 = vpop.f32.mrb[55].mxu0  ;;  %v996_v1 = vpop.f32.mrb[55].mxu1 }
 0x192   : > { %v1040_v20 = vadd.f32 %v1039_v13, %v867_v40  ;;  %v1077_v47 = vadd.f32 %v1076_v27, %v2783_v9 }
 0x195   : > { %v871_v23 = vpop.f32.mrb[56].mxu0  ;;  %v999_v22 = vpop.f32.mrb[56].mxu1 }
 0x196   : > { %v872_v29 = vadd.f32 %v2563_v41, %v871_v23  ;;  %v2788_v30 = vadd.f32 %v2563_v41, %v999_v22  ;;  %v873_v4 = vpop.f32.mrb[57].mxu0  ;;  %v1001_v18 = vpop.f32.mrb[57].mxu1 }
 0x197   : > { %v874_v3 = vpop.f32.mrb[58].mxu0  ;;  %v1002_v62 = vpop.f32.mrb[58].mxu1 }
 0x198   : > { %v1041_v43 = vadd.f32 %v1040_v20, %v872_v29  ;;  %v1078_v0 = vadd.f32 %v1077_v47, %v2788_v30  ;;  %v875_v39 = vadd.f32 %v2563_v41, %v874_v3  ;;  %v2793_v1 = vadd.f32 %v2563_v41, %v1002_v62  ;;  %v876_v13 = vpop.f32.mrb[59].mxu0  ;;  %v1004_v27 = vpop.f32.mrb[59].mxu1 }
 0x19a   : > { %v1042_v48 = vadd.f32 %v1041_v43, %v875_v39  ;;  %v1079_v23 = vadd.f32 %v1078_v0, %v2793_v1 }
 0x19d   : > { %v879_v35 = vpop.f32.mrb[60].mxu0  ;;  %v1007_v22 = vpop.f32.mrb[60].mxu1 }
 0x19e   : > { %v880_v4 = vadd.f32 %v2563_v41, %v879_v35  ;;  %v2798_v18 = vadd.f32 %v2563_v41, %v1007_v22  ;;  %v881_v20 = vpop.f32.mrb[61].mxu0  ;;  %v1009_v26 = vpop.f32.mrb[61].mxu1 }
 0x19f   : > { %v882_v47 = vpop.f32.mrb[62].mxu0  ;;  %v1010_v15 = vpop.f32.mrb[62].mxu1 }
 0x1a0   : > { %v1043_v3 = vadd.f32 %v1042_v48, %v880_v4  ;;  %v1080_v62 = vadd.f32 %v1079_v23, %v2798_v18  ;;  %v883_v13 = vadd.f32 %v2563_v41, %v882_v47  ;;  %v1011_v43 = vadd.f32 %v2563_v41, %v1010_v15  ;;  %v884_v27 = vpop.f32.mrb[63].mxu0  ;;  %v1012_v0 = vpop.f32.mrb[63].mxu1 }
 0x1a2   : > { %v1044_v8 = vadd.f32 %v1043_v3, %v883_v13  ;;  %v1081_v55 = vadd.f32 %v1080_v62, %v1011_v43 }
 0x1a4   : > { %v1045_v21 = vrot.slane %v1044_v8, 4  ;;  %v1082_v63 = vrot.slane %v1081_v55, 4 }
 0x1a6   : > { %v1046_v35 = vadd.f32 %v1045_v21, %v1044_v8  ;;  %v1083_v26 = vadd.f32 %v1082_v63, %v1081_v55 }
 0x1a8   : > { %v1047_v51 = vrot.slane %v1046_v35, 2  ;;  %v1084_v50 = vrot.slane %v1083_v26, 2 }
 0x1aa   : > { %v1048_v22 = vadd.f32 %v1047_v51, %v1046_v35  ;;  %v1085_v23 = vadd.f32 %v1084_v50, %v1083_v26 }
 0x1ac   : > { %v1049_v20 = vrot.slane %v1048_v22, 1 }
 0x1ae   : > { %v1050_v36 = vadd.f32 %v1049_v20, %v1048_v22 }
 0x1b0   : > { %v2803_v48 = vmul.f32 0.00390625, %v1050_v36 }
 0x1b2   : > { %v2807_v47 = vsub.f32 %v2721_v32, %v2803_v48  ;;  %v2811_v41 = vsub.f32 %v2729_v52, %v2803_v48  ;;  %v2815_v8 = vsub.f32 %v2741_v14, %v2803_v48  ;;  %v2819_v51 = vsub.f32 %v2748_v34, %v2803_v48 }
 0x1b3   : > { %v2823_v36 = vsub.f32 %v2757_v2, %v2803_v48  ;;  %v2827_v55 = vsub.f32 %v2765_v44, %v2803_v48  ;;  %v2831_v15 = vsub.f32 %v2774_v61, %v2803_v48  ;;  %v2834_v50 = vsub.f32 %v867_v40, %v2803_v48 }
 0x1b4   : > { %v2837_v63 = vsub.f32 %v872_v29, %v2803_v48  ;;  %v2840_v21 = vsub.f32 %v875_v39, %v2803_v48  ;;  %v2843_v32 = vsub.f32 %v880_v4, %v2803_v48  ;;  %v2846_v52 = vsub.f32 %v883_v13, %v2803_v48 }
 0x1b5   : > { %v2850_v14 = vsub.f32 %v2569_v45, %v2803_v48  ;;  %v2854_v34 = vsub.f32 %v2566_v42, %v2803_v48  ;;  %v1086_v2 = vrot.slane %v1085_v23, 1  ;;  %v2858_v44 = vsub.f32 %v2572_v46, %v2803_v48 }
 0x1b6   : > { %v2866_v29 = vsub.f32 %v2581_v56, %v2803_v48  ;;  %v2870_v42 = vsub.f32 %v2590_v59, %v2803_v48  ;;  %v2876_v4 = vsub.f32 %v2601_v7, %v2803_v48  ;;  %v2882_v56 = vsub.f32 %v2607_v11, %v2803_v48 }
 0x1b7   : > { %v1155_v61 = vmul.f32 %v2850_v14, %v2850_v14  ;;  %v1156_v40 = vmul.f32 %v2854_v34, %v2854_v34  ;;  %v1087_v45 = vadd.f32 %v1086_v2, %v1085_v23  ;;  %v1157_v39 = vmul.f32 %v2858_v44, %v2858_v44 }
 0x1b8   : > { %v1158_v3 = vmul.f32 %v2866_v29, %v2866_v29  ;;  %v1159_v59 = vmul.f32 %v2870_v42, %v2870_v42  ;;  %v2890_v0 = vsub.f32 %v2617_v19, %v2803_v48  ;;  %v2894_v7 = vsub.f32 %v2623_v25, %v2803_v48 }
 0x1b9   : > { %v1219_v46 = vadd.f32 %v1156_v40, %v1155_v61  ;;  %v2884_v13 = vmul.f32 0.00390625, %v1087_v45  ;;  %v1160_v35 = vmul.f32 %v2876_v4, %v2876_v4  ;;  %v1161_v11 = vmul.f32 %v2882_v56, %v2882_v56 }
 0x1ba   : > { %v1162_v61 = vmul.f32 %v2890_v0, %v2890_v0  ;;  %v2949_v45 = vsub.f32 %v2649_v53, %v2803_v48 }
 0x1bb   : > { %v1220_v62 = vadd.f32 %v1219_v46, %v1157_v39  ;;  %v2902_v20 = vsub.f32 %v2770_v6, %v2884_v13  ;;  %v2906_v26 = vsub.f32 %v2777_v49, %v2884_v13  ;;  %v2910_v19 = vsub.f32 %v2783_v9, %v2884_v13 }
 0x1bc   : > { %v2914_v23 = vsub.f32 %v2788_v30, %v2884_v13  ;;  %v2918_v2 = vsub.f32 %v2793_v1, %v2884_v13  ;;  %v2922_v6 = vsub.f32 %v2798_v18, %v2884_v13  ;;  %v2926_v49 = vsub.f32 %v2633_v33, %v2803_v48 }
 0x1bd   : > { %v1221_v27 = vadd.f32 %v1220_v62, %v1158_v3  ;;  %v2929_v9 = vsub.f32 %v1011_v43, %v2884_v13  ;;  %v2935_v40 = vsub.f32 %v2584_v57, %v2884_v13  ;;  %v2939_v1 = vsub.f32 %v2577_v54, %v2884_v13 }
 0x1be   : > { %3406 = vst [vmem:[#allocation22_spill] sm:$0xff] %v2914_v23  ;;  %v2943_v18 = vsub.f32 %v2639_v37, %v2803_v48  ;;  %v1163_v33 = vmul.f32 %v2894_v7, %v2894_v7  ;;  %v1164_v57 = vmul.f32 %v2926_v49, %v2926_v49  ;;  %v2955_v54 = vsub.f32 %v2587_v58, %v2884_v13 }
 0x1bf   : > { %v1222_v22 = vadd.f32 %v1221_v27, %v1159_v59  ;;  %v1187_v37 = vmul.f32 %v2935_v40, %v2935_v40  ;;  %v1188_v46 = vmul.f32 %v2939_v1, %v2939_v1  ;;  %v2963_v3 = vsub.f32 %v2655_v60, %v2803_v48 }
 0x1c0   : > { %v1165_v53 = vmul.f32 %v2943_v18, %v2943_v18  ;;  %v2969_v59 = vsub.f32 %v2597_v5, %v2884_v13  ;;  %v2973_v58 = vsub.f32 %v2665_v12, %v2803_v48  ;;  %v1166_v27 = vmul.f32 %v2949_v45, %v2949_v45 }
 0x1c1   : > { %v1223_v25 = vadd.f32 %v1222_v22, %v1160_v35  ;;  %v2979_v60 = vsub.f32 %v2604_v10, %v2884_v13  ;;  %v1189_v22 = vmul.f32 %v2955_v54, %v2955_v54  ;;  %v2985_v5 = vsub.f32 %v2671_v16, %v2803_v48 }
 0x1c2   : > { %v1167_v12 = vmul.f32 %v2963_v3, %v2963_v3  ;;  %v1190_v10 = vmul.f32 %v2969_v59, %v2969_v59  ;;  %v1168_v16 = vmul.f32 %v2973_v58, %v2973_v58 }
 0x1c3   : > { %v1224_v30 = vadd.f32 %v1223_v25, %v1161_v11  ;;  %v1256_v11 = vadd.f32 %v1188_v46, %v1187_v37  ;;  %v3009_v37 = vsub.f32 %v2687_v38, %v2803_v48 }
 0x1c5   : > { %v1225_v43 = vadd.f32 %v1224_v30, %v1162_v61  ;;  %v2991_v61 = vsub.f32 %v2613_v17, %v2884_v13  ;;  %v1257_v30 = vadd.f32 %v1256_v11, %v1189_v22  ;;  %v1191_v17 = vmul.f32 %v2979_v60, %v2979_v60  ;;  %v3411_v11 = vld [vmem:[#allocation2_spill] sm:$0xff] }
 0x1c7   : > { %v1226_v39 = vadd.f32 %v1225_v43, %v1163_v33  ;;  %3407 = vst [vmem:[#allocation23_spill] sm:$0xff] %v2991_v61  ;;  %v2997_v33 = vsub.f32 %v2681_v28, %v2803_v48  ;;  %v1169_v28 = vmul.f32 %v2985_v5, %v2985_v5 }
 0x1c9   : > { %v1227_v62 = vadd.f32 %v1226_v39, %v1164_v57  ;;  %v3003_v57 = vsub.f32 %v2620_v24, %v2884_v13  ;;  %v1258_v39 = vadd.f32 %v1257_v30, %v1190_v10  ;;  %v1192_v24 = vmul.f32 %v2991_v61, %v2991_v61  ;;  %v3413_v10 = vld [vmem:[#allocation12_spill] sm:$0xff] }
 0x1ca   : > { %v1170_v38 = vmul.f32 %v2997_v33, %v2997_v33  ;;  %v3033_v30 = vsub.f32 %v3413_v10, %v2803_v48  ;;  %v3417_v10 = vld [vmem:[#allocation4_spill] sm:$0xff] }
 0x1cb   : > { %v1228_v35 = vadd.f32 %v1227_v62, %v1165_v53  ;;  %3408 = vst [vmem:[#allocation24_spill] sm:$0xff] %v3003_v57  ;;  %v3015_v53 = vsub.f32 %v2629_v31, %v2884_v13  ;;  %v1259_v62 = vadd.f32 %v1258_v39, %v1191_v17  ;;  %v1193_v31 = vmul.f32 %v3003_v57, %v3003_v57  ;;  %v3414_v17 = vld [vmem:[#allocation3_spill] sm:$0xff] }
 0x1cc   : > { %v3039_v39 = vsub.f32 %v3414_v17, %v2884_v13  ;;  %v3051_v57 = vsub.f32 %v3417_v10, %v2884_v13  ;;  %v1173_v17 = vmul.f32 %v3033_v30, %v3033_v30 }
 0x1cd   : > { %v1229_v25 = vadd.f32 %v1228_v35, %v1166_v27  ;;  %3409 = vst [vmem:[#allocation25_spill] sm:$0xff] %v3015_v53  ;;  %v3410_v27 = vld [vmem:[#allocation10_spill] sm:$0xff] }
 0x1ce   : > { %v3021_v35 = vsub.f32 %v3410_v27, %v2803_v48  ;;  %3415 = vst [vmem:[#allocation2_spill] sm:$0xff] %v3039_v39  ;;  %v3416_v27 = vld [vmem:[#allocation14_spill] sm:$0xff]  ;;  %3418 = vst [vmem:[#allocation12_spill] sm:$0xff] %v3051_v57 }
 0x1cf   : > { %v1230_v43 = vadd.f32 %v1229_v25, %v1167_v12  ;;  %v3027_v12 = vsub.f32 %v3411_v11, %v2884_v13  ;;  %v1260_v25 = vadd.f32 %v1259_v62, %v1192_v24  ;;  %v3045_v11 = vsub.f32 %v3416_v27, %v2803_v48 }
 0x1d0   : > { %v1172_v24 = vmul.f32 %v3021_v35, %v3021_v35  ;;  %v1196_v27 = vmul.f32 %v3039_v39, %v3039_v39 }
 0x1d1   : > { %v1231_v46 = vadd.f32 %v1230_v43, %v1168_v16  ;;  %3412 = vst [vmem:[#allocation10_spill] sm:$0xff] %v3027_v12  ;;  %v1171_v16 = vmul.f32 %v3009_v37, %v3009_v37 }
 0x1d3   : > { %v1232_v22 = vadd.f32 %v1231_v46, %v1169_v28  ;;  %v1194_v28 = vmul.f32 %v3015_v53, %v3015_v53  ;;  %v1261_v46 = vadd.f32 %v1260_v25, %v1193_v31  ;;  %v3419_v25 = vld [vmem:[#allocation5_spill] sm:$0xff]  ;;  %v3421_v53 = vld [vmem:[#allocation6_spill] sm:$0xff] }
 0x1d4   : > { %v3059_v48 = vsub.f32 %v3419_v25, %v2884_v13  ;;  %v3423_v25 = vld [vmem:[#allocation7_spill] sm:$0xff] }
 0x1d5   : > { %v1233_v43 = vadd.f32 %v1232_v22, %v1170_v38  ;;  %v1195_v38 = vmul.f32 %v3027_v12, %v3027_v12  ;;  %v1262_v22 = vadd.f32 %v1261_v46, %v1194_v28  ;;  %v3067_v12 = vsub.f32 %v3421_v53, %v2884_v13 }
 0x1d6   : > { %3420 = vst [vmem:[#allocation3_spill] sm:$0xff] %v3059_v48  ;;  %v1197_v28 = vmul.f32 %v3051_v57, %v3051_v57  ;;  %v3075_v39 = vsub.f32 %v3423_v25, %v2884_v13  ;;  %v1176_v53 = vmul.f32 %v2811_v41, %v2811_v41  ;;  %v3427_v25 = vld [vmem:[#allocation9_spill] sm:$0xff] }
 0x1d7   : > { %v1234_v62 = vadd.f32 %v1233_v43, %v1171_v16  ;;  %v1263_v16 = vadd.f32 %v1262_v22, %v1195_v38  ;;  %v1174_v43 = vmul.f32 %v3045_v11, %v3045_v11  ;;  %3422 = vst [vmem:[#allocation14_spill] sm:$0xff] %v3067_v12  ;;  %v1198_v38 = vmul.f32 %v3059_v48, %v3059_v48 }
 0x1d8   : > { %3424 = vst [vmem:[#allocation4_spill] sm:$0xff] %v3075_v39  ;;  %v3091_v48 = vsub.f32 %v3427_v25, %v2884_v13  ;;  %v3431_v25 = vld [vmem:[#allocation13_spill] sm:$0xff] }
 0x1d9   : > { %v1235_v31 = vadd.f32 %v1234_v62, %v1172_v24  ;;  %v1264_v46 = vadd.f32 %v1263_v16, %v1196_v27  ;;  %v1175_v24 = vmul.f32 %v2807_v47, %v2807_v47  ;;  %v1199_v27 = vmul.f32 %v3067_v12, %v3067_v12 }
 0x1da   : > { %3428 = vst [vmem:[#allocation6_spill] sm:$0xff] %v3091_v48 }
 0x1db   : > { %v1236_v10 = vadd.f32 %v1235_v31, %v1173_v17  ;;  %v1265_v22 = vadd.f32 %v1264_v46, %v1197_v28  ;;  %v3425_v31 = vld [vmem:[#allocation8_spill] sm:$0xff]  ;;  %v1200_v28 = vmul.f32 %v3075_v39, %v3075_v39  ;;  %v3107_v39 = vsub.f32 %v3431_v25, %v2884_v13 }
 0x1dc   : > { %v3083_v57 = vsub.f32 %v3425_v31, %v2884_v13  ;;  %v3429_v31 = vld [vmem:[#allocation11_spill] sm:$0xff]  ;;  %v3435_v25 = vld [vmem:[#allocation16_spill] sm:$0xff] }
 0x1dd   : > { %v1237_v62 = vadd.f32 %v1236_v10, %v1174_v43  ;;  %v1266_v16 = vadd.f32 %v1265_v22, %v1198_v38  ;;  %v1177_v43 = vmul.f32 %v2815_v8, %v2815_v8  ;;  %v3099_v12 = vsub.f32 %v3429_v31, %v2884_v13  ;;  %3432 = vst [vmem:[#allocation8_spill] sm:$0xff] %v3107_v39  ;;  %v3433_v31 = vld [vmem:[#allocation15_spill] sm:$0xff] }
 0x1de   : > { %3426 = vst [vmem:[#allocation5_spill] sm:$0xff] %v3083_v57  ;;  %v1201_v38 = vmul.f32 %v3083_v57, %v3083_v57  ;;  %v3115_v57 = vsub.f32 %v3433_v31, %v2884_v13  ;;  %v3437_v31 = vld [vmem:[#allocation17_spill] sm:$0xff] }
 0x1df   : > { %v1238_v17 = vadd.f32 %v1237_v62, %v1175_v24  ;;  %v1267_v46 = vadd.f32 %v1266_v16, %v1199_v27  ;;  %v1178_v24 = vmul.f32 %v2819_v51, %v2819_v51  ;;  %3430 = vst [vmem:[#allocation7_spill] sm:$0xff] %v3099_v12  ;;  %v1202_v27 = vmul.f32 %v3091_v48, %v3091_v48 }
 0x1e0   : > { %3434 = vst [vmem:[#allocation9_spill] sm:$0xff] %v3115_v57  ;;  %v3123_v48 = vsub.f32 %v3435_v25, %v2884_v13  ;;  %v3439_v25 = vld [vmem:[#allocation18_spill] sm:$0xff] }
 0x1e1   : > { %v1239_v10 = vadd.f32 %v1238_v17, %v1176_v53  ;;  %v1268_v22 = vadd.f32 %v1267_v46, %v1200_v28  ;;  %v1179_v53 = vmul.f32 %v2823_v36, %v2823_v36  ;;  %v1203_v28 = vmul.f32 %v3099_v12, %v3099_v12 }
 0x1e2   : > { %3436 = vst [vmem:[#allocation11_spill] sm:$0xff] %v3123_v48  ;;  %v3131_v12 = vsub.f32 %v3437_v31, %v2884_v13  ;;  %v3441_v31 = vld [vmem:[#allocation19_spill] sm:$0xff] }
 0x1e3   : > { %v1240_v62 = vadd.f32 %v1239_v10, %v1177_v43  ;;  %v1269_v16 = vadd.f32 %v1268_v22, %v1201_v38  ;;  %v1180_v43 = vmul.f32 %v2827_v55, %v2827_v55  ;;  %v1204_v38 = vmul.f32 %v3107_v39, %v3107_v39 }
 0x1e4   : > { %3438 = vst [vmem:[#allocation13_spill] sm:$0xff] %v3131_v12  ;;  %v3139_v39 = vsub.f32 %v3439_v25, %v2884_v13  ;;  %v3442_v25 = vld [vmem:[#allocation20_spill] sm:$0xff] }
 0x1e5   : > { %v1241_v17 = vadd.f32 %v1240_v62, %v1178_v24  ;;  %v1270_v46 = vadd.f32 %v1269_v16, %v1202_v27  ;;  %v1181_v24 = vmul.f32 %v2831_v15, %v2831_v15  ;;  %v1205_v27 = vmul.f32 %v3115_v57, %v3115_v57 }
 0x1e6   : > { %3440 = vst [vmem:[#allocation15_spill] sm:$0xff] %v3139_v39  ;;  %v3147_v57 = vsub.f32 %v3441_v31, %v2884_v13  ;;  %v3443_v31 = vld [vmem:[#allocation21_spill] sm:$0xff] }
 0x1e7   : > { %v1242_v10 = vadd.f32 %v1241_v17, %v1179_v53  ;;  %v1271_v22 = vadd.f32 %v1270_v46, %v1203_v28  ;;  %v1182_v53 = vmul.f32 %v2834_v50, %v2834_v50  ;;  %v1206_v28 = vmul.f32 %v3123_v48, %v3123_v48 }
 0x1e8   : > { %v3155_v48 = vsub.f32 %v3442_v25, %v2884_v13 }
 0x1e9   : > { %v1243_v62 = vadd.f32 %v1242_v10, %v1180_v43  ;;  %v1272_v16 = vadd.f32 %v1271_v22, %v1204_v38  ;;  %v1183_v43 = vmul.f32 %v2837_v63, %v2837_v63  ;;  %v1207_v38 = vmul.f32 %v3131_v12, %v3131_v12 }
 0x1ea   : > { %v3163_v12 = vsub.f32 %v3443_v31, %v2884_v13  ;;  %v1213_v31 = vmul.f32 %v2906_v26, %v2906_v26 }
 0x1eb   : > { %v1244_v17 = vadd.f32 %v1243_v62, %v1181_v24  ;;  %v1273_v46 = vadd.f32 %v1272_v16, %v1205_v27  ;;  %v1184_v24 = vmul.f32 %v2840_v21, %v2840_v21  ;;  %v1208_v27 = vmul.f32 %v3139_v39, %v3139_v39 }
 0x1ed   : > { %v1245_v10 = vadd.f32 %v1244_v17, %v1182_v53  ;;  %v1274_v22 = vadd.f32 %v1273_v46, %v1206_v28  ;;  %v1185_v53 = vmul.f32 %v2843_v32, %v2843_v32  ;;  %v1209_v28 = vmul.f32 %v3147_v57, %v3147_v57 }
 0x1ef   : > { %v1246_v62 = vadd.f32 %v1245_v10, %v1183_v43  ;;  %v1275_v16 = vadd.f32 %v1274_v22, %v1207_v38  ;;  %v1186_v43 = vmul.f32 %v2846_v52, %v2846_v52  ;;  %v1211_v38 = vmul.f32 %v3163_v12, %v3163_v12 }
 0x1f1   : > { %v1247_v17 = vadd.f32 %v1246_v62, %v1184_v24  ;;  %v1276_v46 = vadd.f32 %v1275_v16, %v1208_v27  ;;  %v1210_v62 = vmul.f32 %v3155_v48, %v3155_v48 }
 0x1f3   : > { %v1248_v10 = vadd.f32 %v1247_v17, %v1185_v53  ;;  %v1277_v25 = vadd.f32 %v1276_v46, %v1209_v28  ;;  %v1212_v53 = vmul.f32 %v2902_v20, %v2902_v20  ;;  %v1215_v46 = vmul.f32 %v2914_v23, %v2914_v23 }
 0x1f5   : > { %v1249_v24 = vadd.f32 %v1248_v10, %v1186_v43  ;;  %v1278_v22 = vadd.f32 %v1277_v25, %v1210_v62  ;;  %v1214_v43 = vmul.f32 %v2910_v19, %v2910_v19 }
 0x1f7   : > { %v1250_v61 = vrot.slane %v1249_v24, 4  ;;  %v1279_v13 = vadd.f32 %v1278_v22, %v1211_v38  ;;  %v1217_v22 = vmul.f32 %v2922_v6, %v2922_v6 }
 0x1f9   : > { %v1251_v39 = vadd.f32 %v1250_v61, %v1249_v24  ;;  %v1280_v27 = vadd.f32 %v1279_v13, %v1212_v53  ;;  %v1216_v24 = vmul.f32 %v2918_v2, %v2918_v2  ;;  %v1218_v13 = vmul.f32 %v2929_v9, %v2929_v9 }
 0x1fb   : > { %v1252_v17 = vrot.slane %v1251_v39, 2  ;;  %v1281_v10 = vadd.f32 %v1280_v27, %v1213_v31 }
 0x1fd   : > { %v1253_v16 = vadd.f32 %v1252_v17, %v1251_v39  ;;  %v1282_v62 = vadd.f32 %v1281_v10, %v1214_v43 }
 0x1ff   : > { %v1254_v28 = vrot.slane %v1253_v16, 1  ;;  %v1283_v25 = vadd.f32 %v1282_v62, %v1215_v46 }
 0x201   : > { %v1255_v61 = vadd.f32 %v1254_v28, %v1253_v16  ;;  %v1284_v53 = vadd.f32 %v1283_v25, %v1216_v24 }
 0x203   : > { %v1293_v38 = vmul.f32 0.00390625, %v1255_v61  ;;  %v1285_v17 = vadd.f32 %v1284_v53, %v1217_v22 }
 0x205   : > { %v1295_v39 = vadd.f32 1e-05, %v1293_v38  ;;  %v1286_v31 = vadd.f32 %v1285_v17, %v1218_v13 }
 0x207   : > { %2392 = vrsqrt.f32 %v1295_v39  ;;  %v1287_v27 = vrot.slane %v1286_v31, 4 }
 0x209   : > { %v1288_v23 = vadd.f32 %v1287_v27, %v1286_v31 }
 0x20b   : > { %v1289_v43 = vrot.slane %v1288_v23, 2 }
 0x20d   : > { %v3185_v16 = vadd.f32 %v1289_v43, %v1288_v23 }
 0x211   : > { %v2393_v10 = vpop.eup %2392 }
 0x212   : > { %v3189_v46 = vmul.f32 %v2393_v10, %v2850_v14  ;;  %v3192_v62 = vmul.f32 %v2393_v10, %v2854_v34  ;;  %v3195_v61 = vmul.f32 %v2393_v10, %v2858_v44  ;;  %v3198_v24 = vmul.f32 %v2393_v10, %v2866_v29 }
 0x213   : > { %v3201_v25 = vmul.f32 %v2393_v10, %v2870_v42  ;;  %v3204_v23 = vmul.f32 %v2393_v10, %v2876_v4  ;;  %v3207_v38 = vmul.f32 %v2393_v10, %v2882_v56  ;;  %v3210_v14 = vmul.f32 %v2393_v10, %v2890_v0 }
 0x214   : > { %v3213_v34 = vmul.f32 %v2393_v10, %v2894_v7  ;;  %v1308_v44 = vmul.f32 %v2393_v10, %v2926_v49  ;;  %v1309_v29 = vmul.f32 %v2393_v10, %v2943_v18  ;;  %v1310_v22 = vmul.f32 %v2393_v10, %v2949_v45 }
 0x215   : > { %v1311_v42 = vmul.f32 %v2393_v10, %v2963_v3  ;;  %v1312_v4 = vmul.f32 %v2393_v10, %v2973_v58  ;;  %v1313_v53 = vmul.f32 %v2393_v10, %v2985_v5  ;;  %v1314_v56 = vmul.f32 %v2393_v10, %v2997_v33 }
 0x216   : > { %v3223_v0 = vmul.f32 %v2393_v10, %v3009_v37  ;;  %v1316_v7 = vmul.f32 %v2393_v10, %v3021_v35  ;;  %v1317_v39 = vmul.f32 %v2393_v10, %v3033_v30  ;;  %v1318_v49 = vmul.f32 %v2393_v10, %v3045_v11 }
 0x217   : > { %v1319_v18 = vmul.f32 %v2393_v10, %v2807_v47  ;;  %v1320_v45 = vmul.f32 %v2393_v10, %v2811_v41  ;;  %v1321_v3 = vmul.f32 %v2393_v10, %v2815_v8  ;;  %v1322_v58 = vmul.f32 %v2393_v10, %v2819_v51 }
 0x218   : > { %v3233_v5 = vmul.f32 %v2393_v10, %v2823_v36  ;;  %v1324_v33 = vmul.f32 %v2393_v10, %v2827_v55  ;;  %v1325_v37 = vmul.f32 %v2393_v10, %v2831_v15  ;;  %v1326_v35 = vmul.f32 %v2393_v10, %v2834_v50 }
 0x219   : > { %v1327_v30 = vmul.f32 %v2393_v10, %v2837_v63  ;;  %v1328_v11 = vmul.f32 %v2393_v10, %v2840_v21  ;;  %v1329_v47 = vmul.f32 %v2393_v10, %v2843_v32  ;;  %v1330_v41 = vmul.f32 %v2393_v10, %v2846_v52 }
 0x21a   : > { %v1363_v8 = vmax.f32 %v3189_v46, 0.0  ;;  %v1364_v51 = vmax.f32 %v3192_v62, 0.0  ;;  %v1365_v36 = vmax.f32 %v3195_v61, 0.0  ;;  %v1366_v55 = vmax.f32 %v3198_v24, 0.0 }
 0x21b   : > { %v1367_v15 = vmax.f32 %v3201_v25, 0.0  ;;  %v1368_v50 = vmax.f32 %v3204_v23, 0.0  ;;  %v1369_v63 = vmax.f32 %v3207_v38, 0.0  ;;  %v1370_v21 = vmax.f32 %v3210_v14, 0.0 }
 0x21c   : > { %v1371_v32 = vmax.f32 %v3213_v34, 0.0  ;;  %v1372_v52 = vmax.f32 %v1308_v44, 0.0  ;;  %v1373_v13 = vmax.f32 %v1309_v29, 0.0  ;;  %v1374_v17 = vmax.f32 %v1310_v22, 0.0 }
 0x21d   : > { %v1375_v31 = vmax.f32 %v1311_v42, 0.0  ;;  %v1376_v27 = vmax.f32 %v1312_v4, 0.0  ;;  %v1377_v43 = vmax.f32 %v1313_v53, 0.0  ;;  %v1378_v10 = vmax.f32 %v1314_v56, 0.0 }
 0x21e   : > { %v1379_v46 = vmax.f32 %v3223_v0, 0.0  ;;  %v1380_v62 = vmax.f32 %v1316_v7, 0.0  ;;  %v1381_v61 = vmax.f32 %v1317_v39, 0.0  ;;  %v1382_v24 = vmax.f32 %v1318_v49, 0.0 }
 0x21f   : > { %v1383_v25 = vmax.f32 %v1319_v18, 0.0  ;;  %v1384_v23 = vmax.f32 %v1320_v45, 0.0  ;;  %v1385_v38 = vmax.f32 %v1321_v3, 0.0  ;;  %v1386_v28 = vmax.f32 %v1322_v58, 0.0 }
 0x220   : > { %v1387_v14 = vmax.f32 %v3233_v5, 0.0  ;;  %v1388_v34 = vmax.f32 %v1324_v33, 0.0  ;;  %v1389_v44 = vmax.f32 %v1325_v37, 0.0  ;;  %v1390_v29 = vmax.f32 %v1326_v35, 0.0 }
 0x221   : > { %v1391_v22 = vmax.f32 %v1327_v30, 0.0  ;;  %v1392_v42 = vmax.f32 %v1328_v11, 0.0  ;;  %v1393_v4 = vmax.f32 %v1329_v47, 0.0  ;;  %v1394_v53 = vmax.f32 %v1330_v41, 0.0 }
 0x222   : > { %v2051_v56 = vpack.c.bf16 %v1364_v51, %v1363_v8  ;;  %v2056_v0 = vpack.c.bf16 %v1366_v55, %v1365_v36  ;;  %v2061_v7 = vpack.c.bf16 %v1368_v50, %v1367_v15  ;;  %v2066_v39 = vpack.c.bf16 %v1370_v21, %v1369_v63  ;;  %v3445_v21 = vld [vmem:[#allocation23_spill] sm:$0xff] }
 0x223   : > { %v2071_v49 = vpack.c.bf16 %v1372_v52, %v1371_v32  ;;  %v2076_v18 = vpack.c.bf16 %v1374_v17, %v1373_v13  ;;  %v2081_v45 = vpack.c.bf16 %v1376_v27, %v1375_v31  ;;  %v2086_v3 = vpack.c.bf16 %v1378_v10, %v1377_v43  ;;  %v3446_v52 = vld [vmem:[#allocation24_spill] sm:$0xff]  ;;  %v3447_v17 = vld [vmem:[#allocation25_spill] sm:$0xff]  ;;  %v3449_v43 = vld [vmem:[#allocation2_spill] sm:$0xff] }
 0x224   : > { %2052 = vst [vmem:[%s3257_s28] sm:$0xff] %v2051_v56   ;;  %2208 = vst [vmem:[%s3257_s28 + $0x8] sm:$0xff] %v2056_v0   ;;  %v2091_v58 = vpack.c.bf16 %v1380_v62, %v1379_v46  ;;  %v2096_v5 = vpack.c.bf16 %v1382_v24, %v1381_v61  ;;  %v2101_v33 = vpack.c.bf16 %v1384_v23, %v1383_v25  ;;  %v3444_v41 = vrot.slane %v3185_v16, 1  ;;  %v3450_v10 = vld [vmem:[#allocation12_spill] sm:$0xff]  ;;  %v3452_v61 = vld [vmem:[#allocation14_spill] sm:$0xff] }
 0x225   : > { %2209 = vst [vmem:[%s3257_s28 + $0x10] sm:$0xff] %v2061_v7   ;;  %2210 = vst [vmem:[%s3257_s28 + $0x18] sm:$0xff] %v2066_v39   ;;  %v2106_v37 = vpack.c.bf16 %v1386_v28, %v1385_v38  ;;  %v2111_v35 = vpack.c.bf16 %v1388_v34, %v1387_v14  ;;  %v2116_v30 = vpack.c.bf16 %v1390_v29, %v1389_v44  ;;  %v3453_v24 = vld [vmem:[#allocation4_spill] sm:$0xff]  ;;  %v3455_v38 = vld [vmem:[#allocation6_spill] sm:$0xff] }
 0x226   : > { %2211 = vst [vmem:[%s3257_s28 + $0x20] sm:$0xff] %v2071_v49   ;;  %2212 = vst [vmem:[%s3257_s28 + $0x28] sm:$0xff] %v2076_v18   ;;  %v2121_v11 = vpack.c.bf16 %v1392_v42, %v1391_v22  ;;  %v2126_v47 = vpack.c.bf16 %v1394_v53, %v1393_v4  ;;  %v1292_v8 = vadd.f32 %v3444_v41, %v3185_v16  ;;  %v3456_v34 = vld [vmem:[#allocation7_spill] sm:$0xff]  ;;  %v3457_v29 = vld [vmem:[#allocation8_spill] sm:$0xff] }
 0x227   : > { %2213 = vst [vmem:[%s3257_s28 + $0x30] sm:$0xff] %v2081_v45   ;;  %2214 = vst [vmem:[%s3257_s28 + $0x38] sm:$0xff] %v2086_v3   ;;  %v3458_v42 = vld [vmem:[#allocation9_spill] sm:$0xff]  ;;  %v3459_v53 = vld [vmem:[#allocation11_spill] sm:$0xff] }
 0x228   : > { %2215 = vst [vmem:[%s3257_s28 + $0x40] sm:$0xff] %v2091_v58   ;;  %2216 = vst [vmem:[%s3257_s28 + $0x48] sm:$0xff] %v2096_v5   ;;  %v1294_v28 = vmul.f32 0.00390625, %v1292_v8  ;;  %v3460_v0 = vld [vmem:[#allocation13_spill] sm:$0xff]  ;;  %v3461_v39 = vld [vmem:[#allocation15_spill] sm:$0xff] }
 0x229   : > { %2217 = vst [vmem:[%s3257_s28 + $0x50] sm:$0xff] %v2101_v33   ;;  %2218 = vst [vmem:[%s3257_s28 + $0x58] sm:$0xff] %v2106_v37   ;;  %v3462_v37 = vld [vmem:[#allocation22_spill] sm:$0xff] }
 0x22a   : > { %2219 = vst [vmem:[%s3257_s28 + $0x60] sm:$0xff] %v2111_v35   ;;  %2220 = vst [vmem:[%s3257_s28 + $0x68] sm:$0xff] %v2116_v30   ;;  %v1296_v51 = vadd.f32 1e-05, %v1294_v28 }
 0x22b   : > { %2221 = vst [vmem:[%s3257_s28 + $0x70] sm:$0xff] %v2121_v11   ;;  %2222 = vst [vmem:[%s3257_s28 + $0x78] sm:$0xff] %v2126_v47  }
 0x22c   : > { %2394 = vrsqrt.f32 %v1296_v51 }
 0x236   : > { %v2395_v36 = vpop.eup %2394 }
 0x237   : > { %v3279_v55 = vmul.f32 %v2395_v36, %v2935_v40  ;;  %v3282_v15 = vmul.f32 %v2395_v36, %v2939_v1  ;;  %v3285_v50 = vmul.f32 %v2395_v36, %v2955_v54  ;;  %v3288_v63 = vmul.f32 %v2395_v36, %v2969_v59  ;;  %v3448_v40 = vld [vmem:[#allocation10_spill] sm:$0xff]  ;;  %v3451_v54 = vld [vmem:[#allocation3_spill] sm:$0xff] }
 0x238   : > { %v3291_v16 = vmul.f32 %v2395_v36, %v2979_v60  ;;  %v1336_v32 = vmul.f32 %v2395_v36, %v3445_v21  ;;  %v1337_v13 = vmul.f32 %v2395_v36, %v3446_v52  ;;  %v1338_v31 = vmul.f32 %v2395_v36, %v3447_v17  ;;  %v3454_v60 = vld [vmem:[#allocation5_spill] sm:$0xff] }
 0x239   : > { %v1339_v27 = vmul.f32 %v2395_v36, %v3448_v40  ;;  %v1340_v1 = vmul.f32 %v2395_v36, %v3449_v43  ;;  %v1341_v46 = vmul.f32 %v2395_v36, %v3450_v10  ;;  %v1342_v62 = vmul.f32 %v2395_v36, %v3451_v54 }
 0x23a   : > { %v1343_v59 = vmul.f32 %v2395_v36, %v3452_v61  ;;  %v1344_v25 = vmul.f32 %v2395_v36, %v3453_v24  ;;  %v1345_v23 = vmul.f32 %v2395_v36, %v3454_v60  ;;  %v1346_v14 = vmul.f32 %v2395_v36, %v3455_v38 }
 0x23b   : > { %v1347_v44 = vmul.f32 %v2395_v36, %v3456_v34  ;;  %v1348_v22 = vmul.f32 %v2395_v36, %v3457_v29  ;;  %v1349_v4 = vmul.f32 %v2395_v36, %v3458_v42  ;;  %v1350_v56 = vmul.f32 %v2395_v36, %v3459_v53 }
 0x23c   : > { %v1351_v7 = vmul.f32 %v2395_v36, %v3460_v0  ;;  %v1352_v49 = vmul.f32 %v2395_v36, %v3461_v39  ;;  %v1353_v18 = vmul.f32 %v2395_v36, %v3147_v57  ;;  %v1354_v45 = vmul.f32 %v2395_v36, %v3155_v48 }
 0x23d   : > { %v1355_v3 = vmul.f32 %v2395_v36, %v3163_v12  ;;  %v1356_v58 = vmul.f32 %v2395_v36, %v2902_v20  ;;  %v1357_v5 = vmul.f32 %v2395_v36, %v2906_v26  ;;  %v1358_v33 = vmul.f32 %v2395_v36, %v2910_v19 }
 0x23e   : > { %v1359_v35 = vmul.f32 %v2395_v36, %v3462_v37  ;;  %v1360_v30 = vmul.f32 %v2395_v36, %v2918_v2  ;;  %v1361_v11 = vmul.f32 %v2395_v36, %v2922_v6  ;;  %v1362_v47 = vmul.f32 %v2395_v36, %v2929_v9 }
 0x23f   : > { %v1395_v57 = vmax.f32 %v3279_v55, 0.0  ;;  %v1396_v48 = vmax.f32 %v3282_v15, 0.0  ;;  %v1397_v12 = vmax.f32 %v3285_v50, 0.0  ;;  %v1398_v20 = vmax.f32 %v3288_v63, 0.0 }
 0x240   : > { %v1399_v26 = vmax.f32 %v3291_v16, 0.0  ;;  %v1400_v41 = vmax.f32 %v1336_v32, 0.0  ;;  %v1401_v19 = vmax.f32 %v1337_v13, 0.0  ;;  %v1402_v8 = vmax.f32 %v1338_v31, 0.0 }
 0x241   : > { %v1403_v28 = vmax.f32 %v1339_v27, 0.0  ;;  %v1404_v51 = vmax.f32 %v1340_v1, 0.0  ;;  %v1405_v2 = vmax.f32 %v1341_v46, 0.0  ;;  %v1406_v21 = vmax.f32 %v1342_v62, 0.0 }
 0x242   : > { %v1407_v6 = vmax.f32 %v1343_v59, 0.0  ;;  %v1408_v52 = vmax.f32 %v1344_v25, 0.0  ;;  %v1409_v9 = vmax.f32 %v1345_v23, 0.0  ;;  %v1410_v36 = vmax.f32 %v1346_v14, 0.0 }
 0x243   : > { %v1411_v55 = vmax.f32 %v1347_v44, 0.0  ;;  %v1412_v17 = vmax.f32 %v1348_v22, 0.0  ;;  %v1413_v15 = vmax.f32 %v1349_v4, 0.0  ;;  %v1414_v40 = vmax.f32 %v1350_v56, 0.0 }
 0x244   : > { %v1415_v50 = vmax.f32 %v1351_v7, 0.0  ;;  %v1416_v43 = vmax.f32 %v1352_v49, 0.0  ;;  %v1417_v63 = vmax.f32 %v1353_v18, 0.0  ;;  %v1418_v10 = vmax.f32 %v1354_v45, 0.0 }
 0x245   : > { %v1419_v16 = vmax.f32 %v1355_v3, 0.0  ;;  %v1420_v32 = vmax.f32 %v1356_v58, 0.0  ;;  %v1421_v13 = vmax.f32 %v1357_v5, 0.0  ;;  %v1422_v31 = vmax.f32 %v1358_v33, 0.0 }
 0x246   : > { %v1423_v27 = vmax.f32 %v1359_v35, 0.0  ;;  %v1424_v1 = vmax.f32 %v1360_v30, 0.0  ;;  %v1425_v46 = vmax.f32 %v1361_v11, 0.0  ;;  %v1426_v54 = vmax.f32 %v1362_v47, 0.0 }
 0x247   : > { %v2131_v62 = vpack.c.bf16 %v1396_v48, %v1395_v57  ;;  %v2136_v61 = vpack.c.bf16 %v1398_v20, %v1397_v12  ;;  %v2141_v59 = vpack.c.bf16 %v1400_v41, %v1399_v26  ;;  %v2146_v24 = vpack.c.bf16 %v1402_v8, %v1401_v19 }
 0x248   : > { %v2151_v25 = vpack.c.bf16 %v1404_v51, %v1403_v28  ;;  %v2156_v60 = vpack.c.bf16 %v1406_v21, %v1405_v2  ;;  %v2161_v23 = vpack.c.bf16 %v1408_v52, %v1407_v6  ;;  %v2166_v38 = vpack.c.bf16 %v1410_v36, %v1409_v9 }
 0x249   : > { %2223 = vst [vmem:[%s3257_s28 + $0x80] sm:$0xff] %v2131_v62   ;;  %2224 = vst [vmem:[%s3257_s28 + $0x88] sm:$0xff] %v2136_v61   ;;  %v2171_v14 = vpack.c.bf16 %v1412_v17, %v1411_v55  ;;  %v2176_v34 = vpack.c.bf16 %v1414_v40, %v1413_v15  ;;  %v2181_v44 = vpack.c.bf16 %v1416_v43, %v1415_v50 }
 0x24a   : > { %2225 = vst [vmem:[%s3257_s28 + $0x90] sm:$0xff] %v2141_v59   ;;  %2226 = vst [vmem:[%s3257_s28 + $0x98] sm:$0xff] %v2146_v24   ;;  %v2186_v29 = vpack.c.bf16 %v1418_v10, %v1417_v63  ;;  %v2191_v22 = vpack.c.bf16 %v1420_v32, %v1419_v16  ;;  %v2196_v42 = vpack.c.bf16 %v1422_v31, %v1421_v13 }
 0x24b   : > { %2227 = vst [vmem:[%s3257_s28 + $0xa0] sm:$0xff] %v2151_v25   ;;  %2228 = vst [vmem:[%s3257_s28 + $0xa8] sm:$0xff] %v2156_v60   ;;  %v2201_v4 = vpack.c.bf16 %v1424_v1, %v1423_v27  ;;  %v2206_v53 = vpack.c.bf16 %v1426_v54, %v1425_v46 }
 0x24c   : > { %2229 = vst [vmem:[%s3257_s28 + $0xb0] sm:$0xff] %v2161_v23   ;;  %2230 = vst [vmem:[%s3257_s28 + $0xb8] sm:$0xff] %v2166_v38  }
 0x24d   : > { %2231 = vst [vmem:[%s3257_s28 + $0xc0] sm:$0xff] %v2171_v14   ;;  %2232 = vst [vmem:[%s3257_s28 + $0xc8] sm:$0xff] %v2176_v34  }
 0x24e   : > { %2233 = vst [vmem:[%s3257_s28 + $0xd0] sm:$0xff] %v2181_v44   ;;  %2234 = vst [vmem:[%s3257_s28 + $0xd8] sm:$0xff] %v2186_v29  }
 0x24f   : > { %2235 = vst [vmem:[%s3257_s28 + $0xe0] sm:$0xff] %v2191_v22   ;;  %2236 = vst [vmem:[%s3257_s28 + $0xe8] sm:$0xff] %v2196_v42  }
 0x250   : > { %2237 = vst [vmem:[%s3257_s28 + $0xf0] sm:$0xff] %v2201_v4   ;;  %2238 = vst [vmem:[%s3257_s28 + $0xf8] sm:$0xff] %v2206_v53  }
 0x251 PF: > { %s13_s12 = sadd.s32 1, %s2402_s12  }
 0x252   : > { %p10_p4 = scmp.ge.s32.totalorder %s13_s12, 4  }
 0x254   :  { %12 = sbr.rel (!%p10_p4) target bundleno = 1 (0x1), region = 68 }

// kernel: munit_forward.15
= control target key start
LH: loop header
LB: loop body
LE: loop exit
PB: predicated region body
PF: predicated region fallthrough
CT: control target
= control target key end

     0   :  { %s951_s12 = smov 0   ;;  %s1105_s0 = inlined_call_operand.vmem [shape: bf16[2,128,128], index: 0, kind: input, shape index: {}]   ;;  %s1106_s1 = inlined_call_operand.vmem [shape: bf16[2,128,128], index: 1, kind: input, shape index: {}]   ;;  %s1107_s2 = inlined_call_operand.vmem [shape: f32[2,1,128], index: 2, kind: input, shape index: {}]   ;;  %s1108_s3 = inlined_call_operand.vmem [shape: bf16[2,128,128], index: 3, kind: output, shape index: {}]  }
   0x1 LB: > { %s719_s13 = sadd.s32 4294967295, %s929_s12   ;;  %p723_p0 = scmp.ge.s32.totalorder %s929_s12, 1  ;;  %s929_s12 = sphi %s951_s12, %s13_s12  }
   0x2   : > { %p155_p1 = scmp.lt.s32.totalorder %s929_s12, 3 }
   0x4   : > { %p156_p2 = pnand %p723_p0, %p155_p1 }
   0x5   : > { %p187_p3 = scmp.lt.s32.totalorder (!%p156_p2), %s719_s13, 1 }
   0x6   : > { %159 = sbr.rel (%p156_p2) target bundleno = 353 (0x161), region = 32 }
   0xd   : > { %s1110_s13 = smov (!%p187_p3, %s719_s13), 1 }
   0xe   : > { %s962_s14 = sshll.u32 %s1110_s13, 6  ;;  %s199_s23 = scalar_lea.vmem %s1107_s2, %s1110_s13 }
   0xf   : > { %s968_s17 = scalar_lea.vmem %s1106_s1, %s962_s14  ;;  %s977_s20 = scalar_lea.vmem %s1105_s0, %s962_s14  ;;  %v730_v16 = vld [vmem:[%s199_s23] ss:$0 sm:$0xff] }
  0x10   : > { %v903_v0 = vld [vmem:[%s968_s17] sm:$0xff]   ;;  %v904_v1 = vld [vmem:[%s968_s17 + $0x8] sm:$0xff]   ;;  %v905_v2 = vld [vmem:[%s968_s17 + $0x10] sm:$0xff]   ;;  %s1084_s26 = scalar_lea.vmem %s1108_s3, %s962_s14 }
  0x11   : > { %847 = vmatprep.subr.bf16.mxu0 %v903_v0  ;;  %879 = vmatprep.subr.bf16.mxu1 %v903_v0  ;;  %v906_v3 = vld [vmem:[%s968_s17 + $0x18] sm:$0xff]   ;;  %v911_v4 = vld [vmem:[%s977_s20] sm:$0xff]   ;;  %v908_v7 = vld [vmem:[%s968_s17 + $0x28] sm:$0xff]  }
  0x12   : > { %848 = vmatpush3.bf16.msra.mxu0 %v903_v0  ;;  %887 = vmatpush3.bf16.msra.mxu1 %v903_v0  ;;  %v912_v5 = vld [vmem:[%s977_s20 + $0x20] sm:$0xff]   ;;  %v909_v8 = vld [vmem:[%s968_s17 + $0x30] sm:$0xff]   ;;  %v910_v9 = vld [vmem:[%s968_s17 + $0x38] sm:$0xff]  }
  0x13   : > { %849 = vmatprep.subr.bf16.mxu0 %v904_v1  ;;  %880 = vmatprep.subr.bf16.mxu1 %v904_v1  ;;  %v907_v6 = vld [vmem:[%s968_s17 + $0x20] sm:$0xff]   ;;  %v913_v10 = vld [vmem:[%s977_s20 + $0x8] sm:$0xff]   ;;  %v915_v12 = vld [vmem:[%s977_s20 + $0x10] sm:$0xff]  }
  0x14   : > { %863 = vmatprep.mubr.bf16.mxu0 %v911_v4  ;;  %871 = vmatprep.mubr.bf16.mxu1 %v912_v5  ;;  %v914_v11 = vld [vmem:[%s977_s20 + $0x28] sm:$0xff]   ;;  %v916_v13 = vld [vmem:[%s977_s20 + $0x30] sm:$0xff]   ;;  %v917_v14 = vld [vmem:[%s977_s20 + $0x18] sm:$0xff]  }
  0x15   : > { %v918_v15 = vld [vmem:[%s977_s20 + $0x38] sm:$0xff]  }
  0x16   : > { %850 = vmatpush3.bf16.msra.mxu0 %v904_v1  ;;  %888 = vmatpush3.bf16.msra.mxu1 %v904_v1 }
  0x17   : > { %851 = vmatprep.subr.bf16.mxu0 %v905_v2  ;;  %881 = vmatprep.subr.bf16.mxu1 %v905_v2 }
  0x1a   : > { %852 = vmatpush3.bf16.msra.mxu0 %v905_v2  ;;  %889 = vmatpush3.bf16.msra.mxu1 %v905_v2 }
  0x1b   : > { %853 = vmatprep.subr.bf16.mxu0 %v906_v3  ;;  %882 = vmatprep.subr.bf16.mxu1 %v906_v3 }
  0x1e   : > { %854 = vmatpush3.bf16.msra.mxu0 %v906_v3  ;;  %890 = vmatpush3.bf16.msra.mxu1 %v906_v3 }
  0x1f   : > { %855 = vmatprep.subr.bf16.mxu0 %v907_v6  ;;  %883 = vmatprep.subr.bf16.mxu1 %v907_v6 }
  0x22   : > { %856 = vmatpush3.bf16.msra.mxu0 %v907_v6  ;;  %891 = vmatpush3.bf16.msra.mxu1 %v907_v6 }
  0x23   : > { %857 = vmatprep.subr.bf16.mxu0 %v908_v7  ;;  %884 = vmatprep.subr.bf16.mxu1 %v908_v7 }
  0x26   : > { %858 = vmatpush3.bf16.msra.mxu0 %v908_v7  ;;  %892 = vmatpush3.bf16.msra.mxu1 %v908_v7 }
  0x27   : > { %859 = vmatprep.subr.bf16.mxu0 %v909_v8  ;;  %885 = vmatprep.subr.bf16.mxu1 %v909_v8 }
  0x2a   : > { %860 = vmatpush3.bf16.msra.mxu0 %v909_v8  ;;  %893 = vmatpush3.bf16.msra.mxu1 %v909_v8 }
  0x2b   : > { %861 = vmatprep.subr.bf16.mxu0 %v910_v9  ;;  %886 = vmatprep.subr.bf16.mxu1 %v910_v9 }
  0x2e   : > { %862 = vmatpush3.bf16.msra.mxu0 %v910_v9  ;;  %894 = vmatpush3.bf16.msra.mxu1 %v910_v9 }
  0x31   : > { %864 = vmatmul.mubr.bf16.vlgmr.msra.gmra.mrb[0].mxu0 %v913_v10  ;;  %872 = vmatmul.mubr.bf16.vlgmr.msra.gmra.mrb[0].mxu1 %v914_v11 }
  0x32   : > { %867 = vmatprep.mubr.bf16.mxu0 %v915_v12  ;;  %875 = vmatprep.mubr.bf16.mxu1 %v916_v13 }
  0x39   : > { %868 = vmatmul.mubr.bf16.gmra.mrb[4].mxu0 %v917_v14  ;;  %876 = vmatmul.mubr.bf16.gmra.mrb[4].mxu1 %v918_v15 }
 0x104   : > { %v865_v17 = vpop.f32.mrb[0].mxu0  ;;  %v873_v18 = vpop.f32.mrb[0].mxu1 }
 0x105   : > { %v384_v19 = vadd.f32 %v865_v17, %v730_v16  ;;  %v996_v20 = vadd.f32 %v873_v18, %v730_v16  ;;  %v375_v21 = vpop.f32.mrb[1].mxu0  ;;  %v407_v22 = vpop.f32.mrb[1].mxu1 }
 0x106   : > { %v376_v23 = vadd.f32 %v730_v16, %v375_v21  ;;  %v998_v24 = vadd.f32 %v730_v16, %v407_v22  ;;  %v866_v25 = vpop.f32.mrb[2].mxu0  ;;  %v874_v26 = vpop.f32.mrb[2].mxu1 }
 0x107   : > { %v387_v27 = vadd.f32 %v866_v25, %v730_v16  ;;  %v1000_v28 = vadd.f32 %v874_v26, %v730_v16  ;;  %v378_v29 = vpop.f32.mrb[3].mxu0  ;;  %v410_v30 = vpop.f32.mrb[3].mxu1 }
 0x108   : > { %v379_v31 = vadd.f32 %v730_v16, %v378_v29  ;;  %v411_v32 = vadd.f32 %v730_v16, %v410_v30 }
 0x10a   : > { %v438_v33 = vadd.f32 %v379_v31, %v376_v23  ;;  %v451_v34 = vadd.f32 %v411_v32, %v998_v24 }
 0x10c   : > { %v439_v35 = vadd.f32 %v438_v33, %v384_v19  ;;  %v452_v36 = vadd.f32 %v451_v34, %v996_v20  ;;  %v869_v37 = vpop.f32.mrb[4].mxu0  ;;  %v877_v38 = vpop.f32.mrb[4].mxu1 }
 0x10d   : > { %v400_v39 = vadd.f32 %v869_v37, %v730_v16  ;;  %v432_v40 = vadd.f32 %v877_v38, %v730_v16  ;;  %v391_v41 = vpop.f32.mrb[5].mxu0  ;;  %v423_v42 = vpop.f32.mrb[5].mxu1 }
 0x10e   : > { %v392_v43 = vadd.f32 %v730_v16, %v391_v41  ;;  %v440_v44 = vadd.f32 %v439_v35, %v387_v27  ;;  %v424_v45 = vadd.f32 %v730_v16, %v423_v42  ;;  %v453_v46 = vadd.f32 %v452_v36, %v1000_v28  ;;  %v870_v47 = vpop.f32.mrb[6].mxu0  ;;  %v878_v48 = vpop.f32.mrb[6].mxu1 }
 0x10f   : > { %v403_v49 = vadd.f32 %v870_v47, %v730_v16  ;;  %v435_v50 = vadd.f32 %v878_v48, %v730_v16  ;;  %v394_v51 = vpop.f32.mrb[7].mxu0  ;;  %v426_v52 = vpop.f32.mrb[7].mxu1 }
 0x110   : > { %v441_v53 = vadd.f32 %v440_v44, %v392_v43  ;;  %v454_v54 = vadd.f32 %v453_v46, %v424_v45  ;;  %v395_v55 = vadd.f32 %v730_v16, %v394_v51  ;;  %v427_v56 = vadd.f32 %v730_v16, %v426_v52 }
 0x112   : > { %v442_v57 = vadd.f32 %v441_v53, %v395_v55  ;;  %v455_v58 = vadd.f32 %v454_v54, %v427_v56 }
 0x114   : > { %v443_v59 = vadd.f32 %v442_v57, %v400_v39  ;;  %v456_v60 = vadd.f32 %v455_v58, %v432_v40 }
 0x116   : > { %v444_v61 = vadd.f32 %v443_v59, %v403_v49  ;;  %v457_v62 = vadd.f32 %v456_v60, %v435_v50 }
 0x118   : > { %v445_v63 = vrot.slane %v444_v61, 4  ;;  %v458_v0 = vrot.slane %v457_v62, 4 }
 0x11a   : > { %v446_v1 = vadd.f32 %v445_v63, %v444_v61  ;;  %v459_v2 = vadd.f32 %v458_v0, %v457_v62 }
 0x11c   : > { %v447_v3 = vrot.slane %v446_v1, 2  ;;  %v460_v4 = vrot.slane %v459_v2, 2 }
 0x11e   : > { %v448_v5 = vadd.f32 %v447_v3, %v446_v1  ;;  %v461_v6 = vadd.f32 %v460_v4, %v459_v2 }
 0x120   : > { %v449_v7 = vrot.slane %v448_v5, 1  ;;  %v462_v8 = vrot.slane %v461_v6, 1 }
 0x122   : > { %v450_v9 = vadd.f32 %v449_v7, %v448_v5  ;;  %v463_v10 = vadd.f32 %v462_v8, %v461_v6 }
 0x124   : > { %v465_v11 = vmul.f32 0.015625, %v450_v9  ;;  %v466_v12 = vmul.f32 0.015625, %v463_v10 }
 0x126   : > { %v1005_v13 = vsub.f32 %v376_v23, %v465_v11  ;;  %v1007_v14 = vsub.f32 %v379_v31, %v465_v11  ;;  %v1009_v15 = vsub.f32 %v384_v19, %v465_v11  ;;  %v1011_v16 = vsub.f32 %v387_v27, %v465_v11 }
 0x127   : > { %v1013_v17 = vsub.f32 %v392_v43, %v465_v11  ;;  %v1015_v18 = vsub.f32 %v395_v55, %v465_v11  ;;  %v1017_v21 = vsub.f32 %v400_v39, %v465_v11  ;;  %v1019_v22 = vsub.f32 %v403_v49, %v465_v11 }
 0x128   : > { %v483_v25 = vmul.f32 %v1005_v13, %v1005_v13  ;;  %v484_v23 = vmul.f32 %v1007_v14, %v1007_v14  ;;  %v485_v19 = vmul.f32 %v1009_v15, %v1009_v15  ;;  %v486_v26 = vmul.f32 %v1011_v16, %v1011_v16 }
 0x129   : > { %v1030_v29 = vsub.f32 %v998_v24, %v466_v12  ;;  %v1032_v30 = vsub.f32 %v411_v32, %v466_v12  ;;  %v1035_v31 = vsub.f32 %v996_v20, %v466_v12  ;;  %v1038_v33 = vsub.f32 %v1000_v28, %v466_v12 }
 0x12a   : > { %v499_v27 = vadd.f32 %v484_v23, %v483_v25  ;;  %v1040_v34 = vsub.f32 %v424_v45, %v466_v12  ;;  %v1042_v35 = vsub.f32 %v427_v56, %v466_v12  ;;  %v1044_v36 = vsub.f32 %v432_v40, %v466_v12 }
 0x12b   : > { %v1046_v38 = vsub.f32 %v435_v50, %v466_v12  ;;  %v491_v24 = vmul.f32 %v1030_v29, %v1030_v29  ;;  %v492_v32 = vmul.f32 %v1032_v30, %v1032_v30  ;;  %v487_v20 = vmul.f32 %v1013_v17, %v1013_v17 }
 0x12c   : > { %v500_v37 = vadd.f32 %v499_v27, %v485_v19  ;;  %v493_v39 = vmul.f32 %v1035_v31, %v1035_v31  ;;  %v488_v40 = vmul.f32 %v1015_v18, %v1015_v18  ;;  %v494_v43 = vmul.f32 %v1038_v33, %v1038_v33 }
 0x12d   : > { %v512_v41 = vadd.f32 %v492_v32, %v491_v24  ;;  %v489_v45 = vmul.f32 %v1017_v21, %v1017_v21  ;;  %v495_v47 = vmul.f32 %v1040_v34, %v1040_v34  ;;  %v490_v49 = vmul.f32 %v1019_v22, %v1019_v22 }
 0x12e   : > { %v501_v28 = vadd.f32 %v500_v37, %v486_v26  ;;  %v496_v51 = vmul.f32 %v1042_v35, %v1042_v35  ;;  %v497_v54 = vmul.f32 %v1044_v36, %v1044_v36  ;;  %v498_v57 = vmul.f32 %v1046_v38, %v1046_v38 }
 0x12f   : > { %v513_v44 = vadd.f32 %v512_v41, %v493_v39 }
 0x130   : > { %v502_v42 = vadd.f32 %v501_v28, %v487_v20 }
 0x131   : > { %v514_v48 = vadd.f32 %v513_v44, %v494_v43 }
 0x132   : > { %v503_v46 = vadd.f32 %v502_v42, %v488_v40 }
 0x133   : > { %v515_v52 = vadd.f32 %v514_v48, %v495_v47 }
 0x134   : > { %v504_v50 = vadd.f32 %v503_v46, %v489_v45 }
 0x135   : > { %v516_v55 = vadd.f32 %v515_v52, %v496_v51 }
 0x136   : > { %v505_v53 = vadd.f32 %v504_v50, %v490_v49 }
 0x137   : > { %v517_v58 = vadd.f32 %v516_v55, %v497_v54 }
 0x138   : > { %v506_v56 = vrot.slane %v505_v53, 4 }
 0x139   : > { %v518_v60 = vadd.f32 %v517_v58, %v498_v57 }
 0x13a   : > { %v507_v59 = vadd.f32 %v506_v56, %v505_v53 }
 0x13b   : > { %v519_v62 = vrot.slane %v518_v60, 4 }
 0x13c   : > { %v508_v61 = vrot.slane %v507_v59, 2 }
 0x13d   : > { %v520_v0 = vadd.f32 %v519_v62, %v518_v60 }
 0x13e   : > { %v509_v63 = vadd.f32 %v508_v61, %v507_v59 }
 0x13f   : > { %v521_v2 = vrot.slane %v520_v0, 2 }
 0x140   : > { %v510_v1 = vrot.slane %v509_v63, 1 }
 0x141   : > { %v522_v4 = vadd.f32 %v521_v2, %v520_v0 }
 0x142   : > { %v511_v3 = vadd.f32 %v510_v1, %v509_v63 }
 0x143   : > { %v523_v6 = vrot.slane %v522_v4, 1 }
 0x144   : > { %v525_v5 = vmul.f32 0.015625, %v511_v3 }
 0x145   : > { %v524_v8 = vadd.f32 %v523_v6, %v522_v4 }
 0x146   : > { %v527_v7 = vadd.f32 1e-05, %v525_v5 }
 0x147   : > { %v526_v9 = vmul.f32 0.015625, %v524_v8 }
 0x148   : > { %919 = vrsqrt.f32 %v527_v7 }
 0x149   : > { %v528_v10 = vadd.f32 1e-05, %v526_v9 }
 0x14b   : > { %921 = vrsqrt.f32 %v528_v10 }
 0x152   : > { %v920_v11 = vpop.eup %919 }
 0x153   : > { %v531_v12 = vmul.f32 %v920_v11, %v1005_v13  ;;  %v532_v25 = vmul.f32 %v920_v11, %v1007_v14  ;;  %v533_v23 = vmul.f32 %v920_v11, %v1009_v15  ;;  %v534_v19 = vmul.f32 %v920_v11, %v1011_v16 }
 0x154   : > { %v535_v26 = vmul.f32 %v920_v11, %v1013_v17  ;;  %v536_v27 = vmul.f32 %v920_v11, %v1015_v18  ;;  %v537_v37 = vmul.f32 %v920_v11, %v1017_v21  ;;  %v538_v24 = vmul.f32 %v920_v11, %v1019_v22 }
 0x155   : > { %v547_v32 = vmax.f32 %v531_v12, 0.0  ;;  %v548_v20 = vmax.f32 %v532_v25, 0.0  ;;  %v549_v28 = vmax.f32 %v533_v23, 0.0  ;;  %v550_v39 = vmax.f32 %v534_v19, 0.0  ;;  %v922_v41 = vpop.eup %921 }
 0x156   : > { %v551_v13 = vmax.f32 %v535_v26, 0.0  ;;  %v552_v14 = vmax.f32 %v536_v27, 0.0  ;;  %v553_v15 = vmax.f32 %v537_v37, 0.0  ;;  %v554_v16 = vmax.f32 %v538_v24, 0.0 }
 0x157   : > { %v787_v17 = vpack.c.bf16 %v548_v20, %v547_v32  ;;  %v792_v18 = vpack.c.bf16 %v550_v39, %v549_v28  ;;  %v539_v21 = vmul.f32 %v922_v41, %v1030_v29  ;;  %v540_v22 = vmul.f32 %v922_v41, %v1032_v30 }
 0x158   : > { %v797_v40 = vpack.c.bf16 %v552_v14, %v551_v13  ;;  %v802_v42 = vpack.c.bf16 %v554_v16, %v553_v15  ;;  %v541_v43 = vmul.f32 %v922_v41, %v1035_v31  ;;  %v542_v44 = vmul.f32 %v922_v41, %v1038_v33 }
 0x159   : > { %788 = vst [vmem:[%s1084_s26] sm:$0xff] %v787_v17   ;;  %824 = vst [vmem:[%s1084_s26 + $0x8] sm:$0xff] %v792_v18   ;;  %v543_v45 = vmul.f32 %v922_v41, %v1040_v34  ;;  %v544_v46 = vmul.f32 %v922_v41, %v1042_v35  ;;  %v545_v47 = vmul.f32 %v922_v41, %v1044_v36  ;;  %v555_v29 = vmax.f32 %v539_v21, 0.0 }
 0x15a   : > { %v546_v48 = vmul.f32 %v922_v41, %v1046_v38  ;;  %825 = vst [vmem:[%s1084_s26 + $0x10] sm:$0xff] %v797_v40   ;;  %826 = vst [vmem:[%s1084_s26 + $0x18] sm:$0xff] %v802_v42   ;;  %v556_v30 = vmax.f32 %v540_v22, 0.0  ;;  %v557_v31 = vmax.f32 %v541_v43, 0.0  ;;  %v558_v33 = vmax.f32 %v542_v44, 0.0 }
 0x15b   : > { %v559_v49 = vmax.f32 %v543_v45, 0.0  ;;  %v560_v50 = vmax.f32 %v544_v46, 0.0  ;;  %v561_v51 = vmax.f32 %v545_v47, 0.0 }
 0x15c   : > { %v562_v34 = vmax.f32 %v546_v48, 0.0  ;;  %v807_v52 = vpack.c.bf16 %v556_v30, %v555_v29  ;;  %v812_v35 = vpack.c.bf16 %v558_v33, %v557_v31 }
 0x15d   : > { %v817_v53 = vpack.c.bf16 %v560_v50, %v559_v49 }
 0x15e   : > { %v822_v36 = vpack.c.bf16 %v562_v34, %v561_v51  ;;  %827 = vst [vmem:[%s1084_s26 + $0x20] sm:$0xff] %v807_v52   ;;  %828 = vst [vmem:[%s1084_s26 + $0x28] sm:$0xff] %v812_v35  }
 0x15f   : > { %829 = vst [vmem:[%s1084_s26 + $0x30] sm:$0xff] %v817_v53  }
 0x160   : > { %830 = vst [vmem:[%s1084_s26 + $0x38] sm:$0xff] %v822_v36  }
 0x161 PF: > { %s13_s12 = sadd.s32 1, %s929_s12  }
 0x162   : > { %p10_p4 = scmp.ge.s32.totalorder %s13_s12, 4  }
 0x164   :  { %12 = sbr.rel (!%p10_p4) target bundleno = 1 (0x1), region = 68 }

// kernel: munit_forward.16
= control target key start
LH: loop header
LB: loop body
LE: loop exit
PB: predicated region body
PF: predicated region fallthrough
CT: control target
= control target key end

     0   :  { %s725_s12 = smov 0   ;;  %s772_s0 = inlined_call_operand.vmem [shape: bf16[2,32,256], index: 0, kind: input, shape index: {}]   ;;  %s773_s1 = inlined_call_operand.vmem [shape: bf16[2,256,128], index: 1, kind: input, shape index: {}]   ;;  %s774_s2 = inlined_call_operand.vmem [shape: f32[2,1,128], index: 2, kind: input, shape index: {}]   ;;  %s775_s3 = inlined_call_operand.vmem [shape: bf16[2,32,128], index: 3, kind: output, shape index: {}]  }
   0x1 LB: > { %s563_s13 = sadd.s32 4294967295, %s703_s12   ;;  %p567_p0 = scmp.ge.s32.totalorder %s703_s12, 1  ;;  %s703_s12 = sphi %s725_s12, %s13_s12  }
   0x2   : > { %p155_p1 = scmp.lt.s32.totalorder %s703_s12, 3 }
   0x4   : > { %p156_p2 = pnand %p567_p0, %p155_p1 }
   0x5   : > { %p187_p3 = scmp.lt.s32.totalorder (!%p156_p2), %s563_s13, 1 }
   0x6   : > { %159 = sbr.rel (%p156_p2) target bundleno = 325 (0x145), region = 32 }
   0xd   : > { %s777_s13 = smov (!%p187_p3, %s563_s13), 1 }
   0xe   : > { %s602_s14 = sshll.u32 %s777_s13, 7  ;;  %s601_s18 = sshll.u32 %s777_s13, 5 }
   0xf   : > { %s739_s17 = scalar_lea.vmem %s773_s1, %s602_s14  ;;  %s191_s21 = scalar_lea.vmem %s772_s0, %s601_s18 }
  0x10   : > { %v671_v0 = vld [vmem:[%s739_s17 + $0x40] sm:$0xff]   ;;  %v673_v2 = vld [vmem:[%s739_s17 + $0x48] sm:$0xff]   ;;  %v675_v4 = vld [vmem:[%s739_s17 + $0x50] sm:$0xff]   ;;  %s199_s24 = scalar_lea.vmem %s774_s2, %s777_s13  ;;  %s603_s25 = sshll.u32 %s777_s13, 4 }
  0x11   : > { %v672_v1 = vld [vmem:[%s739_s17] sm:$0xff]   ;;  %619 = vmatprep.subr.bf16.mxu0 %v671_v0  ;;  %647 = vmatprep.subr.bf16.mxu1 %v671_v0  ;;  %v674_v3 = vld [vmem:[%s739_s17 + $0x8] sm:$0xff]   ;;  %v676_v5 = vld [vmem:[%s739_s17 + $0x10] sm:$0xff]   ;;  %s204_s28 = scalar_lea.vmem %s775_s3, %s603_s25 }
  0x12   : > { %620 = vmatpush3.bf16.msra.mxu0 %v672_v1  ;;  %655 = vmatpush3.bf16.msra.mxu1 %v672_v1  ;;  %v677_v6 = vld [vmem:[%s739_s17 + $0x58] sm:$0xff]   ;;  %v679_v8 = vld [vmem:[%s739_s17 + $0x60] sm:$0xff]   ;;  %v681_v10 = vld [vmem:[%s739_s17 + $0x68] sm:$0xff]  }
  0x13   : > { %621 = vmatprep.subr.bf16.mxu0 %v673_v2  ;;  %648 = vmatprep.subr.bf16.mxu1 %v673_v2  ;;  %v678_v7 = vld [vmem:[%s739_s17 + $0x18] sm:$0xff]   ;;  %v680_v9 = vld [vmem:[%s739_s17 + $0x20] sm:$0xff]   ;;  %v682_v13 = vld [vmem:[%s739_s17 + $0x28] sm:$0xff]  }
  0x14   : > { %v689_v11 = vld [vmem:[%s191_s21 + $0x4] ss:$8 sps:$4 sm:$0xff]   ;;  %v692_v12 = vld [vmem:[%s191_s21 + $0x14] ss:$8 sps:$4 sm:$0xff]   ;;  %v687_v18 = vld [vmem:[%s191_s21] ss:$8 sps:$4 sm:$0xff]  }
  0x15   : > { %v683_v14 = vld [vmem:[%s739_s17 + $0x70] sm:$0xff]   ;;  %397 = vmatprep.mubr.bf16.mxu0 %v689_v11  ;;  %405 = vmatprep.mubr.bf16.mxu1 %v692_v12  ;;  %v685_v16 = vld [vmem:[%s739_s17 + $0x78] sm:$0xff]   ;;  %v574_v28 = vld [vmem:[%s199_s24] ss:$0 sm:$0xff] }
  0x16   : > { %622 = vmatpush3.bf16.msra.mxu0 %v674_v3  ;;  %656 = vmatpush3.bf16.msra.mxu1 %v674_v3  ;;  %v684_v15 = vld [vmem:[%s739_s17 + $0x30] sm:$0xff]   ;;  %v686_v17 = vld [vmem:[%s739_s17 + $0x38] sm:$0xff]  }
  0x17   : > { %623 = vmatprep.subr.bf16.mxu0 %v675_v4  ;;  %649 = vmatprep.subr.bf16.mxu1 %v675_v4  ;;  %v690_v19 = vld [vmem:[%s191_s21 + $0x10] ss:$8 sps:$4 sm:$0xff]  }
  0x1a   : > { %624 = vmatpush3.bf16.msra.mxu0 %v676_v5  ;;  %657 = vmatpush3.bf16.msra.mxu1 %v676_v5 }
  0x1b   : > { %625 = vmatprep.subr.bf16.mxu0 %v677_v6  ;;  %650 = vmatprep.subr.bf16.mxu1 %v677_v6 }
  0x1e   : > { %626 = vmatpush3.bf16.msra.mxu0 %v678_v7  ;;  %658 = vmatpush3.bf16.msra.mxu1 %v678_v7 }
  0x1f   : > { %627 = vmatprep.subr.bf16.mxu0 %v679_v8  ;;  %651 = vmatprep.subr.bf16.mxu1 %v679_v8 }
  0x22   : > { %628 = vmatpush3.bf16.msra.mxu0 %v680_v9  ;;  %659 = vmatpush3.bf16.msra.mxu1 %v680_v9 }
  0x23   : > { %629 = vmatprep.subr.bf16.mxu0 %v681_v10  ;;  %652 = vmatprep.subr.bf16.mxu1 %v681_v10 }
  0x26   : > { %630 = vmatpush3.bf16.msra.mxu0 %v682_v13  ;;  %660 = vmatpush3.bf16.msra.mxu1 %v682_v13 }
  0x27   : > { %631 = vmatprep.subr.bf16.mxu0 %v683_v14  ;;  %653 = vmatprep.subr.bf16.mxu1 %v683_v14 }
  0x2a   : > { %632 = vmatpush3.bf16.msra.mxu0 %v684_v15  ;;  %661 = vmatpush3.bf16.msra.mxu1 %v684_v15 }
  0x2b   : > { %633 = vmatprep.subr.bf16.mxu0 %v685_v16  ;;  %654 = vmatprep.subr.bf16.mxu1 %v685_v16 }
  0x2e   : > { %634 = vmatpush3.bf16.msra.mxu0 %v686_v17  ;;  %662 = vmatpush3.bf16.msra.mxu1 %v686_v17 }
  0x31   : > { %398 = vmatmul.mubr.bf16.vlgmr.msra.gmra.mrb[0].mxu0 %v687_v18  ;;  %406 = vmatmul.mubr.bf16.vlgmr.msra.gmra.mrb[0].mxu1 %v690_v19 }
 0x104   : > { %v635_v20 = vpop.f32.mrb[0].mxu0  ;;  %v641_v21 = vpop.f32.mrb[0].mxu1 }
 0x105   : > { %v636_v22 = vpop.f32.mrb[1].mxu0  ;;  %v642_v23 = vpop.f32.mrb[1].mxu1 }
 0x106   : > { %v637_v24 = vadd.f32 %v636_v22, %v635_v20  ;;  %v643_v25 = vadd.f32 %v642_v23, %v641_v21  ;;  %v638_v26 = vpop.f32.mrb[2].mxu0  ;;  %v644_v27 = vpop.f32.mrb[2].mxu1 }
 0x107   : > { %v639_v29 = vpop.f32.mrb[3].mxu0  ;;  %v645_v30 = vpop.f32.mrb[3].mxu1 }
 0x108   : > { %v640_v31 = vadd.f32 %v639_v29, %v638_v26  ;;  %v646_v32 = vadd.f32 %v645_v30, %v644_v27  ;;  %v400_v33 = vadd.f32 %v637_v24, %v574_v28  ;;  %v408_v34 = vadd.f32 %v643_v25, %v574_v28 }
 0x10a   : > { %v403_v35 = vadd.f32 %v640_v31, %v574_v28  ;;  %v411_v36 = vadd.f32 %v646_v32, %v574_v28 }
 0x10c   : > { %v414_v37 = vadd.f32 %v403_v35, %v400_v33  ;;  %v421_v38 = vadd.f32 %v411_v36, %v408_v34 }
 0x10e   : > { %v415_v39 = vrot.slane %v414_v37, 4  ;;  %v422_v40 = vrot.slane %v421_v38, 4 }
 0x110   : > { %v416_v41 = vadd.f32 %v415_v39, %v414_v37  ;;  %v423_v42 = vadd.f32 %v422_v40, %v421_v38 }
 0x112   : > { %v417_v43 = vrot.slane %v416_v41, 2  ;;  %v424_v44 = vrot.slane %v423_v42, 2 }
 0x114   : > { %v418_v45 = vadd.f32 %v417_v43, %v416_v41  ;;  %v425_v46 = vadd.f32 %v424_v44, %v423_v42 }
 0x116   : > { %v419_v47 = vrot.slane %v418_v45, 1  ;;  %v426_v48 = vrot.slane %v425_v46, 1 }
 0x118   : > { %v420_v49 = vadd.f32 %v419_v47, %v418_v45  ;;  %v427_v50 = vadd.f32 %v426_v48, %v425_v46 }
 0x11a   : > { %v429_v51 = vmul.f32 0.0625, %v420_v49  ;;  %v430_v52 = vmul.f32 0.0625, %v427_v50 }
 0x11c   : > { %v431_v53 = vsub.f32 %v400_v33, %v429_v51  ;;  %v432_v54 = vsub.f32 %v403_v35, %v429_v51  ;;  %v433_v55 = vsub.f32 %v408_v34, %v430_v52  ;;  %v434_v56 = vsub.f32 %v411_v36, %v430_v52 }
 0x11e   : > { %v435_v57 = vmul.f32 %v431_v53, %v431_v53  ;;  %v436_v58 = vmul.f32 %v432_v54, %v432_v54  ;;  %v437_v59 = vmul.f32 %v433_v55, %v433_v55  ;;  %v438_v60 = vmul.f32 %v434_v56, %v434_v56 }
 0x120   : > { %v439_v61 = vadd.f32 %v436_v58, %v435_v57  ;;  %v446_v62 = vadd.f32 %v438_v60, %v437_v59 }
 0x122   : > { %v440_v63 = vrot.slane %v439_v61, 4  ;;  %v447_v0 = vrot.slane %v446_v62, 4 }
 0x124   : > { %v441_v1 = vadd.f32 %v440_v63, %v439_v61  ;;  %v448_v2 = vadd.f32 %v447_v0, %v446_v62 }
 0x126   : > { %v442_v3 = vrot.slane %v441_v1, 2  ;;  %v449_v4 = vrot.slane %v448_v2, 2 }
 0x128   : > { %v443_v5 = vadd.f32 %v442_v3, %v441_v1  ;;  %v450_v6 = vadd.f32 %v449_v4, %v448_v2 }
 0x12a   : > { %v444_v7 = vrot.slane %v443_v5, 1  ;;  %v451_v8 = vrot.slane %v450_v6, 1 }
 0x12c   : > { %v445_v9 = vadd.f32 %v444_v7, %v443_v5  ;;  %v452_v10 = vadd.f32 %v451_v8, %v450_v6 }
 0x12e   : > { %v453_v11 = vmul.f32 0.0625, %v445_v9  ;;  %v454_v12 = vmul.f32 0.0625, %v452_v10 }
 0x130   : > { %v455_v13 = vadd.f32 1e-05, %v453_v11  ;;  %v456_v14 = vadd.f32 1e-05, %v454_v12 }
 0x132   : > { %693 = vrsqrt.f32 %v455_v13 }
 0x133   : > { %695 = vrsqrt.f32 %v456_v14 }
 0x13c   : > { %v694_v15 = vpop.eup %693 }
 0x13d   : > { %v696_v16 = vpop.eup %695  ;;  %v459_v17 = vmul.f32 %v694_v15, %v431_v53  ;;  %v460_v18 = vmul.f32 %v694_v15, %v432_v54 }
 0x13e   : > { %v461_v19 = vmul.f32 %v696_v16, %v433_v55  ;;  %v462_v20 = vmul.f32 %v696_v16, %v434_v56 }
 0x13f   : > { %v463_v21 = vmax.f32 %v459_v17, 0.0  ;;  %v464_v22 = vmax.f32 %v460_v18, 0.0 }
 0x140   : > { %v465_v23 = vmax.f32 %v461_v19, 0.0  ;;  %v466_v24 = vmax.f32 %v462_v20, 0.0 }
 0x141   : > { %v611_v25 = vpack.c.bf16 %v464_v22, %v463_v21 }
 0x142   : > { %v616_v26 = vpack.c.bf16 %v466_v24, %v465_v23 }
 0x143   : > { %612 = vst [vmem:[%s204_s28] sm:$0xff] %v611_v25  }
 0x144   : > { %618 = vst [vmem:[%s204_s28 + $0x8] sm:$0xff] %v616_v26  }
 0x145 PF: > { %s13_s12 = sadd.s32 1, %s703_s12  }
 0x146   : > { %p10_p4 = scmp.ge.s32.totalorder %s13_s12, 4  }
 0x148   :  { %12 = sbr.rel (!%p10_p4) target bundleno = 1 (0x1), region = 68 }

// kernel: munit_forward.18
= control target key start
LH: loop header
LB: loop body
LE: loop exit
PB: predicated region body
PF: predicated region fallthrough
CT: control target
= control target key end

     0   :  { %s970_s15 = smov 0   ;;  %s1028_s0 = inlined_call_operand.vmem [shape: bf16[2,32,384], index: 0, kind: input, shape index: {}]   ;;  %s1029_s1 = inlined_call_operand.vmem [shape: bf16[2,384,128], index: 1, kind: input, shape index: {}]   ;;  %s1030_s2 = inlined_call_operand.vmem [shape: f32[2,1,128], index: 2, kind: input, shape index: {}]   ;;  %s1031_s3 = inlined_call_operand.vmem [shape: bf16[2,32,128], index: 3, kind: input, shape index: {}]   ;;  %s1032_s4 = inlined_call_operand.vmem [shape: bf16[2,32,128], index: 4, kind: output, shape index: {}]  }
   0x1 LB: > { %s759_s16 = sadd.s32 4294967295, %s943_s15   ;;  %p763_p0 = scmp.ge.s32.totalorder %s943_s15, 1  ;;  %s943_s15 = sphi %s970_s15, %s14_s15  }
   0x2   : > { %p190_p1 = scmp.lt.s32.totalorder %s943_s15, 3 }
   0x4   : > { %p191_p2 = pnand %p763_p0, %p190_p1 }
   0x5   : > { %p229_p3 = scmp.lt.s32.totalorder (!%p191_p2), %s759_s16, 1 }
   0x6   : > { %194 = sbr.rel (%p191_p2) target bundleno = 335 (0x14f), region = 36 }
   0xd   : > { %s1034_s16 = smov (!%p229_p3, %s759_s16), 1 }
   0xe   : > { %s892_s17 = smul.u32 192, %s1034_s16  ;;  %s241_s27 = scalar_lea.vmem %s1030_s2, %s1034_s16 }
   0xf   : > { %s891_s21 = smul.u32 48, %s1034_s16  ;;  %v770_v32 = vld [vmem:[%s241_s27] ss:$0 sm:$0xff]  ;;  %s807_s28 = sshll.u32 %s1034_s16, 4 }
  0x10   : > { %s984_s20 = scalar_lea.vmem %s1029_s1, %s892_s17  ;;  %s246_s5 = scalar_lea.vmem %s1031_s3, %s807_s28 }
  0x11   : > { %v901_v0 = vld [vmem:[%s984_s20 + $0x40] sm:$0xff]   ;;  %v903_v2 = vld [vmem:[%s984_s20 + $0x48] sm:$0xff]   ;;  %v906_v5 = vld [vmem:[%s984_s20 + $0x50] sm:$0xff]   ;;  %s233_s24 = scalar_lea.vmem %s1028_s0, %s891_s21  ;;  %s251_s8 = scalar_lea.vmem %s1032_s4, %s807_s28 }
  0x12   : > { %v902_v1 = vld [vmem:[%s984_s20] sm:$0xff]   ;;  %833 = vmatprep.subr.bf16.mxu0 %v901_v0  ;;  %v905_v4 = vld [vmem:[%s984_s20 + $0x8] sm:$0xff]   ;;  %v908_v7 = vld [vmem:[%s984_s20 + $0x10] sm:$0xff]  }
  0x13   : > { %834 = vmatpush3.bf16.msra.mxu0 %v902_v1  ;;  %v904_v3 = vld [vmem:[%s984_s20 + $0x80] sm:$0xff]   ;;  %v907_v6 = vld [vmem:[%s984_s20 + $0x88] sm:$0xff]   ;;  %v909_v8 = vld [vmem:[%s984_s20 + $0x58] sm:$0xff]  }
  0x14   : > { %835 = vmatprep.subr.bf16.mxu0 %v903_v2  ;;  %871 = vmatprep.subr.bf16.mxu1 %v904_v3  ;;  %v910_v9 = vld [vmem:[%s984_s20 + $0x90] sm:$0xff]   ;;  %v911_v10 = vld [vmem:[%s984_s20 + $0x18] sm:$0xff]   ;;  %v912_v11 = vld [vmem:[%s984_s20 + $0x60] sm:$0xff]  }
  0x15   : > { %872 = vmatpush3.bf16.msra.mxu1 %v904_v3  ;;  %v913_v12 = vld [vmem:[%s984_s20 + $0x98] sm:$0xff]   ;;  %v914_v13 = vld [vmem:[%s984_s20 + $0x20] sm:$0xff]   ;;  %v915_v15 = vld [vmem:[%s984_s20 + $0x68] sm:$0xff]  }
  0x16   : > { %873 = vmatprep.subr.bf16.mxu1 %v907_v6  ;;  %v916_v14 = vld [vmem:[%s984_s20 + $0xa0] sm:$0xff]   ;;  %v917_v16 = vld [vmem:[%s984_s20 + $0x28] sm:$0xff]   ;;  %v918_v18 = vld [vmem:[%s984_s20 + $0x70] sm:$0xff]  }
  0x17   : > { %836 = vmatpush3.bf16.msra.mxu0 %v905_v4  ;;  %v919_v17 = vld [vmem:[%s984_s20 + $0xa8] sm:$0xff]   ;;  %v920_v19 = vld [vmem:[%s984_s20 + $0x30] sm:$0xff]   ;;  %v921_v20 = vld [vmem:[%s984_s20 + $0x78] sm:$0xff]  }
  0x18   : > { %837 = vmatprep.subr.bf16.mxu0 %v906_v5  ;;  %v922_v21 = vld [vmem:[%s984_s20 + $0xb0] sm:$0xff]   ;;  %v923_v23 = vld [vmem:[%s984_s20 + $0x38] sm:$0xff]   ;;  %v924_v26 = vld [vmem:[%s233_s24] ss:$12 sps:$4 sm:$0xff]  }
  0x19   : > { %874 = vmatpush3.bf16.msra.mxu1 %v907_v6  ;;  %v926_v22 = vld [vmem:[%s233_s24 + $0x4] ss:$12 sps:$4 sm:$0xff]   ;;  %v928_v24 = vld [vmem:[%s233_s24 + $0x8] ss:$12 sps:$4 sm:$0xff]   ;;  %v927_v25 = vld [vmem:[%s984_s20 + $0xb8] sm:$0xff]  }
  0x1a   : > { %875 = vmatprep.subr.bf16.mxu1 %v910_v9  ;;  %524 = vmatprep.mubr.bf16.mxu0 %v926_v22  ;;  %v930_v27 = vld [vmem:[%s233_s24 + $0x1c] ss:$12 sps:$4 sm:$0xff]   ;;  %v929_v28 = vld [vmem:[%s233_s24 + $0x20] ss:$12 sps:$4 sm:$0xff]   ;;  %v932_v29 = vld [vmem:[%s233_s24 + $0x18] ss:$12 sps:$4 sm:$0xff]  }
  0x1b   : > { %838 = vmatpush3.bf16.msra.mxu0 %v908_v7  ;;  %887 = vmatprep.mubr.bf16.mxu1 %v928_v24 }
  0x1c   : > { %839 = vmatprep.subr.bf16.mxu0 %v909_v8 }
  0x1d   : > { %876 = vmatpush3.bf16.msra.mxu1 %v910_v9 }
  0x1e   : > { %877 = vmatprep.subr.bf16.mxu1 %v913_v12 }
  0x1f   : > { %840 = vmatpush3.bf16.msra.mxu0 %v911_v10 }
  0x20   : > { %841 = vmatprep.subr.bf16.mxu0 %v912_v11 }
  0x21   : > { %878 = vmatpush3.bf16.msra.mxu1 %v913_v12 }
  0x22   : > { %879 = vmatprep.subr.bf16.mxu1 %v916_v14 }
  0x23   : > { %842 = vmatpush3.bf16.msra.mxu0 %v914_v13 }
  0x24   : > { %843 = vmatprep.subr.bf16.mxu0 %v915_v15 }
  0x25   : > { %880 = vmatpush3.bf16.msra.mxu1 %v916_v14 }
  0x26   : > { %881 = vmatprep.subr.bf16.mxu1 %v919_v17 }
  0x27   : > { %844 = vmatpush3.bf16.msra.mxu0 %v917_v16 }
  0x28   : > { %845 = vmatprep.subr.bf16.mxu0 %v918_v18 }
  0x29   : > { %882 = vmatpush3.bf16.msra.mxu1 %v919_v17 }
  0x2a   : > { %883 = vmatprep.subr.bf16.mxu1 %v922_v21 }
  0x2b   : > { %846 = vmatpush3.bf16.msra.mxu0 %v920_v19 }
  0x2c   : > { %847 = vmatprep.subr.bf16.mxu0 %v921_v20 }
  0x2d   : > { %884 = vmatpush3.bf16.msra.mxu1 %v922_v21 }
  0x2e   : > { %885 = vmatprep.subr.bf16.mxu1 %v927_v25 }
  0x2f   : > { %848 = vmatpush3.bf16.msra.mxu0 %v923_v23 }
  0x31   : > { %886 = vmatpush3.bf16.msra.mxu1 %v927_v25 }
  0x32   : > { %525 = vmatmul.mubr.bf16.vlgmr.msra.gmra.mrb[0].mxu0 %v924_v26 }
  0x33   : > { %532 = vmatprep.mubr.bf16.mxu0 %v930_v27 }
  0x34   : > { %888 = vmatmul.mubr.bf16.vlgmr.msra.gmra.mrb[0].mxu1 %v929_v28 }
  0x3a   : > { %533 = vmatmul.mubr.bf16.gmra.mrb[4].mxu0 %v932_v29 }
 0x105   : > { %v849_v30 = vpop.f32.mrb[0].mxu0 }
 0x106   : > { %v850_v31 = vpop.f32.mrb[1].mxu0 }
 0x107   : > { %v851_v33 = vadd.f32 %v850_v31, %v849_v30  ;;  %v852_v34 = vpop.f32.mrb[2].mxu0  ;;  %v889_v36 = vpop.f32.mrb[0].mxu1 }
 0x108   : > { %v853_v35 = vpop.f32.mrb[3].mxu0  ;;  %v575_v39 = vpop.f32.mrb[1].mxu1 }
 0x109   : > { %v854_v37 = vadd.f32 %v853_v35, %v852_v34  ;;  %v527_v38 = vadd.f32 %v851_v33, %v770_v32  ;;  %v890_v40 = vpop.f32.mrb[2].mxu1 }
 0x10a   : > { %v578_v43 = vpop.f32.mrb[3].mxu1 }
 0x10b   : > { %v576_v41 = vadd.f32 %v575_v39, %v527_v38  ;;  %v530_v42 = vadd.f32 %v854_v37, %v770_v32 }
 0x10d   : > { %v579_v44 = vadd.f32 %v578_v43, %v530_v42  ;;  %v855_v45 = vpop.f32.mrb[4].mxu0 }
 0x10e   : > { %v856_v46 = vpop.f32.mrb[5].mxu0 }
 0x10f   : > { %v590_v47 = vadd.f32 %v579_v44, %v576_v41  ;;  %v857_v48 = vadd.f32 %v856_v46, %v855_v45  ;;  %v858_v49 = vpop.f32.mrb[6].mxu0 }
 0x110   : > { %v859_v50 = vpop.f32.mrb[7].mxu0 }
 0x111   : > { %v591_v51 = vrot.slane %v590_v47, 4  ;;  %v535_v52 = vadd.f32 %v857_v48, %v770_v32  ;;  %v860_v53 = vadd.f32 %v859_v50, %v858_v49 }
 0x113   : > { %v592_v54 = vadd.f32 %v591_v51, %v590_v47  ;;  %v584_v55 = vadd.f32 %v889_v36, %v535_v52  ;;  %v538_v56 = vadd.f32 %v860_v53, %v770_v32  ;;  %v814_v32 = vld [vmem:[%s246_s5] sm:$0xff]  }
 0x114   : > { %v815_v34 = vunpack.c.l.bf16 %v814_v32  ;;  %v816_v35 = vunpack.c.h.bf16 %v814_v32 }
 0x115   : > { %v593_v57 = vrot.slane %v592_v54, 2  ;;  %v587_v58 = vadd.f32 %v890_v40, %v538_v56 }
 0x117   : > { %v594_v59 = vadd.f32 %v593_v57, %v592_v54  ;;  %v597_v60 = vadd.f32 %v587_v58, %v584_v55 }
 0x119   : > { %v595_v61 = vrot.slane %v594_v59, 1  ;;  %v598_v62 = vrot.slane %v597_v60, 4 }
 0x11b   : > { %v596_v63 = vadd.f32 %v595_v61, %v594_v59  ;;  %v599_v0 = vadd.f32 %v598_v62, %v597_v60 }
 0x11d   : > { %v605_v1 = vmul.f32 0.0625, %v596_v63  ;;  %v600_v2 = vrot.slane %v599_v0, 2 }
 0x11f   : > { %v607_v3 = vsub.f32 %v576_v41, %v605_v1  ;;  %v608_v4 = vsub.f32 %v579_v44, %v605_v1  ;;  %v601_v5 = vadd.f32 %v600_v2, %v599_v0  ;;  %v831_v41 = vld [vmem:[%s246_s5 + $0x8] sm:$0xff]  }
 0x120   : > { %v819_v43 = vunpack.c.l.bf16 %v831_v41  ;;  %v820_v44 = vunpack.c.h.bf16 %v831_v41 }
 0x121   : > { %v611_v6 = vmul.f32 %v607_v3, %v607_v3  ;;  %v612_v7 = vmul.f32 %v608_v4, %v608_v4  ;;  %v602_v8 = vrot.slane %v601_v5, 1 }
 0x123   : > { %v615_v9 = vadd.f32 %v612_v7, %v611_v6  ;;  %v603_v10 = vadd.f32 %v602_v8, %v601_v5 }
 0x125   : > { %v616_v11 = vrot.slane %v615_v9, 4  ;;  %v606_v12 = vmul.f32 0.0625, %v603_v10 }
 0x127   : > { %v617_v13 = vadd.f32 %v616_v11, %v615_v9  ;;  %v609_v14 = vsub.f32 %v584_v55, %v606_v12  ;;  %v610_v15 = vsub.f32 %v587_v58, %v606_v12 }
 0x129   : > { %v618_v16 = vrot.slane %v617_v13, 2  ;;  %v613_v17 = vmul.f32 %v609_v14, %v609_v14  ;;  %v614_v18 = vmul.f32 %v610_v15, %v610_v15 }
 0x12b   : > { %v619_v19 = vadd.f32 %v618_v16, %v617_v13  ;;  %v622_v20 = vadd.f32 %v614_v18, %v613_v17 }
 0x12d   : > { %v620_v21 = vrot.slane %v619_v19, 1  ;;  %v623_v22 = vrot.slane %v622_v20, 4 }
 0x12f   : > { %v621_v23 = vadd.f32 %v620_v21, %v619_v19  ;;  %v624_v24 = vadd.f32 %v623_v22, %v622_v20 }
 0x131   : > { %v629_v25 = vmul.f32 0.0625, %v621_v23  ;;  %v625_v26 = vrot.slane %v624_v24, 2 }
 0x133   : > { %v631_v27 = vadd.f32 1e-05, %v629_v25  ;;  %v626_v28 = vadd.f32 %v625_v26, %v624_v24 }
 0x135   : > { %933 = vrsqrt.f32 %v631_v27  ;;  %v627_v29 = vrot.slane %v626_v28, 1 }
 0x137   : > { %v628_v30 = vadd.f32 %v627_v29, %v626_v28 }
 0x139   : > { %v630_v31 = vmul.f32 0.0625, %v628_v30 }
 0x13b   : > { %v632_v33 = vadd.f32 1e-05, %v630_v31 }
 0x13d   : > { %935 = vrsqrt.f32 %v632_v33 }
 0x13f   : > { %v934_v36 = vpop.eup %933 }
 0x140   : > { %v635_v37 = vmul.f32 %v934_v36, %v607_v3  ;;  %v636_v38 = vmul.f32 %v934_v36, %v608_v4 }
 0x142   : > { %v647_v39 = vadd.f32 %v815_v34, %v635_v37  ;;  %v648_v40 = vadd.f32 %v816_v35, %v636_v38 }
 0x144   : > { %v824_v42 = vpack.c.bf16 %v648_v40, %v647_v39 }
 0x146   : > { %825 = vst [vmem:[%s251_s8] sm:$0xff] %v824_v42  }
 0x147   : > { %v936_v45 = vpop.eup %935 }
 0x148   : > { %v637_v46 = vmul.f32 %v936_v45, %v609_v14  ;;  %v638_v47 = vmul.f32 %v936_v45, %v610_v15 }
 0x14a   : > { %v649_v48 = vadd.f32 %v819_v43, %v637_v46  ;;  %v650_v49 = vadd.f32 %v820_v44, %v638_v47 }
 0x14c   : > { %v829_v50 = vpack.c.bf16 %v650_v49, %v649_v48 }
 0x14e   : > { %832 = vst [vmem:[%s251_s8 + $0x8] sm:$0xff] %v829_v50  }
 0x14f PF: > { %s14_s15 = sadd.s32 1, %s943_s15  }
 0x150   : > { %p11_p4 = scmp.ge.s32.totalorder %s14_s15, 4  }
 0x152   :  { %13 = sbr.rel (!%p11_p4) target bundleno = 1 (0x1), region = 75 }

// kernel: munit_forward.17
= control target key start
LH: loop header
LB: loop body
LE: loop exit
PB: predicated region body
PF: predicated region fallthrough
CT: control target
= control target key end

     0   :  { %s886_s12 = smov 0   ;;  %s941_s0 = inlined_call_operand.vmem [shape: bf16[2,32,384], index: 0, kind: input, shape index: {}]   ;;  %s942_s1 = inlined_call_operand.vmem [shape: bf16[2,384,128], index: 1, kind: input, shape index: {}]   ;;  %s943_s2 = inlined_call_operand.vmem [shape: f32[2,1,128], index: 2, kind: input, shape index: {}]   ;;  %s944_s3 = inlined_call_operand.vmem [shape: bf16[2,32,128], index: 3, kind: output, shape index: {}]  }
   0x1 LB: > { %s692_s13 = sadd.s32 4294967295, %s864_s12   ;;  %p696_p0 = scmp.ge.s32.totalorder %s864_s12, 1  ;;  %s864_s12 = sphi %s886_s12, %s13_s12  }
   0x2   : > { %p155_p1 = scmp.lt.s32.totalorder %s864_s12, 3 }
   0x4   : > { %p156_p2 = pnand %p696_p0, %p155_p1 }
   0x5   : > { %p187_p3 = scmp.lt.s32.totalorder (!%p156_p2), %s692_s13, 1 }
   0x6   : > { %159 = sbr.rel (%p156_p2) target bundleno = 335 (0x14f), region = 32 }
   0xd   : > { %s946_s13 = smov (!%p187_p3, %s692_s13), 1 }
   0xe   : > { %s813_s14 = smul.u32 192, %s946_s13  ;;  %s199_s24 = scalar_lea.vmem %s943_s2, %s946_s13 }
   0xf   : > { %s812_s18 = smul.u32 48, %s946_s13  ;;  %v701_v32 = vld [vmem:[%s199_s24] ss:$0 sm:$0xff]  ;;  %s738_s25 = sshll.u32 %s946_s13, 4 }
  0x10   : > { %s900_s17 = scalar_lea.vmem %s942_s1, %s813_s14  ;;  %s204_s28 = scalar_lea.vmem %s944_s3, %s738_s25 }
  0x11   : > { %v822_v0 = vld [vmem:[%s900_s17 + $0x40] sm:$0xff]   ;;  %v824_v2 = vld [vmem:[%s900_s17 + $0x48] sm:$0xff]   ;;  %v827_v5 = vld [vmem:[%s900_s17 + $0x50] sm:$0xff]   ;;  %s191_s21 = scalar_lea.vmem %s941_s0, %s812_s18 }
  0x12   : > { %v823_v1 = vld [vmem:[%s900_s17] sm:$0xff]   ;;  %754 = vmatprep.subr.bf16.mxu0 %v822_v0  ;;  %v826_v4 = vld [vmem:[%s900_s17 + $0x8] sm:$0xff]   ;;  %v829_v7 = vld [vmem:[%s900_s17 + $0x10] sm:$0xff]  }
  0x13   : > { %755 = vmatpush3.bf16.msra.mxu0 %v823_v1  ;;  %v825_v3 = vld [vmem:[%s900_s17 + $0x80] sm:$0xff]   ;;  %v828_v6 = vld [vmem:[%s900_s17 + $0x88] sm:$0xff]   ;;  %v830_v8 = vld [vmem:[%s900_s17 + $0x58] sm:$0xff]  }
  0x14   : > { %756 = vmatprep.subr.bf16.mxu0 %v824_v2  ;;  %792 = vmatprep.subr.bf16.mxu1 %v825_v3  ;;  %v831_v9 = vld [vmem:[%s900_s17 + $0x90] sm:$0xff]   ;;  %v832_v10 = vld [vmem:[%s900_s17 + $0x18] sm:$0xff]   ;;  %v833_v11 = vld [vmem:[%s900_s17 + $0x60] sm:$0xff]  }
  0x15   : > { %793 = vmatpush3.bf16.msra.mxu1 %v825_v3  ;;  %v834_v12 = vld [vmem:[%s900_s17 + $0x98] sm:$0xff]   ;;  %v835_v13 = vld [vmem:[%s900_s17 + $0x20] sm:$0xff]   ;;  %v836_v15 = vld [vmem:[%s900_s17 + $0x68] sm:$0xff]  }
  0x16   : > { %794 = vmatprep.subr.bf16.mxu1 %v828_v6  ;;  %v837_v14 = vld [vmem:[%s900_s17 + $0xa0] sm:$0xff]   ;;  %v838_v16 = vld [vmem:[%s900_s17 + $0x28] sm:$0xff]   ;;  %v839_v18 = vld [vmem:[%s900_s17 + $0x70] sm:$0xff]  }
  0x17   : > { %757 = vmatpush3.bf16.msra.mxu0 %v826_v4  ;;  %v840_v17 = vld [vmem:[%s900_s17 + $0xa8] sm:$0xff]   ;;  %v841_v19 = vld [vmem:[%s900_s17 + $0x30] sm:$0xff]   ;;  %v842_v20 = vld [vmem:[%s900_s17 + $0x78] sm:$0xff]  }
  0x18   : > { %758 = vmatprep.subr.bf16.mxu0 %v827_v5  ;;  %v843_v21 = vld [vmem:[%s900_s17 + $0xb0] sm:$0xff]   ;;  %v844_v23 = vld [vmem:[%s900_s17 + $0x38] sm:$0xff]   ;;  %v845_v26 = vld [vmem:[%s191_s21] ss:$12 sps:$4 sm:$0xff]  }
  0x19   : > { %795 = vmatpush3.bf16.msra.mxu1 %v828_v6  ;;  %v847_v22 = vld [vmem:[%s191_s21 + $0x4] ss:$12 sps:$4 sm:$0xff]   ;;  %v849_v24 = vld [vmem:[%s191_s21 + $0x8] ss:$12 sps:$4 sm:$0xff]   ;;  %v848_v25 = vld [vmem:[%s900_s17 + $0xb8] sm:$0xff]  }
  0x1a   : > { %796 = vmatprep.subr.bf16.mxu1 %v831_v9  ;;  %477 = vmatprep.mubr.bf16.mxu0 %v847_v22  ;;  %v851_v27 = vld [vmem:[%s191_s21 + $0x1c] ss:$12 sps:$4 sm:$0xff]   ;;  %v850_v28 = vld [vmem:[%s191_s21 + $0x20] ss:$12 sps:$4 sm:$0xff]   ;;  %v853_v29 = vld [vmem:[%s191_s21 + $0x18] ss:$12 sps:$4 sm:$0xff]  }
  0x1b   : > { %759 = vmatpush3.bf16.msra.mxu0 %v829_v7  ;;  %808 = vmatprep.mubr.bf16.mxu1 %v849_v24 }
  0x1c   : > { %760 = vmatprep.subr.bf16.mxu0 %v830_v8 }
  0x1d   : > { %797 = vmatpush3.bf16.msra.mxu1 %v831_v9 }
  0x1e   : > { %798 = vmatprep.subr.bf16.mxu1 %v834_v12 }
  0x1f   : > { %761 = vmatpush3.bf16.msra.mxu0 %v832_v10 }
  0x20   : > { %762 = vmatprep.subr.bf16.mxu0 %v833_v11 }
  0x21   : > { %799 = vmatpush3.bf16.msra.mxu1 %v834_v12 }
  0x22   : > { %800 = vmatprep.subr.bf16.mxu1 %v837_v14 }
  0x23   : > { %763 = vmatpush3.bf16.msra.mxu0 %v835_v13 }
  0x24   : > { %764 = vmatprep.subr.bf16.mxu0 %v836_v15 }
  0x25   : > { %801 = vmatpush3.bf16.msra.mxu1 %v837_v14 }
  0x26   : > { %802 = vmatprep.subr.bf16.mxu1 %v840_v17 }
  0x27   : > { %765 = vmatpush3.bf16.msra.mxu0 %v838_v16 }
  0x28   : > { %766 = vmatprep.subr.bf16.mxu0 %v839_v18 }
  0x29   : > { %803 = vmatpush3.bf16.msra.mxu1 %v840_v17 }
  0x2a   : > { %804 = vmatprep.subr.bf16.mxu1 %v843_v21 }
  0x2b   : > { %767 = vmatpush3.bf16.msra.mxu0 %v841_v19 }
  0x2c   : > { %768 = vmatprep.subr.bf16.mxu0 %v842_v20 }
  0x2d   : > { %805 = vmatpush3.bf16.msra.mxu1 %v843_v21 }
  0x2e   : > { %806 = vmatprep.subr.bf16.mxu1 %v848_v25 }
  0x2f   : > { %769 = vmatpush3.bf16.msra.mxu0 %v844_v23 }
  0x31   : > { %807 = vmatpush3.bf16.msra.mxu1 %v848_v25 }
  0x32   : > { %478 = vmatmul.mubr.bf16.vlgmr.msra.gmra.mrb[0].mxu0 %v845_v26 }
  0x33   : > { %485 = vmatprep.mubr.bf16.mxu0 %v851_v27 }
  0x34   : > { %809 = vmatmul.mubr.bf16.vlgmr.msra.gmra.mrb[0].mxu1 %v850_v28 }
  0x3a   : > { %486 = vmatmul.mubr.bf16.gmra.mrb[4].mxu0 %v853_v29 }
 0x105   : > { %v770_v30 = vpop.f32.mrb[0].mxu0 }
 0x106   : > { %v771_v31 = vpop.f32.mrb[1].mxu0 }
 0x107   : > { %v772_v33 = vadd.f32 %v771_v31, %v770_v30  ;;  %v773_v34 = vpop.f32.mrb[2].mxu0  ;;  %v810_v36 = vpop.f32.mrb[0].mxu1 }
 0x108   : > { %v774_v35 = vpop.f32.mrb[3].mxu0  ;;  %v528_v39 = vpop.f32.mrb[1].mxu1 }
 0x109   : > { %v775_v37 = vadd.f32 %v774_v35, %v773_v34  ;;  %v480_v38 = vadd.f32 %v772_v33, %v701_v32  ;;  %v811_v40 = vpop.f32.mrb[2].mxu1 }
 0x10a   : > { %v531_v43 = vpop.f32.mrb[3].mxu1 }
 0x10b   : > { %v529_v41 = vadd.f32 %v528_v39, %v480_v38  ;;  %v483_v42 = vadd.f32 %v775_v37, %v701_v32 }
 0x10d   : > { %v532_v44 = vadd.f32 %v531_v43, %v483_v42  ;;  %v776_v45 = vpop.f32.mrb[4].mxu0 }
 0x10e   : > { %v777_v46 = vpop.f32.mrb[5].mxu0 }
 0x10f   : > { %v543_v47 = vadd.f32 %v532_v44, %v529_v41  ;;  %v778_v48 = vadd.f32 %v777_v46, %v776_v45  ;;  %v779_v49 = vpop.f32.mrb[6].mxu0 }
 0x110   : > { %v780_v50 = vpop.f32.mrb[7].mxu0 }
 0x111   : > { %v544_v51 = vrot.slane %v543_v47, 4  ;;  %v488_v52 = vadd.f32 %v778_v48, %v701_v32  ;;  %v781_v53 = vadd.f32 %v780_v50, %v779_v49 }
 0x113   : > { %v545_v54 = vadd.f32 %v544_v51, %v543_v47  ;;  %v537_v55 = vadd.f32 %v810_v36, %v488_v52  ;;  %v491_v56 = vadd.f32 %v781_v53, %v701_v32 }
 0x115   : > { %v546_v57 = vrot.slane %v545_v54, 2  ;;  %v540_v58 = vadd.f32 %v811_v40, %v491_v56 }
 0x117   : > { %v547_v59 = vadd.f32 %v546_v57, %v545_v54  ;;  %v550_v60 = vadd.f32 %v540_v58, %v537_v55 }
 0x119   : > { %v548_v61 = vrot.slane %v547_v59, 1  ;;  %v551_v62 = vrot.slane %v550_v60, 4 }
 0x11b   : > { %v549_v63 = vadd.f32 %v548_v61, %v547_v59  ;;  %v552_v0 = vadd.f32 %v551_v62, %v550_v60 }
 0x11d   : > { %v558_v1 = vmul.f32 0.0625, %v549_v63  ;;  %v553_v2 = vrot.slane %v552_v0, 2 }
 0x11f   : > { %v560_v3 = vsub.f32 %v529_v41, %v558_v1  ;;  %v561_v4 = vsub.f32 %v532_v44, %v558_v1  ;;  %v554_v5 = vadd.f32 %v553_v2, %v552_v0 }
 0x121   : > { %v564_v6 = vmul.f32 %v560_v3, %v560_v3  ;;  %v565_v7 = vmul.f32 %v561_v4, %v561_v4  ;;  %v555_v8 = vrot.slane %v554_v5, 1 }
 0x123   : > { %v568_v9 = vadd.f32 %v565_v7, %v564_v6  ;;  %v556_v10 = vadd.f32 %v555_v8, %v554_v5 }
 0x125   : > { %v569_v11 = vrot.slane %v568_v9, 4  ;;  %v559_v12 = vmul.f32 0.0625, %v556_v10 }
 0x127   : > { %v570_v13 = vadd.f32 %v569_v11, %v568_v9  ;;  %v562_v14 = vsub.f32 %v537_v55, %v559_v12  ;;  %v563_v15 = vsub.f32 %v540_v58, %v559_v12 }
 0x129   : > { %v571_v16 = vrot.slane %v570_v13, 2  ;;  %v566_v17 = vmul.f32 %v562_v14, %v562_v14  ;;  %v567_v18 = vmul.f32 %v563_v15, %v563_v15 }
 0x12b   : > { %v572_v19 = vadd.f32 %v571_v16, %v570_v13  ;;  %v575_v20 = vadd.f32 %v567_v18, %v566_v17 }
 0x12d   : > { %v573_v21 = vrot.slane %v572_v19, 1  ;;  %v576_v22 = vrot.slane %v575_v20, 4 }
 0x12f   : > { %v574_v23 = vadd.f32 %v573_v21, %v572_v19  ;;  %v577_v24 = vadd.f32 %v576_v22, %v575_v20 }
 0x131   : > { %v582_v25 = vmul.f32 0.0625, %v574_v23  ;;  %v578_v26 = vrot.slane %v577_v24, 2 }
 0x133   : > { %v584_v27 = vadd.f32 1e-05, %v582_v25  ;;  %v579_v28 = vadd.f32 %v578_v26, %v577_v24 }
 0x135   : > { %854 = vrsqrt.f32 %v584_v27  ;;  %v580_v29 = vrot.slane %v579_v28, 1 }
 0x137   : > { %v581_v30 = vadd.f32 %v580_v29, %v579_v28 }
 0x139   : > { %v583_v31 = vmul.f32 0.0625, %v581_v30 }
 0x13b   : > { %v585_v32 = vadd.f32 1e-05, %v583_v31 }
 0x13d   : > { %856 = vrsqrt.f32 %v585_v32 }
 0x13f   : > { %v855_v33 = vpop.eup %854 }
 0x140   : > { %v588_v34 = vmul.f32 %v855_v33, %v560_v3  ;;  %v589_v35 = vmul.f32 %v855_v33, %v561_v4 }
 0x142   : > { %v592_v36 = vmax.f32 %v588_v34, 0.0  ;;  %v593_v37 = vmax.f32 %v589_v35, 0.0 }
 0x144   : > { %v746_v38 = vpack.c.bf16 %v593_v37, %v592_v36 }
 0x146   : > { %747 = vst [vmem:[%s204_s28] sm:$0xff] %v746_v38  }
 0x147   : > { %v857_v39 = vpop.eup %856 }
 0x148   : > { %v590_v40 = vmul.f32 %v857_v39, %v562_v14  ;;  %v591_v41 = vmul.f32 %v857_v39, %v563_v15 }
 0x14a   : > { %v594_v42 = vmax.f32 %v590_v40, 0.0  ;;  %v595_v43 = vmax.f32 %v591_v41, 0.0 }
 0x14c   : > { %v751_v44 = vpack.c.bf16 %v595_v43, %v594_v42 }
 0x14e   : > { %753 = vst [vmem:[%s204_s28 + $0x8] sm:$0xff] %v751_v44  }
 0x14f PF: > { %s13_s12 = sadd.s32 1, %s864_s12  }
 0x150   : > { %p10_p4 = scmp.ge.s32.totalorder %s13_s12, 4  }
 0x152   :  { %12 = sbr.rel (!%p10_p4) target bundleno = 1 (0x1), region = 68 }

// kernel: munit_forward.21
= control target key start
LH: loop header
LB: loop body
LE: loop exit
PB: predicated region body
PF: predicated region fallthrough
CT: control target
= control target key end

     0   :  { %s1050_s18 = smov 0   ;;  %s1112_s0 = inlined_call_operand.vmem [shape: bf16[2,32,384], index: 0, kind: input, shape index: {}]   ;;  %s1113_s1 = inlined_call_operand.vmem [shape: bf16[2,384,128], index: 1, kind: input, shape index: {}]   ;;  %s1114_s2 = inlined_call_operand.vmem [shape: f32[2,1,128], index: 2, kind: input, shape index: {}]   ;;  %s1115_s3 = inlined_call_operand.vmem [shape: f32[2,2,1,128], index: 3, kind: input, shape index: {}]   ;;  %s1116_s4 = inlined_call_operand.vmem [shape: f32[2,2,1,128], index: 4, kind: input, shape index: {}]   ;;  %s1117_s5 = inlined_call_operand.vmem [shape: bf16[2,32,128], index: 5, kind: output, shape index: {}]  }
   0x1 LB: > { %s840_s19 = sadd.s32 4294967295, %s1018_s18   ;;  %p844_p0 = scmp.ge.s32.totalorder %s1018_s18, 1  ;;  %s1018_s18 = sphi %s1050_s18, %s15_s18  }
   0x2   : > { %p223_p1 = scmp.lt.s32.totalorder %s1018_s18, 3 }
   0x4   : > { %p224_p2 = pnand %p844_p0, %p223_p1 }
   0x5   : > { %p267_p3 = scmp.lt.s32.totalorder (!%p224_p2), %s840_s19, 1 }
   0x6   : > { %227 = sbr.rel (%p224_p2) target bundleno = 339 (0x153), region = 40 }
   0xd   : > { %s1119_s19 = smov (!%p267_p3, %s840_s19), 1 }
   0xe   : > { %s967_s20 = smul.u32 192, %s1119_s19  ;;  %s279_s30 = scalar_lea.vmem %s1114_s2, %s1119_s19 }
   0xf   : > { %s966_s24 = smul.u32 48, %s1119_s19  ;;  %v851_v32 = vld [vmem:[%s279_s30] ss:$0 sm:$0xff]  ;;  %s847_s6 = sshll.u32 %s1119_s19, 1 }
  0x10   : > { %s1064_s23 = scalar_lea.vmem %s1113_s1, %s967_s20  ;;  %s283_s9 = scalar_lea.vmem %s1115_s3, %s847_s6 }
  0x11   : > { %v976_v0 = vld [vmem:[%s1064_s23 + $0x40] sm:$0xff]   ;;  %v978_v2 = vld [vmem:[%s1064_s23 + $0x48] sm:$0xff]   ;;  %v981_v5 = vld [vmem:[%s1064_s23 + $0x50] sm:$0xff]   ;;  %s271_s27 = scalar_lea.vmem %s1112_s0, %s966_s24  ;;  %s287_s12 = scalar_lea.vmem %s1116_s4, %s847_s6 }
  0x12   : > { %v977_v1 = vld [vmem:[%s1064_s23] sm:$0xff]   ;;  %908 = vmatprep.subr.bf16.mxu0 %v976_v0  ;;  %v980_v4 = vld [vmem:[%s1064_s23 + $0x8] sm:$0xff]   ;;  %v983_v7 = vld [vmem:[%s1064_s23 + $0x10] sm:$0xff]   ;;  %s892_s13 = sshll.u32 %s1119_s19, 4 }
  0x13   : > { %909 = vmatpush3.bf16.msra.mxu0 %v977_v1  ;;  %v979_v3 = vld [vmem:[%s1064_s23 + $0x80] sm:$0xff]   ;;  %v982_v6 = vld [vmem:[%s1064_s23 + $0x88] sm:$0xff]   ;;  %v984_v8 = vld [vmem:[%s1064_s23 + $0x58] sm:$0xff]   ;;  %s292_s16 = scalar_lea.vmem %s1117_s5, %s892_s13 }
  0x14   : > { %910 = vmatprep.subr.bf16.mxu0 %v978_v2  ;;  %946 = vmatprep.subr.bf16.mxu1 %v979_v3  ;;  %v985_v9 = vld [vmem:[%s1064_s23 + $0x90] sm:$0xff]   ;;  %v986_v10 = vld [vmem:[%s1064_s23 + $0x18] sm:$0xff]   ;;  %v987_v11 = vld [vmem:[%s1064_s23 + $0x60] sm:$0xff]  }
  0x15   : > { %947 = vmatpush3.bf16.msra.mxu1 %v979_v3  ;;  %v988_v12 = vld [vmem:[%s1064_s23 + $0x98] sm:$0xff]   ;;  %v989_v13 = vld [vmem:[%s1064_s23 + $0x20] sm:$0xff]   ;;  %v990_v15 = vld [vmem:[%s1064_s23 + $0x68] sm:$0xff]  }
  0x16   : > { %948 = vmatprep.subr.bf16.mxu1 %v982_v6  ;;  %v991_v14 = vld [vmem:[%s1064_s23 + $0xa0] sm:$0xff]   ;;  %v992_v16 = vld [vmem:[%s1064_s23 + $0x28] sm:$0xff]   ;;  %v993_v18 = vld [vmem:[%s1064_s23 + $0x70] sm:$0xff]  }
  0x17   : > { %911 = vmatpush3.bf16.msra.mxu0 %v980_v4  ;;  %v994_v17 = vld [vmem:[%s1064_s23 + $0xa8] sm:$0xff]   ;;  %v995_v19 = vld [vmem:[%s1064_s23 + $0x30] sm:$0xff]   ;;  %v996_v20 = vld [vmem:[%s1064_s23 + $0x78] sm:$0xff]  }
  0x18   : > { %912 = vmatprep.subr.bf16.mxu0 %v981_v5  ;;  %v997_v21 = vld [vmem:[%s1064_s23 + $0xb0] sm:$0xff]   ;;  %v998_v23 = vld [vmem:[%s1064_s23 + $0x38] sm:$0xff]   ;;  %v999_v26 = vld [vmem:[%s271_s27] ss:$12 sps:$4 sm:$0xff]  }
  0x19   : > { %949 = vmatpush3.bf16.msra.mxu1 %v982_v6  ;;  %v1001_v22 = vld [vmem:[%s271_s27 + $0x4] ss:$12 sps:$4 sm:$0xff]   ;;  %v1003_v24 = vld [vmem:[%s271_s27 + $0x8] ss:$12 sps:$4 sm:$0xff]   ;;  %v1002_v25 = vld [vmem:[%s1064_s23 + $0xb8] sm:$0xff]  }
  0x1a   : > { %950 = vmatprep.subr.bf16.mxu1 %v985_v9  ;;  %565 = vmatprep.mubr.bf16.mxu0 %v1001_v22  ;;  %v1005_v27 = vld [vmem:[%s271_s27 + $0x1c] ss:$12 sps:$4 sm:$0xff]   ;;  %v1004_v28 = vld [vmem:[%s271_s27 + $0x20] ss:$12 sps:$4 sm:$0xff]   ;;  %v1007_v29 = vld [vmem:[%s271_s27 + $0x18] ss:$12 sps:$4 sm:$0xff]  }
  0x1b   : > { %913 = vmatpush3.bf16.msra.mxu0 %v983_v7  ;;  %962 = vmatprep.mubr.bf16.mxu1 %v1003_v24 }
  0x1c   : > { %914 = vmatprep.subr.bf16.mxu0 %v984_v8 }
  0x1d   : > { %951 = vmatpush3.bf16.msra.mxu1 %v985_v9 }
  0x1e   : > { %952 = vmatprep.subr.bf16.mxu1 %v988_v12 }
  0x1f   : > { %915 = vmatpush3.bf16.msra.mxu0 %v986_v10 }
  0x20   : > { %916 = vmatprep.subr.bf16.mxu0 %v987_v11 }
  0x21   : > { %953 = vmatpush3.bf16.msra.mxu1 %v988_v12 }
  0x22   : > { %954 = vmatprep.subr.bf16.mxu1 %v991_v14 }
  0x23   : > { %917 = vmatpush3.bf16.msra.mxu0 %v989_v13 }
  0x24   : > { %918 = vmatprep.subr.bf16.mxu0 %v990_v15 }
  0x25   : > { %955 = vmatpush3.bf16.msra.mxu1 %v991_v14 }
  0x26   : > { %956 = vmatprep.subr.bf16.mxu1 %v994_v17 }
  0x27   : > { %919 = vmatpush3.bf16.msra.mxu0 %v992_v16 }
  0x28   : > { %920 = vmatprep.subr.bf16.mxu0 %v993_v18 }
  0x29   : > { %957 = vmatpush3.bf16.msra.mxu1 %v994_v17 }
  0x2a   : > { %958 = vmatprep.subr.bf16.mxu1 %v997_v21 }
  0x2b   : > { %921 = vmatpush3.bf16.msra.mxu0 %v995_v19 }
  0x2c   : > { %922 = vmatprep.subr.bf16.mxu0 %v996_v20 }
  0x2d   : > { %959 = vmatpush3.bf16.msra.mxu1 %v997_v21 }
  0x2e   : > { %960 = vmatprep.subr.bf16.mxu1 %v1002_v25 }
  0x2f   : > { %923 = vmatpush3.bf16.msra.mxu0 %v998_v23 }
  0x31   : > { %961 = vmatpush3.bf16.msra.mxu1 %v1002_v25 }
  0x32   : > { %566 = vmatmul.mubr.bf16.vlgmr.msra.gmra.mrb[0].mxu0 %v999_v26 }
  0x33   : > { %573 = vmatprep.mubr.bf16.mxu0 %v1005_v27 }
  0x34   : > { %963 = vmatmul.mubr.bf16.vlgmr.msra.gmra.mrb[0].mxu1 %v1004_v28 }
  0x3a   : > { %574 = vmatmul.mubr.bf16.gmra.mrb[4].mxu0 %v1007_v29 }
 0x105   : > { %v924_v30 = vpop.f32.mrb[0].mxu0 }
 0x106   : > { %v925_v31 = vpop.f32.mrb[1].mxu0 }
 0x107   : > { %v926_v33 = vadd.f32 %v925_v31, %v924_v30  ;;  %v927_v34 = vpop.f32.mrb[2].mxu0  ;;  %v964_v36 = vpop.f32.mrb[0].mxu1 }
 0x108   : > { %v928_v35 = vpop.f32.mrb[3].mxu0  ;;  %v616_v39 = vpop.f32.mrb[1].mxu1 }
 0x109   : > { %v929_v37 = vadd.f32 %v928_v35, %v927_v34  ;;  %v568_v38 = vadd.f32 %v926_v33, %v851_v32  ;;  %v965_v40 = vpop.f32.mrb[2].mxu1  ;;  %v882_v34 = vld [vmem:[%s283_s9] ss:$0 sm:$0xff] }
 0x10a   : > { %v619_v43 = vpop.f32.mrb[3].mxu1 }
 0x10b   : > { %v617_v41 = vadd.f32 %v616_v39, %v568_v38  ;;  %v571_v42 = vadd.f32 %v929_v37, %v851_v32  ;;  %v884_v37 = vld [vmem:[%s287_s12] ss:$0 sm:$0xff] }
 0x10d   : > { %v620_v44 = vadd.f32 %v619_v43, %v571_v42  ;;  %v930_v45 = vpop.f32.mrb[4].mxu0 }
 0x10e   : > { %v931_v46 = vpop.f32.mrb[5].mxu0 }
 0x10f   : > { %v631_v47 = vadd.f32 %v620_v44, %v617_v41  ;;  %v932_v48 = vadd.f32 %v931_v46, %v930_v45  ;;  %v933_v49 = vpop.f32.mrb[6].mxu0  ;;  %v883_v45 = vld [vmem:[%s283_s9 + $0x1] ss:$0 sm:$0xff] }
 0x110   : > { %v934_v50 = vpop.f32.mrb[7].mxu0 }
 0x111   : > { %v632_v51 = vrot.slane %v631_v47, 4  ;;  %v576_v52 = vadd.f32 %v932_v48, %v851_v32  ;;  %v935_v53 = vadd.f32 %v934_v50, %v933_v49  ;;  %v885_v49 = vld [vmem:[%s287_s12 + $0x1] ss:$0 sm:$0xff] }
 0x113   : > { %v633_v54 = vadd.f32 %v632_v51, %v631_v47  ;;  %v625_v55 = vadd.f32 %v964_v36, %v576_v52  ;;  %v579_v56 = vadd.f32 %v935_v53, %v851_v32 }
 0x115   : > { %v634_v57 = vrot.slane %v633_v54, 2  ;;  %v628_v58 = vadd.f32 %v965_v40, %v579_v56 }
 0x117   : > { %v635_v59 = vadd.f32 %v634_v57, %v633_v54  ;;  %v638_v60 = vadd.f32 %v628_v58, %v625_v55 }
 0x119   : > { %v636_v61 = vrot.slane %v635_v59, 1  ;;  %v639_v62 = vrot.slane %v638_v60, 4 }
 0x11b   : > { %v637_v63 = vadd.f32 %v636_v61, %v635_v59  ;;  %v640_v0 = vadd.f32 %v639_v62, %v638_v60 }
 0x11d   : > { %v646_v1 = vmul.f32 0.0625, %v637_v63  ;;  %v641_v2 = vrot.slane %v640_v0, 2 }
 0x11f   : > { %v648_v3 = vsub.f32 %v617_v41, %v646_v1  ;;  %v649_v4 = vsub.f32 %v620_v44, %v646_v1  ;;  %v642_v5 = vadd.f32 %v641_v2, %v640_v0 }
 0x121   : > { %v652_v6 = vmul.f32 %v648_v3, %v648_v3  ;;  %v653_v7 = vmul.f32 %v649_v4, %v649_v4  ;;  %v643_v8 = vrot.slane %v642_v5, 1 }
 0x123   : > { %v656_v9 = vadd.f32 %v653_v7, %v652_v6  ;;  %v644_v10 = vadd.f32 %v643_v8, %v642_v5 }
 0x125   : > { %v657_v11 = vrot.slane %v656_v9, 4  ;;  %v647_v12 = vmul.f32 0.0625, %v644_v10 }
 0x127   : > { %v658_v13 = vadd.f32 %v657_v11, %v656_v9  ;;  %v650_v14 = vsub.f32 %v625_v55, %v647_v12  ;;  %v651_v15 = vsub.f32 %v628_v58, %v647_v12 }
 0x129   : > { %v659_v16 = vrot.slane %v658_v13, 2  ;;  %v654_v17 = vmul.f32 %v650_v14, %v650_v14  ;;  %v655_v18 = vmul.f32 %v651_v15, %v651_v15 }
 0x12b   : > { %v660_v19 = vadd.f32 %v659_v16, %v658_v13  ;;  %v663_v20 = vadd.f32 %v655_v18, %v654_v17 }
 0x12d   : > { %v661_v21 = vrot.slane %v660_v19, 1  ;;  %v664_v22 = vrot.slane %v663_v20, 4 }
 0x12f   : > { %v662_v23 = vadd.f32 %v661_v21, %v660_v19  ;;  %v665_v24 = vadd.f32 %v664_v22, %v663_v20 }
 0x131   : > { %v670_v25 = vmul.f32 0.0625, %v662_v23  ;;  %v666_v26 = vrot.slane %v665_v24, 2 }
 0x133   : > { %v672_v27 = vadd.f32 1e-05, %v670_v25  ;;  %v667_v28 = vadd.f32 %v666_v26, %v665_v24 }
 0x135   : > { %1008 = vrsqrt.f32 %v672_v27  ;;  %v668_v29 = vrot.slane %v667_v28, 1 }
 0x137   : > { %v669_v30 = vadd.f32 %v668_v29, %v667_v28 }
 0x139   : > { %v671_v31 = vmul.f32 0.0625, %v669_v30 }
 0x13b   : > { %v673_v32 = vadd.f32 1e-05, %v671_v31 }
 0x13d   : > { %1010 = vrsqrt.f32 %v673_v32 }
 0x13f   : > { %v1009_v33 = vpop.eup %1008 }
 0x140   : > { %v676_v35 = vmul.f32 %v1009_v33, %v648_v3  ;;  %v677_v36 = vmul.f32 %v1009_v33, %v649_v4 }
 0x142   : > { %v694_v38 = vmul.f32 %v882_v34, %v676_v35  ;;  %v695_v39 = vmul.f32 %v882_v34, %v677_v36 }
 0x144   : > { %v712_v40 = vadd.f32 %v884_v37, %v694_v38  ;;  %v713_v41 = vadd.f32 %v884_v37, %v695_v39 }
 0x146   : > { %v716_v42 = vmax.f32 %v712_v40, 0.0  ;;  %v717_v43 = vmax.f32 %v713_v41, 0.0 }
 0x147   : > { %v1011_v44 = vpop.eup %1010 }
 0x148   : > { %v900_v46 = vpack.c.bf16 %v717_v43, %v716_v42  ;;  %v678_v47 = vmul.f32 %v1011_v44, %v650_v14  ;;  %v679_v48 = vmul.f32 %v1011_v44, %v651_v15 }
 0x14a   : > { %901 = vst [vmem:[%s292_s16] sm:$0xff] %v900_v46   ;;  %v696_v50 = vmul.f32 %v883_v45, %v678_v47  ;;  %v697_v51 = vmul.f32 %v883_v45, %v679_v48 }
 0x14c   : > { %v714_v52 = vadd.f32 %v885_v49, %v696_v50  ;;  %v715_v53 = vadd.f32 %v885_v49, %v697_v51 }
 0x14e   : > { %v718_v54 = vmax.f32 %v714_v52, 0.0  ;;  %v719_v55 = vmax.f32 %v715_v53, 0.0 }
 0x150   : > { %v905_v56 = vpack.c.bf16 %v719_v55, %v718_v54 }
 0x152   : > { %907 = vst [vmem:[%s292_s16 + $0x8] sm:$0xff] %v905_v56  }
 0x153 PF: > { %s15_s18 = sadd.s32 1, %s1018_s18  }
 0x154   : > { %p12_p4 = scmp.ge.s32.totalorder %s15_s18, 4  }
 0x156   :  { %14 = sbr.rel (!%p12_p4) target bundleno = 1 (0x1), region = 82 }

// kernel: munit_forward.22
= control target key start
LH: loop header
LB: loop body
LE: loop exit
PB: predicated region body
PF: predicated region fallthrough
CT: control target
= control target key end

     0   :  { %s1134_s21 = smov 0   ;;  %s1199_s0 = inlined_call_operand.vmem [shape: bf16[2,32,384], index: 0, kind: input, shape index: {}]   ;;  %s1200_s1 = inlined_call_operand.vmem [shape: bf16[2,384,128], index: 1, kind: input, shape index: {}]   ;;  %s1201_s2 = inlined_call_operand.vmem [shape: f32[2,1,128], index: 2, kind: input, shape index: {}]   ;;  %s1202_s3 = inlined_call_operand.vmem [shape: f32[2,2,1,128], index: 3, kind: input, shape index: {}]   ;;  %s1203_s4 = inlined_call_operand.vmem [shape: f32[2,2,1,128], index: 4, kind: input, shape index: {}]   ;;  %s1204_s5 = inlined_call_operand.vmem [shape: bf16[2,32,128], index: 5, kind: input, shape index: {}]   ;;  %s1205_s6 = inlined_call_operand.vmem [shape: bf16[2,32,128], index: 6, kind: output, shape index: {}]  }
   0x1 LB: > { %s907_s22 = sadd.s32 4294967295, %s1097_s21   ;;  %p911_p0 = scmp.ge.s32.totalorder %s1097_s21, 1  ;;  %s1097_s21 = sphi %s1134_s21, %s16_s21  }
   0x2   : > { %p258_p1 = scmp.lt.s32.totalorder %s1097_s21, 3 }
   0x4   : > { %p259_p2 = pnand %p911_p0, %p258_p1 }
   0x5   : > { %p309_p3 = scmp.lt.s32.totalorder (!%p259_p2), %s907_s22, 1 }
   0x6   : > { %262 = sbr.rel (%p259_p2) target bundleno = 339 (0x153), region = 44 }
   0xd   : > { %s1207_s22 = smov (!%p309_p3, %s907_s22), 1 }
   0xe   : > { %s1046_s23 = smul.u32 192, %s1207_s22  ;;  %s321_s9 = scalar_lea.vmem %s1201_s2, %s1207_s22 }
   0xf   : > { %s1045_s27 = smul.u32 48, %s1207_s22  ;;  %v920_v32 = vld [vmem:[%s321_s9] ss:$0 sm:$0xff]  ;;  %s914_s10 = sshll.u32 %s1207_s22, 1 }
  0x10   : > { %s1148_s26 = scalar_lea.vmem %s1200_s1, %s1046_s23  ;;  %s961_s11 = sshll.u32 %s1207_s22, 4 }
  0x11   : > { %v1055_v0 = vld [vmem:[%s1148_s26 + $0x40] sm:$0xff]   ;;  %v1057_v2 = vld [vmem:[%s1148_s26 + $0x48] sm:$0xff]   ;;  %v1060_v5 = vld [vmem:[%s1148_s26 + $0x50] sm:$0xff]   ;;  %s313_s30 = scalar_lea.vmem %s1199_s0, %s1045_s27  ;;  %s325_s14 = scalar_lea.vmem %s1202_s3, %s914_s10 }
  0x12   : > { %v1056_v1 = vld [vmem:[%s1148_s26] sm:$0xff]   ;;  %987 = vmatprep.subr.bf16.mxu0 %v1055_v0  ;;  %v1059_v4 = vld [vmem:[%s1148_s26 + $0x8] sm:$0xff]   ;;  %v1062_v7 = vld [vmem:[%s1148_s26 + $0x10] sm:$0xff]   ;;  %s334_s17 = scalar_lea.vmem %s1204_s5, %s961_s11  ;;  %s329_s20 = scalar_lea.vmem %s1203_s4, %s914_s10 }
  0x13   : > { %988 = vmatpush3.bf16.msra.mxu0 %v1056_v1  ;;  %v1058_v3 = vld [vmem:[%s1148_s26 + $0x80] sm:$0xff]   ;;  %v1061_v6 = vld [vmem:[%s1148_s26 + $0x88] sm:$0xff]   ;;  %v1063_v8 = vld [vmem:[%s1148_s26 + $0x58] sm:$0xff]   ;;  %s339_s24 = scalar_lea.vmem %s1205_s6, %s961_s11 }
  0x14   : > { %989 = vmatprep.subr.bf16.mxu0 %v1057_v2  ;;  %1025 = vmatprep.subr.bf16.mxu1 %v1058_v3  ;;  %v1064_v9 = vld [vmem:[%s1148_s26 + $0x90] sm:$0xff]   ;;  %v1065_v10 = vld [vmem:[%s1148_s26 + $0x18] sm:$0xff]   ;;  %v1066_v11 = vld [vmem:[%s1148_s26 + $0x60] sm:$0xff]  }
  0x15   : > { %1026 = vmatpush3.bf16.msra.mxu1 %v1058_v3  ;;  %v1067_v12 = vld [vmem:[%s1148_s26 + $0x98] sm:$0xff]   ;;  %v1068_v13 = vld [vmem:[%s1148_s26 + $0x20] sm:$0xff]   ;;  %v1069_v15 = vld [vmem:[%s1148_s26 + $0x68] sm:$0xff]  }
  0x16   : > { %1027 = vmatprep.subr.bf16.mxu1 %v1061_v6  ;;  %v1070_v14 = vld [vmem:[%s1148_s26 + $0xa0] sm:$0xff]   ;;  %v1071_v16 = vld [vmem:[%s1148_s26 + $0x28] sm:$0xff]   ;;  %v1072_v18 = vld [vmem:[%s1148_s26 + $0x70] sm:$0xff]  }
  0x17   : > { %990 = vmatpush3.bf16.msra.mxu0 %v1059_v4  ;;  %v1073_v17 = vld [vmem:[%s1148_s26 + $0xa8] sm:$0xff]   ;;  %v1074_v19 = vld [vmem:[%s1148_s26 + $0x30] sm:$0xff]   ;;  %v1075_v20 = vld [vmem:[%s1148_s26 + $0x78] sm:$0xff]  }
  0x18   : > { %991 = vmatprep.subr.bf16.mxu0 %v1060_v5  ;;  %v1076_v21 = vld [vmem:[%s1148_s26 + $0xb0] sm:$0xff]   ;;  %v1077_v23 = vld [vmem:[%s1148_s26 + $0x38] sm:$0xff]   ;;  %v1078_v26 = vld [vmem:[%s313_s30] ss:$12 sps:$4 sm:$0xff]  }
  0x19   : > { %1028 = vmatpush3.bf16.msra.mxu1 %v1061_v6  ;;  %v1080_v22 = vld [vmem:[%s313_s30 + $0x4] ss:$12 sps:$4 sm:$0xff]   ;;  %v1082_v24 = vld [vmem:[%s313_s30 + $0x8] ss:$12 sps:$4 sm:$0xff]   ;;  %v1081_v25 = vld [vmem:[%s1148_s26 + $0xb8] sm:$0xff]  }
  0x1a   : > { %1029 = vmatprep.subr.bf16.mxu1 %v1064_v9  ;;  %612 = vmatprep.mubr.bf16.mxu0 %v1080_v22  ;;  %v1084_v27 = vld [vmem:[%s313_s30 + $0x1c] ss:$12 sps:$4 sm:$0xff]   ;;  %v1083_v28 = vld [vmem:[%s313_s30 + $0x20] ss:$12 sps:$4 sm:$0xff]   ;;  %v1086_v29 = vld [vmem:[%s313_s30 + $0x18] ss:$12 sps:$4 sm:$0xff]  }
  0x1b   : > { %992 = vmatpush3.bf16.msra.mxu0 %v1062_v7  ;;  %1041 = vmatprep.mubr.bf16.mxu1 %v1082_v24 }
  0x1c   : > { %993 = vmatprep.subr.bf16.mxu0 %v1063_v8 }
  0x1d   : > { %1030 = vmatpush3.bf16.msra.mxu1 %v1064_v9 }
  0x1e   : > { %1031 = vmatprep.subr.bf16.mxu1 %v1067_v12 }
  0x1f   : > { %994 = vmatpush3.bf16.msra.mxu0 %v1065_v10 }
  0x20   : > { %995 = vmatprep.subr.bf16.mxu0 %v1066_v11 }
  0x21   : > { %1032 = vmatpush3.bf16.msra.mxu1 %v1067_v12 }
  0x22   : > { %1033 = vmatprep.subr.bf16.mxu1 %v1070_v14 }
  0x23   : > { %996 = vmatpush3.bf16.msra.mxu0 %v1068_v13 }
  0x24   : > { %997 = vmatprep.subr.bf16.mxu0 %v1069_v15 }
  0x25   : > { %1034 = vmatpush3.bf16.msra.mxu1 %v1070_v14 }
  0x26   : > { %1035 = vmatprep.subr.bf16.mxu1 %v1073_v17 }
  0x27   : > { %998 = vmatpush3.bf16.msra.mxu0 %v1071_v16 }
  0x28   : > { %999 = vmatprep.subr.bf16.mxu0 %v1072_v18 }
  0x29   : > { %1036 = vmatpush3.bf16.msra.mxu1 %v1073_v17 }
  0x2a   : > { %1037 = vmatprep.subr.bf16.mxu1 %v1076_v21 }
  0x2b   : > { %1000 = vmatpush3.bf16.msra.mxu0 %v1074_v19 }
  0x2c   : > { %1001 = vmatprep.subr.bf16.mxu0 %v1075_v20 }
  0x2d   : > { %1038 = vmatpush3.bf16.msra.mxu1 %v1076_v21 }
  0x2e   : > { %1039 = vmatprep.subr.bf16.mxu1 %v1081_v25 }
  0x2f   : > { %1002 = vmatpush3.bf16.msra.mxu0 %v1077_v23 }
  0x31   : > { %1040 = vmatpush3.bf16.msra.mxu1 %v1081_v25 }
  0x32   : > { %613 = vmatmul.mubr.bf16.vlgmr.msra.gmra.mrb[0].mxu0 %v1078_v26 }
  0x33   : > { %620 = vmatprep.mubr.bf16.mxu0 %v1084_v27 }
  0x34   : > { %1042 = vmatmul.mubr.bf16.vlgmr.msra.gmra.mrb[0].mxu1 %v1083_v28 }
  0x3a   : > { %621 = vmatmul.mubr.bf16.gmra.mrb[4].mxu0 %v1086_v29 }
 0x105   : > { %v1003_v30 = vpop.f32.mrb[0].mxu0 }
 0x106   : > { %v1004_v31 = vpop.f32.mrb[1].mxu0 }
 0x107   : > { %v1005_v33 = vadd.f32 %v1004_v31, %v1003_v30  ;;  %v1006_v34 = vpop.f32.mrb[2].mxu0  ;;  %v1043_v36 = vpop.f32.mrb[0].mxu1 }
 0x108   : > { %v1007_v35 = vpop.f32.mrb[3].mxu0  ;;  %v663_v39 = vpop.f32.mrb[1].mxu1 }
 0x109   : > { %v1008_v37 = vadd.f32 %v1007_v35, %v1006_v34  ;;  %v615_v38 = vadd.f32 %v1005_v33, %v920_v32  ;;  %v1044_v40 = vpop.f32.mrb[2].mxu1  ;;  %v951_v34 = vld [vmem:[%s325_s14] ss:$0 sm:$0xff] }
 0x10a   : > { %v666_v43 = vpop.f32.mrb[3].mxu1  ;;  %v968_v35 = vld [vmem:[%s334_s17] sm:$0xff]  }
 0x10b   : > { %v664_v41 = vadd.f32 %v663_v39, %v615_v38  ;;  %v618_v42 = vadd.f32 %v1008_v37, %v920_v32  ;;  %v953_v38 = vld [vmem:[%s329_s20] ss:$0 sm:$0xff] }
 0x10d   : > { %v667_v44 = vadd.f32 %v666_v43, %v618_v42  ;;  %v1009_v45 = vpop.f32.mrb[4].mxu0  ;;  %v970_v42 = vunpack.c.h.bf16 %v968_v35 }
 0x10e   : > { %v1010_v46 = vpop.f32.mrb[5].mxu0 }
 0x10f   : > { %v678_v47 = vadd.f32 %v667_v44, %v664_v41  ;;  %v1011_v48 = vadd.f32 %v1010_v46, %v1009_v45  ;;  %v1012_v49 = vpop.f32.mrb[6].mxu0 }
 0x110   : > { %v1013_v50 = vpop.f32.mrb[7].mxu0 }
 0x111   : > { %v679_v51 = vrot.slane %v678_v47, 4  ;;  %v623_v52 = vadd.f32 %v1011_v48, %v920_v32  ;;  %v1014_v53 = vadd.f32 %v1013_v50, %v1012_v49  ;;  %v952_v48 = vld [vmem:[%s325_s14 + $0x1] ss:$0 sm:$0xff]  ;;  %v985_v49 = vld [vmem:[%s334_s17 + $0x8] sm:$0xff]  }
 0x113   : > { %v680_v54 = vadd.f32 %v679_v51, %v678_v47  ;;  %v672_v55 = vadd.f32 %v1043_v36, %v623_v52  ;;  %v626_v56 = vadd.f32 %v1014_v53, %v920_v32  ;;  %v954_v53 = vld [vmem:[%s329_s20 + $0x1] ss:$0 sm:$0xff] }
 0x115   : > { %v681_v57 = vrot.slane %v680_v54, 2  ;;  %v675_v58 = vadd.f32 %v1044_v40, %v626_v56 }
 0x117   : > { %v682_v59 = vadd.f32 %v681_v57, %v680_v54  ;;  %v685_v60 = vadd.f32 %v675_v58, %v672_v55  ;;  %v973_v54 = vunpack.c.l.bf16 %v985_v49  ;;  %v974_v57 = vunpack.c.h.bf16 %v985_v49 }
 0x119   : > { %v683_v61 = vrot.slane %v682_v59, 1  ;;  %v686_v62 = vrot.slane %v685_v60, 4 }
 0x11b   : > { %v684_v63 = vadd.f32 %v683_v61, %v682_v59  ;;  %v687_v0 = vadd.f32 %v686_v62, %v685_v60 }
 0x11d   : > { %v693_v1 = vmul.f32 0.0625, %v684_v63  ;;  %v688_v2 = vrot.slane %v687_v0, 2 }
 0x11f   : > { %v695_v3 = vsub.f32 %v664_v41, %v693_v1  ;;  %v696_v4 = vsub.f32 %v667_v44, %v693_v1  ;;  %v689_v5 = vadd.f32 %v688_v2, %v687_v0  ;;  %v969_v41 = vunpack.c.l.bf16 %v968_v35 }
 0x121   : > { %v699_v6 = vmul.f32 %v695_v3, %v695_v3  ;;  %v700_v7 = vmul.f32 %v696_v4, %v696_v4  ;;  %v690_v8 = vrot.slane %v689_v5, 1 }
 0x123   : > { %v703_v9 = vadd.f32 %v700_v7, %v699_v6  ;;  %v691_v10 = vadd.f32 %v690_v8, %v689_v5 }
 0x125   : > { %v704_v11 = vrot.slane %v703_v9, 4  ;;  %v694_v12 = vmul.f32 0.0625, %v691_v10 }
 0x127   : > { %v705_v13 = vadd.f32 %v704_v11, %v703_v9  ;;  %v697_v14 = vsub.f32 %v672_v55, %v694_v12  ;;  %v698_v15 = vsub.f32 %v675_v58, %v694_v12 }
 0x129   : > { %v706_v16 = vrot.slane %v705_v13, 2  ;;  %v701_v17 = vmul.f32 %v697_v14, %v697_v14  ;;  %v702_v18 = vmul.f32 %v698_v15, %v698_v15 }
 0x12b   : > { %v707_v19 = vadd.f32 %v706_v16, %v705_v13  ;;  %v710_v20 = vadd.f32 %v702_v18, %v701_v17 }
 0x12d   : > { %v708_v21 = vrot.slane %v707_v19, 1  ;;  %v711_v22 = vrot.slane %v710_v20, 4 }
 0x12f   : > { %v709_v23 = vadd.f32 %v708_v21, %v707_v19  ;;  %v712_v24 = vadd.f32 %v711_v22, %v710_v20 }
 0x131   : > { %v717_v25 = vmul.f32 0.0625, %v709_v23  ;;  %v713_v26 = vrot.slane %v712_v24, 2 }
 0x133   : > { %v719_v27 = vadd.f32 1e-05, %v717_v25  ;;  %v714_v28 = vadd.f32 %v713_v26, %v712_v24 }
 0x135   : > { %1087 = vrsqrt.f32 %v719_v27  ;;  %v715_v29 = vrot.slane %v714_v28, 1 }
 0x137   : > { %v716_v30 = vadd.f32 %v715_v29, %v714_v28 }
 0x139   : > { %v718_v31 = vmul.f32 0.0625, %v716_v30 }
 0x13b   : > { %v720_v32 = vadd.f32 1e-05, %v718_v31 }
 0x13d   : > { %1089 = vrsqrt.f32 %v720_v32 }
 0x13f   : > { %v1088_v33 = vpop.eup %1087 }
 0x140   : > { %v723_v36 = vmul.f32 %v1088_v33, %v695_v3  ;;  %v724_v37 = vmul.f32 %v1088_v33, %v696_v4 }
 0x142   : > { %v741_v39 = vmul.f32 %v951_v34, %v723_v36  ;;  %v742_v40 = vmul.f32 %v951_v34, %v724_v37 }
 0x144   : > { %v759_v43 = vadd.f32 %v953_v38, %v741_v39  ;;  %v760_v44 = vadd.f32 %v953_v38, %v742_v40 }
 0x146   : > { %v771_v45 = vadd.f32 %v969_v41, %v759_v43  ;;  %v772_v46 = vadd.f32 %v970_v42, %v760_v44 }
 0x147   : > { %v1090_v47 = vpop.eup %1089 }
 0x148   : > { %v978_v50 = vpack.c.bf16 %v772_v46, %v771_v45  ;;  %v725_v51 = vmul.f32 %v1090_v47, %v697_v14  ;;  %v726_v52 = vmul.f32 %v1090_v47, %v698_v15 }
 0x14a   : > { %979 = vst [vmem:[%s339_s24] sm:$0xff] %v978_v50   ;;  %v743_v55 = vmul.f32 %v952_v48, %v725_v51  ;;  %v744_v56 = vmul.f32 %v952_v48, %v726_v52 }
 0x14c   : > { %v761_v58 = vadd.f32 %v954_v53, %v743_v55  ;;  %v762_v59 = vadd.f32 %v954_v53, %v744_v56 }
 0x14e   : > { %v773_v60 = vadd.f32 %v973_v54, %v761_v58  ;;  %v774_v61 = vadd.f32 %v974_v57, %v762_v59 }
 0x150   : > { %v983_v62 = vpack.c.bf16 %v774_v61, %v773_v60 }
 0x152   : > { %986 = vst [vmem:[%s339_s24 + $0x8] sm:$0xff] %v983_v62  }
 0x153 PF: > { %s16_s21 = sadd.s32 1, %s1097_s21  }
 0x154   : > { %p13_p4 = scmp.ge.s32.totalorder %s16_s21, 4  }
 0x156   :  { %15 = sbr.rel (!%p13_p4) target bundleno = 1 (0x1), region = 89 }

// kernel: munit_forward.25
= control target key start
LH: loop header
LB: loop body
LE: loop exit
PB: predicated region body
PF: predicated region fallthrough
CT: control target
= control target key end

     0   :  { %s2567_s18 = smov 0   ;;  %s3024_s0 = inlined_call_operand.vmem [shape: bf16[2,128,896], index: 0, kind: input, shape index: {}]   ;;  %s3025_s1 = inlined_call_operand.vmem [shape: bf16[2,896,128], index: 1, kind: input, shape index: {}]   ;;  %s3026_s2 = inlined_call_operand.vmem [shape: f32[2,1,128], index: 2, kind: input, shape index: {}]   ;;  %s3027_s3 = inlined_call_operand.vmem [shape: f32[2,1,128], index: 3, kind: input, shape index: {}]   ;;  %s3028_s4 = inlined_call_operand.vmem [shape: f32[2,1,128], index: 4, kind: input, shape index: {}]   ;;  %s3029_s5 = inlined_call_operand.vmem [shape: bf16[2,128,128], index: 5, kind: output, shape index: {}]  }
   0x1 LB: > { %s1930_s19 = sadd.s32 4294967295, %s2535_s18   ;;  %p1934_p0 = scmp.ge.s32.totalorder %s2535_s18, 1  ;;  %s2535_s18 = sphi %s2567_s18, %s15_s18  }
   0x2   : > { %p221_p1 = scmp.lt.s32.totalorder %s2535_s18, 3 }
   0x4   : > { %p222_p2 = pnand %p1934_p0, %p221_p1 }
   0x5   : > { %p263_p3 = scmp.lt.s32.totalorder (!%p222_p2), %s1930_s19, 1 }
   0x6   : > { %225 = sbr.rel (%p222_p2) target bundleno = 785 (0x311), region = 40 }
   0xd   : > { %s3031_s19 = smov (!%p263_p3, %s1930_s19), 1 }
   0xe   : > { %s2376_s20 = smul.u32 448, %s3031_s19  ;;  %s275_s29 = scalar_lea.vmem %s3026_s2, %s3031_s19 }
   0xf   : > { %s278_s7 = scalar_lea.vmem %s3027_s3, %s3031_s19  ;;  %s281_s10 = scalar_lea.vmem %s3028_s4, %s3031_s19 }
  0x10   : > { %s2583_s23 = scalar_lea.vmem %s3025_s1, %s2376_s20  ;;  %s2619_s26 = scalar_lea.vmem %s3024_s0, %s2376_s20 }
  0x11   : > { %v2385_v0 = vld [vmem:[%s2583_s23 + $0x40] sm:$0xff]   ;;  %v2389_v4 = vld [vmem:[%s2583_s23 + $0x48] sm:$0xff]   ;;  %v2393_v8 = vld [vmem:[%s2583_s23 + $0x50] sm:$0xff]   ;;  %s2072_s11 = sshll.u32 %s3031_s19, 6 }
  0x12   : > { %v2386_v1 = vld [vmem:[%s2583_s23] sm:$0xff]   ;;  %2136 = vmatprep.subr.bf16.mxu0 %v2385_v0  ;;  %v2390_v5 = vld [vmem:[%s2583_s23 + $0x8] sm:$0xff]   ;;  %v2394_v9 = vld [vmem:[%s2583_s23 + $0x10] sm:$0xff]   ;;  %s2987_s14 = scalar_lea.vmem %s3029_s5, %s2072_s11 }
  0x13   : > { %v2387_v2 = vld [vmem:[%s2583_s23 + $0xc0] sm:$0xff]   ;;  %2137 = vmatpush3.bf16.msra.mxu0 %v2386_v1  ;;  %v2391_v6 = vld [vmem:[%s2583_s23 + $0xc8] sm:$0xff]   ;;  %v2395_v10 = vld [vmem:[%s2583_s23 + $0xd0] sm:$0xff]  }
  0x14   : > { %v2388_v3 = vld [vmem:[%s2583_s23 + $0x80] sm:$0xff]   ;;  %2200 = vmatprep.subr.bf16.mxu1 %v2387_v2  ;;  %2138 = vmatprep.subr.bf16.mxu0 %v2389_v4  ;;  %v2392_v7 = vld [vmem:[%s2583_s23 + $0x88] sm:$0xff]   ;;  %v2396_v11 = vld [vmem:[%s2583_s23 + $0x90] sm:$0xff]  }
  0x15   : > { %2201 = vmatpush3.bf16.msra.mxu1 %v2388_v3  ;;  %v2397_v12 = vld [vmem:[%s2583_s23 + $0x58] sm:$0xff]   ;;  %v2401_v16 = vld [vmem:[%s2583_s23 + $0x60] sm:$0xff]   ;;  %v2405_v20 = vld [vmem:[%s2583_s23 + $0x68] sm:$0xff]  }
  0x16   : > { %2202 = vmatprep.subr.bf16.mxu1 %v2391_v6  ;;  %v2398_v13 = vld [vmem:[%s2583_s23 + $0x18] sm:$0xff]   ;;  %v2402_v17 = vld [vmem:[%s2583_s23 + $0x20] sm:$0xff]   ;;  %v2406_v21 = vld [vmem:[%s2583_s23 + $0x28] sm:$0xff]  }
  0x17   : > { %2139 = vmatpush3.bf16.msra.mxu0 %v2390_v5  ;;  %v2399_v14 = vld [vmem:[%s2583_s23 + $0xd8] sm:$0xff]   ;;  %v2403_v18 = vld [vmem:[%s2583_s23 + $0xe0] sm:$0xff]   ;;  %v2407_v22 = vld [vmem:[%s2583_s23 + $0xe8] sm:$0xff]  }
  0x18   : > { %2140 = vmatprep.subr.bf16.mxu0 %v2393_v8  ;;  %v2400_v15 = vld [vmem:[%s2583_s23 + $0x98] sm:$0xff]   ;;  %v2404_v19 = vld [vmem:[%s2583_s23 + $0xa0] sm:$0xff]   ;;  %v2408_v23 = vld [vmem:[%s2583_s23 + $0xa8] sm:$0xff]  }
  0x19   : > { %2203 = vmatpush3.bf16.msra.mxu1 %v2392_v7  ;;  %v2409_v24 = vld [vmem:[%s2583_s23 + $0x70] sm:$0xff]   ;;  %v2413_v28 = vld [vmem:[%s2583_s23 + $0x78] sm:$0xff]   ;;  %v2418_v32 = vld [vmem:[%s2619_s26 + $0x4] ss:$28 sps:$4 sm:$0xff]  }
  0x1a   : > { %2204 = vmatprep.subr.bf16.mxu1 %v2395_v10  ;;  %v2410_v25 = vld [vmem:[%s2583_s23 + $0x30] sm:$0xff]   ;;  %v2414_v29 = vld [vmem:[%s2583_s23 + $0x38] sm:$0xff]   ;;  %1127 = vmatprep.mubr.bf16.mxu0 %v2418_v32  ;;  %v2420_v34 = vld [vmem:[%s2583_s23 + $0x140] sm:$0xff]  }
  0x1b   : > { %2141 = vmatpush3.bf16.msra.mxu0 %v2394_v9  ;;  %v2411_v26 = vld [vmem:[%s2583_s23 + $0xf0] sm:$0xff]   ;;  %v2415_v30 = vld [vmem:[%s2583_s23 + $0xf8] sm:$0xff]   ;;  %v2421_v35 = vld [vmem:[%s2619_s26 + $0x8] ss:$28 sps:$4 sm:$0xff]  }
  0x1c   : > { %2142 = vmatprep.subr.bf16.mxu0 %v2397_v12  ;;  %v2412_v27 = vld [vmem:[%s2583_s23 + $0xb0] sm:$0xff]   ;;  %v2416_v31 = vld [vmem:[%s2619_s26] ss:$28 sps:$4 sm:$0xff]   ;;  %v2423_v36 = vld [vmem:[%s2619_s26 + $0xc] ss:$28 sps:$4 sm:$0xff]  }
  0x1d   : > { %2205 = vmatpush3.bf16.msra.mxu1 %v2396_v11  ;;  %v2419_v33 = vld [vmem:[%s2583_s23 + $0xb8] sm:$0xff]   ;;  %v2424_v37 = vld [vmem:[%s2583_s23 + $0x100] sm:$0xff]   ;;  %1224 = vmatprep.mubr.bf16.mxu1 %v2423_v36  ;;  %v2428_v40 = vld [vmem:[%s2583_s23 + $0x148] sm:$0xff]  }
  0x1e   : > { %2206 = vmatprep.subr.bf16.mxu1 %v2399_v14  ;;  %v2425_v38 = vld [vmem:[%s2619_s26 + $0x3c] ss:$28 sps:$4 sm:$0xff]   ;;  %v2429_v41 = vld [vmem:[%s2619_s26 + $0x44] ss:$28 sps:$4 sm:$0xff]   ;;  %v2431_v42 = vld [vmem:[%s2583_s23 + $0x108] sm:$0xff]  }
  0x1f   : > { %2143 = vmatpush3.bf16.msra.mxu0 %v2398_v13  ;;  %v2427_v39 = vld [vmem:[%s2619_s26 + $0x38] ss:$28 sps:$4 sm:$0xff]   ;;  %v2432_v43 = vld [vmem:[%s2619_s26 + $0x40] ss:$28 sps:$4 sm:$0xff]   ;;  %v2435_v49 = vld [vmem:[%s2619_s26 + $0x70] ss:$28 sps:$4 sm:$0xff]  }
  0x20   : > { %2144 = vmatprep.subr.bf16.mxu0 %v2401_v16  ;;  %v2433_v44 = vld [vmem:[%s2619_s26 + $0x74] ss:$28 sps:$4 sm:$0xff]   ;;  %v2437_v46 = vld [vmem:[%s2619_s26 + $0x7c] ss:$28 sps:$4 sm:$0xff]   ;;  %v2441_v48 = vld [vmem:[%s2583_s23 + $0x180] sm:$0xff]  }
  0x21   : > { %2207 = vmatpush3.bf16.msra.mxu1 %v2400_v15  ;;  %v2436_v45 = vld [vmem:[%s2583_s23 + $0x150] sm:$0xff]   ;;  %v2442_v50 = vld [vmem:[%s2619_s26 + $0xac] ss:$28 sps:$4 sm:$0xff]   ;;  %v2445_v51 = vld [vmem:[%s2583_s23 + $0x158] sm:$0xff]  }
  0x22   : > { %2208 = vmatprep.subr.bf16.mxu1 %v2403_v18  ;;  %v2439_v47 = vld [vmem:[%s2583_s23 + $0x110] sm:$0xff]   ;;  %v2448_v54 = vld [vmem:[%s2583_s23 + $0x118] sm:$0xff]   ;;  %v2450_v55 = vld [vmem:[%s2583_s23 + $0x188] sm:$0xff]  }
  0x23   : > { %2145 = vmatpush3.bf16.msra.mxu0 %v2402_v17  ;;  %v2440_v52 = vld [vmem:[%s2619_s26 + $0x78] ss:$28 sps:$4 sm:$0xff]   ;;  %v2444_v56 = vld [vmem:[%s2619_s26 + $0xa8] ss:$28 sps:$4 sm:$0xff]   ;;  %v2449_v60 = vld [vmem:[%s2619_s26 + $0xb0] ss:$28 sps:$4 sm:$0xff]  }
  0x24   : > { %2146 = vmatprep.subr.bf16.mxu0 %v2405_v20  ;;  %v2446_v53 = vld [vmem:[%s2619_s26 + $0xb4] ss:$28 sps:$4 sm:$0xff]   ;;  %v2454_v57 = vld [vmem:[%s2583_s23 + $0x160] sm:$0xff]   ;;  %v2455_v62 = vld [vmem:[%s2619_s26 + $0xec] ss:$28 sps:$4 sm:$0xff]  }
  0x25   : > { %2209 = vmatpush3.bf16.msra.mxu1 %v2404_v19  ;;  %v2451_v58 = vld [vmem:[%s2619_s26 + $0xe4] ss:$28 sps:$4 sm:$0xff]   ;;  %v2459_v61 = vld [vmem:[%s2583_s23 + $0x190] sm:$0xff]   ;;  %v2463_v63 = vld [vmem:[%s2583_s23 + $0x168] sm:$0xff]  }
  0x26   : > { %2210 = vmatprep.subr.bf16.mxu1 %v2407_v22  ;;  %v2457_v59 = vld [vmem:[%s2583_s23 + $0x120] sm:$0xff]   ;;  %v2466_v1 = vld [vmem:[%s2583_s23 + $0x128] sm:$0xff]   ;;  %v2468_v2 = vld [vmem:[%s2583_s23 + $0x198] sm:$0xff]  }
  0x27   : > { %2147 = vmatpush3.bf16.msra.mxu0 %v2406_v21  ;;  %v2453_v0 = vld [vmem:[%s2619_s26 + $0xe0] ss:$28 sps:$4 sm:$0xff]   ;;  %v2458_v4 = vld [vmem:[%s2619_s26 + $0xe8] ss:$28 sps:$4 sm:$0xff]   ;;  %v2472_v5 = vld [vmem:[%s2583_s23 + $0x170] sm:$0xff]  }
  0x28   : > { %2148 = vmatprep.subr.bf16.mxu0 %v2409_v24  ;;  %v2460_v3 = vld [vmem:[%s2619_s26 + $0x11c] ss:$28 sps:$4 sm:$0xff]   ;;  %v2464_v6 = vld [vmem:[%s2619_s26 + $0x124] ss:$28 sps:$4 sm:$0xff]   ;;  %v2475_v7 = vld [vmem:[%s2583_s23 + $0x130] sm:$0xff]  }
  0x29   : > { %2211 = vmatpush3.bf16.msra.mxu1 %v2408_v23  ;;  %v2477_v8 = vld [vmem:[%s2583_s23 + $0x1a0] sm:$0xff]   ;;  %v2462_v9 = vld [vmem:[%s2619_s26 + $0x118] ss:$28 sps:$4 sm:$0xff]   ;;  %v2482_v12 = vld [vmem:[%s2583_s23 + $0x1a8] sm:$0xff]  }
  0x2a   : > { %2212 = vmatprep.subr.bf16.mxu1 %v2411_v26  ;;  %v2469_v10 = vld [vmem:[%s2619_s26 + $0x154] ss:$28 sps:$4 sm:$0xff]   ;;  %v2481_v11 = vld [vmem:[%s2583_s23 + $0x178] sm:$0xff]   ;;  %v2478_v19 = vld [vmem:[%s2619_s26 + $0x18c] ss:$28 sps:$4 sm:$0xff]  }
  0x2b   : > { %2149 = vmatpush3.bf16.msra.mxu0 %v2410_v25  ;;  %v2467_v13 = vld [vmem:[%s2619_s26 + $0x120] ss:$28 sps:$4 sm:$0xff]   ;;  %v2487_v16 = vld [vmem:[%s2583_s23 + $0x1b0] sm:$0xff]   ;;  %v2480_v22 = vld [vmem:[%s2619_s26 + $0x188] ss:$28 sps:$4 sm:$0xff]  }
  0x2c   : > { %2150 = vmatprep.subr.bf16.mxu0 %v2413_v28  ;;  %v2485_v14 = vld [vmem:[%s2583_s23 + $0x138] sm:$0xff]   ;;  %v2471_v18 = vld [vmem:[%s2619_s26 + $0x150] ss:$28 sps:$4 sm:$0xff]  }
  0x2d   : > { %2213 = vmatpush3.bf16.msra.mxu1 %v2412_v27  ;;  %v2473_v15 = vld [vmem:[%s2619_s26 + $0x15c] ss:$28 sps:$4 sm:$0xff]   ;;  %v2483_v21 = vld [vmem:[%s2619_s26 + $0x194] ss:$28 sps:$4 sm:$0xff]   ;;  %v2494_v27 = vld [vmem:[%s2619_s26 + $0x4c] ss:$28 sps:$4 sm:$0xff]  }
  0x2e   : > { %2214 = vmatprep.subr.bf16.mxu1 %v2415_v30  ;;  %v2491_v17 = vld [vmem:[%s2583_s23 + $0x1b8] sm:$0xff]   ;;  %v2490_v23 = vld [vmem:[%s2619_s26 + $0x14] ss:$28 sps:$4 sm:$0xff]   ;;  %v2496_v30 = vld [vmem:[%s2619_s26 + $0x48] ss:$28 sps:$4 sm:$0xff]  }
  0x2f   : > { %2151 = vmatpush3.bf16.msra.mxu0 %v2414_v29  ;;  %v2476_v20 = vld [vmem:[%s2619_s26 + $0x158] ss:$28 sps:$4 sm:$0xff]   ;;  %v2486_v24 = vld [vmem:[%s2619_s26 + $0x190] ss:$28 sps:$4 sm:$0xff]   ;;  %v2500_v29 = vld [vmem:[%s2619_s26 + $0x88] ss:$28 sps:$4 sm:$0xff]  }
  0x30   : > { %2264 = vmatprep.subr.bf16.mxu0 %v2420_v34  ;;  %v2492_v25 = vld [vmem:[%s2619_s26 + $0x18] ss:$28 sps:$4 sm:$0xff]   ;;  %v2488_v26 = vld [vmem:[%s2619_s26 + $0x10] ss:$28 sps:$4 sm:$0xff]   ;;  %v2501_v32 = vld [vmem:[%s2619_s26 + $0xc0] ss:$28 sps:$4 sm:$0xff]  }
  0x31   : > { %2215 = vmatpush3.bf16.msra.mxu1 %v2419_v33  ;;  %v2493_v28 = vld [vmem:[%s2619_s26 + $0x50] ss:$28 sps:$4 sm:$0xff]   ;;  %v2508_v33 = vld [vmem:[%s2619_s26 + $0xf8] ss:$28 sps:$4 sm:$0xff]   ;;  %v2499_v34 = vld [vmem:[%s2619_s26 + $0x80] ss:$28 sps:$4 sm:$0xff]  }
  0x32   : > { %1128 = vmatmul.mubr.bf16.vlgmr.msra.gmra.mrb[0].mxu0 %v2416_v31  ;;  %2344 = vmatprep.subr.bf16.mxu1 %v2441_v48  ;;  %v2497_v31 = vld [vmem:[%s2619_s26 + $0x84] ss:$28 sps:$4 sm:$0xff]   ;;  %v2509_v36 = vld [vmem:[%s2619_s26 + $0x130] ss:$28 sps:$4 sm:$0xff]  }
  0x33   : > { %2265 = vmatpush3.bf16.msra.mxu0 %v2424_v37  ;;  %1135 = vmatprep.mubr.bf16.mxu0 %v2425_v38  ;;  %v2516_v37 = vld [vmem:[%s2619_s26 + $0x168] ss:$28 sps:$4 sm:$0xff]   ;;  %v2504_v38 = vld [vmem:[%s2619_s26 + $0xb8] ss:$28 sps:$4 sm:$0xff]  }
  0x34   : > { %1225 = vmatmul.mubr.bf16.vlgmr.msra.gmra.mrb[0].mxu1 %v2421_v35  ;;  %2266 = vmatprep.subr.bf16.mxu0 %v2428_v40  ;;  %v2502_v35 = vld [vmem:[%s2619_s26 + $0xbc] ss:$28 sps:$4 sm:$0xff]  }
  0x35   : > { %1232 = vmatprep.mubr.bf16.mxu1 %v2429_v41  ;;  %2345 = vmatpush3.bf16.msra.mxu1 %v2441_v48  ;;  %v2517_v40 = vld [vmem:[%s2619_s26 + $0x1a0] ss:$28 sps:$4 sm:$0xff]   ;;  %v2507_v41 = vld [vmem:[%s2619_s26 + $0xf0] ss:$28 sps:$4 sm:$0xff]  }
  0x36   : > { %2346 = vmatprep.subr.bf16.mxu1 %v2450_v55 }
  0x37   : > { %2267 = vmatpush3.bf16.msra.mxu0 %v2431_v42  ;;  %v2510_v42 = vld [vmem:[%s2619_s26 + $0x12c] ss:$28 sps:$4 sm:$0xff]  }
  0x38   : > { %2268 = vmatprep.subr.bf16.mxu0 %v2436_v45  ;;  %v2515_v45 = vld [vmem:[%s2619_s26 + $0x160] ss:$28 sps:$4 sm:$0xff]  }
  0x39   : > { %2347 = vmatpush3.bf16.msra.mxu1 %v2450_v55 }
  0x3a   : > { %1136 = vmatmul.mubr.bf16.gmra.mrb[4].mxu0 %v2427_v39  ;;  %2348 = vmatprep.subr.bf16.mxu1 %v2459_v61  ;;  %v2505_v39 = vld [vmem:[%s2619_s26 + $0xf4] ss:$28 sps:$4 sm:$0xff]  }
  0x3b   : > { %1143 = vmatprep.mubr.bf16.mxu0 %v2433_v44  ;;  %2269 = vmatpush3.bf16.msra.mxu0 %v2439_v47  ;;  %v2513_v44 = vld [vmem:[%s2619_s26 + $0x164] ss:$28 sps:$4 sm:$0xff]   ;;  %v2520_v47 = vld [vmem:[%s2619_s26 + $0x198] ss:$28 sps:$4 sm:$0xff]  }
  0x3c   : > { %1233 = vmatmul.mubr.bf16.gmra.mrb[4].mxu1 %v2432_v43  ;;  %2270 = vmatprep.subr.bf16.mxu0 %v2445_v51  ;;  %v2512_v43 = vld [vmem:[%s2619_s26 + $0x128] ss:$28 sps:$4 sm:$0xff]  }
  0x3d   : > { %1240 = vmatprep.mubr.bf16.mxu1 %v2437_v46  ;;  %2349 = vmatpush3.bf16.msra.mxu1 %v2459_v61  ;;  %v2518_v46 = vld [vmem:[%s2619_s26 + $0x19c] ss:$28 sps:$4 sm:$0xff]  }
  0x3e   : > { %2350 = vmatprep.subr.bf16.mxu1 %v2468_v2 }
  0x3f   : > { %2271 = vmatpush3.bf16.msra.mxu0 %v2448_v54 }
  0x40   : > { %2272 = vmatprep.subr.bf16.mxu0 %v2454_v57 }
  0x41   : > { %2351 = vmatpush3.bf16.msra.mxu1 %v2468_v2 }
  0x42   : > { %1144 = vmatmul.mubr.bf16.gmra.mrb[8].mxu0 %v2435_v49  ;;  %2352 = vmatprep.subr.bf16.mxu1 %v2477_v8  ;;  %v2708_v49 = vld [vmem:[%s275_s29] ss:$0 sm:$0xff] }
  0x43   : > { %1151 = vmatprep.mubr.bf16.mxu0 %v2442_v50  ;;  %2273 = vmatpush3.bf16.msra.mxu0 %v2457_v59 }
  0x44   : > { %1241 = vmatmul.mubr.bf16.gmra.mrb[8].mxu1 %v2440_v52  ;;  %2274 = vmatprep.subr.bf16.mxu0 %v2463_v63 }
  0x45   : > { %1248 = vmatprep.mubr.bf16.mxu1 %v2446_v53  ;;  %2353 = vmatpush3.bf16.msra.mxu1 %v2477_v8 }
  0x46   : > { %2354 = vmatprep.subr.bf16.mxu1 %v2482_v12 }
  0x47   : > { %2275 = vmatpush3.bf16.msra.mxu0 %v2466_v1 }
  0x48   : > { %2276 = vmatprep.subr.bf16.mxu0 %v2472_v5 }
  0x49   : > { %2355 = vmatpush3.bf16.msra.mxu1 %v2482_v12 }
  0x4a   : > { %1152 = vmatmul.mubr.bf16.gmra.mrb[12].mxu0 %v2444_v56  ;;  %2356 = vmatprep.subr.bf16.mxu1 %v2487_v16 }
  0x4b   : > { %1159 = vmatprep.mubr.bf16.mxu0 %v2451_v58  ;;  %2277 = vmatpush3.bf16.msra.mxu0 %v2475_v7 }
  0x4c   : > { %1249 = vmatmul.mubr.bf16.gmra.mrb[12].mxu1 %v2449_v60  ;;  %2278 = vmatprep.subr.bf16.mxu0 %v2481_v11 }
  0x4d   : > { %1256 = vmatprep.mubr.bf16.mxu1 %v2455_v62  ;;  %2357 = vmatpush3.bf16.msra.mxu1 %v2487_v16 }
  0x4e   : > { %2358 = vmatprep.subr.bf16.mxu1 %v2491_v17 }
  0x4f   : > { %2279 = vmatpush3.bf16.msra.mxu0 %v2485_v14 }
  0x51   : > { %2359 = vmatpush3.bf16.msra.mxu1 %v2491_v17 }
  0x52   : > { %1160 = vmatmul.mubr.bf16.gmra.mrb[16].mxu0 %v2453_v0 }
  0x53   : > { %1167 = vmatprep.mubr.bf16.mxu0 %v2460_v3 }
  0x54   : > { %1257 = vmatmul.mubr.bf16.gmra.mrb[16].mxu1 %v2458_v4 }
  0x55   : > { %1264 = vmatprep.mubr.bf16.mxu1 %v2464_v6 }
  0x5a   : > { %1168 = vmatmul.mubr.bf16.gmra.mrb[20].mxu0 %v2462_v9 }
  0x5b   : > { %1175 = vmatprep.mubr.bf16.mxu0 %v2469_v10 }
  0x5c   : > { %1265 = vmatmul.mubr.bf16.gmra.mrb[20].mxu1 %v2467_v13 }
  0x5d   : > { %1272 = vmatprep.mubr.bf16.mxu1 %v2473_v15 }
  0x62   : > { %1176 = vmatmul.mubr.bf16.gmra.mrb[24].mxu0 %v2471_v18 }
  0x63   : > { %1183 = vmatprep.mubr.bf16.mxu0 %v2478_v19 }
  0x64   : > { %1273 = vmatmul.mubr.bf16.gmra.mrb[24].mxu1 %v2476_v20 }
  0x65   : > { %1280 = vmatprep.mubr.bf16.mxu1 %v2483_v21 }
  0x6a   : > { %1184 = vmatmul.mubr.bf16.gmra.mrb[28].mxu0 %v2480_v22 }
  0x6b   : > { %1321 = vmatprep.mubr.bf16.mxu0 %v2490_v23 }
  0x6c   : > { %1281 = vmatmul.mubr.bf16.gmra.mrb[28].mxu1 %v2486_v24 }
  0x6d   : > { %2360 = vmatprep.mubr.bf16.mxu1 %v2492_v25 }
  0x72   : > { %1322 = vmatmul.mubr.bf16.vlgmr.msra.gmra.mrb[32].mxu0 %v2488_v26 }
  0x73   : > { %1329 = vmatprep.mubr.bf16.mxu0 %v2494_v27 }
  0x74   : > { %2361 = vmatmul.mubr.bf16.vlgmr.msra.gmra.mrb[32].mxu1 %v2493_v28 }
  0x75   : > { %2364 = vmatprep.mubr.bf16.mxu1 %v2500_v29 }
  0x7a   : > { %1330 = vmatmul.mubr.bf16.gmra.mrb[36].mxu0 %v2496_v30 }
  0x7b   : > { %1337 = vmatprep.mubr.bf16.mxu0 %v2497_v31 }
  0x7c   : > { %2365 = vmatmul.mubr.bf16.gmra.mrb[36].mxu1 %v2501_v32 }
  0x7d   : > { %2368 = vmatprep.mubr.bf16.mxu1 %v2508_v33 }
  0x82   : > { %1338 = vmatmul.mubr.bf16.gmra.mrb[40].mxu0 %v2499_v34 }
  0x83   : > { %1345 = vmatprep.mubr.bf16.mxu0 %v2502_v35 }
  0x84   : > { %2369 = vmatmul.mubr.bf16.gmra.mrb[40].mxu1 %v2509_v36 }
  0x85   : > { %2372 = vmatprep.mubr.bf16.mxu1 %v2516_v37 }
  0x8a   : > { %1346 = vmatmul.mubr.bf16.gmra.mrb[44].mxu0 %v2504_v38 }
  0x8b   : > { %1353 = vmatprep.mubr.bf16.mxu0 %v2505_v39 }
  0x8c   : > { %2373 = vmatmul.mubr.bf16.gmra.mrb[44].mxu1 %v2517_v40 }
  0x92   : > { %1354 = vmatmul.mubr.bf16.gmra.mrb[48].mxu0 %v2507_v41 }
  0x93   : > { %1361 = vmatprep.mubr.bf16.mxu0 %v2510_v42 }
  0x9a   : > { %1362 = vmatmul.mubr.bf16.gmra.mrb[52].mxu0 %v2512_v43 }
  0x9b   : > { %1369 = vmatprep.mubr.bf16.mxu0 %v2513_v44 }
  0xa2   : > { %1370 = vmatmul.mubr.bf16.gmra.mrb[56].mxu0 %v2515_v45 }
  0xa3   : > { %1377 = vmatprep.mubr.bf16.mxu0 %v2518_v46 }
  0xaa   : > { %1378 = vmatmul.mubr.bf16.gmra.mrb[60].mxu0 %v2520_v47 }
 0x105   : > { %v2152_v48 = vpop.f32.mrb[0].mxu0 }
 0x106   : > { %v2153_v50 = vpop.f32.mrb[1].mxu0 }
 0x107   : > { %v2154_v51 = vadd.f32 %v2153_v50, %v2152_v48  ;;  %v2155_v52 = vpop.f32.mrb[2].mxu0  ;;  %v2216_v53 = vpop.f32.mrb[0].mxu1 }
 0x108   : > { %v2156_v54 = vpop.f32.mrb[3].mxu0  ;;  %v2217_v57 = vpop.f32.mrb[1].mxu1 }
 0x109   : > { %v1130_v55 = vadd.f32 %v2154_v51, %v2708_v49  ;;  %v2157_v56 = vadd.f32 %v2156_v54, %v2155_v52  ;;  %v2218_v58 = vadd.f32 %v2217_v57, %v2216_v53  ;;  %v2219_v59 = vpop.f32.mrb[2].mxu1 }
 0x10a   : > { %v2220_v61 = vpop.f32.mrb[3].mxu1 }
 0x10b   : > { %v1133_v60 = vadd.f32 %v2157_v56, %v2708_v49  ;;  %v2712_v62 = vadd.f32 %v2218_v58, %v1130_v55  ;;  %v2221_v63 = vadd.f32 %v2220_v61, %v2219_v59 }
 0x10d   : > { %v2158_v0 = vpop.f32.mrb[4].mxu0  ;;  %v2714_v1 = vadd.f32 %v2221_v63, %v1133_v60 }
 0x10e   : > { %v2159_v2 = vpop.f32.mrb[5].mxu0 }
 0x10f   : > { %v2160_v3 = vadd.f32 %v2159_v2, %v2158_v0  ;;  %v2161_v4 = vpop.f32.mrb[6].mxu0  ;;  %v2222_v5 = vpop.f32.mrb[4].mxu1 }
 0x110   : > { %v2162_v6 = vpop.f32.mrb[7].mxu0  ;;  %v2223_v9 = vpop.f32.mrb[5].mxu1 }
 0x111   : > { %v1138_v7 = vadd.f32 %v2160_v3, %v2708_v49  ;;  %v2163_v8 = vadd.f32 %v2162_v6, %v2161_v4  ;;  %v2224_v10 = vadd.f32 %v2223_v9, %v2222_v5  ;;  %v2225_v11 = vpop.f32.mrb[6].mxu1 }
 0x112   : > { %v2226_v13 = vpop.f32.mrb[7].mxu1 }
 0x113   : > { %v1141_v12 = vadd.f32 %v2163_v8, %v2708_v49  ;;  %v2718_v14 = vadd.f32 %v2224_v10, %v1138_v7  ;;  %v2227_v15 = vadd.f32 %v2226_v13, %v2225_v11 }
 0x115   : > { %v2164_v16 = vpop.f32.mrb[8].mxu0  ;;  %v2720_v17 = vadd.f32 %v2227_v15, %v1141_v12 }
 0x116   : > { %v2165_v18 = vpop.f32.mrb[9].mxu0 }
 0x117   : > { %v2166_v19 = vadd.f32 %v2165_v18, %v2164_v16  ;;  %v2167_v20 = vpop.f32.mrb[10].mxu0  ;;  %v2228_v21 = vpop.f32.mrb[8].mxu1 }
 0x118   : > { %v2168_v22 = vpop.f32.mrb[11].mxu0  ;;  %v2229_v25 = vpop.f32.mrb[9].mxu1 }
 0x119   : > { %v1146_v23 = vadd.f32 %v2166_v19, %v2708_v49  ;;  %v2169_v24 = vadd.f32 %v2168_v22, %v2167_v20  ;;  %v2230_v26 = vadd.f32 %v2229_v25, %v2228_v21  ;;  %v2231_v27 = vpop.f32.mrb[10].mxu1 }
 0x11a   : > { %v2232_v29 = vpop.f32.mrb[11].mxu1 }
 0x11b   : > { %v1149_v28 = vadd.f32 %v2169_v24, %v2708_v49  ;;  %v2724_v30 = vadd.f32 %v2230_v26, %v1146_v23  ;;  %v2233_v31 = vadd.f32 %v2232_v29, %v2231_v27 }
 0x11d   : > { %v2170_v32 = vpop.f32.mrb[12].mxu0  ;;  %v2726_v33 = vadd.f32 %v2233_v31, %v1149_v28 }
 0x11e   : > { %v2171_v34 = vpop.f32.mrb[13].mxu0 }
 0x11f   : > { %v2172_v35 = vadd.f32 %v2171_v34, %v2170_v32  ;;  %v2173_v36 = vpop.f32.mrb[14].mxu0  ;;  %v2234_v37 = vpop.f32.mrb[12].mxu1 }
 0x120   : > { %v2174_v38 = vpop.f32.mrb[15].mxu0  ;;  %v2235_v41 = vpop.f32.mrb[13].mxu1 }
 0x121   : > { %v1154_v39 = vadd.f32 %v2172_v35, %v2708_v49  ;;  %v2175_v40 = vadd.f32 %v2174_v38, %v2173_v36  ;;  %v2236_v42 = vadd.f32 %v2235_v41, %v2234_v37  ;;  %v2237_v43 = vpop.f32.mrb[14].mxu1 }
 0x122   : > { %v2238_v45 = vpop.f32.mrb[15].mxu1 }
 0x123   : > { %v1157_v44 = vadd.f32 %v2175_v40, %v2708_v49  ;;  %v2730_v46 = vadd.f32 %v2236_v42, %v1154_v39  ;;  %v2239_v47 = vadd.f32 %v2238_v45, %v2237_v43 }
 0x125   : > { %v2176_v48 = vpop.f32.mrb[16].mxu0  ;;  %v2732_v50 = vadd.f32 %v2239_v47, %v1157_v44 }
 0x126   : > { %v2177_v51 = vpop.f32.mrb[17].mxu0 }
 0x127   : > { %v2178_v52 = vadd.f32 %v2177_v51, %v2176_v48  ;;  %v2179_v53 = vpop.f32.mrb[18].mxu0  ;;  %v2240_v54 = vpop.f32.mrb[16].mxu1 }
 0x128   : > { %v2180_v55 = vpop.f32.mrb[19].mxu0  ;;  %v2241_v58 = vpop.f32.mrb[17].mxu1 }
 0x129   : > { %v1162_v56 = vadd.f32 %v2178_v52, %v2708_v49  ;;  %v2181_v57 = vadd.f32 %v2180_v55, %v2179_v53  ;;  %v2242_v59 = vadd.f32 %v2241_v58, %v2240_v54  ;;  %v2243_v60 = vpop.f32.mrb[18].mxu1 }
 0x12a   : > { %v2244_v63 = vpop.f32.mrb[19].mxu1 }
 0x12b   : > { %v1165_v61 = vadd.f32 %v2181_v57, %v2708_v49  ;;  %v2736_v0 = vadd.f32 %v2242_v59, %v1162_v56  ;;  %v2245_v2 = vadd.f32 %v2244_v63, %v2243_v60 }
 0x12d   : > { %v2182_v3 = vpop.f32.mrb[20].mxu0  ;;  %v2738_v4 = vadd.f32 %v2245_v2, %v1165_v61 }
 0x12e   : > { %v2183_v5 = vpop.f32.mrb[21].mxu0 }
 0x12f   : > { %v2184_v6 = vadd.f32 %v2183_v5, %v2182_v3  ;;  %v2185_v7 = vpop.f32.mrb[22].mxu0  ;;  %v2246_v8 = vpop.f32.mrb[20].mxu1 }
 0x130   : > { %v2186_v9 = vpop.f32.mrb[23].mxu0  ;;  %v2247_v12 = vpop.f32.mrb[21].mxu1 }
 0x131   : > { %v1170_v10 = vadd.f32 %v2184_v6, %v2708_v49  ;;  %v2187_v11 = vadd.f32 %v2186_v9, %v2185_v7  ;;  %v2248_v13 = vadd.f32 %v2247_v12, %v2246_v8  ;;  %v2249_v15 = vpop.f32.mrb[22].mxu1 }
 0x132   : > { %v2250_v18 = vpop.f32.mrb[23].mxu1 }
 0x133   : > { %v1173_v16 = vadd.f32 %v2187_v11, %v2708_v49  ;;  %v2742_v19 = vadd.f32 %v2248_v13, %v1170_v10  ;;  %v2251_v20 = vadd.f32 %v2250_v18, %v2249_v15 }
 0x135   : > { %v2188_v21 = vpop.f32.mrb[24].mxu0  ;;  %v2744_v22 = vadd.f32 %v2251_v20, %v1173_v16 }
 0x136   : > { %v2189_v23 = vpop.f32.mrb[25].mxu0 }
 0x137   : > { %v2190_v24 = vadd.f32 %v2189_v23, %v2188_v21  ;;  %v2191_v25 = vpop.f32.mrb[26].mxu0  ;;  %v2252_v26 = vpop.f32.mrb[24].mxu1 }
 0x138   : > { %v2192_v27 = vpop.f32.mrb[27].mxu0  ;;  %v2253_v31 = vpop.f32.mrb[25].mxu1 }
 0x139   : > { %v1178_v28 = vadd.f32 %v2190_v24, %v2708_v49  ;;  %v2193_v29 = vadd.f32 %v2192_v27, %v2191_v25  ;;  %v2254_v32 = vadd.f32 %v2253_v31, %v2252_v26  ;;  %v2255_v34 = vpop.f32.mrb[26].mxu1 }
 0x13a   : > { %v2256_v36 = vpop.f32.mrb[27].mxu1 }
 0x13b   : > { %v1181_v35 = vadd.f32 %v2193_v29, %v2708_v49  ;;  %v2748_v37 = vadd.f32 %v2254_v32, %v1178_v28  ;;  %v2257_v38 = vadd.f32 %v2256_v36, %v2255_v34 }
 0x13d   : > { %v2194_v39 = vpop.f32.mrb[28].mxu0  ;;  %v2750_v40 = vadd.f32 %v2257_v38, %v1181_v35 }
 0x13e   : > { %v2195_v41 = vpop.f32.mrb[29].mxu0 }
 0x13f   : > { %v2196_v42 = vadd.f32 %v2195_v41, %v2194_v39  ;;  %v2197_v43 = vpop.f32.mrb[30].mxu0  ;;  %v2258_v44 = vpop.f32.mrb[28].mxu1 }
 0x140   : > { %v2198_v45 = vpop.f32.mrb[31].mxu0  ;;  %v2259_v51 = vpop.f32.mrb[29].mxu1 }
 0x141   : > { %v1186_v47 = vadd.f32 %v2196_v42, %v2708_v49  ;;  %v2199_v48 = vadd.f32 %v2198_v45, %v2197_v43  ;;  %v2260_v52 = vadd.f32 %v2259_v51, %v2258_v44  ;;  %v2261_v53 = vpop.f32.mrb[30].mxu1 }
 0x142   : > { %v2262_v55 = vpop.f32.mrb[31].mxu1 }
 0x143   : > { %v1189_v54 = vadd.f32 %v2199_v48, %v2708_v49  ;;  %v2754_v56 = vadd.f32 %v2260_v52, %v1186_v47  ;;  %v2263_v57 = vadd.f32 %v2262_v55, %v2261_v53 }
 0x145   : > { %v2280_v58 = vpop.f32.mrb[32].mxu0  ;;  %v2756_v59 = vadd.f32 %v2263_v57, %v1189_v54 }
 0x146   : > { %v2281_v60 = vpop.f32.mrb[33].mxu0 }
 0x147   : > { %v2282_v61 = vadd.f32 %v2281_v60, %v2280_v58  ;;  %v2283_v63 = vpop.f32.mrb[34].mxu0  ;;  %v2362_v3 = vpop.f32.mrb[32].mxu1 }
 0x148   : > { %v2284_v2 = vpop.f32.mrb[35].mxu0  ;;  %v1420_v7 = vpop.f32.mrb[33].mxu1 }
 0x149   : > { %v2285_v5 = vadd.f32 %v2284_v2, %v2283_v63  ;;  %v1324_v6 = vadd.f32 %v2282_v61, %v2712_v62  ;;  %v2363_v8 = vpop.f32.mrb[34].mxu1 }
 0x14a   : > { %v1423_v10 = vpop.f32.mrb[35].mxu1 }
 0x14b   : > { %v2759_v9 = vadd.f32 %v1420_v7, %v1324_v6  ;;  %v1327_v49 = vadd.f32 %v2285_v5, %v2714_v1 }
 0x14d   : > { %v2762_v11 = vadd.f32 %v1423_v10, %v1327_v49  ;;  %v2286_v12 = vpop.f32.mrb[36].mxu0  ;;  %1483 = vadd.xlane.f32.xlu0 %v2759_v9 }
 0x14e   : > { %v2287_v13 = vpop.f32.mrb[37].mxu0 }
 0x14f   : > { %v2288_v15 = vadd.f32 %v2287_v13, %v2286_v12  ;;  %v2289_v16 = vpop.f32.mrb[38].mxu0  ;;  %v2366_v20 = vpop.f32.mrb[36].mxu1 }
 0x150   : > { %v2290_v18 = vpop.f32.mrb[39].mxu0  ;;  %v1436_v23 = vpop.f32.mrb[37].mxu1 }
 0x151   : > { %v1332_v21 = vadd.f32 %v2288_v15, %v2718_v14  ;;  %v2291_v62 = vadd.f32 %v2290_v18, %v2289_v16  ;;  %1485 = vadd.xlane.f32.xlu0 %v2762_v11  ;;  %v2367_v24 = vpop.f32.mrb[38].mxu1 }
 0x152   : > { %v1439_v26 = vpop.f32.mrb[39].mxu1 }
 0x153   : > { %v1335_v1 = vadd.f32 %v2291_v62, %v2720_v17  ;;  %v2768_v25 = vadd.f32 %v2362_v3, %v1332_v21 }
 0x155   : > { %v2292_v27 = vpop.f32.mrb[40].mxu0  ;;  %1487 = vadd.xlane.f32.xlu0 %v2768_v25  ;;  %v2771_v28 = vadd.f32 %v2363_v8, %v1335_v1 }
 0x156   : > { %v2293_v29 = vpop.f32.mrb[41].mxu0 }
 0x157   : > { %v2294_v31 = vadd.f32 %v2293_v29, %v2292_v27  ;;  %v2295_v32 = vpop.f32.mrb[42].mxu0  ;;  %v2370_v14 = vpop.f32.mrb[40].mxu1 }
 0x158   : > { %v2296_v34 = vpop.f32.mrb[43].mxu0  ;;  %v1452_v38 = vpop.f32.mrb[41].mxu1 }
 0x159   : > { %v2297_v35 = vadd.f32 %v2296_v34, %v2295_v32  ;;  %1489 = vadd.xlane.f32.xlu0 %v2771_v28  ;;  %v1340_v36 = vadd.f32 %v2294_v31, %v2724_v30  ;;  %v2371_v17 = vpop.f32.mrb[42].mxu1 }
 0x15a   : > { %v1455_v42 = vpop.f32.mrb[43].mxu1 }
 0x15b   : > { %v2775_v39 = vadd.f32 %v1436_v23, %v1340_v36  ;;  %v1343_v41 = vadd.f32 %v2297_v35, %v2726_v33 }
 0x15d   : > { %v2778_v43 = vadd.f32 %v1439_v26, %v1343_v41  ;;  %v2298_v44 = vpop.f32.mrb[44].mxu0  ;;  %1491 = vadd.xlane.f32.xlu0 %v2775_v39 }
 0x15e   : > { %v2299_v45 = vpop.f32.mrb[45].mxu0 }
 0x15f   : > { %v2300_v47 = vadd.f32 %v2299_v45, %v2298_v44  ;;  %v2301_v48 = vpop.f32.mrb[46].mxu0  ;;  %v2374_v52 = vpop.f32.mrb[44].mxu1 }
 0x160   : > { %v2302_v51 = vpop.f32.mrb[47].mxu0  ;;  %v1468_v54 = vpop.f32.mrb[45].mxu1 }
 0x161   : > { %v1348_v53 = vadd.f32 %v2300_v47, %v2730_v46  ;;  %v2303_v30 = vadd.f32 %v2302_v51, %v2301_v48  ;;  %1493 = vadd.xlane.f32.xlu0 %v2778_v43  ;;  %v2375_v55 = vpop.f32.mrb[46].mxu1 }
 0x162   : > { %v1471_v58 = vpop.f32.mrb[47].mxu1 }
 0x163   : > { %v1351_v33 = vadd.f32 %v2303_v30, %v2732_v50  ;;  %v2784_v57 = vadd.f32 %v2366_v20, %v1348_v53 }
 0x165   : > { %v2304_v60 = vpop.f32.mrb[48].mxu0  ;;  %1495 = vadd.xlane.f32.xlu0 %v2784_v57  ;;  %v2787_v61 = vadd.f32 %v2367_v24, %v1351_v33 }
 0x166   : > { %v2305_v63 = vpop.f32.mrb[49].mxu0 }
 0x167   : > { %v2306_v2 = vadd.f32 %v2305_v63, %v2304_v60  ;;  %v2307_v3 = vpop.f32.mrb[50].mxu0 }
 0x168   : > { %v2308_v5 = vpop.f32.mrb[51].mxu0 }
 0x169   : > { %v2309_v46 = vadd.f32 %v2308_v5, %v2307_v3  ;;  %v1356_v6 = vadd.f32 %v2306_v2, %v2736_v0  ;;  %1497 = vadd.xlane.f32.xlu0 %v2787_v61  ;;  %v1544_v5 = vlaneseq }
 0x16b   : > { %v2791_v7 = vadd.f32 %v1452_v38, %v1356_v6  ;;  %v1359_v50 = vadd.f32 %v2309_v46, %v2738_v4 }
 0x16d   : > { %v2794_v8 = vadd.f32 %v1455_v42, %v1359_v50  ;;  %v2310_v49 = vpop.f32.mrb[52].mxu0  ;;  %1499 = vadd.xlane.f32.xlu1 %v2791_v7 }
 0x16e   : > { %v2311_v10 = vpop.f32.mrb[53].mxu0 }
 0x16f   : > { %v2312_v12 = vadd.f32 %v2311_v10, %v2310_v49  ;;  %v2313_v13 = vpop.f32.mrb[54].mxu0  ;;  %v2822_v49 = vand.u32 127, %v1544_v5 }
 0x170   : > { %v2314_v15 = vpop.f32.mrb[55].mxu0 }
 0x171   : > { %v1364_v16 = vadd.f32 %v2312_v12, %v2742_v19  ;;  %v2315_v18 = vadd.f32 %v2314_v15, %v2313_v13  ;;  %1501 = vadd.xlane.f32.xlu1 %v2794_v8  ;;  %vm1546_vm0 = vcmp.lt.s32.totalorder %v2822_v49, 16 }
 0x173   : > { %v1367_v0 = vadd.f32 %v2315_v18, %v2744_v22  ;;  %v2800_v20 = vadd.f32 %v2370_v14, %v1364_v16 }
 0x175   : > { %v2316_v21 = vpop.f32.mrb[56].mxu0  ;;  %1503 = vadd.xlane.f32.xlu1 %v2800_v20  ;;  %v2803_v4 = vadd.f32 %v2371_v17, %v1367_v0 }
 0x176   : > { %v2317_v62 = vpop.f32.mrb[57].mxu0 }
 0x177   : > { %v2318_v23 = vadd.f32 %v2317_v62, %v2316_v21  ;;  %v2319_v24 = vpop.f32.mrb[58].mxu0 }
 0x178   : > { %v2320_v1 = vpop.f32.mrb[59].mxu0 }
 0x179   : > { %v2321_v26 = vadd.f32 %v2320_v1, %v2319_v24  ;;  %v1372_v27 = vadd.f32 %v2318_v23, %v2748_v37  ;;  %1505 = vadd.xlane.f32.xlu1 %v2803_v4 }
 0x17b   : > { %v2807_v19 = vadd.f32 %v1468_v54, %v1372_v27  ;;  %v1375_v22 = vadd.f32 %v2321_v26, %v2750_v40 }
 0x17d   : > { %v2810_v29 = vadd.f32 %v1471_v58, %v1375_v22  ;;  %v2322_v31 = vpop.f32.mrb[60].mxu0  ;;  %1507 = vadd.xlane.f32.xlu1 %v2807_v19 }
 0x17e   : > { %v2323_v32 = vpop.f32.mrb[61].mxu0 }
 0x17f   : > { %v2324_v34 = vadd.f32 %v2323_v32, %v2322_v31  ;;  %v2325_v14 = vpop.f32.mrb[62].mxu0 }
 0x180   : > { %v2326_v35 = vpop.f32.mrb[63].mxu0 }
 0x181   : > { %v1380_v36 = vadd.f32 %v2324_v34, %v2754_v56  ;;  %v2327_v38 = vadd.f32 %v2326_v35, %v2325_v14  ;;  %1509 = vadd.xlane.f32.xlu1 %v2810_v29 }
 0x183   : > { %v1383_v37 = vadd.f32 %v2327_v38, %v2756_v59  ;;  %v2816_v17 = vadd.f32 %v2374_v52, %v1380_v36 }
 0x185   : > { %1511 = vadd.xlane.f32.xlu1 %v2816_v17  ;;  %v2819_v40 = vadd.f32 %v2375_v55, %v1383_v37 }
 0x189   : > { %1513 = vadd.xlane.f32.xlu1 %v2819_v40 }
 0x1da   : > { %v1484_v41 = vpop.xlane.xlu0 %1483 }
 0x1de   : > { %v1486_v42 = vpop.xlane.xlu0 %1485 }
 0x1df   : > { %v1515_v48 = vadd.f32 %v1486_v42, %v1484_v41 }
 0x1e2   : > { %v1488_v44 = vpop.xlane.xlu0 %1487 }
 0x1e3   : > { %v1516_v56 = vadd.f32 %v1515_v48, %v1488_v44 }
 0x1e6   : > { %v1490_v45 = vpop.xlane.xlu0 %1489 }
 0x1e7   : > { %v1517_v53 = vadd.f32 %v1516_v56, %v1490_v45 }
 0x1ea   : > { %v1492_v47 = vpop.xlane.xlu0 %1491 }
 0x1eb   : > { %v1518_v30 = vadd.f32 %v1517_v53, %v1492_v47 }
 0x1ee   : > { %v1494_v51 = vpop.xlane.xlu0 %1493 }
 0x1ef   : > { %v1519_v59 = vadd.f32 %v1518_v30, %v1494_v51 }
 0x1f2   : > { %v1496_v54 = vpop.xlane.xlu0 %1495 }
 0x1f3   : > { %v1520_v52 = vadd.f32 %v1519_v59, %v1496_v54 }
 0x1f6   : > { %v1498_v33 = vpop.xlane.xlu0 %1497 }
 0x1f7   : > { %v1521_v58 = vadd.f32 %v1520_v52, %v1498_v33 }
 0x1f9   : > { %v1522_v60 = vrot.slane %v1521_v58, 4 }
 0x1fa   : > { %v1500_v55 = vpop.xlane.xlu1 %1499 }
 0x1fb   : > { %v1523_v63 = vadd.f32 %v1522_v60, %v1521_v58 }
 0x1fd   : > { %v1524_v2 = vrot.slane %v1523_v63, 2 }
 0x1fe   : > { %v1502_v3 = vpop.xlane.xlu1 %1501 }
 0x1ff   : > { %v1525_v46 = vadd.f32 %v1524_v2, %v1523_v63  ;;  %v1528_v24 = vadd.f32 %v1502_v3, %v1500_v55 }
 0x201   : > { %v1526_v6 = vrot.slane %v1525_v46, 1 }
 0x202   : > { %v1504_v50 = vpop.xlane.xlu1 %1503 }
 0x203   : > { %v1527_v10 = vadd.f32 %v1526_v6, %v1525_v46  ;;  %v1529_v1 = vadd.f32 %v1528_v24, %v1504_v50 }
 0x205   : > { %v2824_v12 = vmul.f32 0.0009765625, %v1527_v10 }
 0x206   : > { %v1506_v13 = vpop.xlane.xlu1 %1505 }
 0x207   : > { %v1548_v15 = vsub.f32 %v2762_v11, %v2824_v12  ;;  %v1547_v16 = vsub.f32 %v2759_v9, %v2824_v12  ;;  %v1549_v18 = vsub.f32 %v2768_v25, %v2824_v12  ;;  %v1550_v25 = vsub.f32 %v2771_v28, %v2824_v12 }
 0x208   : > { %v1530_v22 = vadd.f32 %v1529_v1, %v1506_v13  ;;  %v1551_v32 = vsub.f32 %v2775_v39, %v2824_v12  ;;  %v1552_v59 = vsub.f32 %v2778_v43, %v2824_v12  ;;  %v1553_v60 = vsub.f32 %v2784_v57, %v2824_v12 }
 0x209   : > { %v2835_v0 = vsel %vm1546_vm0, %v1548_v15, 0.0  ;;  %v2839_v21 = vsel %vm1546_vm0, %v1547_v16, 0.0  ;;  %v2847_v9 = vsel %vm1546_vm0, %v1549_v18, 0.0  ;;  %v2855_v31 = vsel %vm1546_vm0, %v1550_v25, 0.0 }
 0x20a   : > { %v1508_v62 = vpop.xlane.xlu1 %1507  ;;  %v1582_v23 = vmul.f32 %v2835_v0, %v2835_v0  ;;  %v1581_v11 = vmul.f32 %v2839_v21, %v2839_v21  ;;  %v1583_v27 = vmul.f32 %v2847_v9, %v2847_v9  ;;  %v1584_v28 = vmul.f32 %v2855_v31, %v2855_v31 }
 0x20b   : > { %v1531_v34 = vadd.f32 %v1530_v22, %v1508_v62  ;;  %v2863_v36 = vsel %vm1546_vm0, %v1551_v32, 0.0  ;;  %v2890_v43 = vsel %vm1546_vm0, %v1552_v59, 0.0  ;;  %v2905_v3 = vsel %vm1546_vm0, %v1553_v60, 0.0 }
 0x20c   : > { %1599 = vadd.xlane.f32.xlu1 %v1582_v23  ;;  %1597 = vadd.xlane.f32.xlu0 %v1581_v11  ;;  %v1585_v41 = vmul.f32 %v2863_v36, %v2863_v36  ;;  %v1586_v63 = vmul.f32 %v2890_v43, %v2890_v43  ;;  %v1554_v57 = vsub.f32 %v2787_v61, %v2824_v12 }
 0x20d   : > { %v1587_v46 = vmul.f32 %v2905_v3, %v2905_v3 }
 0x20e   : > { %v1510_v26 = vpop.xlane.xlu1 %1509  ;;  %v2920_v50 = vsel %vm1546_vm0, %v1554_v57, 0.0 }
 0x20f   : > { %v1532_v35 = vadd.f32 %v1531_v34, %v1510_v26  ;;  %v1588_v10 = vmul.f32 %v2920_v50, %v2920_v50 }
 0x210   : > { %1601 = vadd.xlane.f32.xlu0 %v1583_v27 }
 0x212   : > { %v1512_v14 = vpop.xlane.xlu1 %1511 }
 0x213   : > { %v1533_v38 = vadd.f32 %v1532_v35, %v1512_v14 }
 0x214   : > { %1603 = vadd.xlane.f32.xlu0 %v1584_v28 }
 0x216   : > { %v1514_v37 = vpop.xlane.xlu1 %1513 }
 0x217   : > { %v1534_v42 = vadd.f32 %v1533_v38, %v1514_v37 }
 0x218   : > { %1605 = vadd.xlane.f32.xlu0 %v1585_v41 }
 0x219   : > { %v1535_v39 = vrot.slane %v1534_v42, 4 }
 0x21b   : > { %v1536_v44 = vadd.f32 %v1535_v39, %v1534_v42 }
 0x21d   : > { %v1537_v45 = vrot.slane %v1536_v44, 2 }
 0x21f   : > { %v1538_v47 = vadd.f32 %v1537_v45, %v1536_v44 }
 0x221   : > { %v1539_v48 = vrot.slane %v1538_v47, 1 }
 0x223   : > { %v1540_v56 = vadd.f32 %v1539_v48, %v1538_v47 }
 0x225   : > { %v1543_v51 = vmul.f32 0.0009765625, %v1540_v56 }
 0x227   : > { %v1556_v53 = vsub.f32 %v2794_v8, %v1543_v51  ;;  %v1555_v30 = vsub.f32 %v2791_v7, %v1543_v51  ;;  %v1557_v54 = vsub.f32 %v2800_v20, %v1543_v51  ;;  %v1558_v20 = vsub.f32 %v2803_v4, %v1543_v51 }
 0x228   : > { %v1559_v4 = vsub.f32 %v2807_v19, %v1543_v51  ;;  %v1560_v19 = vsub.f32 %v2810_v29, %v1543_v51  ;;  %v1561_v13 = vsub.f32 %v2816_v17, %v1543_v51  ;;  %v1562_v16 = vsub.f32 %v2819_v40, %v1543_v51 }
 0x229   : > { %v2874_v52 = vsel %vm1546_vm0, %v1556_v53, 0.0  ;;  %v2878_v33 = vsel %vm1546_vm0, %v1555_v30, 0.0  ;;  %v2886_v7 = vsel %vm1546_vm0, %v1557_v54, 0.0  ;;  %v2901_v2 = vsel %vm1546_vm0, %v1558_v20, 0.0 }
 0x22a   : > { %v1590_v58 = vmul.f32 %v2874_v52, %v2874_v52  ;;  %v1589_v8 = vmul.f32 %v2878_v33, %v2878_v33  ;;  %v1591_v55 = vmul.f32 %v2886_v7, %v2886_v7  ;;  %v1592_v5 = vmul.f32 %v2901_v2, %v2901_v2 }
 0x22b   : > { %v2916_v6 = vsel %vm1546_vm0, %v1559_v4, 0.0  ;;  %v2929_v12 = vsel %vm1546_vm0, %v1560_v19, 0.0  ;;  %v2936_v29 = vsel %vm1546_vm0, %v1561_v13, 0.0  ;;  %v2943_v62 = vsel %vm1546_vm0, %v1562_v16, 0.0 }
 0x22c   : > { %1615 = vadd.xlane.f32.xlu1 %v1590_v58  ;;  %1613 = vadd.xlane.f32.xlu0 %v1589_v8  ;;  %v1593_v61 = vmul.f32 %v2916_v6, %v2916_v6  ;;  %v1594_v15 = vmul.f32 %v2929_v12, %v2929_v12  ;;  %v1595_v18 = vmul.f32 %v2936_v29, %v2936_v29 }
 0x22d   : > { %v1596_v17 = vmul.f32 %v2943_v62, %v2943_v62 }
 0x230   : > { %1617 = vadd.xlane.f32.xlu1 %v1591_v55  ;;  %1607 = vadd.xlane.f32.xlu0 %v1586_v63 }
 0x234   : > { %1619 = vadd.xlane.f32.xlu1 %v1592_v5  ;;  %1609 = vadd.xlane.f32.xlu0 %v1587_v46 }
 0x238   : > { %1621 = vadd.xlane.f32.xlu1 %v1593_v61  ;;  %1611 = vadd.xlane.f32.xlu0 %v1588_v10 }
 0x23c   : > { %1623 = vadd.xlane.f32.xlu1 %v1594_v15 }
 0x240   : > { %1625 = vadd.xlane.f32.xlu1 %v1595_v18 }
 0x244   : > { %1627 = vadd.xlane.f32.xlu1 %v1596_v17 }
 0x299   : > { %v1598_v23 = vpop.xlane.xlu0 %1597  ;;  %v1600_v25 = vpop.xlane.xlu1 %1599 }
 0x29a   : > { %v1629_v27 = vadd.f32 %v1600_v25, %v1598_v23 }
 0x29d   : > { %v1602_v11 = vpop.xlane.xlu0 %1601 }
 0x29e   : > { %v1630_v22 = vadd.f32 %v1629_v27, %v1602_v11  ;;  %v2955_v27 = vld [vmem:[%s278_s7] ss:$0 sm:$0xff] }
 0x2a1   : > { %v1604_v24 = vpop.xlane.xlu0 %1603 }
 0x2a2   : > { %v1631_v14 = vadd.f32 %v1630_v22, %v1604_v24 }
 0x2a5   : > { %v1606_v1 = vpop.xlane.xlu0 %1605 }
 0x2a6   : > { %v1632_v49 = vadd.f32 %v1631_v14, %v1606_v1 }
 0x2b9   : > { %v1616_v26 = vpop.xlane.xlu1 %1615  ;;  %v1614_v40 = vpop.xlane.xlu0 %1613 }
 0x2ba   : > { %v1642_v39 = vadd.f32 %v1616_v26, %v1614_v40 }
 0x2bd   : > { %v1618_v32 = vpop.xlane.xlu1 %1617  ;;  %v1608_v34 = vpop.xlane.xlu0 %1607 }
 0x2be   : > { %v1633_v38 = vadd.f32 %v1632_v49, %v1608_v34  ;;  %v1643_v45 = vadd.f32 %v1642_v39, %v1618_v32 }
 0x2c1   : > { %v1620_v28 = vpop.xlane.xlu1 %1619  ;;  %v1610_v35 = vpop.xlane.xlu0 %1609 }
 0x2c2   : > { %v1634_v37 = vadd.f32 %v1633_v38, %v1610_v35  ;;  %v1644_v56 = vadd.f32 %v1643_v45, %v1620_v28  ;;  %v2961_v28 = vld [vmem:[%s281_s10] ss:$0 sm:$0xff] }
 0x2c5   : > { %v1622_v41 = vpop.xlane.xlu1 %1621  ;;  %v1612_v42 = vpop.xlane.xlu0 %1611 }
 0x2c6   : > { %v1635_v44 = vadd.f32 %v1634_v37, %v1612_v42  ;;  %v1645_v53 = vadd.f32 %v1644_v56, %v1622_v41 }
 0x2c8   : > { %v1636_v47 = vrot.slane %v1635_v44, 4 }
 0x2c9   : > { %v1624_v48 = vpop.xlane.xlu1 %1623 }
 0x2ca   : > { %v1637_v51 = vadd.f32 %v1636_v47, %v1635_v44  ;;  %v1646_v58 = vadd.f32 %v1645_v53, %v1624_v48 }
 0x2cc   : > { %v1638_v30 = vrot.slane %v1637_v51, 2 }
 0x2cd   : > { %v1626_v54 = vpop.xlane.xlu1 %1625 }
 0x2ce   : > { %v1639_v59 = vadd.f32 %v1638_v30, %v1637_v51  ;;  %v1647_v20 = vadd.f32 %v1646_v58, %v1626_v54 }
 0x2d0   : > { %v1640_v8 = vrot.slane %v1639_v59, 1 }
 0x2d1   : > { %v1628_v60 = vpop.xlane.xlu1 %1627 }
 0x2d2   : > { %v1641_v55 = vadd.f32 %v1640_v8, %v1639_v59  ;;  %v1648_v63 = vadd.f32 %v1647_v20, %v1628_v60 }
 0x2d4   : > { %v1656_v4 = vmul.f32 0.0009775171, %v1641_v55  ;;  %v1649_v57 = vrot.slane %v1648_v63, 4 }
 0x2d6   : > { %2521 = vrsqrt.f32 %v1656_v4  ;;  %v1650_v5 = vadd.f32 %v1649_v57, %v1648_v63  ;;  %vm1660_vm1 = vcmp.eq.f32.partialorder %v1656_v4, inf  ;;  %v1663_v18 = vand.u32 2147483648, %v1656_v4 }
 0x2d7   : > { %vm1662_vm2 = vcmp.eq.f32.partialorder %v1656_v4, 0.0 }
 0x2d8   : > { %v1651_v46 = vrot.slane %v1650_v5, 2 }
 0x2da   : > { %v1652_v19 = vadd.f32 %v1651_v46, %v1650_v5 }
 0x2dc   : > { %v1653_v61 = vrot.slane %v1652_v19, 1 }
 0x2de   : > { %v1654_v10 = vadd.f32 %v1653_v61, %v1652_v19 }
 0x2e0   : > { %v2522_v13 = vpop.eup %2521  ;;  %v1657_v16 = vmul.f32 0.0009775171, %v1654_v10 }
 0x2e1   : > { %v1659_v15 = vmul.f32 %v2522_v13, %v1656_v4 }
 0x2e2   : > { %2523 = vrsqrt.f32 %v1657_v16  ;;  %vm1667_vm3 = vcmp.eq.f32.partialorder %v1657_v16, inf  ;;  %v1670_v1 = vand.u32 2147483648, %v1657_v16  ;;  %vm1669_vm4 = vcmp.eq.f32.partialorder %v1657_v16, 0.0 }
 0x2e3   : > { %v1661_v17 = vsel %vm1660_vm1, %v1656_v4, %v1659_v15 }
 0x2e4   : > { %v1664_v23 = vsel %vm1662_vm2, %v1663_v18, %v1661_v17 }
 0x2e5   : > { %v1672_v11 = vadd.f32 1e-05, %v1664_v23 }
 0x2e7   : > { %2525 = vrcp.f32 %v1672_v11 }
 0x2ec   : > { %v2524_v24 = vpop.eup %2523 }
 0x2ed   : > { %v1666_v25 = vmul.f32 %v2524_v24, %v1657_v16 }
 0x2ef   : > { %v1668_v26 = vsel %vm1667_vm3, %v1657_v16, %v1666_v25 }
 0x2f0   : > { %v1671_v22 = vsel %vm1669_vm4, %v1670_v1, %v1668_v26 }
 0x2f1   : > { %v2526_v40 = vpop.eup %2525  ;;  %v1673_v4 = vadd.f32 1e-05, %v1671_v22 }
 0x2f2   : > { %v1678_v32 = vmul.f32 %v2526_v40, %v2839_v21  ;;  %v1679_v34 = vmul.f32 %v2526_v40, %v2835_v0  ;;  %v1680_v14 = vmul.f32 %v2526_v40, %v2847_v9  ;;  %v1681_v49 = vmul.f32 %v2526_v40, %v2855_v31 }
 0x2f3   : > { %v1682_v35 = vmul.f32 %v2526_v40, %v2863_v36  ;;  %v1683_v38 = vmul.f32 %v2526_v40, %v2890_v43  ;;  %v1684_v37 = vmul.f32 %v2526_v40, %v2905_v3  ;;  %v1685_v41 = vmul.f32 %v2526_v40, %v2920_v50 }
 0x2f4   : > { %v1701_v42 = vmul.f32 %v2955_v27, %v1678_v32  ;;  %v1702_v21 = vmul.f32 %v2955_v27, %v1679_v34  ;;  %v1703_v0 = vmul.f32 %v2955_v27, %v1680_v14  ;;  %v1704_v9 = vmul.f32 %v2955_v27, %v1681_v49 }
 0x2f5   : > { %v1705_v31 = vmul.f32 %v2955_v27, %v1682_v35  ;;  %v1706_v39 = vmul.f32 %v2955_v27, %v1683_v38  ;;  %v1707_v36 = vmul.f32 %v2955_v27, %v1684_v37  ;;  %v1708_v43 = vmul.f32 %v2955_v27, %v1685_v41 }
 0x2f6   : > { %v1724_v3 = vadd.f32 %v2961_v28, %v1701_v42  ;;  %v1725_v50 = vadd.f32 %v2961_v28, %v1702_v21  ;;  %v1726_v44 = vadd.f32 %v2961_v28, %v1703_v0  ;;  %v1727_v45 = vadd.f32 %v2961_v28, %v1704_v9 }
 0x2f7   : > { %v1728_v47 = vadd.f32 %v2961_v28, %v1705_v31  ;;  %v1729_v48 = vadd.f32 %v2961_v28, %v1706_v39  ;;  %v1730_v56 = vadd.f32 %v2961_v28, %v1707_v36  ;;  %v1731_v51 = vadd.f32 %v2961_v28, %v1708_v43 }
 0x2f8   : > { %v1740_v53 = vmax.f32 %v1724_v3, 0.0  ;;  %v1741_v30 = vmax.f32 %v1725_v50, 0.0  ;;  %v1742_v54 = vmax.f32 %v1726_v44, 0.0  ;;  %v1743_v59 = vmax.f32 %v1727_v45, 0.0 }
 0x2f9   : > { %v1744_v58 = vmax.f32 %v1728_v47, 0.0  ;;  %v1745_v8 = vmax.f32 %v1729_v48, 0.0  ;;  %v1746_v20 = vmax.f32 %v1730_v56, 0.0  ;;  %v1747_v60 = vmax.f32 %v1731_v51, 0.0 }
 0x2fa   : > { %v2092_v55 = vpack.c.bf16 %v1741_v30, %v1740_v53  ;;  %v2097_v63 = vpack.c.bf16 %v1743_v59, %v1742_v54  ;;  %2527 = vrcp.f32 %v1673_v4 }
 0x2fb   : > { %v2102_v57 = vpack.c.bf16 %v1745_v8, %v1744_v58  ;;  %v2107_v5 = vpack.c.bf16 %v1747_v60, %v1746_v20 }
 0x2fc   : > { %2093 = vst [vmem:[%s2987_s14] sm:$0xff] %v2092_v55   ;;  %2129 = vst [vmem:[%s2987_s14 + $0x8] sm:$0xff] %v2097_v63  }
 0x2fd   : > { %2130 = vst [vmem:[%s2987_s14 + $0x10] sm:$0xff] %v2102_v57   ;;  %2131 = vst [vmem:[%s2987_s14 + $0x18] sm:$0xff] %v2107_v5  }
 0x304   : > { %v2528_v46 = vpop.eup %2527 }
 0x305   : > { %v1686_v19 = vmul.f32 %v2528_v46, %v2878_v33  ;;  %v1687_v61 = vmul.f32 %v2528_v46, %v2874_v52  ;;  %v1688_v10 = vmul.f32 %v2528_v46, %v2886_v7  ;;  %v1689_v13 = vmul.f32 %v2528_v46, %v2901_v2 }
 0x306   : > { %v1690_v15 = vmul.f32 %v2528_v46, %v2916_v6  ;;  %v1691_v16 = vmul.f32 %v2528_v46, %v2929_v12  ;;  %v1692_v18 = vmul.f32 %v2528_v46, %v2936_v29  ;;  %v1693_v17 = vmul.f32 %v2528_v46, %v2943_v62 }
 0x307   : > { %v1709_v23 = vmul.f32 %v2955_v27, %v1686_v19  ;;  %v1710_v11 = vmul.f32 %v2955_v27, %v1687_v61  ;;  %v1711_v33 = vmul.f32 %v2955_v27, %v1688_v10  ;;  %v1712_v52 = vmul.f32 %v2955_v27, %v1689_v13 }
 0x308   : > { %v1713_v7 = vmul.f32 %v2955_v27, %v1690_v15  ;;  %v1714_v2 = vmul.f32 %v2955_v27, %v1691_v16  ;;  %v1715_v6 = vmul.f32 %v2955_v27, %v1692_v18  ;;  %v1716_v12 = vmul.f32 %v2955_v27, %v1693_v17 }
 0x309   : > { %v1732_v29 = vadd.f32 %v2961_v28, %v1709_v23  ;;  %v1733_v62 = vadd.f32 %v2961_v28, %v1710_v11  ;;  %v1734_v24 = vadd.f32 %v2961_v28, %v1711_v33  ;;  %v1735_v25 = vadd.f32 %v2961_v28, %v1712_v52 }
 0x30a   : > { %v1736_v1 = vadd.f32 %v2961_v28, %v1713_v7  ;;  %v1737_v26 = vadd.f32 %v2961_v28, %v1714_v2  ;;  %v1738_v40 = vadd.f32 %v2961_v28, %v1715_v6  ;;  %v1739_v22 = vadd.f32 %v2961_v28, %v1716_v12 }
 0x30b   : > { %v1748_v27 = vmax.f32 %v1732_v29, 0.0  ;;  %v1749_v32 = vmax.f32 %v1733_v62, 0.0  ;;  %v1750_v34 = vmax.f32 %v1734_v24, 0.0  ;;  %v1751_v14 = vmax.f32 %v1735_v25, 0.0 }
 0x30c   : > { %v1752_v49 = vmax.f32 %v1736_v1, 0.0  ;;  %v1753_v35 = vmax.f32 %v1737_v26, 0.0  ;;  %v1754_v38 = vmax.f32 %v1738_v40, 0.0  ;;  %v1755_v37 = vmax.f32 %v1739_v22, 0.0 }
 0x30d   : > { %v2112_v41 = vpack.c.bf16 %v1749_v32, %v1748_v27  ;;  %v2117_v42 = vpack.c.bf16 %v1751_v14, %v1750_v34 }
 0x30e   : > { %v2122_v21 = vpack.c.bf16 %v1753_v35, %v1752_v49  ;;  %v2127_v0 = vpack.c.bf16 %v1755_v37, %v1754_v38 }
 0x30f   : > { %2132 = vst [vmem:[%s2987_s14 + $0x20] sm:$0xff] %v2112_v41   ;;  %2133 = vst [vmem:[%s2987_s14 + $0x28] sm:$0xff] %v2117_v42  }
 0x310   : > { %2134 = vst [vmem:[%s2987_s14 + $0x30] sm:$0xff] %v2122_v21   ;;  %2135 = vst [vmem:[%s2987_s14 + $0x38] sm:$0xff] %v2127_v0  }
 0x311 PF: > { %s15_s18 = sadd.s32 1, %s2535_s18  }
 0x312   : > { %p12_p4 = scmp.ge.s32.totalorder %s15_s18, 4  }
 0x314   :  { %14 = sbr.rel (!%p12_p4) target bundleno = 1 (0x1), region = 82 }

// kernel: munit_forward.26
= control target key start
LH: loop header
LB: loop body
LE: loop exit
PB: predicated region body
PF: predicated region fallthrough
CT: control target
= control target key end

     0   :  { %s4115_s18 = smov 0   ;;  %s5540_s0 = inlined_call_operand.vmem [shape: bf16[2,512,512], index: 0, kind: input, shape index: {}]   ;;  %s5541_s1 = inlined_call_operand.vmem [shape: bf16[2,512,128], index: 1, kind: input, shape index: {}]   ;;  %s5542_s2 = inlined_call_operand.vmem [shape: f32[2,1,128], index: 2, kind: input, shape index: {}]   ;;  %s5543_s3 = inlined_call_operand.vmem [shape: f32[2,1,128], index: 3, kind: input, shape index: {}]   ;;  %s5544_s4 = inlined_call_operand.vmem [shape: f32[2,1,128], index: 4, kind: input, shape index: {}]   ;;  %s5545_s5 = inlined_call_operand.vmem [shape: bf16[2,512,128], index: 5, kind: output, shape index: {}]  }
   0x1 LB: > { %s3208_s19 = sadd.s32 4294967295, %s4082_s18   ;;  %p3212_p0 = scmp.ge.s32.totalorder %s4082_s18, 1  ;;  %s4082_s18 = sphi %s4115_s18, %s15_s18  }
   0x2   : > { %p221_p1 = scmp.lt.s32.totalorder %s4082_s18, 3 }
   0x4   : > { %p222_p2 = pnand %p3212_p0, %p221_p1 }
   0x6   : > { %225 = sbr.rel (%p222_p2) target bundleno = 1088 (0x440), region = 40 }
   0xd   : > { %p263_p3 = scmp.lt.s32.totalorder %s3208_s19, 1  ;;  %v4084_v0 = vmov 0  }
   0xe   : > { %1319 = vmatprep.subr.bf16.mxu1 %v4084_v0  ;;  %1608 = vmatprep.subr.bf16.mxu0 %v4084_v0 }
   0xf   : > { %s5736_s19 = smov (!%p263_p3, %s3208_s19), 1 }
  0x10   : > { %s3449_s20 = sshll.u32 %s5736_s19, 8  ;;  %s3448_s24 = sshll.u32 %s5736_s19, 10 }
  0x11   : > { %s4133_s23 = scalar_lea.vmem %s5541_s1, %s3449_s20  ;;  %s4169_s27 = scalar_lea.vmem %s5540_s0, %s3448_s24 }
  0x12   : > { %v3843_v1 = vld [vmem:[%s4133_s23] sm:$0xff]   ;;  %v3845_v3 = vld [vmem:[%s4133_s23 + $0x8] sm:$0xff]   ;;  %v3847_v5 = vld [vmem:[%s4133_s23 + $0x10] sm:$0xff]   ;;  %s4316_s30 = scalar_lea.vmem %s5542_s2, %s5736_s19  ;;  %s278_s8 = scalar_lea.vmem %s5543_s3, %s5736_s19 }
  0x13   : > { %1320 = vmatpush1.bf16.msra.mxu1 %v3843_v1  ;;  %v3844_v2 = vld [vmem:[%s4133_s23 + $0x80] sm:$0xff]   ;;  %v3846_v4 = vld [vmem:[%s4133_s23 + $0x88] sm:$0xff]   ;;  %v3848_v6 = vld [vmem:[%s4133_s23 + $0x90] sm:$0xff]   ;;  %s281_s11 = scalar_lea.vmem %s5544_s4, %s5736_s19  ;;  %s5390_s14 = scalar_lea.vmem %s5545_s5, %s3449_s20 }
  0x14   : > { %1321 = vmatprep.subr.bf16.mxu1 %v4084_v0  ;;  %1609 = vmatpush1.bf16.msra.mxu0 %v3844_v2  ;;  %v3849_v7 = vld [vmem:[%s4133_s23 + $0x18] sm:$0xff]   ;;  %v3851_v9 = vld [vmem:[%s4133_s23 + $0x20] sm:$0xff]   ;;  %v3853_v11 = vld [vmem:[%s4133_s23 + $0x28] sm:$0xff]  }
  0x15   : > { %1610 = vmatprep.subr.bf16.mxu0 %v4084_v0  ;;  %v3850_v8 = vld [vmem:[%s4133_s23 + $0x98] sm:$0xff]   ;;  %v3852_v10 = vld [vmem:[%s4133_s23 + $0xa0] sm:$0xff]   ;;  %v3854_v12 = vld [vmem:[%s4133_s23 + $0xa8] sm:$0xff]  }
  0x16   : > { %v3855_v13 = vld [vmem:[%s4133_s23 + $0x30] sm:$0xff]   ;;  %v3857_v15 = vld [vmem:[%s4133_s23 + $0x38] sm:$0xff]   ;;  %v3859_v17 = vld [vmem:[%s4133_s23 + $0x40] sm:$0xff]  }
  0x17   : > { %1322 = vmatpush1.bf16.msra.mxu1 %v3845_v3  ;;  %v3856_v14 = vld [vmem:[%s4133_s23 + $0xb0] sm:$0xff]   ;;  %v3858_v16 = vld [vmem:[%s4133_s23 + $0xb8] sm:$0xff]   ;;  %v3860_v18 = vld [vmem:[%s4133_s23 + $0xc0] sm:$0xff]  }
  0x18   : > { %1323 = vmatprep.subr.bf16.mxu1 %v4084_v0  ;;  %1611 = vmatpush1.bf16.msra.mxu0 %v3846_v4  ;;  %v3877_v19 = vld [vmem:[%s4169_s27 + $0x4] ss:$16 sps:$4 sm:$0xff]   ;;  %v3861_v20 = vld [vmem:[%s4133_s23 + $0x48] sm:$0xff]   ;;  %v3865_v25 = vld [vmem:[%s4133_s23 + $0x58] sm:$0xff]  }
  0x19   : > { %1612 = vmatprep.subr.bf16.mxu0 %v4084_v0  ;;  %1351 = vmatprep.mubr.bf16.mxu1 %v3877_v19  ;;  %v3880_v21 = vld [vmem:[%s4169_s27 + $0xc] ss:$16 sps:$4 sm:$0xff]   ;;  %v3863_v23 = vld [vmem:[%s4133_s23 + $0x50] sm:$0xff]   ;;  %v3867_v27 = vld [vmem:[%s4133_s23 + $0x60] sm:$0xff]  }
  0x1a   : > { %v3862_v22 = vld [vmem:[%s4133_s23 + $0xc8] sm:$0xff]   ;;  %1640 = vmatprep.mubr.bf16.mxu0 %v3880_v21  ;;  %v3864_v24 = vld [vmem:[%s4133_s23 + $0xd0] sm:$0xff]   ;;  %v3866_v26 = vld [vmem:[%s4133_s23 + $0xd8] sm:$0xff]  }
  0x1b   : > { %1324 = vmatpush1.bf16.msra.mxu1 %v3847_v5  ;;  %v3868_v28 = vld [vmem:[%s4133_s23 + $0xe0] sm:$0xff]   ;;  %v3869_v29 = vld [vmem:[%s4133_s23 + $0x68] sm:$0xff]   ;;  %v3871_v31 = vld [vmem:[%s4133_s23 + $0x70] sm:$0xff]  }
  0x1c   : > { %1325 = vmatprep.subr.bf16.mxu1 %v4084_v0  ;;  %1613 = vmatpush1.bf16.msra.mxu0 %v3848_v6  ;;  %v3870_v30 = vld [vmem:[%s4133_s23 + $0xe8] sm:$0xff]   ;;  %v3872_v32 = vld [vmem:[%s4133_s23 + $0xf0] sm:$0xff]   ;;  %v3873_v33 = vld [vmem:[%s4133_s23 + $0x78] sm:$0xff]  }
  0x1d   : > { %1614 = vmatprep.subr.bf16.mxu0 %v4084_v0  ;;  %v3874_v34 = vld [vmem:[%s4133_s23 + $0xf8] sm:$0xff]   ;;  %v3875_v35 = vld [vmem:[%s4169_s27] ss:$16 sps:$4 sm:$0xff]   ;;  %v3881_v36 = vld [vmem:[%s4169_s27 + $0x24] ss:$16 sps:$4 sm:$0xff]  }
  0x1e   : > { %v3878_v37 = vld [vmem:[%s4169_s27 + $0x8] ss:$16 sps:$4 sm:$0xff]   ;;  %v3883_v38 = vld [vmem:[%s4169_s27 + $0x2c] ss:$16 sps:$4 sm:$0xff]   ;;  %v3885_v39 = vld [vmem:[%s4169_s27 + $0x20] ss:$16 sps:$4 sm:$0xff]  }
  0x1f   : > { %1326 = vmatpush1.bf16.msra.mxu1 %v3849_v7  ;;  %v3887_v40 = vld [vmem:[%s4169_s27 + $0x44] ss:$16 sps:$4 sm:$0xff]   ;;  %v3886_v41 = vld [vmem:[%s4169_s27 + $0x28] ss:$16 sps:$4 sm:$0xff]   ;;  %v3889_v42 = vld [vmem:[%s4169_s27 + $0x4c] ss:$16 sps:$4 sm:$0xff]  }
  0x20   : > { %1327 = vmatprep.subr.bf16.mxu1 %v4084_v0  ;;  %1615 = vmatpush1.bf16.msra.mxu0 %v3850_v8  ;;  %v3891_v43 = vld [vmem:[%s4169_s27 + $0x40] ss:$16 sps:$4 sm:$0xff]   ;;  %v3893_v44 = vld [vmem:[%s4169_s27 + $0x64] ss:$16 sps:$4 sm:$0xff]   ;;  %v3892_v45 = vld [vmem:[%s4169_s27 + $0x48] ss:$16 sps:$4 sm:$0xff]  }
  0x21   : > { %1616 = vmatprep.subr.bf16.mxu0 %v4084_v0  ;;  %v3895_v46 = vld [vmem:[%s4169_s27 + $0x6c] ss:$16 sps:$4 sm:$0xff]   ;;  %v3897_v47 = vld [vmem:[%s4169_s27 + $0x60] ss:$16 sps:$4 sm:$0xff]   ;;  %v3898_v48 = vld [vmem:[%s4169_s27 + $0x68] ss:$16 sps:$4 sm:$0xff]  }
  0x22   : > { %v3899_v49 = vld [vmem:[%s4169_s27 + $0x84] ss:$16 sps:$4 sm:$0xff]   ;;  %v3901_v50 = vld [vmem:[%s4169_s27 + $0x8c] ss:$16 sps:$4 sm:$0xff]   ;;  %v3903_v51 = vld [vmem:[%s4169_s27 + $0x80] ss:$16 sps:$4 sm:$0xff]  }
  0x23   : > { %1328 = vmatpush1.bf16.msra.mxu1 %v3851_v9  ;;  %v3905_v52 = vld [vmem:[%s4169_s27 + $0xa4] ss:$16 sps:$4 sm:$0xff]   ;;  %v3904_v53 = vld [vmem:[%s4169_s27 + $0x88] ss:$16 sps:$4 sm:$0xff]   ;;  %v3907_v54 = vld [vmem:[%s4169_s27 + $0xac] ss:$16 sps:$4 sm:$0xff]  }
  0x24   : > { %1329 = vmatprep.subr.bf16.mxu1 %v4084_v0  ;;  %1617 = vmatpush1.bf16.msra.mxu0 %v3852_v10  ;;  %v3909_v55 = vld [vmem:[%s4169_s27 + $0xa0] ss:$16 sps:$4 sm:$0xff]   ;;  %v3911_v56 = vld [vmem:[%s4169_s27 + $0xc4] ss:$16 sps:$4 sm:$0xff]   ;;  %v3910_v57 = vld [vmem:[%s4169_s27 + $0xa8] ss:$16 sps:$4 sm:$0xff]  }
  0x25   : > { %1618 = vmatprep.subr.bf16.mxu0 %v4084_v0  ;;  %v3913_v58 = vld [vmem:[%s4169_s27 + $0xcc] ss:$16 sps:$4 sm:$0xff]   ;;  %v3915_v59 = vld [vmem:[%s4169_s27 + $0xc0] ss:$16 sps:$4 sm:$0xff]   ;;  %v3917_v60 = vld [vmem:[%s4169_s27 + $0xe4] ss:$16 sps:$4 sm:$0xff]  }
  0x26   : > { %v3916_v61 = vld [vmem:[%s4169_s27 + $0xc8] ss:$16 sps:$4 sm:$0xff]   ;;  %v3919_v62 = vld [vmem:[%s4169_s27 + $0xec] ss:$16 sps:$4 sm:$0xff]   ;;  %v3921_v63 = vld [vmem:[%s4169_s27 + $0xe0] ss:$16 sps:$4 sm:$0xff]  }
  0x27   : > { %1330 = vmatpush1.bf16.msra.mxu1 %v3853_v11  ;;  %v3922_v1 = vld [vmem:[%s4169_s27 + $0xe8] ss:$16 sps:$4 sm:$0xff]   ;;  %v3925_v2 = vld [vmem:[%s4169_s27 + $0x10c] ss:$16 sps:$4 sm:$0xff]   ;;  %v3927_v3 = vld [vmem:[%s4169_s27 + $0x100] ss:$16 sps:$4 sm:$0xff]  }
  0x28   : > { %1331 = vmatprep.subr.bf16.mxu1 %v4084_v0  ;;  %1619 = vmatpush1.bf16.msra.mxu0 %v3854_v12  ;;  %v3929_v4 = vld [vmem:[%s4169_s27 + $0x124] ss:$16 sps:$4 sm:$0xff]   ;;  %v3928_v5 = vld [vmem:[%s4169_s27 + $0x108] ss:$16 sps:$4 sm:$0xff]   ;;  %v3931_v6 = vld [vmem:[%s4169_s27 + $0x12c] ss:$16 sps:$4 sm:$0xff]  }
  0x29   : > { %1620 = vmatprep.subr.bf16.mxu0 %v4084_v0  ;;  %v3933_v7 = vld [vmem:[%s4169_s27 + $0x120] ss:$16 sps:$4 sm:$0xff]   ;;  %v3935_v8 = vld [vmem:[%s4169_s27 + $0x144] ss:$16 sps:$4 sm:$0xff]   ;;  %v3934_v9 = vld [vmem:[%s4169_s27 + $0x128] ss:$16 sps:$4 sm:$0xff]  }
  0x2a   : > { %v3937_v10 = vld [vmem:[%s4169_s27 + $0x14c] ss:$16 sps:$4 sm:$0xff]   ;;  %v3939_v11 = vld [vmem:[%s4169_s27 + $0x140] ss:$16 sps:$4 sm:$0xff]   ;;  %v3941_v12 = vld [vmem:[%s4169_s27 + $0x164] ss:$16 sps:$4 sm:$0xff]  }
  0x2b   : > { %1332 = vmatpush1.bf16.msra.mxu1 %v3855_v13  ;;  %v3940_v13 = vld [vmem:[%s4169_s27 + $0x148] ss:$16 sps:$4 sm:$0xff]   ;;  %v3951_v19 = vld [vmem:[%s4169_s27 + $0x180] ss:$16 sps:$4 sm:$0xff]  }
  0x2c   : > { %1333 = vmatprep.subr.bf16.mxu1 %v4084_v0  ;;  %1621 = vmatpush1.bf16.msra.mxu0 %v3856_v14  ;;  %v3943_v14 = vld [vmem:[%s4169_s27 + $0x16c] ss:$16 sps:$4 sm:$0xff]   ;;  %v3952_v21 = vld [vmem:[%s4169_s27 + $0x188] ss:$16 sps:$4 sm:$0xff]  }
  0x2d   : > { %1622 = vmatprep.subr.bf16.mxu0 %v4084_v0 }
  0x2f   : > { %1334 = vmatpush1.bf16.msra.mxu1 %v3857_v15  ;;  %v3945_v15 = vld [vmem:[%s4169_s27 + $0x160] ss:$16 sps:$4 sm:$0xff]  }
  0x30   : > { %1335 = vmatprep.subr.bf16.mxu1 %v4084_v0  ;;  %1623 = vmatpush1.bf16.msra.mxu0 %v3858_v16  ;;  %v3947_v16 = vld [vmem:[%s4169_s27 + $0x184] ss:$16 sps:$4 sm:$0xff]  }
  0x31   : > { %1624 = vmatprep.subr.bf16.mxu0 %v4084_v0 }
  0x33   : > { %1336 = vmatpush1.bf16.msra.mxu1 %v3859_v17  ;;  %v3946_v17 = vld [vmem:[%s4169_s27 + $0x168] ss:$16 sps:$4 sm:$0xff]  }
  0x34   : > { %1337 = vmatprep.subr.bf16.mxu1 %v4084_v0  ;;  %1625 = vmatpush1.bf16.msra.mxu0 %v3860_v18  ;;  %v3949_v18 = vld [vmem:[%s4169_s27 + $0x18c] ss:$16 sps:$4 sm:$0xff]  }
  0x35   : > { %1626 = vmatprep.subr.bf16.mxu0 %v4084_v0 }
  0x37   : > { %1338 = vmatpush1.bf16.msra.mxu1 %v3861_v20  ;;  %v3953_v20 = vld [vmem:[%s4169_s27 + $0x1a4] ss:$16 sps:$4 sm:$0xff]  }
  0x38   : > { %1339 = vmatprep.subr.bf16.mxu1 %v4084_v0  ;;  %1627 = vmatpush1.bf16.msra.mxu0 %v3862_v22  ;;  %v3955_v22 = vld [vmem:[%s4169_s27 + $0x1ac] ss:$16 sps:$4 sm:$0xff]  }
  0x39   : > { %1628 = vmatprep.subr.bf16.mxu0 %v4084_v0 }
  0x3b   : > { %1340 = vmatpush1.bf16.msra.mxu1 %v3863_v23  ;;  %v3957_v23 = vld [vmem:[%s4169_s27 + $0x1a0] ss:$16 sps:$4 sm:$0xff]  }
  0x3c   : > { %1341 = vmatprep.subr.bf16.mxu1 %v4084_v0  ;;  %1629 = vmatpush1.bf16.msra.mxu0 %v3864_v24  ;;  %v3959_v24 = vld [vmem:[%s4169_s27 + $0x1c4] ss:$16 sps:$4 sm:$0xff]  }
  0x3d   : > { %1630 = vmatprep.subr.bf16.mxu0 %v4084_v0 }
  0x3f   : > { %1342 = vmatpush1.bf16.msra.mxu1 %v3865_v25  ;;  %v3958_v25 = vld [vmem:[%s4169_s27 + $0x1a8] ss:$16 sps:$4 sm:$0xff]  }
  0x40   : > { %1343 = vmatprep.subr.bf16.mxu1 %v4084_v0  ;;  %1631 = vmatpush1.bf16.msra.mxu0 %v3866_v26  ;;  %v3961_v26 = vld [vmem:[%s4169_s27 + $0x1cc] ss:$16 sps:$4 sm:$0xff]  }
  0x41   : > { %1632 = vmatprep.subr.bf16.mxu0 %v4084_v0 }
  0x43   : > { %1344 = vmatpush1.bf16.msra.mxu1 %v3867_v27  ;;  %v3963_v27 = vld [vmem:[%s4169_s27 + $0x1c0] ss:$16 sps:$4 sm:$0xff]  }
  0x44   : > { %1345 = vmatprep.subr.bf16.mxu1 %v4084_v0  ;;  %1633 = vmatpush1.bf16.msra.mxu0 %v3868_v28  ;;  %v3965_v28 = vld [vmem:[%s4169_s27 + $0x1e4] ss:$16 sps:$4 sm:$0xff]  }
  0x45   : > { %1634 = vmatprep.subr.bf16.mxu0 %v4084_v0 }
  0x47   : > { %1346 = vmatpush1.bf16.msra.mxu1 %v3869_v29  ;;  %v3964_v29 = vld [vmem:[%s4169_s27 + $0x1c8] ss:$16 sps:$4 sm:$0xff]  }
  0x48   : > { %1347 = vmatprep.subr.bf16.mxu1 %v4084_v0  ;;  %1635 = vmatpush1.bf16.msra.mxu0 %v3870_v30  ;;  %v3967_v30 = vld [vmem:[%s4169_s27 + $0x1ec] ss:$16 sps:$4 sm:$0xff]  }
  0x49   : > { %1636 = vmatprep.subr.bf16.mxu0 %v4084_v0 }
  0x4b   : > { %1348 = vmatpush1.bf16.msra.mxu1 %v3871_v31  ;;  %v3969_v31 = vld [vmem:[%s4169_s27 + $0x1e0] ss:$16 sps:$4 sm:$0xff]  }
  0x4c   : > { %1349 = vmatprep.subr.bf16.mxu1 %v4084_v0  ;;  %1637 = vmatpush1.bf16.msra.mxu0 %v3872_v32  ;;  %v3971_v32 = vld [vmem:[%s4169_s27 + $0x204] ss:$16 sps:$4 sm:$0xff]  }
  0x4d   : > { %1638 = vmatprep.subr.bf16.mxu0 %v4084_v0  ;;  %v3923_v0 = vld [vmem:[%s4169_s27 + $0x104] ss:$16 sps:$4 sm:$0xff]  }
  0x4f   : > { %1350 = vmatpush1.bf16.msra.mxu1 %v3873_v33  ;;  %v3970_v33 = vld [vmem:[%s4169_s27 + $0x1e8] ss:$16 sps:$4 sm:$0xff]  }
  0x50   : > { %1639 = vmatpush1.bf16.msra.mxu0 %v3874_v34  ;;  %v3973_v34 = vld [vmem:[%s4169_s27 + $0x20c] ss:$16 sps:$4 sm:$0xff]  }
  0x52   : > { %1352 = vmatmul.mubr.bf16.vlgmr.msra.gmra.mrb[0].mxu1 %v3875_v35  ;;  %v3975_v35 = vld [vmem:[%s4169_s27 + $0x200] ss:$16 sps:$4 sm:$0xff]  }
  0x53   : > { %1359 = vmatprep.mubr.bf16.mxu1 %v3881_v36  ;;  %1641 = vmatmul.mubr.bf16.vlgmr.msra.gmra.mrb[0].mxu0 %v3878_v37  ;;  %v3977_v36 = vld [vmem:[%s4169_s27 + $0x224] ss:$16 sps:$4 sm:$0xff]   ;;  %v3976_v37 = vld [vmem:[%s4169_s27 + $0x208] ss:$16 sps:$4 sm:$0xff]  }
  0x54   : > { %1648 = vmatprep.mubr.bf16.mxu0 %v3883_v38  ;;  %v3979_v38 = vld [vmem:[%s4169_s27 + $0x22c] ss:$16 sps:$4 sm:$0xff]  }
  0x5a   : > { %1360 = vmatmul.mubr.bf16.gmra.mrb[4].mxu1 %v3885_v39  ;;  %v3981_v39 = vld [vmem:[%s4169_s27 + $0x220] ss:$16 sps:$4 sm:$0xff]  }
  0x5b   : > { %1367 = vmatprep.mubr.bf16.mxu1 %v3887_v40  ;;  %1649 = vmatmul.mubr.bf16.gmra.mrb[4].mxu0 %v3886_v41  ;;  %v3983_v40 = vld [vmem:[%s4169_s27 + $0x244] ss:$16 sps:$4 sm:$0xff]   ;;  %v3982_v41 = vld [vmem:[%s4169_s27 + $0x228] ss:$16 sps:$4 sm:$0xff]  }
  0x5c   : > { %1656 = vmatprep.mubr.bf16.mxu0 %v3889_v42  ;;  %v3985_v42 = vld [vmem:[%s4169_s27 + $0x24c] ss:$16 sps:$4 sm:$0xff]  }
  0x62   : > { %1368 = vmatmul.mubr.bf16.gmra.mrb[8].mxu1 %v3891_v43  ;;  %v3987_v43 = vld [vmem:[%s4169_s27 + $0x240] ss:$16 sps:$4 sm:$0xff]  }
  0x63   : > { %1375 = vmatprep.mubr.bf16.mxu1 %v3893_v44  ;;  %1657 = vmatmul.mubr.bf16.gmra.mrb[8].mxu0 %v3892_v45  ;;  %v3989_v44 = vld [vmem:[%s4169_s27 + $0x264] ss:$16 sps:$4 sm:$0xff]   ;;  %v3988_v45 = vld [vmem:[%s4169_s27 + $0x248] ss:$16 sps:$4 sm:$0xff]  }
  0x64   : > { %1664 = vmatprep.mubr.bf16.mxu0 %v3895_v46  ;;  %v3991_v46 = vld [vmem:[%s4169_s27 + $0x26c] ss:$16 sps:$4 sm:$0xff]  }
  0x6a   : > { %1376 = vmatmul.mubr.bf16.gmra.mrb[12].mxu1 %v3897_v47  ;;  %v3993_v47 = vld [vmem:[%s4169_s27 + $0x260] ss:$16 sps:$4 sm:$0xff]  }
  0x6b   : > { %1383 = vmatprep.mubr.bf16.mxu1 %v3899_v49  ;;  %1665 = vmatmul.mubr.bf16.gmra.mrb[12].mxu0 %v3898_v48  ;;  %v3995_v48 = vld [vmem:[%s4169_s27 + $0x284] ss:$16 sps:$4 sm:$0xff]   ;;  %v3994_v49 = vld [vmem:[%s4169_s27 + $0x268] ss:$16 sps:$4 sm:$0xff]  }
  0x6c   : > { %1672 = vmatprep.mubr.bf16.mxu0 %v3901_v50  ;;  %v3997_v50 = vld [vmem:[%s4169_s27 + $0x28c] ss:$16 sps:$4 sm:$0xff]  }
  0x72   : > { %1384 = vmatmul.mubr.bf16.gmra.mrb[16].mxu1 %v3903_v51  ;;  %v3999_v51 = vld [vmem:[%s4169_s27 + $0x280] ss:$16 sps:$4 sm:$0xff]  }
  0x73   : > { %1391 = vmatprep.mubr.bf16.mxu1 %v3905_v52  ;;  %1673 = vmatmul.mubr.bf16.gmra.mrb[16].mxu0 %v3904_v53  ;;  %v4001_v52 = vld [vmem:[%s4169_s27 + $0x2a4] ss:$16 sps:$4 sm:$0xff]   ;;  %v4000_v53 = vld [vmem:[%s4169_s27 + $0x288] ss:$16 sps:$4 sm:$0xff]  }
  0x74   : > { %1680 = vmatprep.mubr.bf16.mxu0 %v3907_v54  ;;  %v4003_v54 = vld [vmem:[%s4169_s27 + $0x2ac] ss:$16 sps:$4 sm:$0xff]  }
  0x7a   : > { %1392 = vmatmul.mubr.bf16.gmra.mrb[20].mxu1 %v3909_v55  ;;  %v4005_v55 = vld [vmem:[%s4169_s27 + $0x2a0] ss:$16 sps:$4 sm:$0xff]  }
  0x7b   : > { %1399 = vmatprep.mubr.bf16.mxu1 %v3911_v56  ;;  %1681 = vmatmul.mubr.bf16.gmra.mrb[20].mxu0 %v3910_v57  ;;  %v4007_v56 = vld [vmem:[%s4169_s27 + $0x2c4] ss:$16 sps:$4 sm:$0xff]   ;;  %v4006_v57 = vld [vmem:[%s4169_s27 + $0x2a8] ss:$16 sps:$4 sm:$0xff]  }
  0x7c   : > { %1688 = vmatprep.mubr.bf16.mxu0 %v3913_v58  ;;  %v4009_v58 = vld [vmem:[%s4169_s27 + $0x2cc] ss:$16 sps:$4 sm:$0xff]  }
  0x82   : > { %1400 = vmatmul.mubr.bf16.gmra.mrb[24].mxu1 %v3915_v59  ;;  %v4011_v59 = vld [vmem:[%s4169_s27 + $0x2c0] ss:$16 sps:$4 sm:$0xff]  }
  0x83   : > { %1407 = vmatprep.mubr.bf16.mxu1 %v3917_v60  ;;  %1689 = vmatmul.mubr.bf16.gmra.mrb[24].mxu0 %v3916_v61  ;;  %v4013_v60 = vld [vmem:[%s4169_s27 + $0x2e4] ss:$16 sps:$4 sm:$0xff]   ;;  %v4012_v61 = vld [vmem:[%s4169_s27 + $0x2c8] ss:$16 sps:$4 sm:$0xff]  }
  0x84   : > { %1696 = vmatprep.mubr.bf16.mxu0 %v3919_v62  ;;  %v4015_v62 = vld [vmem:[%s4169_s27 + $0x2ec] ss:$16 sps:$4 sm:$0xff]  }
  0x8a   : > { %1408 = vmatmul.mubr.bf16.gmra.mrb[28].mxu1 %v3921_v63  ;;  %v4017_v63 = vld [vmem:[%s4169_s27 + $0x2e0] ss:$16 sps:$4 sm:$0xff]  }
  0x8b   : > { %1415 = vmatprep.mubr.bf16.mxu1 %v3923_v0  ;;  %1697 = vmatmul.mubr.bf16.gmra.mrb[28].mxu0 %v3922_v1  ;;  %v4019_v0 = vld [vmem:[%s4169_s27 + $0x304] ss:$16 sps:$4 sm:$0xff]   ;;  %v4018_v1 = vld [vmem:[%s4169_s27 + $0x2e8] ss:$16 sps:$4 sm:$0xff]  }
  0x8c   : > { %1704 = vmatprep.mubr.bf16.mxu0 %v3925_v2  ;;  %v4021_v2 = vld [vmem:[%s4169_s27 + $0x30c] ss:$16 sps:$4 sm:$0xff]  }
  0x92   : > { %1416 = vmatmul.mubr.bf16.gmra.mrb[32].mxu1 %v3927_v3  ;;  %v4023_v3 = vld [vmem:[%s4169_s27 + $0x300] ss:$16 sps:$4 sm:$0xff]  }
  0x93   : > { %1423 = vmatprep.mubr.bf16.mxu1 %v3929_v4  ;;  %1705 = vmatmul.mubr.bf16.gmra.mrb[32].mxu0 %v3928_v5  ;;  %v4025_v4 = vld [vmem:[%s4169_s27 + $0x324] ss:$16 sps:$4 sm:$0xff]   ;;  %v4024_v5 = vld [vmem:[%s4169_s27 + $0x308] ss:$16 sps:$4 sm:$0xff]  }
  0x94   : > { %1712 = vmatprep.mubr.bf16.mxu0 %v3931_v6  ;;  %v4027_v6 = vld [vmem:[%s4169_s27 + $0x32c] ss:$16 sps:$4 sm:$0xff]  }
  0x9a   : > { %1424 = vmatmul.mubr.bf16.gmra.mrb[36].mxu1 %v3933_v7  ;;  %v4029_v7 = vld [vmem:[%s4169_s27 + $0x320] ss:$16 sps:$4 sm:$0xff]  }
  0x9b   : > { %1431 = vmatprep.mubr.bf16.mxu1 %v3935_v8  ;;  %1713 = vmatmul.mubr.bf16.gmra.mrb[36].mxu0 %v3934_v9  ;;  %v4031_v8 = vld [vmem:[%s4169_s27 + $0x344] ss:$16 sps:$4 sm:$0xff]   ;;  %v4030_v9 = vld [vmem:[%s4169_s27 + $0x328] ss:$16 sps:$4 sm:$0xff]  }
  0x9c   : > { %1720 = vmatprep.mubr.bf16.mxu0 %v3937_v10  ;;  %v4033_v10 = vld [vmem:[%s4169_s27 + $0x34c] ss:$16 sps:$4 sm:$0xff]  }
  0xa2   : > { %1432 = vmatmul.mubr.bf16.gmra.mrb[40].mxu1 %v3939_v11  ;;  %v4035_v11 = vld [vmem:[%s4169_s27 + $0x340] ss:$16 sps:$4 sm:$0xff]  }
  0xa3   : > { %1439 = vmatprep.mubr.bf16.mxu1 %v3941_v12  ;;  %1721 = vmatmul.mubr.bf16.gmra.mrb[40].mxu0 %v3940_v13  ;;  %v4037_v12 = vld [vmem:[%s4169_s27 + $0x364] ss:$16 sps:$4 sm:$0xff]   ;;  %v4036_v13 = vld [vmem:[%s4169_s27 + $0x348] ss:$16 sps:$4 sm:$0xff]  }
  0xa4   : > { %1728 = vmatprep.mubr.bf16.mxu0 %v3943_v14  ;;  %v4039_v14 = vld [vmem:[%s4169_s27 + $0x36c] ss:$16 sps:$4 sm:$0xff]  }
  0xaa   : > { %1440 = vmatmul.mubr.bf16.gmra.mrb[44].mxu1 %v3945_v15  ;;  %v4320_v15 = vld [vmem:[%s4316_s30] ss:$0 sm:$0xff] }
  0xab   : > { %1447 = vmatprep.mubr.bf16.mxu1 %v3947_v16  ;;  %1729 = vmatmul.mubr.bf16.gmra.mrb[44].mxu0 %v3946_v17 }
  0xac   : > { %1736 = vmatprep.mubr.bf16.mxu0 %v3949_v18 }
  0xb2   : > { %1448 = vmatmul.mubr.bf16.gmra.mrb[48].mxu1 %v3951_v19  ;;  %v4041_v19 = vld [vmem:[%s4169_s27 + $0x360] ss:$16 sps:$4 sm:$0xff]  }
  0xb3   : > { %1455 = vmatprep.mubr.bf16.mxu1 %v3953_v20  ;;  %1737 = vmatmul.mubr.bf16.gmra.mrb[48].mxu0 %v3952_v21 }
  0xb4   : > { %1744 = vmatprep.mubr.bf16.mxu0 %v3955_v22  ;;  %v4043_v22 = vld [vmem:[%s4169_s27 + $0x384] ss:$16 sps:$4 sm:$0xff]  }
  0xba   : > { %1456 = vmatmul.mubr.bf16.gmra.mrb[52].mxu1 %v3957_v23 }
  0xbb   : > { %1463 = vmatprep.mubr.bf16.mxu1 %v3959_v24  ;;  %1745 = vmatmul.mubr.bf16.gmra.mrb[52].mxu0 %v3958_v25 }
  0xbc   : > { %1752 = vmatprep.mubr.bf16.mxu0 %v3961_v26 }
  0xc2   : > { %1464 = vmatmul.mubr.bf16.gmra.mrb[56].mxu1 %v3963_v27  ;;  %v4042_v27 = vld [vmem:[%s4169_s27 + $0x368] ss:$16 sps:$4 sm:$0xff]  }
  0xc3   : > { %1471 = vmatprep.mubr.bf16.mxu1 %v3965_v28  ;;  %1753 = vmatmul.mubr.bf16.gmra.mrb[56].mxu0 %v3964_v29  ;;  %v4045_v29 = vld [vmem:[%s4169_s27 + $0x38c] ss:$16 sps:$4 sm:$0xff]  }
  0xc4   : > { %1760 = vmatprep.mubr.bf16.mxu0 %v3967_v30 }
  0xca   : > { %1472 = vmatmul.mubr.bf16.gmra.mrb[60].mxu1 %v3969_v31 }
  0xcb   : > { %1479 = vmatprep.mubr.bf16.mxu1 %v3971_v32  ;;  %1761 = vmatmul.mubr.bf16.gmra.mrb[60].mxu0 %v3970_v33 }
  0xcc   : > { %1768 = vmatprep.mubr.bf16.mxu0 %v3973_v34 }
  0xd2   : > { %1480 = vmatmul.mubr.bf16.gmra.mrb[64].mxu1 %v3975_v35  ;;  %v4047_v35 = vld [vmem:[%s4169_s27 + $0x380] ss:$16 sps:$4 sm:$0xff]  }
  0xd3   : > { %1487 = vmatprep.mubr.bf16.mxu1 %v3977_v36  ;;  %1769 = vmatmul.mubr.bf16.gmra.mrb[64].mxu0 %v3976_v37 }
  0xd4   : > { %1776 = vmatprep.mubr.bf16.mxu0 %v3979_v38  ;;  %v4049_v38 = vld [vmem:[%s4169_s27 + $0x3a4] ss:$16 sps:$4 sm:$0xff]  }
  0xda   : > { %1488 = vmatmul.mubr.bf16.gmra.mrb[68].mxu1 %v3981_v39 }
  0xdb   : > { %1495 = vmatprep.mubr.bf16.mxu1 %v3983_v40  ;;  %1777 = vmatmul.mubr.bf16.gmra.mrb[68].mxu0 %v3982_v41 }
  0xdc   : > { %1784 = vmatprep.mubr.bf16.mxu0 %v3985_v42 }
  0xe2   : > { %1496 = vmatmul.mubr.bf16.gmra.mrb[72].mxu1 %v3987_v43  ;;  %v4048_v43 = vld [vmem:[%s4169_s27 + $0x388] ss:$16 sps:$4 sm:$0xff]  }
  0xe3   : > { %1503 = vmatprep.mubr.bf16.mxu1 %v3989_v44  ;;  %1785 = vmatmul.mubr.bf16.gmra.mrb[72].mxu0 %v3988_v45  ;;  %v4051_v45 = vld [vmem:[%s4169_s27 + $0x3ac] ss:$16 sps:$4 sm:$0xff]  }
  0xe4   : > { %1792 = vmatprep.mubr.bf16.mxu0 %v3991_v46 }
  0xea   : > { %1504 = vmatmul.mubr.bf16.gmra.mrb[76].mxu1 %v3993_v47 }
  0xeb   : > { %1511 = vmatprep.mubr.bf16.mxu1 %v3995_v48  ;;  %1793 = vmatmul.mubr.bf16.gmra.mrb[76].mxu0 %v3994_v49 }
  0xec   : > { %1800 = vmatprep.mubr.bf16.mxu0 %v3997_v50 }
  0xf2   : > { %1512 = vmatmul.mubr.bf16.gmra.mrb[80].mxu1 %v3999_v51  ;;  %v4053_v51 = vld [vmem:[%s4169_s27 + $0x3a0] ss:$16 sps:$4 sm:$0xff]  }
  0xf3   : > { %1519 = vmatprep.mubr.bf16.mxu1 %v4001_v52  ;;  %1801 = vmatmul.mubr.bf16.gmra.mrb[80].mxu0 %v4000_v53 }
  0xf4   : > { %1808 = vmatprep.mubr.bf16.mxu0 %v4003_v54  ;;  %v4055_v54 = vld [vmem:[%s4169_s27 + $0x3c4] ss:$16 sps:$4 sm:$0xff]  }
  0xfa   : > { %1520 = vmatmul.mubr.bf16.gmra.mrb[84].mxu1 %v4005_v55 }
  0xfb   : > { %1527 = vmatprep.mubr.bf16.mxu1 %v4007_v56  ;;  %1809 = vmatmul.mubr.bf16.gmra.mrb[84].mxu0 %v4006_v57 }
  0xfc   : > { %1816 = vmatprep.mubr.bf16.mxu0 %v4009_v58 }
 0x102   : > { %1528 = vmatmul.mubr.bf16.gmra.mrb[88].mxu1 %v4011_v59  ;;  %v4054_v59 = vld [vmem:[%s4169_s27 + $0x3a8] ss:$16 sps:$4 sm:$0xff]  }
 0x103   : > { %1535 = vmatprep.mubr.bf16.mxu1 %v4013_v60  ;;  %1817 = vmatmul.mubr.bf16.gmra.mrb[88].mxu0 %v4012_v61  ;;  %v4057_v61 = vld [vmem:[%s4169_s27 + $0x3cc] ss:$16 sps:$4 sm:$0xff]  }
 0x104   : > { %1824 = vmatprep.mubr.bf16.mxu0 %v4015_v62 }
 0x10a   : > { %1536 = vmatmul.mubr.bf16.gmra.mrb[92].mxu1 %v4017_v63 }
 0x10b   : > { %1543 = vmatprep.mubr.bf16.mxu1 %v4019_v0  ;;  %1825 = vmatmul.mubr.bf16.gmra.mrb[92].mxu0 %v4018_v1 }
 0x10c   : > { %1832 = vmatprep.mubr.bf16.mxu0 %v4021_v2 }
 0x112   : > { %1544 = vmatmul.mubr.bf16.gmra.mrb[96].mxu1 %v4023_v3  ;;  %v4059_v3 = vld [vmem:[%s4169_s27 + $0x3c0] ss:$16 sps:$4 sm:$0xff]  }
 0x113   : > { %1551 = vmatprep.mubr.bf16.mxu1 %v4025_v4  ;;  %1833 = vmatmul.mubr.bf16.gmra.mrb[96].mxu0 %v4024_v5 }
 0x114   : > { %1840 = vmatprep.mubr.bf16.mxu0 %v4027_v6  ;;  %v4061_v6 = vld [vmem:[%s4169_s27 + $0x3e4] ss:$16 sps:$4 sm:$0xff]  }
 0x11a   : > { %1552 = vmatmul.mubr.bf16.gmra.mrb[100].mxu1 %v4029_v7 }
 0x11b   : > { %1559 = vmatprep.mubr.bf16.mxu1 %v4031_v8  ;;  %1841 = vmatmul.mubr.bf16.gmra.mrb[100].mxu0 %v4030_v9 }
 0x11c   : > { %1848 = vmatprep.mubr.bf16.mxu0 %v4033_v10 }
 0x122   : > { %1560 = vmatmul.mubr.bf16.gmra.mrb[104].mxu1 %v4035_v11  ;;  %v4060_v11 = vld [vmem:[%s4169_s27 + $0x3c8] ss:$16 sps:$4 sm:$0xff]  }
 0x123   : > { %1567 = vmatprep.mubr.bf16.mxu1 %v4037_v12  ;;  %1849 = vmatmul.mubr.bf16.gmra.mrb[104].mxu0 %v4036_v13  ;;  %v4063_v13 = vld [vmem:[%s4169_s27 + $0x3ec] ss:$16 sps:$4 sm:$0xff]  }
 0x124   : > { %1856 = vmatprep.mubr.bf16.mxu0 %v4039_v14 }
 0x125   : > { %v1353_v16 = vpop.f32.mrb[0].mxu1 }
 0x126   : > { %v1354_v17 = vadd.f32 %v4320_v15, %v1353_v16  ;;  %v1355_v18 = vpop.f32.mrb[1].mxu1  ;;  %v1642_v20 = vpop.f32.mrb[0].mxu0 }
 0x127   : > { %v1356_v21 = vpop.f32.mrb[2].mxu1  ;;  %v1644_v24 = vpop.f32.mrb[1].mxu0 }
 0x128   : > { %v4325_v23 = vadd.f32 %v1642_v20, %v1354_v17  ;;  %v1357_v25 = vadd.f32 %v4320_v15, %v1356_v21  ;;  %v1358_v26 = vpop.f32.mrb[3].mxu1  ;;  %v1645_v28 = vpop.f32.mrb[2].mxu0  ;;  %v4065_v20 = vld [vmem:[%s4169_s27 + $0x3e0] ss:$16 sps:$4 sm:$0xff]  }
 0x129   : > { %v1647_v31 = vpop.f32.mrb[3].mxu0 }
 0x12a   : > { %v4330_v30 = vadd.f32 %v1645_v28, %v1357_v25  ;;  %1568 = vmatmul.mubr.bf16.gmra.mrb[108].mxu1 %v4041_v19  ;;  %1897 = vadd.xlane.f32.xlu0 %v4325_v23  ;;  %v4066_v28 = vld [vmem:[%s4169_s27 + $0x3e8] ss:$16 sps:$4 sm:$0xff]  }
 0x12b   : > { %1575 = vmatprep.mubr.bf16.mxu1 %v4043_v22  ;;  %1857 = vmatmul.mubr.bf16.gmra.mrb[108].mxu0 %v4042_v27 }
 0x12c   : > { %1864 = vmatprep.mubr.bf16.mxu0 %v4045_v29 }
 0x12d   : > { %v1361_v32 = vpop.f32.mrb[4].mxu1 }
 0x12e   : > { %v1362_v33 = vadd.f32 %v4320_v15, %v1361_v32  ;;  %v1363_v34 = vpop.f32.mrb[5].mxu1  ;;  %1899 = vadd.xlane.f32.xlu0 %v4330_v30  ;;  %v1650_v36 = vpop.f32.mrb[4].mxu0 }
 0x12f   : > { %v1364_v37 = vpop.f32.mrb[6].mxu1  ;;  %v1652_v40 = vpop.f32.mrb[5].mxu0 }
 0x130   : > { %v4337_v39 = vadd.f32 %v1650_v36, %v1362_v33  ;;  %v1365_v41 = vadd.f32 %v4320_v15, %v1364_v37  ;;  %v1366_v42 = vpop.f32.mrb[7].mxu1  ;;  %v1653_v44 = vpop.f32.mrb[6].mxu0 }
 0x131   : > { %v1655_v47 = vpop.f32.mrb[7].mxu0 }
 0x132   : > { %v4342_v46 = vadd.f32 %v1653_v44, %v1365_v41  ;;  %1576 = vmatmul.mubr.bf16.gmra.mrb[112].mxu1 %v4047_v35  ;;  %1901 = vadd.xlane.f32.xlu0 %v4337_v39 }
 0x133   : > { %1583 = vmatprep.mubr.bf16.mxu1 %v4049_v38  ;;  %1865 = vmatmul.mubr.bf16.gmra.mrb[112].mxu0 %v4048_v43 }
 0x134   : > { %1872 = vmatprep.mubr.bf16.mxu0 %v4051_v45 }
 0x135   : > { %v1369_v48 = vpop.f32.mrb[8].mxu1 }
 0x136   : > { %v1370_v49 = vadd.f32 %v4320_v15, %v1369_v48  ;;  %v1371_v50 = vpop.f32.mrb[9].mxu1  ;;  %1903 = vadd.xlane.f32.xlu0 %v4342_v46  ;;  %v1658_v52 = vpop.f32.mrb[8].mxu0 }
 0x137   : > { %v1372_v53 = vpop.f32.mrb[10].mxu1  ;;  %v1660_v56 = vpop.f32.mrb[9].mxu0 }
 0x138   : > { %v4349_v55 = vadd.f32 %v1658_v52, %v1370_v49  ;;  %v1373_v57 = vadd.f32 %v4320_v15, %v1372_v53  ;;  %v1374_v58 = vpop.f32.mrb[11].mxu1  ;;  %v1661_v60 = vpop.f32.mrb[10].mxu0 }
 0x139   : > { %v1663_v63 = vpop.f32.mrb[11].mxu0 }
 0x13a   : > { %v4354_v62 = vadd.f32 %v1661_v60, %v1373_v57  ;;  %1584 = vmatmul.mubr.bf16.gmra.mrb[116].mxu1 %v4053_v51  ;;  %1905 = vadd.xlane.f32.xlu0 %v4349_v55 }
 0x13b   : > { %1591 = vmatprep.mubr.bf16.mxu1 %v4055_v54  ;;  %1873 = vmatmul.mubr.bf16.gmra.mrb[116].mxu0 %v4054_v59 }
 0x13c   : > { %1880 = vmatprep.mubr.bf16.mxu0 %v4057_v61 }
 0x13d   : > { %v1377_v0 = vpop.f32.mrb[12].mxu1 }
 0x13e   : > { %v1378_v1 = vadd.f32 %v4320_v15, %v1377_v0  ;;  %v1379_v2 = vpop.f32.mrb[13].mxu1  ;;  %1907 = vadd.xlane.f32.xlu0 %v4354_v62  ;;  %v1666_v4 = vpop.f32.mrb[12].mxu0 }
 0x13f   : > { %v1380_v5 = vpop.f32.mrb[14].mxu1  ;;  %v1668_v8 = vpop.f32.mrb[13].mxu0 }
 0x140   : > { %v4361_v7 = vadd.f32 %v1666_v4, %v1378_v1  ;;  %v1381_v9 = vadd.f32 %v4320_v15, %v1380_v5  ;;  %v1382_v10 = vpop.f32.mrb[15].mxu1  ;;  %v1669_v12 = vpop.f32.mrb[14].mxu0 }
 0x141   : > { %v1671_v16 = vpop.f32.mrb[15].mxu0 }
 0x142   : > { %v4366_v14 = vadd.f32 %v1669_v12, %v1381_v9  ;;  %1592 = vmatmul.mubr.bf16.gmra.mrb[120].mxu1 %v4059_v3  ;;  %1909 = vadd.xlane.f32.xlu0 %v4361_v7 }
 0x143   : > { %1599 = vmatprep.mubr.bf16.mxu1 %v4061_v6  ;;  %1881 = vmatmul.mubr.bf16.gmra.mrb[120].mxu0 %v4060_v11 }
 0x144   : > { %1888 = vmatprep.mubr.bf16.mxu0 %v4063_v13 }
 0x145   : > { %v1385_v17 = vpop.f32.mrb[16].mxu1 }
 0x146   : > { %v1386_v18 = vadd.f32 %v4320_v15, %v1385_v17  ;;  %v1387_v19 = vpop.f32.mrb[17].mxu1  ;;  %1911 = vadd.xlane.f32.xlu0 %v4366_v14  ;;  %v1674_v21 = vpop.f32.mrb[16].mxu0 }
 0x147   : > { %v1388_v22 = vpop.f32.mrb[18].mxu1  ;;  %v1676_v25 = vpop.f32.mrb[17].mxu0 }
 0x148   : > { %v4372_v24 = vadd.f32 %v1674_v21, %v1386_v18  ;;  %v1389_v26 = vadd.f32 %v4320_v15, %v1388_v22  ;;  %v1390_v27 = vpop.f32.mrb[19].mxu1  ;;  %v1677_v29 = vpop.f32.mrb[18].mxu0 }
 0x149   : > { %v1679_v32 = vpop.f32.mrb[19].mxu0 }
 0x14a   : > { %v4376_v31 = vadd.f32 %v1677_v29, %v1389_v26  ;;  %1600 = vmatmul.mubr.bf16.gmra.mrb[124].mxu1 %v4065_v20  ;;  %1913 = vadd.xlane.f32.xlu0 %v4372_v24 }
 0x14b   : > { %1889 = vmatmul.mubr.bf16.gmra.mrb[124].mxu0 %v4066_v28 }
 0x14d   : > { %v1393_v33 = vpop.f32.mrb[20].mxu1 }
 0x14e   : > { %v1394_v34 = vadd.f32 %v4320_v15, %v1393_v33  ;;  %v1395_v35 = vpop.f32.mrb[21].mxu1  ;;  %1915 = vadd.xlane.f32.xlu0 %v4376_v31  ;;  %v1682_v36 = vpop.f32.mrb[20].mxu0 }
 0x14f   : > { %v1396_v37 = vpop.f32.mrb[22].mxu1  ;;  %v1684_v40 = vpop.f32.mrb[21].mxu0 }
 0x150   : > { %v4381_v38 = vadd.f32 %v1682_v36, %v1394_v34  ;;  %v1397_v41 = vadd.f32 %v4320_v15, %v1396_v37  ;;  %v1398_v42 = vpop.f32.mrb[23].mxu1  ;;  %v1685_v43 = vpop.f32.mrb[22].mxu0 }
 0x151   : > { %v1687_v45 = vpop.f32.mrb[23].mxu0 }
 0x152   : > { %v4384_v44 = vadd.f32 %v1685_v43, %v1397_v41  ;;  %1917 = vadd.xlane.f32.xlu0 %v4381_v38 }
 0x155   : > { %v1401_v47 = vpop.f32.mrb[24].mxu1 }
 0x156   : > { %v1402_v48 = vadd.f32 %v4320_v15, %v1401_v47  ;;  %v1403_v49 = vpop.f32.mrb[25].mxu1  ;;  %1919 = vadd.xlane.f32.xlu0 %v4384_v44  ;;  %v1690_v50 = vpop.f32.mrb[24].mxu0 }
 0x157   : > { %v1404_v51 = vpop.f32.mrb[26].mxu1  ;;  %v1692_v53 = vpop.f32.mrb[25].mxu0 }
 0x158   : > { %v4389_v52 = vadd.f32 %v1690_v50, %v1402_v48  ;;  %v1405_v54 = vadd.f32 %v4320_v15, %v1404_v51  ;;  %v1406_v56 = vpop.f32.mrb[27].mxu1  ;;  %v1693_v57 = vpop.f32.mrb[26].mxu0 }
 0x159   : > { %v1695_v59 = vpop.f32.mrb[27].mxu0 }
 0x15a   : > { %v4392_v58 = vadd.f32 %v1693_v57, %v1405_v54  ;;  %1921 = vadd.xlane.f32.xlu0 %v4389_v52 }
 0x15d   : > { %v1409_v60 = vpop.f32.mrb[28].mxu1 }
 0x15e   : > { %v1410_v61 = vadd.f32 %v4320_v15, %v1409_v60  ;;  %v1411_v63 = vpop.f32.mrb[29].mxu1  ;;  %1923 = vadd.xlane.f32.xlu0 %v4392_v58  ;;  %v1698_v0 = vpop.f32.mrb[28].mxu0 }
 0x15f   : > { %v1412_v1 = vpop.f32.mrb[30].mxu1  ;;  %v1700_v3 = vpop.f32.mrb[29].mxu0 }
 0x160   : > { %v4397_v2 = vadd.f32 %v1698_v0, %v1410_v61  ;;  %v1413_v4 = vadd.f32 %v4320_v15, %v1412_v1  ;;  %v1414_v5 = vpop.f32.mrb[31].mxu1  ;;  %v1701_v6 = vpop.f32.mrb[30].mxu0 }
 0x161   : > { %v1703_v9 = vpop.f32.mrb[31].mxu0 }
 0x162   : > { %v4400_v8 = vadd.f32 %v1701_v6, %v1413_v4  ;;  %1925 = vadd.xlane.f32.xlu0 %v4397_v2 }
 0x165   : > { %v1417_v10 = vpop.f32.mrb[32].mxu1 }
 0x166   : > { %v1418_v11 = vadd.f32 %v4320_v15, %v1417_v10  ;;  %v1419_v12 = vpop.f32.mrb[33].mxu1  ;;  %1927 = vadd.xlane.f32.xlu0 %v4400_v8  ;;  %v1706_v13 = vpop.f32.mrb[32].mxu0 }
 0x167   : > { %v1420_v16 = vpop.f32.mrb[34].mxu1  ;;  %v1708_v18 = vpop.f32.mrb[33].mxu0 }
 0x168   : > { %v4405_v17 = vadd.f32 %v1706_v13, %v1418_v11  ;;  %v1421_v19 = vadd.f32 %v4320_v15, %v1420_v16  ;;  %v1422_v20 = vpop.f32.mrb[35].mxu1  ;;  %v1709_v21 = vpop.f32.mrb[34].mxu0 }
 0x169   : > { %v1711_v25 = vpop.f32.mrb[35].mxu0 }
 0x16a   : > { %v4408_v22 = vadd.f32 %v1709_v21, %v1421_v19  ;;  %1929 = vadd.xlane.f32.xlu0 %v4405_v17 }
 0x16d   : > { %v1425_v26 = vpop.f32.mrb[36].mxu1 }
 0x16e   : > { %v1426_v27 = vadd.f32 %v4320_v15, %v1425_v26  ;;  %v1427_v28 = vpop.f32.mrb[37].mxu1  ;;  %1931 = vadd.xlane.f32.xlu0 %v4408_v22  ;;  %v1714_v29 = vpop.f32.mrb[36].mxu0 }
 0x16f   : > { %v1428_v32 = vpop.f32.mrb[38].mxu1  ;;  %v1716_v34 = vpop.f32.mrb[37].mxu0 }
 0x170   : > { %v4413_v33 = vadd.f32 %v1714_v29, %v1426_v27  ;;  %v1429_v35 = vadd.f32 %v4320_v15, %v1428_v32  ;;  %v1430_v36 = vpop.f32.mrb[39].mxu1  ;;  %v1717_v37 = vpop.f32.mrb[38].mxu0 }
 0x171   : > { %v1719_v41 = vpop.f32.mrb[39].mxu0 }
 0x172   : > { %v4416_v40 = vadd.f32 %v1717_v37, %v1429_v35  ;;  %1933 = vadd.xlane.f32.xlu0 %v4413_v33 }
 0x175   : > { %v1433_v42 = vpop.f32.mrb[40].mxu1 }
 0x176   : > { %v1434_v43 = vadd.f32 %v4320_v15, %v1433_v42  ;;  %v1435_v45 = vpop.f32.mrb[41].mxu1  ;;  %1935 = vadd.xlane.f32.xlu0 %v4416_v40  ;;  %v1722_v47 = vpop.f32.mrb[40].mxu0 }
 0x177   : > { %v1436_v48 = vpop.f32.mrb[42].mxu1  ;;  %v1724_v50 = vpop.f32.mrb[41].mxu0 }
 0x178   : > { %v4421_v49 = vadd.f32 %v1722_v47, %v1434_v43  ;;  %v1437_v51 = vadd.f32 %v4320_v15, %v1436_v48  ;;  %v1438_v53 = vpop.f32.mrb[43].mxu1  ;;  %v1725_v54 = vpop.f32.mrb[42].mxu0 }
 0x179   : > { %v1727_v57 = vpop.f32.mrb[43].mxu0 }
 0x17a   : > { %v4424_v56 = vadd.f32 %v1725_v54, %v1437_v51  ;;  %1937 = vadd.xlane.f32.xlu0 %v4421_v49 }
 0x17d   : > { %v1441_v59 = vpop.f32.mrb[44].mxu1 }
 0x17e   : > { %v1442_v60 = vadd.f32 %v4320_v15, %v1441_v59  ;;  %v1443_v61 = vpop.f32.mrb[45].mxu1  ;;  %1939 = vadd.xlane.f32.xlu0 %v4424_v56  ;;  %v1730_v63 = vpop.f32.mrb[44].mxu0 }
 0x17f   : > { %v1444_v0 = vpop.f32.mrb[46].mxu1  ;;  %v1732_v3 = vpop.f32.mrb[45].mxu0 }
 0x180   : > { %v4429_v1 = vadd.f32 %v1730_v63, %v1442_v60  ;;  %v1445_v4 = vadd.f32 %v4320_v15, %v1444_v0  ;;  %v1446_v5 = vpop.f32.mrb[47].mxu1  ;;  %v1733_v6 = vpop.f32.mrb[46].mxu0 }
 0x181   : > { %v1735_v10 = vpop.f32.mrb[47].mxu0 }
 0x182   : > { %v4432_v9 = vadd.f32 %v1733_v6, %v1445_v4  ;;  %1941 = vadd.xlane.f32.xlu0 %v4429_v1 }
 0x185   : > { %v1449_v11 = vpop.f32.mrb[48].mxu1 }
 0x186   : > { %v1450_v12 = vadd.f32 %v4320_v15, %v1449_v11  ;;  %v1451_v13 = vpop.f32.mrb[49].mxu1  ;;  %1943 = vadd.xlane.f32.xlu0 %v4432_v9  ;;  %v1738_v16 = vpop.f32.mrb[48].mxu0 }
 0x187   : > { %v1452_v18 = vpop.f32.mrb[50].mxu1  ;;  %v1740_v20 = vpop.f32.mrb[49].mxu0 }
 0x188   : > { %v4437_v19 = vadd.f32 %v1738_v16, %v1450_v12  ;;  %v1453_v21 = vadd.f32 %v4320_v15, %v1452_v18  ;;  %v1454_v25 = vpop.f32.mrb[51].mxu1  ;;  %v1741_v26 = vpop.f32.mrb[50].mxu0 }
 0x189   : > { %v1743_v28 = vpop.f32.mrb[51].mxu0 }
 0x18a   : > { %5609 = vst [vmem:[#allocation2_spill] sm:$0xff] %v4437_v19  ;;  %v4440_v27 = vadd.f32 %v1741_v26, %v1453_v21  ;;  %1945 = vadd.xlane.f32.xlu0 %v4437_v19 }
 0x18c   : > { %5610 = vst [vmem:[#allocation3_spill] sm:$0xff] %v4440_v27 }
 0x18d   : > { %v1457_v29 = vpop.f32.mrb[52].mxu1 }
 0x18e   : > { %v1458_v32 = vadd.f32 %v4320_v15, %v1457_v29  ;;  %v1459_v34 = vpop.f32.mrb[53].mxu1  ;;  %1947 = vadd.xlane.f32.xlu0 %v4440_v27  ;;  %v1746_v35 = vpop.f32.mrb[52].mxu0 }
 0x18f   : > { %v1460_v36 = vpop.f32.mrb[54].mxu1  ;;  %v1748_v41 = vpop.f32.mrb[53].mxu0 }
 0x190   : > { %v4445_v37 = vadd.f32 %v1746_v35, %v1458_v32  ;;  %v1461_v42 = vadd.f32 %v4320_v15, %v1460_v36  ;;  %v1462_v43 = vpop.f32.mrb[55].mxu1  ;;  %v1749_v45 = vpop.f32.mrb[54].mxu0 }
 0x191   : > { %v1751_v48 = vpop.f32.mrb[55].mxu0 }
 0x192   : > { %5611 = vst [vmem:[#allocation4_spill] sm:$0xff] %v4445_v37  ;;  %v4448_v47 = vadd.f32 %v1749_v45, %v1461_v42  ;;  %1949 = vadd.xlane.f32.xlu0 %v4445_v37 }
 0x194   : > { %5612 = vst [vmem:[#allocation5_spill] sm:$0xff] %v4448_v47 }
 0x195   : > { %v1465_v50 = vpop.f32.mrb[56].mxu1 }
 0x196   : > { %v1466_v51 = vadd.f32 %v4320_v15, %v1465_v50  ;;  %v1467_v53 = vpop.f32.mrb[57].mxu1  ;;  %1951 = vadd.xlane.f32.xlu0 %v4448_v47  ;;  %v1754_v54 = vpop.f32.mrb[56].mxu0 }
 0x197   : > { %v1468_v57 = vpop.f32.mrb[58].mxu1  ;;  %v1756_v60 = vpop.f32.mrb[57].mxu0 }
 0x198   : > { %v4453_v59 = vadd.f32 %v1754_v54, %v1466_v51  ;;  %v1469_v61 = vadd.f32 %v4320_v15, %v1468_v57  ;;  %v1470_v63 = vpop.f32.mrb[59].mxu1  ;;  %v1757_v0 = vpop.f32.mrb[58].mxu0 }
 0x199   : > { %v1759_v4 = vpop.f32.mrb[59].mxu0 }
 0x19a   : > { %5613 = vst [vmem:[#allocation6_spill] sm:$0xff] %v4453_v59  ;;  %v4456_v3 = vadd.f32 %v1757_v0, %v1469_v61  ;;  %1953 = vadd.xlane.f32.xlu0 %v4453_v59 }
 0x19c   : > { %5614 = vst [vmem:[#allocation7_spill] sm:$0xff] %v4456_v3 }
 0x19d   : > { %v1473_v5 = vpop.f32.mrb[60].mxu1 }
 0x19e   : > { %v1474_v6 = vadd.f32 %v4320_v15, %v1473_v5  ;;  %v1475_v10 = vpop.f32.mrb[61].mxu1  ;;  %1955 = vadd.xlane.f32.xlu0 %v4456_v3  ;;  %v1762_v11 = vpop.f32.mrb[60].mxu0 }
 0x19f   : > { %v1476_v12 = vpop.f32.mrb[62].mxu1  ;;  %v1764_v16 = vpop.f32.mrb[61].mxu0 }
 0x1a0   : > { %v4461_v13 = vadd.f32 %v1762_v11, %v1474_v6  ;;  %v1477_v18 = vadd.f32 %v4320_v15, %v1476_v12  ;;  %v1478_v20 = vpop.f32.mrb[63].mxu1  ;;  %v1765_v21 = vpop.f32.mrb[62].mxu0 }
 0x1a1   : > { %v1767_v26 = vpop.f32.mrb[63].mxu0 }
 0x1a2   : > { %5615 = vst [vmem:[#allocation8_spill] sm:$0xff] %v4461_v13  ;;  %v4464_v25 = vadd.f32 %v1765_v21, %v1477_v18  ;;  %1957 = vadd.xlane.f32.xlu0 %v4461_v13 }
 0x1a4   : > { %5616 = vst [vmem:[#allocation9_spill] sm:$0xff] %v4464_v25 }
 0x1a5   : > { %v1481_v28 = vpop.f32.mrb[64].mxu1 }
 0x1a6   : > { %v1482_v29 = vadd.f32 %v4320_v15, %v1481_v28  ;;  %v1483_v32 = vpop.f32.mrb[65].mxu1  ;;  %1959 = vadd.xlane.f32.xlu0 %v4464_v25  ;;  %v1770_v34 = vpop.f32.mrb[64].mxu0 }
 0x1a7   : > { %v1484_v35 = vpop.f32.mrb[66].mxu1  ;;  %v1772_v41 = vpop.f32.mrb[65].mxu0 }
 0x1a8   : > { %v4469_v36 = vadd.f32 %v1770_v34, %v1482_v29  ;;  %v1485_v42 = vadd.f32 %v4320_v15, %v1484_v35  ;;  %v1486_v43 = vpop.f32.mrb[67].mxu1  ;;  %v1773_v45 = vpop.f32.mrb[66].mxu0 }
 0x1a9   : > { %v1775_v50 = vpop.f32.mrb[67].mxu0 }
 0x1aa   : > { %v4472_v48 = vadd.f32 %v1773_v45, %v1485_v42  ;;  %1961 = vadd.xlane.f32.xlu1 %v4469_v36 }
 0x1ad   : > { %v1489_v51 = vpop.f32.mrb[68].mxu1 }
 0x1ae   : > { %v1490_v53 = vadd.f32 %v4320_v15, %v1489_v51  ;;  %v1491_v54 = vpop.f32.mrb[69].mxu1  ;;  %1963 = vadd.xlane.f32.xlu1 %v4472_v48  ;;  %v1778_v57 = vpop.f32.mrb[68].mxu0 }
 0x1af   : > { %v1492_v60 = vpop.f32.mrb[70].mxu1  ;;  %v1780_v63 = vpop.f32.mrb[69].mxu0 }
 0x1b0   : > { %v4477_v61 = vadd.f32 %v1778_v57, %v1490_v53  ;;  %v1493_v0 = vadd.f32 %v4320_v15, %v1492_v60  ;;  %v1494_v4 = vpop.f32.mrb[71].mxu1  ;;  %v1781_v5 = vpop.f32.mrb[70].mxu0 }
 0x1b1   : > { %v1783_v10 = vpop.f32.mrb[71].mxu0 }
 0x1b2   : > { %v4480_v6 = vadd.f32 %v1781_v5, %v1493_v0  ;;  %1965 = vadd.xlane.f32.xlu1 %v4477_v61 }
 0x1b5   : > { %v1497_v11 = vpop.f32.mrb[72].mxu1 }
 0x1b6   : > { %v1498_v12 = vadd.f32 %v4320_v15, %v1497_v11  ;;  %v1499_v16 = vpop.f32.mrb[73].mxu1  ;;  %1967 = vadd.xlane.f32.xlu1 %v4480_v6  ;;  %v1786_v18 = vpop.f32.mrb[72].mxu0 }
 0x1b7   : > { %v1500_v20 = vpop.f32.mrb[74].mxu1  ;;  %v1788_v26 = vpop.f32.mrb[73].mxu0 }
 0x1b8   : > { %v4485_v21 = vadd.f32 %v1786_v18, %v1498_v12  ;;  %v1501_v28 = vadd.f32 %v4320_v15, %v1500_v20  ;;  %v4488_v29 = vpop.xlane.xlu0 %1897  ;;  %v1789_v32 = vpop.f32.mrb[74].mxu0 }
 0x1b9   : > { %v1502_v34 = vpop.f32.mrb[75].mxu1  ;;  %v1791_v41 = vpop.f32.mrb[75].mxu0 }
 0x1ba   : > { %v4490_v35 = vadd.f32 %v1789_v32, %v1501_v28  ;;  %1969 = vadd.xlane.f32.xlu1 %v4485_v21 }
 0x1bc   : > { %v4493_v42 = vpop.xlane.xlu0 %1899 }
 0x1bd   : > { %v1505_v43 = vpop.f32.mrb[76].mxu1 }
 0x1be   : > { %v1506_v45 = vadd.f32 %v4320_v15, %v1505_v43  ;;  %v1507_v50 = vpop.f32.mrb[77].mxu1  ;;  %1971 = vadd.xlane.f32.xlu1 %v4490_v35  ;;  %v1794_v51 = vpop.f32.mrb[76].mxu0 }
 0x1bf   : > { %v1508_v53 = vpop.f32.mrb[78].mxu1  ;;  %v1796_v57 = vpop.f32.mrb[77].mxu0 }
 0x1c0   : > { %v4497_v54 = vadd.f32 %v1794_v51, %v1506_v45  ;;  %v1509_v60 = vadd.f32 %v4320_v15, %v1508_v53  ;;  %v4500_v63 = vpop.xlane.xlu0 %1901  ;;  %v1797_v0 = vpop.f32.mrb[78].mxu0 }
 0x1c1   : > { %v1510_v4 = vpop.f32.mrb[79].mxu1  ;;  %v1799_v10 = vpop.f32.mrb[79].mxu0 }
 0x1c2   : > { %v4502_v5 = vadd.f32 %v1797_v0, %v1509_v60  ;;  %1973 = vadd.xlane.f32.xlu1 %v4497_v54 }
 0x1c4   : > { %v4505_v11 = vpop.xlane.xlu0 %1903 }
 0x1c5   : > { %v1513_v12 = vpop.f32.mrb[80].mxu1 }
 0x1c6   : > { %v1514_v16 = vadd.f32 %v4320_v15, %v1513_v12  ;;  %v1515_v18 = vpop.f32.mrb[81].mxu1  ;;  %1975 = vadd.xlane.f32.xlu1 %v4502_v5  ;;  %v1802_v20 = vpop.f32.mrb[80].mxu0 }
 0x1c7   : > { %v1516_v26 = vpop.f32.mrb[82].mxu1  ;;  %v1804_v32 = vpop.f32.mrb[81].mxu0 }
 0x1c8   : > { %v4509_v28 = vadd.f32 %v1802_v20, %v1514_v16  ;;  %v1517_v34 = vadd.f32 %v4320_v15, %v1516_v26  ;;  %v4512_v41 = vpop.xlane.xlu0 %1905  ;;  %v1805_v43 = vpop.f32.mrb[82].mxu0 }
 0x1c9   : > { %v1518_v45 = vpop.f32.mrb[83].mxu1  ;;  %v1807_v51 = vpop.f32.mrb[83].mxu0 }
 0x1ca   : > { %v4514_v50 = vadd.f32 %v1805_v43, %v1517_v34  ;;  %1977 = vadd.xlane.f32.xlu1 %v4509_v28 }
 0x1cc   : > { %5617 = vst [vmem:[#allocation10_spill] sm:$0xff] %v4514_v50  ;;  %v4517_v53 = vpop.xlane.xlu0 %1907 }
 0x1cd   : > { %v1521_v57 = vpop.f32.mrb[84].mxu1 }
 0x1ce   : > { %v1522_v60 = vadd.f32 %v4320_v15, %v1521_v57  ;;  %v1523_v0 = vpop.f32.mrb[85].mxu1  ;;  %1979 = vadd.xlane.f32.xlu1 %v4514_v50  ;;  %v1810_v4 = vpop.f32.mrb[84].mxu0 }
 0x1cf   : > { %v1524_v10 = vpop.f32.mrb[86].mxu1  ;;  %v1812_v16 = vpop.f32.mrb[85].mxu0 }
 0x1d0   : > { %v4521_v12 = vadd.f32 %v1810_v4, %v1522_v60  ;;  %v1525_v18 = vadd.f32 %v4320_v15, %v1524_v10  ;;  %v4524_v20 = vpop.xlane.xlu0 %1909  ;;  %v1813_v26 = vpop.f32.mrb[86].mxu0 }
 0x1d1   : > { %v1526_v32 = vpop.f32.mrb[87].mxu1  ;;  %v1815_v43 = vpop.f32.mrb[87].mxu0 }
 0x1d2   : > { %5618 = vst [vmem:[#allocation11_spill] sm:$0xff] %v4521_v12  ;;  %v4526_v34 = vadd.f32 %v1813_v26, %v1525_v18  ;;  %1981 = vadd.xlane.f32.xlu1 %v4521_v12 }
 0x1d4   : > { %5619 = vst [vmem:[#allocation12_spill] sm:$0xff] %v4526_v34  ;;  %v4529_v45 = vpop.xlane.xlu0 %1911 }
 0x1d5   : > { %v1529_v51 = vpop.f32.mrb[88].mxu1 }
 0x1d6   : > { %v1530_v57 = vadd.f32 %v4320_v15, %v1529_v51  ;;  %v1531_v0 = vpop.f32.mrb[89].mxu1  ;;  %1983 = vadd.xlane.f32.xlu1 %v4526_v34  ;;  %v1818_v60 = vpop.f32.mrb[88].mxu0 }
 0x1d7   : > { %v1532_v4 = vpop.f32.mrb[90].mxu1  ;;  %v1820_v16 = vpop.f32.mrb[89].mxu0 }
 0x1d8   : > { %v4533_v10 = vadd.f32 %v1818_v60, %v1530_v57  ;;  %v1533_v32 = vadd.f32 %v4320_v15, %v1532_v4  ;;  %v4536_v18 = vpop.xlane.xlu0 %1913  ;;  %v1821_v26 = vpop.f32.mrb[90].mxu0 }
 0x1d9   : > { %v1534_v43 = vpop.f32.mrb[91].mxu1  ;;  %v1823_v13 = vpop.f32.mrb[91].mxu0 }
 0x1da   : > { %5620 = vst [vmem:[#allocation13_spill] sm:$0xff] %v4533_v10  ;;  %v4538_v25 = vadd.f32 %v1821_v26, %v1533_v32  ;;  %1985 = vadd.xlane.f32.xlu1 %v4533_v10 }
 0x1dc   : > { %5621 = vst [vmem:[#allocation14_spill] sm:$0xff] %v4538_v25  ;;  %v4541_v51 = vpop.xlane.xlu0 %1915 }
 0x1dd   : > { %v1537_v0 = vpop.f32.mrb[92].mxu1 }
 0x1de   : > { %v1538_v3 = vadd.f32 %v4320_v15, %v1537_v0  ;;  %v1539_v59 = vpop.f32.mrb[93].mxu1  ;;  %1987 = vadd.xlane.f32.xlu1 %v4538_v25  ;;  %v1826_v57 = vpop.f32.mrb[92].mxu0 }
 0x1df   : > { %v1540_v60 = vpop.f32.mrb[94].mxu1  ;;  %v1828_v16 = vpop.f32.mrb[93].mxu0 }
 0x1e0   : > { %v4545_v4 = vadd.f32 %v1826_v57, %v1538_v3  ;;  %v1541_v43 = vadd.f32 %v4320_v15, %v1540_v60  ;;  %v4548_v32 = vpop.xlane.xlu0 %1917  ;;  %v1829_v13 = vpop.f32.mrb[94].mxu0 }
 0x1e1   : > { %v1542_v26 = vpop.f32.mrb[95].mxu1  ;;  %v1831_v10 = vpop.f32.mrb[95].mxu0 }
 0x1e2   : > { %5622 = vst [vmem:[#allocation15_spill] sm:$0xff] %v4545_v4  ;;  %v4550_v47 = vadd.f32 %v1829_v13, %v1541_v43  ;;  %1989 = vadd.xlane.f32.xlu1 %v4545_v4 }
 0x1e4   : > { %5623 = vst [vmem:[#allocation16_spill] sm:$0xff] %v4550_v47  ;;  %v4553_v0 = vpop.xlane.xlu0 %1919 }
 0x1e5   : > { %v1545_v59 = vpop.f32.mrb[96].mxu1 }
 0x1e6   : > { %v1546_v25 = vadd.f32 %v4320_v15, %v1545_v59  ;;  %v1547_v37 = vpop.f32.mrb[97].mxu1  ;;  %1991 = vadd.xlane.f32.xlu1 %v4550_v47  ;;  %v1834_v3 = vpop.f32.mrb[96].mxu0 }
 0x1e7   : > { %v1548_v57 = vpop.f32.mrb[98].mxu1  ;;  %v1836_v16 = vpop.f32.mrb[97].mxu0 }
 0x1e8   : > { %v4557_v60 = vadd.f32 %v1834_v3, %v1546_v25  ;;  %v1549_v26 = vadd.f32 %v4320_v15, %v1548_v57  ;;  %v4560_v43 = vpop.xlane.xlu0 %1921  ;;  %v1837_v10 = vpop.f32.mrb[98].mxu0 }
 0x1e9   : > { %v1550_v13 = vpop.f32.mrb[99].mxu1  ;;  %v1839_v34 = vpop.f32.mrb[99].mxu0 }
 0x1ea   : > { %5624 = vst [vmem:[#allocation17_spill] sm:$0xff] %v4557_v60  ;;  %v4562_v4 = vadd.f32 %v1837_v10, %v1549_v26  ;;  %1993 = vadd.xlane.f32.xlu1 %v4557_v60 }
 0x1ec   : > { %5625 = vst [vmem:[#allocation18_spill] sm:$0xff] %v4562_v4  ;;  %v4565_v59 = vpop.xlane.xlu0 %1923 }
 0x1ed   : > { %v1553_v37 = vpop.f32.mrb[100].mxu1 }
 0x1ee   : > { %v1554_v47 = vadd.f32 %v4320_v15, %v1553_v37  ;;  %v1555_v27 = vpop.f32.mrb[101].mxu1  ;;  %1995 = vadd.xlane.f32.xlu1 %v4562_v4  ;;  %v1842_v25 = vpop.f32.mrb[100].mxu0 }
 0x1ef   : > { %v1556_v3 = vpop.f32.mrb[102].mxu1  ;;  %v1844_v16 = vpop.f32.mrb[101].mxu0 }
 0x1f0   : > { %v4569_v57 = vadd.f32 %v1842_v25, %v1554_v47  ;;  %v1557_v13 = vadd.f32 %v4320_v15, %v1556_v3  ;;  %v4572_v26 = vpop.xlane.xlu0 %1925  ;;  %v1845_v34 = vpop.f32.mrb[102].mxu0 }
 0x1f1   : > { %v1558_v10 = vpop.f32.mrb[103].mxu1  ;;  %v1847_v12 = vpop.f32.mrb[103].mxu0 }
 0x1f2   : > { %5626 = vst [vmem:[#allocation19_spill] sm:$0xff] %v4569_v57  ;;  %v4574_v60 = vadd.f32 %v1845_v34, %v1557_v13  ;;  %1997 = vadd.xlane.f32.xlu1 %v4569_v57  ;;  %v2025_v12 = vadd.f32 %v4493_v42, %v4488_v29 }
 0x1f4   : > { %5627 = vst [vmem:[#allocation20_spill] sm:$0xff] %v4574_v60  ;;  %v4577_v37 = vpop.xlane.xlu0 %1927 }
 0x1f5   : > { %v1561_v27 = vpop.f32.mrb[104].mxu1 }
 0x1f6   : > { %v1562_v4 = vadd.f32 %v4320_v15, %v1561_v27  ;;  %v1563_v19 = vpop.f32.mrb[105].mxu1  ;;  %1999 = vadd.xlane.f32.xlu1 %v4574_v60  ;;  %v1850_v47 = vpop.f32.mrb[104].mxu0 }
 0x1f7   : > { %v1564_v25 = vpop.f32.mrb[106].mxu1  ;;  %v1852_v16 = vpop.f32.mrb[105].mxu0  ;;  %v2026_v19 = vadd.f32 %v2025_v12, %v4500_v63 }
 0x1f8   : > { %v4581_v3 = vadd.f32 %v1850_v47, %v1562_v4  ;;  %v1565_v10 = vadd.f32 %v4320_v15, %v1564_v25  ;;  %v4584_v13 = vpop.xlane.xlu0 %1929  ;;  %v1853_v34 = vpop.f32.mrb[106].mxu0 }
 0x1f9   : > { %v1566_v57 = vpop.f32.mrb[107].mxu1  ;;  %v1855_v27 = vpop.f32.mrb[107].mxu0  ;;  %v2027_v4 = vadd.f32 %v2026_v19, %v4505_v11 }
 0x1fa   : > { %5628 = vst [vmem:[#allocation21_spill] sm:$0xff] %v4581_v3  ;;  %v4588_v50 = vadd.f32 %v1853_v34, %v1565_v10  ;;  %2001 = vadd.xlane.f32.xlu1 %v4581_v3 }
 0x1fb   : > { %v2028_v29 = vadd.f32 %v2027_v4, %v4512_v41 }
 0x1fc   : > { %v4592_v60 = vpop.xlane.xlu0 %1931 }
 0x1fd   : > { %v1569_v47 = vpop.f32.mrb[108].mxu1  ;;  %v2029_v12 = vadd.f32 %v2028_v29, %v4517_v53 }
 0x1fe   : > { %v1570_v25 = vadd.f32 %v4320_v15, %v1569_v47  ;;  %v1571_v16 = vpop.f32.mrb[109].mxu1  ;;  %2003 = vadd.xlane.f32.xlu1 %v4588_v50  ;;  %v1858_v42 = vpop.f32.mrb[108].mxu0 }
 0x1ff   : > { %v1572_v57 = vpop.f32.mrb[110].mxu1  ;;  %v1860_v34 = vpop.f32.mrb[109].mxu0  ;;  %v2030_v41 = vadd.f32 %v2029_v12, %v4524_v20 }
 0x200   : > { %v4598_v10 = vadd.f32 %v1858_v42, %v1570_v25  ;;  %v1573_v27 = vadd.f32 %v4320_v15, %v1572_v57  ;;  %v4601_v63 = vpop.xlane.xlu0 %1933  ;;  %v1861_v11 = vpop.f32.mrb[110].mxu0 }
 0x201   : > { %v1574_v19 = vpop.f32.mrb[111].mxu1  ;;  %v1863_v47 = vpop.f32.mrb[111].mxu0  ;;  %v2031_v25 = vadd.f32 %v2030_v41, %v4529_v45 }
 0x202   : > { %v4604_v3 = vadd.f32 %v1861_v11, %v1573_v27  ;;  %2005 = vadd.xlane.f32.xlu1 %v4598_v10 }
 0x203   : > { %v2032_v53 = vadd.f32 %v2031_v25, %v4536_v18 }
 0x204   : > { %v1936_v4 = vpop.xlane.xlu0 %1935 }
 0x205   : > { %v1577_v16 = vpop.f32.mrb[112].mxu1  ;;  %v2033_v20 = vadd.f32 %v2032_v53, %v4541_v51 }
 0x206   : > { %v1578_v42 = vadd.f32 %v4320_v15, %v1577_v16  ;;  %v1579_v57 = vpop.f32.mrb[113].mxu1  ;;  %2007 = vadd.xlane.f32.xlu1 %v4604_v3  ;;  %v1866_v29 = vpop.f32.mrb[112].mxu0 }
 0x207   : > { %v1580_v34 = vpop.f32.mrb[114].mxu1  ;;  %v1868_v11 = vpop.f32.mrb[113].mxu0  ;;  %v2034_v57 = vadd.f32 %v2033_v20, %v4548_v32 }
 0x208   : > { %v4612_v27 = vadd.f32 %v1866_v29, %v1578_v42  ;;  %v1581_v19 = vadd.f32 %v4320_v15, %v1580_v34  ;;  %v1938_v47 = vpop.xlane.xlu0 %1937  ;;  %v1869_v12 = vpop.f32.mrb[114].mxu0 }
 0x209   : > { %v1582_v45 = vpop.f32.mrb[115].mxu1  ;;  %v1871_v16 = vpop.f32.mrb[115].mxu0  ;;  %v2035_v25 = vadd.f32 %v2034_v57, %v4553_v0 }
 0x20a   : > { %v4616_v41 = vadd.f32 %v1869_v12, %v1581_v19  ;;  %2009 = vadd.xlane.f32.xlu1 %v4612_v27 }
 0x20b   : > { %v2036_v51 = vadd.f32 %v2035_v25, %v4560_v43 }
 0x20c   : > { %v1940_v18 = vpop.xlane.xlu0 %1939 }
 0x20d   : > { %v1585_v42 = vpop.f32.mrb[116].mxu1  ;;  %v2037_v32 = vadd.f32 %v2036_v51, %v4565_v59 }
 0x20e   : > { %v1586_v29 = vadd.f32 %v4320_v15, %v1585_v42  ;;  %v1587_v11 = vpop.f32.mrb[117].mxu1  ;;  %2011 = vadd.xlane.f32.xlu1 %v4616_v41  ;;  %v1874_v53 = vpop.f32.mrb[116].mxu0 }
 0x20f   : > { %v1588_v34 = vpop.f32.mrb[118].mxu1  ;;  %v1876_v12 = vpop.f32.mrb[117].mxu0  ;;  %v2038_v11 = vadd.f32 %v2037_v32, %v4572_v26 }
 0x210   : > { %v4624_v19 = vadd.f32 %v1874_v53, %v1586_v29  ;;  %v1589_v45 = vadd.f32 %v4320_v15, %v1588_v34  ;;  %v1942_v16 = vpop.xlane.xlu0 %1941  ;;  %v1877_v20 = vpop.f32.mrb[118].mxu0 }
 0x211   : > { %v1590_v0 = vpop.f32.mrb[119].mxu1  ;;  %v1879_v42 = vpop.f32.mrb[119].mxu0  ;;  %v2039_v25 = vadd.f32 %v2038_v11, %v4577_v37 }
 0x212   : > { %5629 = vst [vmem:[#allocation22_spill] sm:$0xff] %v4624_v19  ;;  %v4628_v57 = vadd.f32 %v1877_v20, %v1589_v45  ;;  %2013 = vadd.xlane.f32.xlu1 %v4624_v19 }
 0x213   : > { %v2040_v59 = vadd.f32 %v2039_v25, %v4584_v13 }
 0x214   : > { %5630 = vst [vmem:[#allocation23_spill] sm:$0xff] %v4628_v57  ;;  %v1944_v43 = vpop.xlane.xlu0 %1943 }
 0x215   : > { %v1593_v29 = vpop.f32.mrb[120].mxu1  ;;  %v2041_v32 = vadd.f32 %v2040_v59, %v4592_v60 }
 0x216   : > { %v1594_v53 = vadd.f32 %v4320_v15, %v1593_v29  ;;  %v1595_v12 = vpop.f32.mrb[121].mxu1  ;;  %2015 = vadd.xlane.f32.xlu1 %v4628_v57  ;;  %v1882_v51 = vpop.f32.mrb[120].mxu0 }
 0x217   : > { %v1596_v34 = vpop.f32.mrb[122].mxu1  ;;  %v1884_v20 = vpop.f32.mrb[121].mxu0  ;;  %v2042_v13 = vadd.f32 %v2041_v32, %v4601_v63 }
 0x218   : > { %v4636_v45 = vadd.f32 %v1882_v51, %v1594_v53  ;;  %v1597_v0 = vadd.f32 %v4320_v15, %v1596_v34  ;;  %v1946_v26 = vpop.xlane.xlu0 %1945  ;;  %v1885_v37 = vpop.f32.mrb[122].mxu0  ;;  %v4075_v53 = vld [vmem:[%s4316_s30] ss:$0 sm:$0xff] }
 0x219   : > { %v1598_v42 = vpop.f32.mrb[123].mxu1  ;;  %v1887_v29 = vpop.f32.mrb[123].mxu0  ;;  %v2043_v12 = vadd.f32 %v2042_v13, %v1936_v4 }
 0x21a   : > { %5631 = vst [vmem:[#allocation24_spill] sm:$0xff] %v4636_v45  ;;  %v4640_v11 = vadd.f32 %v1885_v37, %v1597_v0  ;;  %2017 = vadd.xlane.f32.xlu1 %v4636_v45 }
 0x21b   : > { %v2044_v15 = vadd.f32 %v2043_v12, %v1938_v47 }
 0x21c   : > { %v1948_v25 = vpop.xlane.xlu0 %1947 }
 0x21d   : > { %v1601_v57 = vpop.f32.mrb[124].mxu1  ;;  %v2045_v29 = vadd.f32 %v2044_v15, %v1940_v18 }
 0x21e   : > { %v1602_v51 = vadd.f32 %v4075_v53, %v1601_v57  ;;  %v1603_v20 = vpop.f32.mrb[125].mxu1  ;;  %2019 = vadd.xlane.f32.xlu1 %v4640_v11  ;;  %v1890_v34 = vpop.f32.mrb[124].mxu0 }
 0x21f   : > { %v1604_v60 = vpop.f32.mrb[126].mxu1  ;;  %v1892_v0 = vpop.f32.mrb[125].mxu0  ;;  %v2046_v57 = vadd.f32 %v2045_v29, %v1942_v16 }
 0x220   : > { %v4646_v59 = vadd.f32 %v1890_v34, %v1602_v51  ;;  %v1605_v37 = vadd.f32 %v4075_v53, %v1604_v60  ;;  %v1950_v42 = vpop.xlane.xlu0 %1949  ;;  %v1893_v45 = vpop.f32.mrb[126].mxu0 }
 0x221   : > { %v1606_v19 = vpop.f32.mrb[127].mxu1  ;;  %v1895_v4 = vpop.f32.mrb[127].mxu0  ;;  %v2047_v13 = vadd.f32 %v2046_v57, %v1944_v43 }
 0x222   : > { %v4648_v63 = vadd.f32 %v1893_v45, %v1605_v37  ;;  %2021 = vadd.xlane.f32.xlu1 %v4646_v59 }
 0x223   : > { %v2048_v47 = vadd.f32 %v2047_v13, %v1946_v26  ;;  %v2102_v13 = vlaneseq }
 0x224   : > { %v1952_v32 = vpop.xlane.xlu0 %1951 }
 0x225   : > { %v2049_v51 = vadd.f32 %v2048_v47, %v1948_v25 }
 0x226   : > { %2023 = vadd.xlane.f32.xlu1 %v4648_v63 }
 0x227   : > { %v2050_v20 = vadd.f32 %v2049_v51, %v1950_v42  ;;  %v4664_v51 = vand.u32 127, %v2102_v13 }
 0x228   : > { %v1954_v12 = vpop.xlane.xlu0 %1953 }
 0x229   : > { %v2051_v53 = vadd.f32 %v2050_v20, %v1952_v32  ;;  %vm2104_vm0 = vcmp.lt.s32.totalorder %v4664_v51, 8 }
 0x22b   : > { %v2052_v60 = vadd.f32 %v2051_v53, %v1954_v12 }
 0x22c   : > { %v1956_v34 = vpop.xlane.xlu0 %1955 }
 0x22d   : > { %v2053_v15 = vadd.f32 %v2052_v60, %v1956_v34 }
 0x230   : > { %v1958_v18 = vpop.xlane.xlu0 %1957 }
 0x231   : > { %v2054_v19 = vadd.f32 %v2053_v15, %v1958_v18 }
 0x234   : > { %v1960_v45 = vpop.xlane.xlu0 %1959 }
 0x235   : > { %v2055_v0 = vadd.f32 %v2054_v19, %v1960_v45 }
 0x237   : > { %v2056_v37 = vrot.slane %v2055_v0, 4  ;;  %v4652_v4 = vpop.xlane.xlu1 %1961 }
 0x239   : > { %v2057_v16 = vadd.f32 %v2056_v37, %v2055_v0 }
 0x23b   : > { %v2058_v29 = vrot.slane %v2057_v16, 2  ;;  %v4654_v43 = vpop.xlane.xlu1 %1963 }
 0x23d   : > { %v2059_v57 = vadd.f32 %v2058_v29, %v2057_v16 }
 0x23f   : > { %v4656_v26 = vpop.xlane.xlu1 %1965  ;;  %v2060_v25 = vrot.slane %v2059_v57, 1 }
 0x241   : > { %v2061_v32 = vadd.f32 %v2060_v25, %v2059_v57 }
 0x243   : > { %v4658_v42 = vpop.xlane.xlu1 %1967  ;;  %v4662_v12 = vmul.f32 0.00048828125, %v2061_v32 }
 0x245   : > { %v2105_v34 = vsub.f32 %v4325_v23, %v4662_v12  ;;  %v2106_v53 = vsub.f32 %v4330_v30, %v4662_v12  ;;  %v2107_v60 = vsub.f32 %v4337_v39, %v4662_v12  ;;  %v2108_v45 = vsub.f32 %v4342_v46, %v4662_v12 }
 0x246   : > { %v2109_v16 = vsub.f32 %v4349_v55, %v4662_v12  ;;  %v2110_v25 = vsub.f32 %v4354_v62, %v4662_v12 }
 0x247   : > { %v4660_v47 = vpop.xlane.xlu1 %1969  ;;  %v4679_v15 = vsel %vm2104_vm0, %v2106_v53, 0.0  ;;  %v4683_v19 = vsel %vm2104_vm0, %v2105_v34, 0.0  ;;  %v4693_v39 = vsel %vm2104_vm0, %v2107_v60, 0.0  ;;  %v4703_v29 = vsel %vm2104_vm0, %v2108_v45, 0.0 }
 0x248   : > { %v2236_v23 = vmul.f32 %v4679_v15, %v4679_v15  ;;  %v2235_v30 = vmul.f32 %v4683_v19, %v4683_v19  ;;  %v2237_v37 = vmul.f32 %v4693_v39, %v4693_v39  ;;  %v2238_v46 = vmul.f32 %v4703_v29, %v4703_v29 }
 0x249   : > { %v4713_v32 = vsel %vm2104_vm0, %v2109_v16, 0.0  ;;  %v2111_v34 = vsub.f32 %v4361_v7, %v4662_v12  ;;  %v4723_v53 = vsel %vm2104_vm0, %v2110_v25, 0.0  ;;  %v2114_v25 = vsub.f32 %v4376_v31, %v4662_v12 }
 0x24a   : > { %2301 = vadd.xlane.f32.xlu1 %v2236_v23  ;;  %2299 = vadd.xlane.f32.xlu0 %v2235_v30  ;;  %v2239_v55 = vmul.f32 %v4713_v32, %v4713_v32  ;;  %v2240_v62 = vmul.f32 %v4723_v53, %v4723_v53  ;;  %v2112_v23 = vsub.f32 %v4366_v14, %v4662_v12 }
 0x24b   : > { %v4666_v20 = vpop.xlane.xlu1 %1971  ;;  %v4731_v30 = vsel %vm2104_vm0, %v2111_v34, 0.0 }
 0x24c   : > { %5632 = vst [vmem:[#allocation25_spill] sm:$0xff] %v4731_v30  ;;  %v2241_v7 = vmul.f32 %v4731_v30, %v4731_v30  ;;  %v4739_v16 = vsel %vm2104_vm0, %v2112_v23, 0.0  ;;  %v4755_v23 = vsel %vm2104_vm0, %v2114_v25, 0.0  ;;  %v2117_v25 = vsub.f32 %v4389_v52, %v4662_v12 }
 0x24d   : > { %5633 = vst [vmem:[#allocation26_spill] sm:$0xff] %v4739_v16  ;;  %v2242_v14 = vmul.f32 %v4739_v16, %v4739_v16  ;;  %5635 = vst [vmem:[#allocation28_spill] sm:$0xff] %v4755_v23  ;;  %v2244_v31 = vmul.f32 %v4755_v23, %v4755_v23 }
 0x24e   : > { %2303 = vadd.xlane.f32.xlu0 %v2237_v37  ;;  %v2113_v37 = vsub.f32 %v4372_v24, %v4662_v12  ;;  %v4782_v52 = vsel %vm2104_vm0, %v2117_v25, 0.0 }
 0x24f   : > { %v4675_v18 = vpop.xlane.xlu1 %1973  ;;  %5637 = vst [vmem:[#allocation30_spill] sm:$0xff] %v4782_v52 }
 0x252   : > { %2305 = vadd.xlane.f32.xlu0 %v2238_v46 }
 0x253   : > { %v4695_v0 = vpop.xlane.xlu1 %1975 }
 0x256   : > { %2307 = vadd.xlane.f32.xlu0 %v2239_v55  ;;  %v4747_v55 = vsel %vm2104_vm0, %v2113_v37, 0.0  ;;  %v2116_v37 = vsub.f32 %v4384_v44, %v4662_v12  ;;  %v2062_v44 = vadd.f32 %v4654_v43, %v4652_v4  ;;  %v2247_v4 = vmul.f32 %v4782_v52, %v4782_v52 }
 0x257   : > { %v4705_v57 = vpop.xlane.xlu1 %1977  ;;  %5634 = vst [vmem:[#allocation27_spill] sm:$0xff] %v4747_v55  ;;  %v2243_v24 = vmul.f32 %v4747_v55, %v4747_v55  ;;  %v2119_v43 = vsub.f32 %v4397_v2, %v4662_v12 }
 0x25a   : > { %2309 = vadd.xlane.f32.xlu0 %v2240_v62  ;;  %v2115_v62 = vsub.f32 %v4381_v38, %v4662_v12 }
 0x25b   : > { %v4715_v13 = vpop.xlane.xlu1 %1979 }
 0x25e   : > { %2311 = vadd.xlane.f32.xlu0 %v2241_v7 }
 0x25f   : > { %v1982_v60 = vpop.xlane.xlu1 %1981 }
 0x262   : > { %2313 = vadd.xlane.f32.xlu0 %v2242_v14  ;;  %v4763_v14 = vsel %vm2104_vm0, %v2115_v62, 0.0  ;;  %v2063_v62 = vadd.f32 %v2062_v44, %v4656_v26  ;;  %v4802_v44 = vsel %vm2104_vm0, %v2119_v43, 0.0 }
 0x263   : > { %v1984_v45 = vpop.xlane.xlu1 %1983  ;;  %5636 = vst [vmem:[#allocation29_spill] sm:$0xff] %v4763_v14  ;;  %v2245_v38 = vmul.f32 %v4763_v14, %v4763_v14  ;;  %v2118_v14 = vsub.f32 %v4392_v58, %v4662_v12  ;;  %5639 = vst [vmem:[#allocation32_spill] sm:$0xff] %v4802_v44 }
 0x265   : > { %v4792_v26 = vsel %vm2104_vm0, %v2118_v14, 0.0 }
 0x266   : > { %2315 = vadd.xlane.f32.xlu0 %v2243_v24  ;;  %v4771_v24 = vsel %vm2104_vm0, %v2116_v37, 0.0  ;;  %v2064_v37 = vadd.f32 %v2063_v62, %v4658_v42  ;;  %5638 = vst [vmem:[#allocation31_spill] sm:$0xff] %v4792_v26  ;;  %v2248_v42 = vmul.f32 %v4792_v26, %v4792_v26 }
 0x267   : > { %v1986_v46 = vpop.xlane.xlu1 %1985 }
 0x268   : > { %v2065_v30 = vadd.f32 %v2064_v37, %v4660_v47  ;;  %v2120_v47 = vsub.f32 %v4400_v8, %v4662_v12 }
 0x26a   : > { %2317 = vadd.xlane.f32.xlu0 %v2244_v31  ;;  %v2246_v31 = vmul.f32 %v4771_v24, %v4771_v24 }
 0x26b   : > { %v1988_v34 = vpop.xlane.xlu1 %1987 }
 0x26e   : > { %2319 = vadd.xlane.f32.xlu0 %v2245_v38  ;;  %v2066_v38 = vadd.f32 %v2065_v30, %v4666_v20  ;;  %v2249_v20 = vmul.f32 %v4802_v44, %v4802_v44  ;;  %v4812_v30 = vsel %vm2104_vm0, %v2120_v47, 0.0 }
 0x26f   : > { %v1990_v7 = vpop.xlane.xlu1 %1989  ;;  %5640 = vst [vmem:[#allocation33_spill] sm:$0xff] %v4812_v30 }
 0x270   : > { %v2067_v25 = vadd.f32 %v2066_v38, %v4675_v18  ;;  %v2121_v18 = vsub.f32 %v4405_v17, %v4662_v12 }
 0x272   : > { %2321 = vadd.xlane.f32.xlu0 %v2246_v31  ;;  %v2068_v14 = vadd.f32 %v2067_v25, %v4695_v0  ;;  %v2250_v0 = vmul.f32 %v4812_v30, %v4812_v30 }
 0x273   : > { %v1992_v55 = vpop.xlane.xlu1 %1991 }
 0x274   : > { %v2069_v62 = vadd.f32 %v2068_v14, %v4705_v57  ;;  %v4819_v57 = vsel %vm2104_vm0, %v2121_v18, 0.0 }
 0x275   : > { %5641 = vst [vmem:[#allocation34_spill] sm:$0xff] %v4819_v57  ;;  %v2251_v38 = vmul.f32 %v4819_v57, %v4819_v57 }
 0x276   : > { %2323 = vadd.xlane.f32.xlu0 %v2247_v4  ;;  %v2070_v31 = vadd.f32 %v2069_v62, %v4715_v13 }
 0x277   : > { %v1994_v23 = vpop.xlane.xlu1 %1993 }
 0x278   : > { %v2071_v37 = vadd.f32 %v2070_v31, %v1982_v60 }
 0x27a   : > { %2325 = vadd.xlane.f32.xlu0 %v2248_v42  ;;  %v2072_v43 = vadd.f32 %v2071_v37, %v1984_v45 }
 0x27b   : > { %v1996_v16 = vpop.xlane.xlu1 %1995 }
 0x27c   : > { %v2073_v17 = vadd.f32 %v2072_v43, %v1986_v46 }
 0x27e   : > { %2327 = vadd.xlane.f32.xlu0 %v2249_v20  ;;  %v2074_v42 = vadd.f32 %v2073_v17, %v1988_v34 }
 0x27f   : > { %v1998_v58 = vpop.xlane.xlu1 %1997 }
 0x280   : > { %v2075_v13 = vadd.f32 %v2074_v42, %v1990_v7 }
 0x282   : > { %2329 = vadd.xlane.f32.xlu0 %v2250_v0  ;;  %v2076_v60 = vadd.f32 %v2075_v13, %v1992_v55 }
 0x283   : > { %v2000_v2 = vpop.xlane.xlu1 %1999 }
 0x284   : > { %v2077_v14 = vadd.f32 %v2076_v60, %v1994_v23 }
 0x286   : > { %2331 = vadd.xlane.f32.xlu0 %v2251_v38  ;;  %v2078_v20 = vadd.f32 %v2077_v14, %v1996_v16  ;;  %v2122_v14 = vsub.f32 %v4408_v22, %v4662_v12  ;;  %v2123_v22 = vsub.f32 %v4413_v33, %v4662_v12  ;;  %v2124_v33 = vsub.f32 %v4416_v40, %v4662_v12 }
 0x287   : > { %v2002_v8 = vpop.xlane.xlu1 %2001  ;;  %v2125_v40 = vsub.f32 %v4421_v49, %v4662_v12  ;;  %v2126_v49 = vsub.f32 %v4424_v56, %v4662_v12  ;;  %v2127_v56 = vsub.f32 %v4429_v1, %v4662_v12  ;;  %v2128_v1 = vsub.f32 %v4432_v9, %v4662_v12  ;;  %v5650_v9 = vld [vmem:[#allocation2_spill] sm:$0xff] }
 0x288   : > { %v2079_v31 = vadd.f32 %v2078_v20, %v1998_v58 }
 0x28a   : > { %v2080_v18 = vadd.f32 %v2079_v31, %v2000_v2 }
 0x28b   : > { %v2004_v4 = vpop.xlane.xlu1 %2003 }
 0x28c   : > { %v2081_v44 = vadd.f32 %v2080_v18, %v2002_v8 }
 0x28e   : > { %v2082_v45 = vadd.f32 %v2081_v44, %v2004_v4 }
 0x28f   : > { %v2006_v25 = vpop.xlane.xlu1 %2005 }
 0x290   : > { %v2083_v37 = vadd.f32 %v2082_v45, %v2006_v25 }
 0x293   : > { %v2008_v47 = vpop.xlane.xlu1 %2007 }
 0x294   : > { %v2084_v0 = vadd.f32 %v2083_v37, %v2008_v47 }
 0x297   : > { %v2010_v62 = vpop.xlane.xlu1 %2009 }
 0x298   : > { %v2085_v43 = vadd.f32 %v2084_v0, %v2010_v62 }
 0x29b   : > { %v2012_v30 = vpop.xlane.xlu1 %2011 }
 0x29c   : > { %v2086_v52 = vadd.f32 %v2085_v43, %v2012_v30 }
 0x29f   : > { %v2014_v26 = vpop.xlane.xlu1 %2013 }
 0x2a0   : > { %v2087_v34 = vadd.f32 %v2086_v52, %v2014_v26 }
 0x2a3   : > { %v2016_v46 = vpop.xlane.xlu1 %2015 }
 0x2a4   : > { %v2088_v7 = vadd.f32 %v2087_v34, %v2016_v46  ;;  %v4873_v46 = vsel %vm2104_vm0, %v2123_v22, 0.0 }
 0x2a5   : > { %v2253_v43 = vmul.f32 %v4873_v46, %v4873_v46 }
 0x2a7   : > { %v2018_v57 = vpop.xlane.xlu1 %2017 }
 0x2a8   : > { %v2089_v38 = vadd.f32 %v2088_v7, %v2018_v57 }
 0x2ab   : > { %v2020_v17 = vpop.xlane.xlu1 %2019 }
 0x2ac   : > { %v2090_v23 = vadd.f32 %v2089_v38, %v2020_v17  ;;  %v4889_v17 = vsel %vm2104_vm0, %v2124_v33, 0.0 }
 0x2ad   : > { %v2254_v38 = vmul.f32 %v4889_v17, %v4889_v17 }
 0x2af   : > { %v2022_v55 = vpop.xlane.xlu1 %2021 }
 0x2b0   : > { %v2091_v42 = vadd.f32 %v2090_v23, %v2022_v55  ;;  %v4905_v23 = vsel %vm2104_vm0, %v2125_v40, 0.0 }
 0x2b3   : > { %v2024_v16 = vpop.xlane.xlu1 %2023 }
 0x2b4   : > { %v2092_v58 = vadd.f32 %v2091_v42, %v2024_v16  ;;  %v2255_v16 = vmul.f32 %v4905_v23, %v4905_v23 }
 0x2b6   : > { %v2093_v13 = vrot.slane %v2092_v58, 4 }
 0x2b8   : > { %v2094_v2 = vadd.f32 %v2093_v13, %v2092_v58  ;;  %v4921_v13 = vsel %vm2104_vm0, %v2126_v49, 0.0 }
 0x2ba   : > { %v2095_v8 = vrot.slane %v2094_v2, 2 }
 0x2bc   : > { %v2096_v60 = vadd.f32 %v2095_v8, %v2094_v2  ;;  %v2256_v8 = vmul.f32 %v4921_v13, %v4921_v13 }
 0x2be   : > { %v2097_v44 = vrot.slane %v2096_v60, 1 }
 0x2c0   : > { %v2098_v4 = vadd.f32 %v2097_v44, %v2096_v60  ;;  %v4937_v44 = vsel %vm2104_vm0, %v2127_v56, 0.0 }
 0x2c2   : > { %v4823_v25 = vmul.f32 0.00048828125, %v2098_v4 }
 0x2c4   : > { %v2138_v30 = vsub.f32 %v4472_v48, %v4823_v25  ;;  %v2137_v52 = vsub.f32 %v4469_v36, %v4823_v25  ;;  %v2139_v26 = vsub.f32 %v4477_v61, %v4823_v25  ;;  %v2140_v62 = vsub.f32 %v4480_v6, %v4823_v25 }
 0x2c5   : > { %v4857_v6 = vsel %vm2104_vm0, %v2122_v14, 0.0  ;;  %v2141_v31 = vsub.f32 %v4485_v21, %v4823_v25  ;;  %v2142_v21 = vsub.f32 %v4490_v35, %v4823_v25  ;;  %v2143_v35 = vsub.f32 %v4497_v54, %v4823_v25 }
 0x2c6   : > { %v4833_v57 = vsel %vm2104_vm0, %v2138_v30, 0.0  ;;  %v4843_v36 = vsel %vm2104_vm0, %v2137_v52, 0.0  ;;  %v4847_v48 = vsel %vm2104_vm0, %v2139_v26, 0.0  ;;  %v4863_v18 = vsel %vm2104_vm0, %v2140_v62, 0.0  ;;  %v5651_v62 = vld [vmem:[#allocation11_spill] sm:$0xff] }
 0x2c7   : > { %v2268_v47 = vmul.f32 %v4833_v57, %v4833_v57  ;;  %5642 = vst [vmem:[#allocation35_spill] sm:$0xff] %v4847_v48  ;;  %v2267_v61 = vmul.f32 %v4843_v36, %v4843_v36  ;;  %v2269_v20 = vmul.f32 %v4847_v48, %v4847_v48  ;;  %5643 = vst [vmem:[#allocation36_spill] sm:$0xff] %v4863_v18  ;;  %v4879_v0 = vsel %vm2104_vm0, %v2141_v31, 0.0 }
 0x2c8   : > { %v2252_v45 = vmul.f32 %v4857_v6, %v4857_v6  ;;  %v2270_v37 = vmul.f32 %v4863_v18, %v4863_v18  ;;  %5644 = vst [vmem:[#allocation37_spill] sm:$0xff] %v4879_v0  ;;  %v2271_v34 = vmul.f32 %v4879_v0, %v4879_v0  ;;  %v4895_v7 = vsel %vm2104_vm0, %v2142_v21, 0.0  ;;  %v5654_v21 = vld [vmem:[#allocation12_spill] sm:$0xff] }
 0x2c9   : > { %2365 = vadd.xlane.f32.xlu1 %v2268_v47  ;;  %2363 = vadd.xlane.f32.xlu0 %v2267_v61  ;;  %5645 = vst [vmem:[#allocation38_spill] sm:$0xff] %v4895_v7  ;;  %v2272_v55 = vmul.f32 %v4895_v7, %v4895_v7  ;;  %v2144_v54 = vsub.f32 %v4502_v5, %v4823_v25  ;;  %v4911_v42 = vsel %vm2104_vm0, %v2143_v35, 0.0  ;;  %v4953_v14 = vsel %vm2104_vm0, %v2128_v1, 0.0 }
 0x2ca   : > { %5646 = vst [vmem:[#allocation39_spill] sm:$0xff] %v4911_v42  ;;  %v2273_v58 = vmul.f32 %v4911_v42, %v4911_v42  ;;  %v2145_v5 = vsub.f32 %v4509_v28, %v4823_v25  ;;  %v5648_v28 = vld [vmem:[#allocation10_spill] sm:$0xff]  ;;  %v2257_v52 = vmul.f32 %v4937_v44, %v4937_v44  ;;  %v2129_v47 = vsub.f32 %v5650_v9, %v4662_v12 }
 0x2cb   : > { %v4927_v2 = vsel %vm2104_vm0, %v2144_v54, 0.0  ;;  %v2146_v4 = vsub.f32 %v5648_v28, %v4823_v25  ;;  %v2147_v61 = vsub.f32 %v5651_v62, %v4823_v25  ;;  %v2258_v22 = vmul.f32 %v4953_v14, %v4953_v14  ;;  %v5657_v54 = vld [vmem:[#allocation13_spill] sm:$0xff]  ;;  %v5660_v28 = vld [vmem:[#allocation14_spill] sm:$0xff] }
 0x2cc   : > { %5647 = vst [vmem:[#allocation40_spill] sm:$0xff] %v4927_v2  ;;  %v2274_v60 = vmul.f32 %v4927_v2, %v4927_v2  ;;  %v4943_v30 = vsel %vm2104_vm0, %v2145_v5, 0.0  ;;  %v4969_v33 = vsel %vm2104_vm0, %v2129_v47, 0.0  ;;  %v5662_v47 = vld [vmem:[#allocation6_spill] sm:$0xff] }
 0x2cd   : > { %2367 = vadd.xlane.f32.xlu1 %v2269_v20  ;;  %2333 = vadd.xlane.f32.xlu0 %v2252_v45  ;;  %5649 = vst [vmem:[#allocation10_spill] sm:$0xff] %v4943_v30  ;;  %v2275_v26 = vmul.f32 %v4943_v30, %v4943_v30  ;;  %v4959_v20 = vsel %vm2104_vm0, %v2146_v4, 0.0  ;;  %v5653_v45 = vld [vmem:[#allocation3_spill] sm:$0xff]  ;;  %v2259_v40 = vmul.f32 %v4969_v33, %v4969_v33 }
 0x2ce   : > { %5652 = vst [vmem:[#allocation2_spill] sm:$0xff] %v4959_v20  ;;  %v2276_v31 = vmul.f32 %v4959_v20, %v4959_v20  ;;  %v2150_v4 = vsub.f32 %v5660_v28, %v4823_v25  ;;  %v2133_v62 = vsub.f32 %v5662_v47, %v4662_v12  ;;  %v5669_v28 = vld [vmem:[#allocation17_spill] sm:$0xff] }
 0x2d1   : > { %2369 = vadd.xlane.f32.xlu1 %v2270_v37  ;;  %2335 = vadd.xlane.f32.xlu0 %v2253_v43  ;;  %v2130_v37 = vsub.f32 %v5653_v45, %v4662_v12  ;;  %v2148_v43 = vsub.f32 %v5654_v21, %v4823_v25  ;;  %v5023_v45 = vsel %vm2104_vm0, %v2150_v4, 0.0  ;;  %v2153_v4 = vsub.f32 %v5669_v28, %v4823_v25 }
 0x2d2   : > { %v2280_v21 = vmul.f32 %v5023_v45, %v5023_v45 }
 0x2d3   : > { %v4985_v49 = vsel %vm2104_vm0, %v2130_v37, 0.0 }
 0x2d4   : > { %v2260_v56 = vmul.f32 %v4985_v49, %v4985_v49 }
 0x2d5   : > { %2371 = vadd.xlane.f32.xlu1 %v2271_v34  ;;  %2337 = vadd.xlane.f32.xlu0 %v2254_v38  ;;  %v4975_v34 = vsel %vm2104_vm0, %v2147_v61, 0.0  ;;  %v5656_v38 = vld [vmem:[#allocation4_spill] sm:$0xff] }
 0x2d6   : > { %5655 = vst [vmem:[#allocation11_spill] sm:$0xff] %v4975_v34  ;;  %v2277_v35 = vmul.f32 %v4975_v34, %v4975_v34  ;;  %5664 = vst [vmem:[#allocation4_spill] sm:$0xff] %v5023_v45 }
 0x2d9   : > { %2373 = vadd.xlane.f32.xlu1 %v2272_v55  ;;  %2339 = vadd.xlane.f32.xlu0 %v2255_v16  ;;  %v2131_v55 = vsub.f32 %v5656_v38, %v4662_v12  ;;  %v2149_v16 = vsub.f32 %v5657_v54, %v4823_v25  ;;  %v5666_v38 = vld [vmem:[#allocation16_spill] sm:$0xff] }
 0x2db   : > { %v5001_v1 = vsel %vm2104_vm0, %v2131_v55, 0.0  ;;  %v2152_v55 = vsub.f32 %v5666_v38, %v4823_v25 }
 0x2dd   : > { %2375 = vadd.xlane.f32.xlu1 %v2273_v58  ;;  %2341 = vadd.xlane.f32.xlu0 %v2256_v8  ;;  %v4991_v58 = vsel %vm2104_vm0, %v2148_v43, 0.0  ;;  %v5659_v8 = vld [vmem:[#allocation5_spill] sm:$0xff]  ;;  %v5665_v43 = vld [vmem:[#allocation7_spill] sm:$0xff] }
 0x2de   : > { %5658 = vst [vmem:[#allocation3_spill] sm:$0xff] %v4991_v58  ;;  %v2278_v5 = vmul.f32 %v4991_v58, %v4991_v58 }
 0x2e1   : > { %2377 = vadd.xlane.f32.xlu1 %v2274_v60  ;;  %2343 = vadd.xlane.f32.xlu0 %v2257_v52  ;;  %v2132_v60 = vsub.f32 %v5659_v8, %v4662_v12  ;;  %v5007_v52 = vsel %vm2104_vm0, %v2149_v16, 0.0 }
 0x2e2   : > { %5661 = vst [vmem:[#allocation12_spill] sm:$0xff] %v5007_v52  ;;  %v2279_v9 = vmul.f32 %v5007_v52, %v5007_v52 }
 0x2e3   : > { %v5017_v61 = vsel %vm2104_vm0, %v2132_v60, 0.0 }
 0x2e4   : > { %v2262_v37 = vmul.f32 %v5017_v61, %v5017_v61 }
 0x2e5   : > { %2379 = vadd.xlane.f32.xlu1 %v2275_v26  ;;  %2345 = vadd.xlane.f32.xlu0 %v2258_v22  ;;  %v2261_v26 = vmul.f32 %v5001_v1, %v5001_v1  ;;  %v5663_v22 = vld [vmem:[#allocation15_spill] sm:$0xff] }
 0x2e9   : > { %2381 = vadd.xlane.f32.xlu1 %v2276_v31  ;;  %2347 = vadd.xlane.f32.xlu0 %v2259_v40  ;;  %v2151_v31 = vsub.f32 %v5663_v22, %v4823_v25  ;;  %v2134_v40 = vsub.f32 %v5665_v43, %v4662_v12  ;;  %v5671_v22 = vld [vmem:[#allocation9_spill] sm:$0xff] }
 0x2eb   : > { %v5039_v54 = vsel %vm2104_vm0, %v2151_v31, 0.0  ;;  %v5049_v60 = vsel %vm2104_vm0, %v2134_v40, 0.0  ;;  %v2136_v31 = vsub.f32 %v5671_v22, %v4662_v12  ;;  %v5073_v40 = vsel %vm2104_vm0, %v2153_v4, 0.0 }
 0x2ec   : > { %5667 = vst [vmem:[#allocation13_spill] sm:$0xff] %v5039_v54  ;;  %v2264_v47 = vmul.f32 %v5049_v60, %v5049_v60  ;;  %5673 = vst [vmem:[#allocation14_spill] sm:$0xff] %v5073_v40 }
 0x2ed   : > { %2383 = vadd.xlane.f32.xlu1 %v2277_v35  ;;  %2349 = vadd.xlane.f32.xlu0 %v2260_v56  ;;  %v5033_v35 = vsel %vm2104_vm0, %v2133_v62, 0.0  ;;  %v2281_v56 = vmul.f32 %v5039_v54, %v5039_v54 }
 0x2ee   : > { %v2263_v16 = vmul.f32 %v5033_v35, %v5033_v35 }
 0x2f1   : > { %2385 = vadd.xlane.f32.xlu1 %v2278_v5  ;;  %2351 = vadd.xlane.f32.xlu0 %v2261_v26  ;;  %v5668_v5 = vld [vmem:[#allocation8_spill] sm:$0xff]  ;;  %v5053_v26 = vpop.xlane.xlu0 %2299 }
 0x2f2   : > { %v2135_v8 = vsub.f32 %v5668_v5, %v4662_v12  ;;  %v2283_v12 = vmul.f32 %v5073_v40, %v5073_v40 }
 0x2f5   : > { %2387 = vadd.xlane.f32.xlu1 %v2279_v9  ;;  %2353 = vadd.xlane.f32.xlu0 %v2262_v37  ;;  %v5057_v9 = vsel %vm2104_vm0, %v2152_v55, 0.0  ;;  %v5067_v37 = vsel %vm2104_vm0, %v2135_v8, 0.0  ;;  %v5075_v38 = vpop.xlane.xlu0 %2303 }
 0x2f6   : > { %5670 = vst [vmem:[#allocation5_spill] sm:$0xff] %v5057_v9  ;;  %v2282_v62 = vmul.f32 %v5057_v9, %v5057_v9  ;;  %v2265_v55 = vmul.f32 %v5067_v37, %v5067_v37 }
 0x2f9   : > { %2389 = vadd.xlane.f32.xlu1 %v2280_v21  ;;  %2355 = vadd.xlane.f32.xlu0 %v2263_v16  ;;  %v5672_v21 = vld [vmem:[#allocation18_spill] sm:$0xff]  ;;  %v5083_v16 = vsel %vm2104_vm0, %v2136_v31, 0.0  ;;  %v5101_v31 = vpop.xlane.xlu0 %2305 }
 0x2fa   : > { %v2154_v43 = vsub.f32 %v5672_v21, %v4823_v25  ;;  %v2266_v28 = vmul.f32 %v5083_v16, %v5083_v16 }
 0x2fc   : > { %v5089_v8 = vsel %vm2104_vm0, %v2154_v43, 0.0  ;;  %v5678_v43 = vld [vmem:[#allocation21_spill] sm:$0xff] }
 0x2fd   : > { %2391 = vadd.xlane.f32.xlu1 %v2281_v56  ;;  %2357 = vadd.xlane.f32.xlu0 %v2264_v47  ;;  %v5674_v56 = vld [vmem:[#allocation19_spill] sm:$0xff]  ;;  %5675 = vst [vmem:[#allocation6_spill] sm:$0xff] %v5089_v8  ;;  %v2284_v4 = vmul.f32 %v5089_v8, %v5089_v8  ;;  %v5676_v47 = vld [vmem:[#allocation20_spill] sm:$0xff] }
 0x2fe   : > { %v2155_v5 = vsub.f32 %v5674_v56, %v4823_v25  ;;  %v5111_v56 = vpop.xlane.xlu0 %2307 }
 0x300   : > { %v5099_v22 = vsel %vm2104_vm0, %v2155_v5, 0.0 }
 0x301   : > { %2393 = vadd.xlane.f32.xlu1 %v2282_v62  ;;  %2359 = vadd.xlane.f32.xlu0 %v2265_v55  ;;  %v2156_v62 = vsub.f32 %v5676_v47, %v4823_v25  ;;  %5677 = vst [vmem:[#allocation15_spill] sm:$0xff] %v5099_v22  ;;  %v2285_v21 = vmul.f32 %v5099_v22, %v5099_v22 }
 0x302   : > { %v2157_v55 = vsub.f32 %v5678_v43, %v4823_v25  ;;  %v5129_v43 = vpop.xlane.xlu0 %2309 }
 0x305   : > { %2395 = vadd.xlane.f32.xlu1 %v2283_v12  ;;  %2361 = vadd.xlane.f32.xlu0 %v2266_v28  ;;  %v5109_v12 = vsel %vm2104_vm0, %v2156_v62, 0.0  ;;  %v2158_v28 = vsub.f32 %v4588_v50, %v4823_v25  ;;  %v2159_v62 = vsub.f32 %v4598_v10, %v4823_v25 }
 0x306   : > { %5679 = vst [vmem:[#allocation7_spill] sm:$0xff] %v5109_v12  ;;  %v2286_v5 = vmul.f32 %v5109_v12, %v5109_v12 }
 0x309   : > { %2397 = vadd.xlane.f32.xlu1 %v2284_v4  ;;  %v5119_v4 = vsel %vm2104_vm0, %v2157_v55, 0.0  ;;  %v2160_v55 = vsub.f32 %v4604_v3, %v4823_v25 }
 0x30a   : > { %5680 = vst [vmem:[#allocation16_spill] sm:$0xff] %v5119_v4  ;;  %v2287_v47 = vmul.f32 %v5119_v4, %v5119_v4  ;;  %v2312_v4 = vpop.xlane.xlu0 %2311 }
 0x30d   : > { %2399 = vadd.xlane.f32.xlu1 %v2285_v21  ;;  %v5127_v21 = vsel %vm2104_vm0, %v2158_v28, 0.0  ;;  %v2161_v28 = vsub.f32 %v4612_v27, %v4823_v25 }
 0x30e   : > { %5681 = vst [vmem:[#allocation8_spill] sm:$0xff] %v5127_v21  ;;  %v2288_v50 = vmul.f32 %v5127_v21, %v5127_v21  ;;  %v2314_v21 = vpop.xlane.xlu0 %2313 }
 0x311   : > { %2401 = vadd.xlane.f32.xlu1 %v2286_v5  ;;  %v5137_v5 = vsel %vm2104_vm0, %v2159_v62, 0.0  ;;  %v2162_v62 = vsub.f32 %v4616_v41, %v4823_v25 }
 0x312   : > { %5682 = vst [vmem:[#allocation17_spill] sm:$0xff] %v5137_v5  ;;  %v2289_v10 = vmul.f32 %v5137_v5, %v5137_v5  ;;  %v5685_v5 = vld [vmem:[#allocation22_spill] sm:$0xff] }
 0x315   : > { %2403 = vadd.xlane.f32.xlu1 %v2287_v47  ;;  %v5145_v47 = vsel %vm2104_vm0, %v2160_v55, 0.0  ;;  %v2163_v55 = vsub.f32 %v5685_v5, %v4823_v25 }
 0x316   : > { %5683 = vst [vmem:[#allocation9_spill] sm:$0xff] %v5145_v47  ;;  %v2290_v3 = vmul.f32 %v5145_v47, %v5145_v47  ;;  %v2316_v47 = vpop.xlane.xlu0 %2315 }
 0x319   : > { %2405 = vadd.xlane.f32.xlu1 %v2288_v50  ;;  %v5153_v50 = vsel %vm2104_vm0, %v2161_v28, 0.0  ;;  %v5687_v28 = vld [vmem:[#allocation23_spill] sm:$0xff] }
 0x31a   : > { %5684 = vst [vmem:[#allocation18_spill] sm:$0xff] %v5153_v50  ;;  %v2291_v27 = vmul.f32 %v5153_v50, %v5153_v50  ;;  %v2164_v12 = vsub.f32 %v5687_v28, %v4823_v25  ;;  %v5689_v50 = vld [vmem:[#allocation24_spill] sm:$0xff]  ;;  %v2318_v22 = vpop.xlane.xlu0 %2317 }
 0x31d   : > { %2407 = vadd.xlane.f32.xlu1 %v2289_v10  ;;  %v5161_v10 = vsel %vm2104_vm0, %v2162_v62, 0.0  ;;  %v2165_v62 = vsub.f32 %v5689_v50, %v4823_v25 }
 0x31e   : > { %5686 = vst [vmem:[#allocation19_spill] sm:$0xff] %v5161_v10  ;;  %v2292_v41 = vmul.f32 %v5161_v10, %v5161_v10 }
 0x321   : > { %2409 = vadd.xlane.f32.xlu1 %v2290_v3  ;;  %v5169_v3 = vsel %vm2104_vm0, %v2163_v55, 0.0  ;;  %v2166_v55 = vsub.f32 %v4640_v11, %v4823_v25 }
 0x322   : > { %5688 = vst [vmem:[#allocation20_spill] sm:$0xff] %v5169_v3  ;;  %v2293_v5 = vmul.f32 %v5169_v3, %v5169_v3  ;;  %v2320_v3 = vpop.xlane.xlu0 %2319 }
 0x325   : > { %2411 = vadd.xlane.f32.xlu1 %v2291_v27  ;;  %v5177_v27 = vsel %vm2104_vm0, %v2164_v12, 0.0  ;;  %v2167_v12 = vsub.f32 %v4646_v59, %v4823_v25 }
 0x326   : > { %5690 = vst [vmem:[#allocation21_spill] sm:$0xff] %v5177_v27  ;;  %v2294_v28 = vmul.f32 %v5177_v27, %v5177_v27  ;;  %v2322_v27 = vpop.xlane.xlu0 %2321 }
 0x329   : > { %2413 = vadd.xlane.f32.xlu1 %v2292_v41  ;;  %v5185_v41 = vsel %vm2104_vm0, %v2165_v62, 0.0  ;;  %v2168_v62 = vsub.f32 %v4648_v63, %v4823_v25 }
 0x32a   : > { %5691 = vst [vmem:[#allocation22_spill] sm:$0xff] %v5185_v41  ;;  %v2295_v50 = vmul.f32 %v5185_v41, %v5185_v41 }
 0x32d   : > { %2415 = vadd.xlane.f32.xlu1 %v2293_v5  ;;  %v5193_v5 = vsel %vm2104_vm0, %v2166_v55, 0.0  ;;  %v5207_v55 = vsel %vm2104_vm0, %v2168_v62, 0.0 }
 0x32e   : > { %5692 = vst [vmem:[#allocation23_spill] sm:$0xff] %v5193_v5  ;;  %v2296_v11 = vmul.f32 %v5193_v5, %v5193_v5  ;;  %5694 = vst [vmem:[#allocation41_spill] sm:$0xff] %v5207_v55  ;;  %v2298_v5 = vmul.f32 %v5207_v55, %v5207_v55 }
 0x331   : > { %2417 = vadd.xlane.f32.xlu1 %v2294_v28  ;;  %v5201_v28 = vsel %vm2104_vm0, %v2167_v12, 0.0  ;;  %v2302_v12 = vpop.xlane.xlu1 %2301 }
 0x332   : > { %5693 = vst [vmem:[#allocation24_spill] sm:$0xff] %v5201_v28  ;;  %v2297_v59 = vmul.f32 %v5201_v28, %v5201_v28  ;;  %v2427_v28 = vadd.f32 %v2302_v12, %v5053_v26 }
 0x334   : > { %v2428_v51 = vadd.f32 %v2427_v28, %v5075_v38 }
 0x335   : > { %2419 = vadd.xlane.f32.xlu1 %v2295_v50  ;;  %v2324_v50 = vpop.xlane.xlu0 %2323 }
 0x339   : > { %2421 = vadd.xlane.f32.xlu1 %v2296_v11  ;;  %v2326_v63 = vpop.xlane.xlu0 %2325 }
 0x33d   : > { %2423 = vadd.xlane.f32.xlu1 %v2297_v59  ;;  %v2328_v25 = vpop.xlane.xlu0 %2327  ;;  %v2429_v59 = vadd.f32 %v2428_v51, %v5101_v31 }
 0x33f   : > { %v2430_v54 = vadd.f32 %v2429_v59, %v5111_v56 }
 0x341   : > { %2425 = vadd.xlane.f32.xlu1 %v2298_v5  ;;  %v2330_v41 = vpop.xlane.xlu0 %2329  ;;  %v2431_v45 = vadd.f32 %v2430_v54, %v5129_v43 }
 0x343   : > { %v2432_v52 = vadd.f32 %v2431_v45, %v2312_v4 }
 0x345   : > { %v2332_v10 = vpop.xlane.xlu0 %2331  ;;  %v2433_v20 = vadd.f32 %v2432_v52, %v2314_v21 }
 0x347   : > { %v2434_v30 = vadd.f32 %v2433_v20, %v2316_v47 }
 0x349   : > { %v2435_v26 = vadd.f32 %v2434_v30, %v2318_v22 }
 0x34b   : > { %v2436_v12 = vadd.f32 %v2435_v26, %v2320_v3 }
 0x34d   : > { %v2437_v7 = vadd.f32 %v2436_v12, %v2322_v27 }
 0x34f   : > { %v2438_v0 = vadd.f32 %v2437_v7, %v2324_v50 }
 0x351   : > { %v2439_v56 = vadd.f32 %v2438_v0, %v2326_v63 }
 0x353   : > { %v2440_v59 = vadd.f32 %v2439_v56, %v2328_v25 }
 0x355   : > { %v2441_v54 = vadd.f32 %v2440_v59, %v2330_v41 }
 0x356   : > { %v2366_v8 = vpop.xlane.xlu1 %2365  ;;  %v2364_v11 = vpop.xlane.xlu0 %2363 }
 0x357   : > { %v2442_v45 = vadd.f32 %v2441_v54, %v2332_v10  ;;  %v2464_v59 = vadd.f32 %v2366_v8, %v2364_v11 }
 0x35a   : > { %v2368_v40 = vpop.xlane.xlu1 %2367  ;;  %v2334_v62 = vpop.xlane.xlu0 %2333 }
 0x35b   : > { %v2443_v52 = vadd.f32 %v2442_v45, %v2334_v62  ;;  %v2465_v45 = vadd.f32 %v2464_v59, %v2368_v40 }
 0x35e   : > { %v2370_v9 = vpop.xlane.xlu1 %2369  ;;  %v2336_v55 = vpop.xlane.xlu0 %2335 }
 0x35f   : > { %v2444_v20 = vadd.f32 %v2443_v52, %v2336_v55 }
 0x362   : > { %v2372_v5 = vpop.xlane.xlu1 %2371  ;;  %v2338_v58 = vpop.xlane.xlu0 %2337 }
 0x363   : > { %v2445_v30 = vadd.f32 %v2444_v20, %v2338_v58  ;;  %v2466_v58 = vadd.f32 %v2465_v45, %v2370_v9 }
 0x366   : > { %v2374_v34 = vpop.xlane.xlu1 %2373  ;;  %v2340_v2 = vpop.xlane.xlu0 %2339 }
 0x367   : > { %v2446_v22 = vadd.f32 %v2445_v30, %v2340_v2 }
 0x36a   : > { %v2376_v42 = vpop.xlane.xlu1 %2375  ;;  %v2342_v38 = vpop.xlane.xlu0 %2341 }
 0x36b   : > { %v2447_v27 = vadd.f32 %v2446_v22, %v2342_v38  ;;  %v2467_v38 = vadd.f32 %v2466_v58, %v2372_v5 }
 0x36d   : > { %v2468_v22 = vadd.f32 %v2467_v38, %v2374_v34 }
 0x36e   : > { %v2378_v28 = vpop.xlane.xlu1 %2377  ;;  %v2344_v31 = vpop.xlane.xlu0 %2343 }
 0x36f   : > { %v2448_v7 = vadd.f32 %v2447_v27, %v2344_v31 }
 0x372   : > { %v2380_v51 = vpop.xlane.xlu1 %2379  ;;  %v2346_v18 = vpop.xlane.xlu0 %2345 }
 0x373   : > { %v2449_v0 = vadd.f32 %v2448_v7, %v2346_v18  ;;  %v2469_v7 = vadd.f32 %v2468_v22, %v2376_v42 }
 0x376   : > { %v2382_v48 = vpop.xlane.xlu1 %2381  ;;  %v2348_v4 = vpop.xlane.xlu0 %2347 }
 0x377   : > { %v2450_v63 = vadd.f32 %v2449_v0, %v2348_v4 }
 0x37a   : > { %v2384_v43 = vpop.xlane.xlu1 %2383  ;;  %v2350_v21 = vpop.xlane.xlu0 %2349 }
 0x37b   : > { %v2451_v41 = vadd.f32 %v2450_v63, %v2350_v21  ;;  %v2470_v21 = vadd.f32 %v2469_v7, %v2378_v28 }
 0x37d   : > { %v2471_v11 = vadd.f32 %v2470_v21, %v2380_v51 }
 0x37e   : > { %v2386_v47 = vpop.xlane.xlu1 %2385  ;;  %v2352_v3 = vpop.xlane.xlu0 %2351 }
 0x37f   : > { %v2452_v10 = vadd.f32 %v2451_v41, %v2352_v3 }
 0x382   : > { %v2388_v26 = vpop.xlane.xlu1 %2387  ;;  %v2354_v50 = vpop.xlane.xlu0 %2353 }
 0x383   : > { %v2453_v55 = vadd.f32 %v2452_v10, %v2354_v50  ;;  %v2472_v50 = vadd.f32 %v2471_v11, %v2382_v48 }
 0x385   : > { %v2473_v9 = vadd.f32 %v2472_v50, %v2384_v43 }
 0x386   : > { %v2390_v12 = vpop.xlane.xlu1 %2389  ;;  %v2356_v25 = vpop.xlane.xlu0 %2355 }
 0x387   : > { %v2454_v52 = vadd.f32 %v2453_v55, %v2356_v25  ;;  %v2474_v10 = vadd.f32 %v2473_v9, %v2386_v47 }
 0x38a   : > { %v2392_v56 = vpop.xlane.xlu1 %2391  ;;  %v2358_v54 = vpop.xlane.xlu0 %2357 }
 0x38b   : > { %v2455_v30 = vadd.f32 %v2454_v52, %v2358_v54  ;;  %v2475_v54 = vadd.f32 %v2474_v10, %v2388_v26  ;;  %v5695_v10 = vld [vmem:[#allocation25_spill] sm:$0xff] }
 0x38d   : > { %v2476_v55 = vadd.f32 %v2475_v54, %v2390_v12 }
 0x38e   : > { %v2394_v62 = vpop.xlane.xlu1 %2393  ;;  %v2360_v2 = vpop.xlane.xlu0 %2359 }
 0x38f   : > { %v2456_v31 = vadd.f32 %v2455_v30, %v2360_v2  ;;  %v2477_v42 = vadd.f32 %v2476_v55, %v2392_v56  ;;  %v5698_v55 = vld [vmem:[#allocation28_spill] sm:$0xff] }
 0x391   : > { %v2478_v52 = vadd.f32 %v2477_v42, %v2394_v62  ;;  %v5700_v42 = vld [vmem:[#allocation30_spill] sm:$0xff] }
 0x392   : > { %v2396_v20 = vpop.xlane.xlu1 %2395  ;;  %v2362_v27 = vpop.xlane.xlu0 %2361 }
 0x393   : > { %v2457_v4 = vadd.f32 %v2456_v31, %v2362_v27  ;;  %v2479_v58 = vadd.f32 %v2478_v52, %v2396_v20  ;;  %v5701_v52 = vld [vmem:[#allocation31_spill] sm:$0xff] }
 0x395   : > { %v2458_v0 = vrot.slane %v2457_v4, 4 }
 0x396   : > { %v2398_v18 = vpop.xlane.xlu1 %2397 }
 0x397   : > { %v2459_v8 = vadd.f32 %v2458_v0, %v2457_v4  ;;  %v2480_v2 = vadd.f32 %v2479_v58, %v2398_v18 }
 0x399   : > { %v2460_v63 = vrot.slane %v2459_v8, 2 }
 0x39a   : > { %v2400_v3 = vpop.xlane.xlu1 %2399 }
 0x39b   : > { %v2461_v25 = vadd.f32 %v2460_v63, %v2459_v8  ;;  %v2481_v30 = vadd.f32 %v2480_v2, %v2400_v3  ;;  %v5703_v2 = vld [vmem:[#allocation33_spill] sm:$0xff] }
 0x39d   : > { %v2462_v41 = vrot.slane %v2461_v25, 1 }
 0x39e   : > { %v2402_v40 = vpop.xlane.xlu1 %2401 }
 0x39f   : > { %v2463_v5 = vadd.f32 %v2462_v41, %v2461_v25  ;;  %v2482_v31 = vadd.f32 %v2481_v30, %v2402_v40  ;;  %v5704_v30 = vld [vmem:[#allocation34_spill] sm:$0xff] }
 0x3a1   : > { %v2502_v34 = vmul.f32 0.0004885198, %v2463_v5  ;;  %v5696_v5 = vld [vmem:[#allocation26_spill] sm:$0xff] }
 0x3a2   : > { %v2404_v59 = vpop.xlane.xlu1 %2403 }
 0x3a3   : > { %4067 = vrsqrt.f32 %v2502_v34  ;;  %vm2506_vm1 = vcmp.eq.f32.partialorder %v2502_v34, inf  ;;  %v2509_v47 = vand.u32 2147483648, %v2502_v34  ;;  %vm2508_vm2 = vcmp.eq.f32.partialorder %v2502_v34, 0.0 }
 0x3a4   : > { %v2483_v26 = vadd.f32 %v2482_v31, %v2404_v59 }
 0x3a6   : > { %v2406_v45 = vpop.xlane.xlu1 %2405 }
 0x3a7   : > { %v2484_v4 = vadd.f32 %v2483_v26, %v2406_v45  ;;  %v5699_v45 = vld [vmem:[#allocation29_spill] sm:$0xff] }
 0x3aa   : > { %v2408_v28 = vpop.xlane.xlu1 %2407 }
 0x3ab   : > { %v2485_v56 = vadd.f32 %v2484_v4, %v2408_v28  ;;  %v5702_v28 = vld [vmem:[#allocation32_spill] sm:$0xff] }
 0x3ad   : > { %v4068_v48 = vpop.eup %4067 }
 0x3ae   : > { %v2410_v51 = vpop.xlane.xlu1 %2409  ;;  %v2505_v38 = vmul.f32 %v4068_v48, %v2502_v34 }
 0x3af   : > { %v2486_v62 = vadd.f32 %v2485_v56, %v2410_v51 }
 0x3b0   : > { %v2507_v22 = vsel %vm2506_vm1, %v2502_v34, %v2505_v38  ;;  %v5697_v34 = vld [vmem:[#allocation27_spill] sm:$0xff] }
 0x3b1   : > { %v2510_v27 = vsel %vm2508_vm2, %v2509_v47, %v2507_v22  ;;  %v5242_v47 = vld [vmem:[%s278_s8] ss:$0 sm:$0xff] }
 0x3b2   : > { %v2412_v43 = vpop.xlane.xlu1 %2411  ;;  %v2518_v12 = vadd.f32 1e-05, %v2510_v27 }
 0x3b3   : > { %v2487_v18 = vadd.f32 %v2486_v62, %v2412_v43 }
 0x3b4   : > { %4069 = vrcp.f32 %v2518_v12 }
 0x3b6   : > { %v2414_v7 = vpop.xlane.xlu1 %2413 }
 0x3b7   : > { %v2488_v0 = vadd.f32 %v2487_v18, %v2414_v7 }
 0x3ba   : > { %v2416_v20 = vpop.xlane.xlu1 %2415 }
 0x3bb   : > { %v2489_v3 = vadd.f32 %v2488_v0, %v2416_v20 }
 0x3be   : > { %v2418_v21 = vpop.xlane.xlu1 %2417  ;;  %v4070_v8 = vpop.eup %4069 }
 0x3bf   : > { %v5216_v11 = vadd.f32 %v2489_v3, %v2418_v21  ;;  %v2524_v63 = vmul.f32 %v4070_v8, %v4683_v19  ;;  %v2525_v50 = vmul.f32 %v4070_v8, %v4679_v15  ;;  %v2526_v40 = vmul.f32 %v4070_v8, %v4693_v39 }
 0x3c0   : > { %v2527_v25 = vmul.f32 %v4070_v8, %v4703_v29  ;;  %v2528_v9 = vmul.f32 %v4070_v8, %v4713_v32  ;;  %v2529_v41 = vmul.f32 %v4070_v8, %v4723_v53  ;;  %v2530_v59 = vmul.f32 %v4070_v8, %v5695_v10 }
 0x3c1   : > { %v2531_v54 = vmul.f32 %v4070_v8, %v5696_v5  ;;  %v2532_v19 = vmul.f32 %v4070_v8, %v5697_v34  ;;  %v2533_v15 = vmul.f32 %v4070_v8, %v5698_v55  ;;  %v2534_v39 = vmul.f32 %v4070_v8, %v5699_v45 }
 0x3c2   : > { %v2535_v29 = vmul.f32 %v4070_v8, %v4771_v24  ;;  %v2536_v32 = vmul.f32 %v4070_v8, %v5700_v42  ;;  %v2537_v53 = vmul.f32 %v4070_v8, %v5701_v52  ;;  %v2538_v58 = vmul.f32 %v4070_v8, %v5702_v28 }
 0x3c3   : > { %v2539_v51 = vmul.f32 %v4070_v8, %v5703_v2  ;;  %v2540_v48 = vmul.f32 %v4070_v8, %v5704_v30  ;;  %v2541_v38 = vmul.f32 %v4070_v8, %v4857_v6  ;;  %v2542_v31 = vmul.f32 %v4070_v8, %v4873_v46 }
 0x3c4   : > { %v2543_v43 = vmul.f32 %v4070_v8, %v4889_v17  ;;  %v2544_v24 = vmul.f32 %v4070_v8, %v4905_v23  ;;  %v2545_v22 = vmul.f32 %v4070_v8, %v4921_v13  ;;  %v2546_v26 = vmul.f32 %v4070_v8, %v4937_v44 }
 0x3c5   : > { %v2547_v27 = vmul.f32 %v4070_v8, %v4953_v14  ;;  %v2548_v12 = vmul.f32 %v4070_v8, %v4969_v33  ;;  %v2549_v4 = vmul.f32 %v4070_v8, %v4985_v49  ;;  %v2550_v6 = vmul.f32 %v4070_v8, %v5001_v1 }
 0x3c6   : > { %v2551_v46 = vmul.f32 %v4070_v8, %v5017_v61  ;;  %v2552_v17 = vmul.f32 %v4070_v8, %v5033_v35  ;;  %v2553_v7 = vmul.f32 %v4070_v8, %v5049_v60  ;;  %v2554_v23 = vmul.f32 %v4070_v8, %v5067_v37 }
 0x3c7   : > { %v2555_v13 = vmul.f32 %v4070_v8, %v5083_v16  ;;  %v2595_v44 = vmul.f32 %v5242_v47, %v2524_v63  ;;  %v2596_v14 = vmul.f32 %v5242_v47, %v2525_v50  ;;  %v2597_v33 = vmul.f32 %v5242_v47, %v2526_v40  ;;  %v5280_v40 = vld [vmem:[%s281_s11] ss:$0 sm:$0xff] }
 0x3c8   : > { %v2598_v49 = vmul.f32 %v5242_v47, %v2527_v25  ;;  %v2599_v1 = vmul.f32 %v5242_v47, %v2528_v9  ;;  %v2600_v61 = vmul.f32 %v5242_v47, %v2529_v41  ;;  %v2601_v35 = vmul.f32 %v5242_v47, %v2530_v59 }
 0x3c9   : > { %v2602_v60 = vmul.f32 %v5242_v47, %v2531_v54  ;;  %v2603_v37 = vmul.f32 %v5242_v47, %v2532_v19  ;;  %v2604_v16 = vmul.f32 %v5242_v47, %v2533_v15  ;;  %v2605_v56 = vmul.f32 %v5242_v47, %v2534_v39 }
 0x3ca   : > { %v2606_v62 = vmul.f32 %v5242_v47, %v2535_v29  ;;  %v2607_v20 = vmul.f32 %v5242_v47, %v2536_v32  ;;  %v2608_v18 = vmul.f32 %v5242_v47, %v2537_v53  ;;  %v2609_v0 = vmul.f32 %v5242_v47, %v2538_v58 }
 0x3cb   : > { %v2610_v21 = vmul.f32 %v5242_v47, %v2539_v51  ;;  %v2611_v3 = vmul.f32 %v5242_v47, %v2540_v48  ;;  %v2612_v8 = vmul.f32 %v5242_v47, %v2541_v38  ;;  %v2613_v63 = vmul.f32 %v5242_v47, %v2542_v31 }
 0x3cc   : > { %v2614_v50 = vmul.f32 %v5242_v47, %v2543_v43  ;;  %v2615_v25 = vmul.f32 %v5242_v47, %v2544_v24  ;;  %v2616_v9 = vmul.f32 %v5242_v47, %v2545_v22  ;;  %v2617_v41 = vmul.f32 %v5242_v47, %v2546_v26 }
 0x3cd   : > { %v2618_v10 = vmul.f32 %v5242_v47, %v2547_v27  ;;  %v2619_v59 = vmul.f32 %v5242_v47, %v2548_v12  ;;  %v2620_v5 = vmul.f32 %v5242_v47, %v2549_v4  ;;  %v2621_v54 = vmul.f32 %v5242_v47, %v2550_v6 }
 0x3ce   : > { %v2622_v34 = vmul.f32 %v5242_v47, %v2551_v46  ;;  %v2623_v19 = vmul.f32 %v5242_v47, %v2552_v17  ;;  %v2624_v55 = vmul.f32 %v5242_v47, %v2553_v7  ;;  %v2625_v15 = vmul.f32 %v5242_v47, %v2554_v23  ;;  %v5350_v7 = vpop.xlane.xlu1 %2419 }
 0x3cf   : > { %v2626_v45 = vmul.f32 %v5242_v47, %v2555_v13  ;;  %v5295_v39 = vadd.f32 %v5280_v40, %v2595_v44  ;;  %v5298_v29 = vadd.f32 %v5280_v40, %v2596_v14  ;;  %v5301_v42 = vadd.f32 %v5280_v40, %v2597_v33 }
 0x3d0   : > { %v5304_v32 = vadd.f32 %v5280_v40, %v2598_v49  ;;  %v5307_v52 = vadd.f32 %v5280_v40, %v2599_v1  ;;  %v5310_v53 = vadd.f32 %v5280_v40, %v2600_v61  ;;  %v5313_v28 = vadd.f32 %v5280_v40, %v2601_v35 }
 0x3d1   : > { %v5316_v58 = vadd.f32 %v5280_v40, %v2602_v60  ;;  %v5319_v2 = vadd.f32 %v5280_v40, %v2603_v37  ;;  %v5322_v51 = vadd.f32 %v5280_v40, %v2604_v16  ;;  %v5325_v30 = vadd.f32 %v5280_v40, %v2605_v56 }
 0x3d2   : > { %v2677_v48 = vadd.f32 %v5280_v40, %v2606_v62  ;;  %v2678_v38 = vadd.f32 %v5280_v40, %v2607_v20  ;;  %v2679_v31 = vadd.f32 %v5280_v40, %v2608_v18  ;;  %v2680_v43 = vadd.f32 %v5280_v40, %v2609_v0 }
 0x3d3   : > { %v2681_v24 = vadd.f32 %v5280_v40, %v2610_v21  ;;  %v5333_v22 = vadd.f32 %v5280_v40, %v2611_v3  ;;  %v5336_v26 = vadd.f32 %v5280_v40, %v2612_v8  ;;  %v5339_v27 = vadd.f32 %v5280_v40, %v2613_v63 }
 0x3d4   : > { %v5342_v12 = vadd.f32 %v5280_v40, %v2614_v50  ;;  %v5345_v4 = vadd.f32 %v5280_v40, %v2615_v25  ;;  %v2687_v6 = vadd.f32 %v5280_v40, %v2616_v9  ;;  %v2688_v46 = vadd.f32 %v5280_v40, %v2617_v41  ;;  %v2422_v41 = vpop.xlane.xlu1 %2421 }
 0x3d5   : > { %v2689_v17 = vadd.f32 %v5280_v40, %v2618_v10  ;;  %v5353_v23 = vadd.f32 %v5280_v40, %v2619_v59  ;;  %v5356_v13 = vadd.f32 %v5280_v40, %v2620_v5  ;;  %v5359_v44 = vadd.f32 %v5280_v40, %v2621_v54 }
 0x3d6   : > { %v2693_v14 = vadd.f32 %v5280_v40, %v2622_v34  ;;  %v2694_v33 = vadd.f32 %v5280_v40, %v2623_v19  ;;  %v2695_v49 = vadd.f32 %v5280_v40, %v2624_v55  ;;  %v2696_v1 = vadd.f32 %v5280_v40, %v2625_v15 }
 0x3d7   : > { %v2697_v61 = vadd.f32 %v5280_v40, %v2626_v45  ;;  %v2730_v35 = vmax.f32 %v5295_v39, 0.0  ;;  %v2731_v60 = vmax.f32 %v5298_v29, 0.0  ;;  %v2732_v37 = vmax.f32 %v5301_v42, 0.0 }
 0x3d8   : > { %v2733_v16 = vmax.f32 %v5304_v32, 0.0  ;;  %v2734_v56 = vmax.f32 %v5307_v52, 0.0  ;;  %v2735_v62 = vmax.f32 %v5310_v53, 0.0  ;;  %v2736_v20 = vmax.f32 %v5313_v28, 0.0 }
 0x3d9   : > { %v2737_v18 = vmax.f32 %v5316_v58, 0.0  ;;  %v2738_v0 = vmax.f32 %v5319_v2, 0.0  ;;  %v2739_v21 = vmax.f32 %v5322_v51, 0.0  ;;  %v2740_v3 = vmax.f32 %v5325_v30, 0.0 }
 0x3da   : > { %v2741_v8 = vmax.f32 %v2677_v48, 0.0  ;;  %v2742_v63 = vmax.f32 %v2678_v38, 0.0  ;;  %v2743_v50 = vmax.f32 %v2679_v31, 0.0  ;;  %v2744_v25 = vmax.f32 %v2680_v43, 0.0 }
 0x3db   : > { %v2745_v9 = vmax.f32 %v2681_v24, 0.0  ;;  %v2746_v10 = vmax.f32 %v5333_v22, 0.0  ;;  %v2747_v59 = vmax.f32 %v5336_v26, 0.0  ;;  %v2748_v5 = vmax.f32 %v5339_v27, 0.0  ;;  %v2424_v24 = vpop.xlane.xlu1 %2423 }
 0x3dc   : > { %v2749_v54 = vmax.f32 %v5342_v12, 0.0  ;;  %v2750_v34 = vmax.f32 %v5345_v4, 0.0  ;;  %v2751_v19 = vmax.f32 %v2687_v6, 0.0  ;;  %v2752_v55 = vmax.f32 %v2688_v46, 0.0 }
 0x3dd   : > { %v2753_v15 = vmax.f32 %v2689_v17, 0.0  ;;  %v2754_v45 = vmax.f32 %v5353_v23, 0.0  ;;  %v2755_v39 = vmax.f32 %v5356_v13, 0.0  ;;  %v2756_v29 = vmax.f32 %v5359_v44, 0.0 }
 0x3de   : > { %v2757_v42 = vmax.f32 %v2693_v14, 0.0  ;;  %v2758_v32 = vmax.f32 %v2694_v33, 0.0  ;;  %v2759_v52 = vmax.f32 %v2695_v49, 0.0  ;;  %v2760_v53 = vmax.f32 %v2696_v1, 0.0 }
 0x3df   : > { %v2761_v28 = vmax.f32 %v2697_v61, 0.0  ;;  %v3518_v58 = vpack.c.bf16 %v2731_v60, %v2730_v35  ;;  %v3523_v2 = vpack.c.bf16 %v2733_v16, %v2732_v37  ;;  %v3528_v51 = vpack.c.bf16 %v2735_v62, %v2734_v56  ;;  %v2426_v44 = vpop.xlane.xlu1 %2425 }
 0x3e0   : > { %v3533_v30 = vpack.c.bf16 %v2737_v18, %v2736_v20  ;;  %v3538_v48 = vpack.c.bf16 %v2739_v21, %v2738_v0  ;;  %v3543_v38 = vpack.c.bf16 %v2741_v8, %v2740_v3  ;;  %v3548_v31 = vpack.c.bf16 %v2743_v50, %v2742_v63  ;;  %v5705_v8 = vld [vmem:[#allocation35_spill] sm:$0xff]  ;;  %v5706_v50 = vld [vmem:[#allocation36_spill] sm:$0xff] }
 0x3e1   : > { %v3553_v43 = vpack.c.bf16 %v2745_v9, %v2744_v25  ;;  %3519 = vst [vmem:[%s5390_s14] sm:$0xff] %v3518_v58   ;;  %3675 = vst [vmem:[%s5390_s14 + $0x8] sm:$0xff] %v3523_v2   ;;  %v3558_v22 = vpack.c.bf16 %v2747_v59, %v2746_v10  ;;  %v3563_v26 = vpack.c.bf16 %v2749_v54, %v2748_v5  ;;  %v5707_v9 = vld [vmem:[#allocation37_spill] sm:$0xff]  ;;  %v5708_v10 = vld [vmem:[#allocation38_spill] sm:$0xff] }
 0x3e2   : > { %3676 = vst [vmem:[%s5390_s14 + $0x10] sm:$0xff] %v3528_v51   ;;  %3677 = vst [vmem:[%s5390_s14 + $0x18] sm:$0xff] %v3533_v30   ;;  %v3568_v27 = vpack.c.bf16 %v2751_v19, %v2750_v34  ;;  %v3573_v12 = vpack.c.bf16 %v2753_v15, %v2752_v55  ;;  %v3578_v4 = vpack.c.bf16 %v2755_v39, %v2754_v45  ;;  %v5709_v5 = vld [vmem:[#allocation39_spill] sm:$0xff]  ;;  %v5710_v34 = vld [vmem:[#allocation40_spill] sm:$0xff] }
 0x3e3   : > { %3678 = vst [vmem:[%s5390_s14 + $0x20] sm:$0xff] %v3538_v48   ;;  %3679 = vst [vmem:[%s5390_s14 + $0x28] sm:$0xff] %v3543_v38   ;;  %v3583_v6 = vpack.c.bf16 %v2757_v42, %v2756_v29  ;;  %v3588_v46 = vpack.c.bf16 %v2759_v52, %v2758_v32  ;;  %v3593_v17 = vpack.c.bf16 %v2761_v28, %v2760_v53  ;;  %v5711_v55 = vld [vmem:[#allocation10_spill] sm:$0xff]  ;;  %v5713_v29 = vld [vmem:[#allocation11_spill] sm:$0xff] }
 0x3e4   : > { %3680 = vst [vmem:[%s5390_s14 + $0x30] sm:$0xff] %v3548_v31   ;;  %3681 = vst [vmem:[%s5390_s14 + $0x38] sm:$0xff] %v3553_v43   ;;  %v2491_v23 = vadd.f32 %v5216_v11, %v5350_v7  ;;  %v5712_v45 = vld [vmem:[#allocation2_spill] sm:$0xff]  ;;  %v5714_v42 = vld [vmem:[#allocation3_spill] sm:$0xff] }
 0x3e5   : > { %3682 = vst [vmem:[%s5390_s14 + $0x40] sm:$0xff] %v3558_v22   ;;  %3683 = vst [vmem:[%s5390_s14 + $0x48] sm:$0xff] %v3563_v26   ;;  %v5715_v32 = vld [vmem:[#allocation12_spill] sm:$0xff]  ;;  %v5717_v58 = vld [vmem:[#allocation13_spill] sm:$0xff] }
 0x3e6   : > { %3684 = vst [vmem:[%s5390_s14 + $0x50] sm:$0xff] %v3568_v27   ;;  %3685 = vst [vmem:[%s5390_s14 + $0x58] sm:$0xff] %v3573_v12   ;;  %v2492_v13 = vadd.f32 %v2491_v23, %v2422_v41  ;;  %v5716_v53 = vld [vmem:[#allocation4_spill] sm:$0xff]  ;;  %v5718_v51 = vld [vmem:[#allocation5_spill] sm:$0xff] }
 0x3e7   : > { %3686 = vst [vmem:[%s5390_s14 + $0x60] sm:$0xff] %v3578_v4   ;;  %3687 = vst [vmem:[%s5390_s14 + $0x68] sm:$0xff] %v3583_v6   ;;  %v5719_v48 = vld [vmem:[#allocation14_spill] sm:$0xff]  ;;  %v5722_v26 = vld [vmem:[#allocation7_spill] sm:$0xff] }
 0x3e8   : > { %3688 = vst [vmem:[%s5390_s14 + $0x70] sm:$0xff] %v3588_v46   ;;  %3689 = vst [vmem:[%s5390_s14 + $0x78] sm:$0xff] %v3593_v17   ;;  %v2493_v14 = vadd.f32 %v2492_v13, %v2424_v24  ;;  %v5720_v31 = vld [vmem:[#allocation6_spill] sm:$0xff]  ;;  %v5721_v24 = vld [vmem:[#allocation15_spill] sm:$0xff] }
 0x3e9   : > { %v5723_v12 = vld [vmem:[#allocation16_spill] sm:$0xff]  ;;  %v5725_v17 = vld [vmem:[#allocation17_spill] sm:$0xff] }
 0x3ea   : > { %v2494_v33 = vadd.f32 %v2493_v14, %v2426_v44  ;;  %v5724_v6 = vld [vmem:[#allocation8_spill] sm:$0xff]  ;;  %v5726_v13 = vld [vmem:[#allocation9_spill] sm:$0xff]  ;;  %v5727_v14 = vld [vmem:[#allocation18_spill] sm:$0xff] }
 0x3ec   : > { %v2495_v49 = vrot.slane %v2494_v33, 4 }
 0x3ee   : > { %v2496_v1 = vadd.f32 %v2495_v49, %v2494_v33  ;;  %v5728_v49 = vld [vmem:[#allocation19_spill] sm:$0xff] }
 0x3f0   : > { %v2497_v61 = vrot.slane %v2496_v1, 2 }
 0x3f2   : > { %v2498_v35 = vadd.f32 %v2497_v61, %v2496_v1  ;;  %v5729_v61 = vld [vmem:[#allocation20_spill] sm:$0xff] }
 0x3f4   : > { %v2499_v60 = vrot.slane %v2498_v35, 1 }
 0x3f6   : > { %v2500_v37 = vadd.f32 %v2499_v60, %v2498_v35  ;;  %v5730_v60 = vld [vmem:[#allocation21_spill] sm:$0xff] }
 0x3f8   : > { %v2503_v16 = vmul.f32 0.0004885198, %v2500_v37 }
 0x3fa   : > { %4071 = vrsqrt.f32 %v2503_v16  ;;  %vm2513_vm3 = vcmp.eq.f32.partialorder %v2503_v16, inf  ;;  %v2516_v11 = vand.u32 2147483648, %v2503_v16  ;;  %vm2515_vm4 = vcmp.eq.f32.partialorder %v2503_v16, 0.0 }
 0x404   : > { %v4072_v56 = vpop.eup %4071 }
 0x405   : > { %v2512_v62 = vmul.f32 %v4072_v56, %v2503_v16 }
 0x407   : > { %v2514_v7 = vsel %vm2513_vm3, %v2503_v16, %v2512_v62  ;;  %v5731_v16 = vld [vmem:[#allocation22_spill] sm:$0xff]  ;;  %v5732_v62 = vld [vmem:[#allocation23_spill] sm:$0xff] }
 0x408   : > { %v2517_v20 = vsel %vm2515_vm4, %v2516_v11, %v2514_v7  ;;  %v5733_v7 = vld [vmem:[#allocation24_spill] sm:$0xff] }
 0x409   : > { %v2519_v18 = vadd.f32 1e-05, %v2517_v20 }
 0x40b   : > { %4073 = vrcp.f32 %v2519_v18  ;;  %v5734_v18 = vld [vmem:[#allocation41_spill] sm:$0xff] }
 0x415   : > { %v4074_v0 = vpop.eup %4073 }
 0x416   : > { %v2556_v21 = vmul.f32 %v4074_v0, %v4843_v36  ;;  %v2557_v3 = vmul.f32 %v4074_v0, %v4833_v57  ;;  %v2558_v63 = vmul.f32 %v4074_v0, %v5705_v8  ;;  %v2559_v25 = vmul.f32 %v4074_v0, %v5706_v50 }
 0x417   : > { %v2560_v41 = vmul.f32 %v4074_v0, %v5707_v9  ;;  %v2561_v59 = vmul.f32 %v4074_v0, %v5708_v10  ;;  %v2562_v54 = vmul.f32 %v4074_v0, %v5709_v5  ;;  %v2563_v19 = vmul.f32 %v4074_v0, %v5710_v34 }
 0x418   : > { %v2564_v15 = vmul.f32 %v4074_v0, %v5711_v55  ;;  %v2565_v39 = vmul.f32 %v4074_v0, %v5712_v45  ;;  %v2566_v36 = vmul.f32 %v4074_v0, %v5713_v29  ;;  %v2567_v57 = vmul.f32 %v4074_v0, %v5714_v42 }
 0x419   : > { %v2568_v52 = vmul.f32 %v4074_v0, %v5715_v32  ;;  %v2569_v28 = vmul.f32 %v4074_v0, %v5716_v53  ;;  %v2570_v2 = vmul.f32 %v4074_v0, %v5717_v58  ;;  %v2571_v30 = vmul.f32 %v4074_v0, %v5718_v51 }
 0x41a   : > { %v2572_v38 = vmul.f32 %v4074_v0, %v5719_v48  ;;  %v2573_v43 = vmul.f32 %v4074_v0, %v5720_v31  ;;  %v2574_v22 = vmul.f32 %v4074_v0, %v5721_v24  ;;  %v2575_v27 = vmul.f32 %v4074_v0, %v5722_v26 }
 0x41b   : > { %v2576_v4 = vmul.f32 %v4074_v0, %v5723_v12  ;;  %v2577_v46 = vmul.f32 %v4074_v0, %v5724_v6  ;;  %v2578_v23 = vmul.f32 %v4074_v0, %v5725_v17  ;;  %v2579_v44 = vmul.f32 %v4074_v0, %v5726_v13 }
 0x41c   : > { %v2580_v33 = vmul.f32 %v4074_v0, %v5727_v14  ;;  %v2581_v1 = vmul.f32 %v4074_v0, %v5728_v49  ;;  %v2582_v35 = vmul.f32 %v4074_v0, %v5729_v61  ;;  %v2583_v37 = vmul.f32 %v4074_v0, %v5730_v60 }
 0x41d   : > { %v2584_v56 = vmul.f32 %v4074_v0, %v5731_v16  ;;  %v2585_v11 = vmul.f32 %v4074_v0, %v5732_v62  ;;  %v2586_v20 = vmul.f32 %v4074_v0, %v5733_v7  ;;  %v2587_v8 = vmul.f32 %v4074_v0, %v5734_v18 }
 0x41e   : > { %v2627_v50 = vmul.f32 %v5242_v47, %v2556_v21  ;;  %v2628_v9 = vmul.f32 %v5242_v47, %v2557_v3  ;;  %v2629_v10 = vmul.f32 %v5242_v47, %v2558_v63  ;;  %v2630_v5 = vmul.f32 %v5242_v47, %v2559_v25 }
 0x41f   : > { %v2631_v34 = vmul.f32 %v5242_v47, %v2560_v41  ;;  %v2632_v55 = vmul.f32 %v5242_v47, %v2561_v59  ;;  %v2633_v45 = vmul.f32 %v5242_v47, %v2562_v54  ;;  %v2634_v29 = vmul.f32 %v5242_v47, %v2563_v19 }
 0x420   : > { %v2635_v42 = vmul.f32 %v5242_v47, %v2564_v15  ;;  %v2636_v0 = vmul.f32 %v5242_v47, %v2565_v39  ;;  %v2637_v21 = vmul.f32 %v5242_v47, %v2566_v36  ;;  %v2638_v3 = vmul.f32 %v5242_v47, %v2567_v57 }
 0x421   : > { %v2639_v63 = vmul.f32 %v5242_v47, %v2568_v52  ;;  %v2640_v25 = vmul.f32 %v5242_v47, %v2569_v28  ;;  %v2641_v41 = vmul.f32 %v5242_v47, %v2570_v2  ;;  %v2642_v59 = vmul.f32 %v5242_v47, %v2571_v30 }
 0x422   : > { %v2643_v54 = vmul.f32 %v5242_v47, %v2572_v38  ;;  %v2644_v19 = vmul.f32 %v5242_v47, %v2573_v43  ;;  %v2645_v15 = vmul.f32 %v5242_v47, %v2574_v22  ;;  %v2646_v39 = vmul.f32 %v5242_v47, %v2575_v27 }
 0x423   : > { %v2647_v36 = vmul.f32 %v5242_v47, %v2576_v4  ;;  %v2648_v57 = vmul.f32 %v5242_v47, %v2577_v46  ;;  %v2649_v32 = vmul.f32 %v5242_v47, %v2578_v23  ;;  %v2650_v52 = vmul.f32 %v5242_v47, %v2579_v44 }
 0x424   : > { %v2651_v53 = vmul.f32 %v5242_v47, %v2580_v33  ;;  %v2652_v28 = vmul.f32 %v5242_v47, %v2581_v1  ;;  %v2653_v58 = vmul.f32 %v5242_v47, %v2582_v35  ;;  %v2654_v2 = vmul.f32 %v5242_v47, %v2583_v37 }
 0x425   : > { %v2655_v51 = vmul.f32 %v5242_v47, %v2584_v56  ;;  %v2656_v30 = vmul.f32 %v5242_v47, %v2585_v11  ;;  %v2657_v48 = vmul.f32 %v5242_v47, %v2586_v20  ;;  %v2658_v38 = vmul.f32 %v5242_v47, %v2587_v8 }
 0x426   : > { %v5475_v31 = vadd.f32 %v5280_v40, %v2627_v50  ;;  %v5478_v43 = vadd.f32 %v5280_v40, %v2628_v9  ;;  %v5481_v24 = vadd.f32 %v5280_v40, %v2629_v10  ;;  %v5484_v22 = vadd.f32 %v5280_v40, %v2630_v5 }
 0x427   : > { %v5487_v26 = vadd.f32 %v5280_v40, %v2631_v34  ;;  %v2703_v27 = vadd.f32 %v5280_v40, %v2632_v55  ;;  %v2704_v12 = vadd.f32 %v5280_v40, %v2633_v45  ;;  %v2705_v47 = vadd.f32 %v5280_v40, %v2634_v29 }
 0x428   : > { %v2706_v4 = vadd.f32 %v5280_v40, %v2635_v42  ;;  %v2707_v6 = vadd.f32 %v5280_v40, %v2636_v0  ;;  %v2708_v46 = vadd.f32 %v5280_v40, %v2637_v21  ;;  %v2709_v17 = vadd.f32 %v5280_v40, %v2638_v3 }
 0x429   : > { %v2710_v23 = vadd.f32 %v5280_v40, %v2639_v63  ;;  %v2711_v13 = vadd.f32 %v5280_v40, %v2640_v25  ;;  %v2712_v44 = vadd.f32 %v5280_v40, %v2641_v41  ;;  %v2713_v14 = vadd.f32 %v5280_v40, %v2642_v59 }
 0x42a   : > { %v2714_v33 = vadd.f32 %v5280_v40, %v2643_v54  ;;  %v2715_v49 = vadd.f32 %v5280_v40, %v2644_v19  ;;  %v2716_v1 = vadd.f32 %v5280_v40, %v2645_v15  ;;  %v2717_v61 = vadd.f32 %v5280_v40, %v2646_v39 }
 0x42b   : > { %v2718_v35 = vadd.f32 %v5280_v40, %v2647_v36  ;;  %v2719_v60 = vadd.f32 %v5280_v40, %v2648_v57  ;;  %v2720_v37 = vadd.f32 %v5280_v40, %v2649_v32  ;;  %v2721_v16 = vadd.f32 %v5280_v40, %v2650_v52 }
 0x42c   : > { %v2722_v56 = vadd.f32 %v5280_v40, %v2651_v53  ;;  %v2723_v62 = vadd.f32 %v5280_v40, %v2652_v28  ;;  %v2724_v11 = vadd.f32 %v5280_v40, %v2653_v58  ;;  %v2725_v7 = vadd.f32 %v5280_v40, %v2654_v2 }
 0x42d   : > { %v2726_v20 = vadd.f32 %v5280_v40, %v2655_v51  ;;  %v2727_v18 = vadd.f32 %v5280_v40, %v2656_v30  ;;  %v2728_v8 = vadd.f32 %v5280_v40, %v2657_v48  ;;  %v2729_v50 = vadd.f32 %v5280_v40, %v2658_v38 }
 0x42e   : > { %v2762_v9 = vmax.f32 %v5475_v31, 0.0  ;;  %v2763_v10 = vmax.f32 %v5478_v43, 0.0  ;;  %v2764_v5 = vmax.f32 %v5481_v24, 0.0  ;;  %v2765_v34 = vmax.f32 %v5484_v22, 0.0 }
 0x42f   : > { %v2766_v55 = vmax.f32 %v5487_v26, 0.0  ;;  %v2767_v45 = vmax.f32 %v2703_v27, 0.0  ;;  %v2768_v29 = vmax.f32 %v2704_v12, 0.0  ;;  %v2769_v42 = vmax.f32 %v2705_v47, 0.0 }
 0x430   : > { %v2770_v0 = vmax.f32 %v2706_v4, 0.0  ;;  %v2771_v21 = vmax.f32 %v2707_v6, 0.0  ;;  %v2772_v3 = vmax.f32 %v2708_v46, 0.0  ;;  %v2773_v63 = vmax.f32 %v2709_v17, 0.0 }
 0x431   : > { %v2774_v25 = vmax.f32 %v2710_v23, 0.0  ;;  %v2775_v41 = vmax.f32 %v2711_v13, 0.0  ;;  %v2776_v40 = vmax.f32 %v2712_v44, 0.0  ;;  %v2777_v59 = vmax.f32 %v2713_v14, 0.0 }
 0x432   : > { %v2778_v54 = vmax.f32 %v2714_v33, 0.0  ;;  %v2779_v19 = vmax.f32 %v2715_v49, 0.0  ;;  %v2780_v15 = vmax.f32 %v2716_v1, 0.0  ;;  %v2781_v39 = vmax.f32 %v2717_v61, 0.0 }
 0x433   : > { %v2782_v36 = vmax.f32 %v2718_v35, 0.0  ;;  %v2783_v57 = vmax.f32 %v2719_v60, 0.0  ;;  %v2784_v32 = vmax.f32 %v2720_v37, 0.0  ;;  %v2785_v52 = vmax.f32 %v2721_v16, 0.0 }
 0x434   : > { %v2786_v53 = vmax.f32 %v2722_v56, 0.0  ;;  %v2787_v28 = vmax.f32 %v2723_v62, 0.0  ;;  %v2788_v58 = vmax.f32 %v2724_v11, 0.0  ;;  %v2789_v2 = vmax.f32 %v2725_v7, 0.0 }
 0x435   : > { %v2790_v51 = vmax.f32 %v2726_v20, 0.0  ;;  %v2791_v30 = vmax.f32 %v2727_v18, 0.0  ;;  %v2792_v48 = vmax.f32 %v2728_v8, 0.0  ;;  %v2793_v38 = vmax.f32 %v2729_v50, 0.0 }
 0x436   : > { %v3598_v31 = vpack.c.bf16 %v2763_v10, %v2762_v9  ;;  %v3603_v43 = vpack.c.bf16 %v2765_v34, %v2764_v5  ;;  %v3608_v24 = vpack.c.bf16 %v2767_v45, %v2766_v55  ;;  %v3613_v22 = vpack.c.bf16 %v2769_v42, %v2768_v29 }
 0x437   : > { %v3618_v26 = vpack.c.bf16 %v2771_v21, %v2770_v0  ;;  %v3623_v27 = vpack.c.bf16 %v2773_v63, %v2772_v3  ;;  %v3628_v12 = vpack.c.bf16 %v2775_v41, %v2774_v25  ;;  %v3633_v47 = vpack.c.bf16 %v2777_v59, %v2776_v40 }
 0x438   : > { %3690 = vst [vmem:[%s5390_s14 + $0x80] sm:$0xff] %v3598_v31   ;;  %3691 = vst [vmem:[%s5390_s14 + $0x88] sm:$0xff] %v3603_v43   ;;  %v3638_v4 = vpack.c.bf16 %v2779_v19, %v2778_v54  ;;  %v3643_v6 = vpack.c.bf16 %v2781_v39, %v2780_v15  ;;  %v3648_v46 = vpack.c.bf16 %v2783_v57, %v2782_v36 }
 0x439   : > { %3692 = vst [vmem:[%s5390_s14 + $0x90] sm:$0xff] %v3608_v24   ;;  %3693 = vst [vmem:[%s5390_s14 + $0x98] sm:$0xff] %v3613_v22   ;;  %v3653_v17 = vpack.c.bf16 %v2785_v52, %v2784_v32  ;;  %v3658_v23 = vpack.c.bf16 %v2787_v28, %v2786_v53  ;;  %v3663_v13 = vpack.c.bf16 %v2789_v2, %v2788_v58 }
 0x43a   : > { %3694 = vst [vmem:[%s5390_s14 + $0xa0] sm:$0xff] %v3618_v26   ;;  %3695 = vst [vmem:[%s5390_s14 + $0xa8] sm:$0xff] %v3623_v27   ;;  %v3668_v44 = vpack.c.bf16 %v2791_v30, %v2790_v51  ;;  %v3673_v14 = vpack.c.bf16 %v2793_v38, %v2792_v48 }
 0x43b   : > { %3696 = vst [vmem:[%s5390_s14 + $0xb0] sm:$0xff] %v3628_v12   ;;  %3697 = vst [vmem:[%s5390_s14 + $0xb8] sm:$0xff] %v3633_v47  }
 0x43c   : > { %3698 = vst [vmem:[%s5390_s14 + $0xc0] sm:$0xff] %v3638_v4   ;;  %3699 = vst [vmem:[%s5390_s14 + $0xc8] sm:$0xff] %v3643_v6  }
 0x43d   : > { %3700 = vst [vmem:[%s5390_s14 + $0xd0] sm:$0xff] %v3648_v46   ;;  %3701 = vst [vmem:[%s5390_s14 + $0xd8] sm:$0xff] %v3653_v17  }
 0x43e   : > { %3702 = vst [vmem:[%s5390_s14 + $0xe0] sm:$0xff] %v3658_v23   ;;  %3703 = vst [vmem:[%s5390_s14 + $0xe8] sm:$0xff] %v3663_v13  }
 0x43f   : > { %3704 = vst [vmem:[%s5390_s14 + $0xf0] sm:$0xff] %v3668_v44   ;;  %3705 = vst [vmem:[%s5390_s14 + $0xf8] sm:$0xff] %v3673_v14  }
 0x440 PF: > { %s15_s18 = sadd.s32 1, %s4082_s18  }
 0x441   : > { %p12_p4 = scmp.ge.s32.totalorder %s15_s18, 4  }
 0x443   :  { %14 = sbr.rel (!%p12_p4) target bundleno = 1 (0x1), region = 82 }

// kernel: munit_forward.27
= control target key start
LH: loop header
LB: loop body
LE: loop exit
PB: predicated region body
PF: predicated region fallthrough
CT: control target
= control target key end

     0   :  { %s3290_s12 = smov 0   ;;  %s3624_s0 = inlined_call_operand.vmem [shape: bf16[2,512,512], index: 0, kind: input, shape index: {}]   ;;  %s3625_s1 = inlined_call_operand.vmem [shape: bf16[2,512,128], index: 1, kind: input, shape index: {}]   ;;  %s3626_s2 = inlined_call_operand.vmem [shape: f32[2,1,128], index: 2, kind: input, shape index: {}]   ;;  %s3627_s3 = inlined_call_operand.vmem [shape: bf16[2,512,128], index: 3, kind: output, shape index: {}]  }
   0x1 LB: > { %s2275_s13 = sadd.s32 4294967295, %s3267_s12   ;;  %p2279_p0 = scmp.ge.s32.totalorder %s3267_s12, 1  ;;  %s3267_s12 = sphi %s3290_s12, %s13_s12  }
   0x2   : > { %p155_p1 = scmp.lt.s32.totalorder %s3267_s12, 3 }
   0x4   : > { %p156_p2 = pnand %p2279_p0, %p155_p1 }
   0x5   : > { %p187_p3 = scmp.lt.s32.totalorder (!%p156_p2), %s2275_s13, 1  ;;  %v3269_v0 = vmov (!%p156_p2), 0  }
   0x6   : > { %159 = sbr.rel (%p156_p2) target bundleno = 561 (0x231), region = 32  ;;  %1237 = vmatprep.subr.bf16.mxu1 (!%p156_p2), %v3269_v0  ;;  %1526 = vmatprep.subr.bf16.mxu0 (!%p156_p2), %v3269_v0 }
   0xd   : > { %s3629_s13 = smov (!%p187_p3, %s2275_s13), 1 }
   0xe   : > { %s2514_s14 = sshll.u32 %s3629_s13, 8  ;;  %s2513_s18 = sshll.u32 %s3629_s13, 10 }
   0xf   : > { %s3308_s17 = scalar_lea.vmem %s3625_s1, %s2514_s14  ;;  %s3345_s21 = scalar_lea.vmem %s3624_s0, %s2513_s18 }
  0x10   : > { %v2908_v1 = vld [vmem:[%s3308_s17] sm:$0xff]   ;;  %v2910_v3 = vld [vmem:[%s3308_s17 + $0x8] sm:$0xff]   ;;  %v2912_v5 = vld [vmem:[%s3308_s17 + $0x10] sm:$0xff]   ;;  %s3491_s24 = scalar_lea.vmem %s3626_s2, %s3629_s13  ;;  %s3514_s27 = scalar_lea.vmem %s3627_s3, %s2514_s14 }
  0x11   : > { %v2909_v2 = vld [vmem:[%s3308_s17 + $0x80] sm:$0xff]   ;;  %1238 = vmatpush1.bf16.msra.mxu1 %v2908_v1  ;;  %v2911_v4 = vld [vmem:[%s3308_s17 + $0x88] sm:$0xff]   ;;  %v2913_v6 = vld [vmem:[%s3308_s17 + $0x90] sm:$0xff]  }
  0x12   : > { %1527 = vmatpush1.bf16.msra.mxu0 %v2909_v2  ;;  %1239 = vmatprep.subr.bf16.mxu1 %v3269_v0  ;;  %v2914_v7 = vld [vmem:[%s3308_s17 + $0x18] sm:$0xff]   ;;  %v2916_v9 = vld [vmem:[%s3308_s17 + $0x20] sm:$0xff]   ;;  %v2918_v11 = vld [vmem:[%s3308_s17 + $0x28] sm:$0xff]  }
  0x13   : > { %1528 = vmatprep.subr.bf16.mxu0 %v3269_v0  ;;  %v2915_v8 = vld [vmem:[%s3308_s17 + $0x98] sm:$0xff]   ;;  %v2917_v10 = vld [vmem:[%s3308_s17 + $0xa0] sm:$0xff]   ;;  %v2919_v12 = vld [vmem:[%s3308_s17 + $0xa8] sm:$0xff]  }
  0x14   : > { %v2920_v13 = vld [vmem:[%s3308_s17 + $0x30] sm:$0xff]   ;;  %v2922_v15 = vld [vmem:[%s3308_s17 + $0x38] sm:$0xff]   ;;  %v2924_v17 = vld [vmem:[%s3308_s17 + $0x40] sm:$0xff]  }
  0x15   : > { %1240 = vmatpush1.bf16.msra.mxu1 %v2910_v3  ;;  %v2921_v14 = vld [vmem:[%s3308_s17 + $0xb0] sm:$0xff]   ;;  %v2923_v16 = vld [vmem:[%s3308_s17 + $0xb8] sm:$0xff]   ;;  %v2925_v18 = vld [vmem:[%s3308_s17 + $0xc0] sm:$0xff]  }
  0x16   : > { %1529 = vmatpush1.bf16.msra.mxu0 %v2911_v4  ;;  %1241 = vmatprep.subr.bf16.mxu1 %v3269_v0  ;;  %v2942_v19 = vld [vmem:[%s3345_s21 + $0x4] ss:$16 sps:$4 sm:$0xff]   ;;  %v2926_v20 = vld [vmem:[%s3308_s17 + $0x48] sm:$0xff]   ;;  %v2930_v25 = vld [vmem:[%s3308_s17 + $0x58] sm:$0xff]  }
  0x17   : > { %1530 = vmatprep.subr.bf16.mxu0 %v3269_v0  ;;  %v2945_v21 = vld [vmem:[%s3345_s21 + $0xc] ss:$16 sps:$4 sm:$0xff]   ;;  %1269 = vmatprep.mubr.bf16.mxu1 %v2942_v19  ;;  %v2928_v23 = vld [vmem:[%s3308_s17 + $0x50] sm:$0xff]   ;;  %v2932_v27 = vld [vmem:[%s3308_s17 + $0x60] sm:$0xff]  }
  0x18   : > { %v2927_v22 = vld [vmem:[%s3308_s17 + $0xc8] sm:$0xff]   ;;  %1558 = vmatprep.mubr.bf16.mxu0 %v2945_v21  ;;  %v2929_v24 = vld [vmem:[%s3308_s17 + $0xd0] sm:$0xff]   ;;  %v2931_v26 = vld [vmem:[%s3308_s17 + $0xd8] sm:$0xff]  }
  0x19   : > { %1242 = vmatpush1.bf16.msra.mxu1 %v2912_v5  ;;  %v2933_v28 = vld [vmem:[%s3308_s17 + $0xe0] sm:$0xff]   ;;  %v2934_v29 = vld [vmem:[%s3308_s17 + $0x68] sm:$0xff]   ;;  %v2936_v31 = vld [vmem:[%s3308_s17 + $0x70] sm:$0xff]  }
  0x1a   : > { %1531 = vmatpush1.bf16.msra.mxu0 %v2913_v6  ;;  %1243 = vmatprep.subr.bf16.mxu1 %v3269_v0  ;;  %v2935_v30 = vld [vmem:[%s3308_s17 + $0xe8] sm:$0xff]   ;;  %v2937_v32 = vld [vmem:[%s3308_s17 + $0xf0] sm:$0xff]   ;;  %v2938_v33 = vld [vmem:[%s3308_s17 + $0x78] sm:$0xff]  }
  0x1b   : > { %1532 = vmatprep.subr.bf16.mxu0 %v3269_v0  ;;  %v2939_v34 = vld [vmem:[%s3308_s17 + $0xf8] sm:$0xff]   ;;  %v2940_v35 = vld [vmem:[%s3345_s21] ss:$16 sps:$4 sm:$0xff]   ;;  %v2946_v37 = vld [vmem:[%s3345_s21 + $0x24] ss:$16 sps:$4 sm:$0xff]  }
  0x1c   : > { %v2943_v36 = vld [vmem:[%s3345_s21 + $0x8] ss:$16 sps:$4 sm:$0xff]   ;;  %v2948_v38 = vld [vmem:[%s3345_s21 + $0x2c] ss:$16 sps:$4 sm:$0xff]   ;;  %v2950_v39 = vld [vmem:[%s3345_s21 + $0x20] ss:$16 sps:$4 sm:$0xff]  }
  0x1d   : > { %1244 = vmatpush1.bf16.msra.mxu1 %v2914_v7  ;;  %v2951_v40 = vld [vmem:[%s3345_s21 + $0x28] ss:$16 sps:$4 sm:$0xff]   ;;  %v2952_v41 = vld [vmem:[%s3345_s21 + $0x44] ss:$16 sps:$4 sm:$0xff]   ;;  %v2954_v42 = vld [vmem:[%s3345_s21 + $0x4c] ss:$16 sps:$4 sm:$0xff]  }
  0x1e   : > { %1533 = vmatpush1.bf16.msra.mxu0 %v2915_v8  ;;  %1245 = vmatprep.subr.bf16.mxu1 %v3269_v0  ;;  %v2956_v43 = vld [vmem:[%s3345_s21 + $0x40] ss:$16 sps:$4 sm:$0xff]   ;;  %v2957_v44 = vld [vmem:[%s3345_s21 + $0x48] ss:$16 sps:$4 sm:$0xff]   ;;  %v2958_v45 = vld [vmem:[%s3345_s21 + $0x64] ss:$16 sps:$4 sm:$0xff]  }
  0x1f   : > { %1534 = vmatprep.subr.bf16.mxu0 %v3269_v0  ;;  %v2960_v46 = vld [vmem:[%s3345_s21 + $0x6c] ss:$16 sps:$4 sm:$0xff]   ;;  %v2962_v47 = vld [vmem:[%s3345_s21 + $0x60] ss:$16 sps:$4 sm:$0xff]   ;;  %v2963_v48 = vld [vmem:[%s3345_s21 + $0x68] ss:$16 sps:$4 sm:$0xff]  }
  0x20   : > { %v2964_v49 = vld [vmem:[%s3345_s21 + $0x84] ss:$16 sps:$4 sm:$0xff]   ;;  %v2966_v50 = vld [vmem:[%s3345_s21 + $0x8c] ss:$16 sps:$4 sm:$0xff]   ;;  %v2968_v51 = vld [vmem:[%s3345_s21 + $0x80] ss:$16 sps:$4 sm:$0xff]  }
  0x21   : > { %1246 = vmatpush1.bf16.msra.mxu1 %v2916_v9  ;;  %v2969_v52 = vld [vmem:[%s3345_s21 + $0x88] ss:$16 sps:$4 sm:$0xff]   ;;  %v2970_v53 = vld [vmem:[%s3345_s21 + $0xa4] ss:$16 sps:$4 sm:$0xff]   ;;  %v2972_v54 = vld [vmem:[%s3345_s21 + $0xac] ss:$16 sps:$4 sm:$0xff]  }
  0x22   : > { %1535 = vmatpush1.bf16.msra.mxu0 %v2917_v10  ;;  %1247 = vmatprep.subr.bf16.mxu1 %v3269_v0  ;;  %v2974_v55 = vld [vmem:[%s3345_s21 + $0xa0] ss:$16 sps:$4 sm:$0xff]   ;;  %v2975_v56 = vld [vmem:[%s3345_s21 + $0xa8] ss:$16 sps:$4 sm:$0xff]   ;;  %v2976_v57 = vld [vmem:[%s3345_s21 + $0xc4] ss:$16 sps:$4 sm:$0xff]  }
  0x23   : > { %1536 = vmatprep.subr.bf16.mxu0 %v3269_v0  ;;  %v2978_v58 = vld [vmem:[%s3345_s21 + $0xcc] ss:$16 sps:$4 sm:$0xff]   ;;  %v2980_v59 = vld [vmem:[%s3345_s21 + $0xc0] ss:$16 sps:$4 sm:$0xff]   ;;  %v2981_v60 = vld [vmem:[%s3345_s21 + $0xc8] ss:$16 sps:$4 sm:$0xff]  }
  0x24   : > { %v2982_v61 = vld [vmem:[%s3345_s21 + $0xe4] ss:$16 sps:$4 sm:$0xff]   ;;  %v2984_v62 = vld [vmem:[%s3345_s21 + $0xec] ss:$16 sps:$4 sm:$0xff]   ;;  %v2986_v63 = vld [vmem:[%s3345_s21 + $0xe0] ss:$16 sps:$4 sm:$0xff]  }
  0x25   : > { %1248 = vmatpush1.bf16.msra.mxu1 %v2918_v11  ;;  %v2988_v1 = vld [vmem:[%s3345_s21 + $0x104] ss:$16 sps:$4 sm:$0xff]   ;;  %v2990_v2 = vld [vmem:[%s3345_s21 + $0x10c] ss:$16 sps:$4 sm:$0xff]   ;;  %v2992_v3 = vld [vmem:[%s3345_s21 + $0x100] ss:$16 sps:$4 sm:$0xff]  }
  0x26   : > { %1537 = vmatpush1.bf16.msra.mxu0 %v2919_v12  ;;  %1249 = vmatprep.subr.bf16.mxu1 %v3269_v0  ;;  %v2993_v4 = vld [vmem:[%s3345_s21 + $0x108] ss:$16 sps:$4 sm:$0xff]   ;;  %v2994_v5 = vld [vmem:[%s3345_s21 + $0x124] ss:$16 sps:$4 sm:$0xff]   ;;  %v2996_v6 = vld [vmem:[%s3345_s21 + $0x12c] ss:$16 sps:$4 sm:$0xff]  }
  0x27   : > { %1538 = vmatprep.subr.bf16.mxu0 %v3269_v0  ;;  %v2998_v7 = vld [vmem:[%s3345_s21 + $0x120] ss:$16 sps:$4 sm:$0xff]   ;;  %v2999_v8 = vld [vmem:[%s3345_s21 + $0x128] ss:$16 sps:$4 sm:$0xff]   ;;  %v3000_v9 = vld [vmem:[%s3345_s21 + $0x144] ss:$16 sps:$4 sm:$0xff]  }
  0x28   : > { %v3002_v10 = vld [vmem:[%s3345_s21 + $0x14c] ss:$16 sps:$4 sm:$0xff]   ;;  %v3004_v11 = vld [vmem:[%s3345_s21 + $0x140] ss:$16 sps:$4 sm:$0xff]   ;;  %v3005_v12 = vld [vmem:[%s3345_s21 + $0x148] ss:$16 sps:$4 sm:$0xff]  }
  0x29   : > { %1250 = vmatpush1.bf16.msra.mxu1 %v2920_v13  ;;  %v3006_v13 = vld [vmem:[%s3345_s21 + $0x164] ss:$16 sps:$4 sm:$0xff]   ;;  %v3016_v19 = vld [vmem:[%s3345_s21 + $0x180] ss:$16 sps:$4 sm:$0xff]  }
  0x2a   : > { %1539 = vmatpush1.bf16.msra.mxu0 %v2921_v14  ;;  %1251 = vmatprep.subr.bf16.mxu1 %v3269_v0  ;;  %v3008_v14 = vld [vmem:[%s3345_s21 + $0x16c] ss:$16 sps:$4 sm:$0xff]   ;;  %v3018_v21 = vld [vmem:[%s3345_s21 + $0x1a4] ss:$16 sps:$4 sm:$0xff]  }
  0x2b   : > { %1540 = vmatprep.subr.bf16.mxu0 %v3269_v0 }
  0x2d   : > { %1252 = vmatpush1.bf16.msra.mxu1 %v2922_v15  ;;  %v3010_v15 = vld [vmem:[%s3345_s21 + $0x160] ss:$16 sps:$4 sm:$0xff]  }
  0x2e   : > { %1541 = vmatpush1.bf16.msra.mxu0 %v2923_v16  ;;  %1253 = vmatprep.subr.bf16.mxu1 %v3269_v0  ;;  %v3011_v16 = vld [vmem:[%s3345_s21 + $0x168] ss:$16 sps:$4 sm:$0xff]  }
  0x2f   : > { %1542 = vmatprep.subr.bf16.mxu0 %v3269_v0 }
  0x31   : > { %1254 = vmatpush1.bf16.msra.mxu1 %v2924_v17  ;;  %v3012_v17 = vld [vmem:[%s3345_s21 + $0x184] ss:$16 sps:$4 sm:$0xff]  }
  0x32   : > { %1543 = vmatpush1.bf16.msra.mxu0 %v2925_v18  ;;  %1255 = vmatprep.subr.bf16.mxu1 %v3269_v0  ;;  %v3014_v18 = vld [vmem:[%s3345_s21 + $0x18c] ss:$16 sps:$4 sm:$0xff]  }
  0x33   : > { %1544 = vmatprep.subr.bf16.mxu0 %v3269_v0 }
  0x35   : > { %1256 = vmatpush1.bf16.msra.mxu1 %v2926_v20  ;;  %v3017_v20 = vld [vmem:[%s3345_s21 + $0x188] ss:$16 sps:$4 sm:$0xff]  }
  0x36   : > { %1545 = vmatpush1.bf16.msra.mxu0 %v2927_v22  ;;  %1257 = vmatprep.subr.bf16.mxu1 %v3269_v0  ;;  %v3020_v22 = vld [vmem:[%s3345_s21 + $0x1ac] ss:$16 sps:$4 sm:$0xff]  }
  0x37   : > { %1546 = vmatprep.subr.bf16.mxu0 %v3269_v0 }
  0x39   : > { %1258 = vmatpush1.bf16.msra.mxu1 %v2928_v23  ;;  %v3022_v23 = vld [vmem:[%s3345_s21 + $0x1a0] ss:$16 sps:$4 sm:$0xff]  }
  0x3a   : > { %1547 = vmatpush1.bf16.msra.mxu0 %v2929_v24  ;;  %1259 = vmatprep.subr.bf16.mxu1 %v3269_v0  ;;  %v3023_v24 = vld [vmem:[%s3345_s21 + $0x1a8] ss:$16 sps:$4 sm:$0xff]  }
  0x3b   : > { %1548 = vmatprep.subr.bf16.mxu0 %v3269_v0 }
  0x3d   : > { %1260 = vmatpush1.bf16.msra.mxu1 %v2930_v25  ;;  %v3024_v25 = vld [vmem:[%s3345_s21 + $0x1c4] ss:$16 sps:$4 sm:$0xff]  }
  0x3e   : > { %1549 = vmatpush1.bf16.msra.mxu0 %v2931_v26  ;;  %1261 = vmatprep.subr.bf16.mxu1 %v3269_v0  ;;  %v3026_v26 = vld [vmem:[%s3345_s21 + $0x1cc] ss:$16 sps:$4 sm:$0xff]  }
  0x3f   : > { %1550 = vmatprep.subr.bf16.mxu0 %v3269_v0 }
  0x41   : > { %1262 = vmatpush1.bf16.msra.mxu1 %v2932_v27  ;;  %v3028_v27 = vld [vmem:[%s3345_s21 + $0x1c0] ss:$16 sps:$4 sm:$0xff]  }
  0x42   : > { %1551 = vmatpush1.bf16.msra.mxu0 %v2933_v28  ;;  %1263 = vmatprep.subr.bf16.mxu1 %v3269_v0  ;;  %v3029_v28 = vld [vmem:[%s3345_s21 + $0x1c8] ss:$16 sps:$4 sm:$0xff]  }
  0x43   : > { %1552 = vmatprep.subr.bf16.mxu0 %v3269_v0 }
  0x45   : > { %1264 = vmatpush1.bf16.msra.mxu1 %v2934_v29  ;;  %v3030_v29 = vld [vmem:[%s3345_s21 + $0x1e4] ss:$16 sps:$4 sm:$0xff]  }
  0x46   : > { %1553 = vmatpush1.bf16.msra.mxu0 %v2935_v30  ;;  %1265 = vmatprep.subr.bf16.mxu1 %v3269_v0  ;;  %v3032_v30 = vld [vmem:[%s3345_s21 + $0x1ec] ss:$16 sps:$4 sm:$0xff]  }
  0x47   : > { %1554 = vmatprep.subr.bf16.mxu0 %v3269_v0 }
  0x49   : > { %1266 = vmatpush1.bf16.msra.mxu1 %v2936_v31  ;;  %v3034_v31 = vld [vmem:[%s3345_s21 + $0x1e0] ss:$16 sps:$4 sm:$0xff]  }
  0x4a   : > { %1555 = vmatpush1.bf16.msra.mxu0 %v2937_v32  ;;  %1267 = vmatprep.subr.bf16.mxu1 %v3269_v0  ;;  %v3035_v32 = vld [vmem:[%s3345_s21 + $0x1e8] ss:$16 sps:$4 sm:$0xff]  }
  0x4b   : > { %1556 = vmatprep.subr.bf16.mxu0 %v3269_v0  ;;  %v2987_v0 = vld [vmem:[%s3345_s21 + $0xe8] ss:$16 sps:$4 sm:$0xff]  }
  0x4d   : > { %1268 = vmatpush1.bf16.msra.mxu1 %v2938_v33  ;;  %v3036_v33 = vld [vmem:[%s3345_s21 + $0x204] ss:$16 sps:$4 sm:$0xff]  }
  0x4e   : > { %1557 = vmatpush1.bf16.msra.mxu0 %v2939_v34  ;;  %v3038_v34 = vld [vmem:[%s3345_s21 + $0x20c] ss:$16 sps:$4 sm:$0xff]  }
  0x50   : > { %1270 = vmatmul.mubr.bf16.vlgmr.msra.gmra.mrb[0].mxu1 %v2940_v35  ;;  %v3040_v35 = vld [vmem:[%s3345_s21 + $0x200] ss:$16 sps:$4 sm:$0xff]  }
  0x51   : > { %1559 = vmatmul.mubr.bf16.vlgmr.msra.gmra.mrb[0].mxu0 %v2943_v36  ;;  %1277 = vmatprep.mubr.bf16.mxu1 %v2946_v37  ;;  %v3041_v36 = vld [vmem:[%s3345_s21 + $0x208] ss:$16 sps:$4 sm:$0xff]   ;;  %v3042_v37 = vld [vmem:[%s3345_s21 + $0x224] ss:$16 sps:$4 sm:$0xff]  }
  0x52   : > { %1566 = vmatprep.mubr.bf16.mxu0 %v2948_v38  ;;  %v3044_v38 = vld [vmem:[%s3345_s21 + $0x22c] ss:$16 sps:$4 sm:$0xff]  }
  0x58   : > { %1278 = vmatmul.mubr.bf16.gmra.mrb[4].mxu1 %v2950_v39  ;;  %v3046_v39 = vld [vmem:[%s3345_s21 + $0x220] ss:$16 sps:$4 sm:$0xff]  }
  0x59   : > { %1567 = vmatmul.mubr.bf16.gmra.mrb[4].mxu0 %v2951_v40  ;;  %1285 = vmatprep.mubr.bf16.mxu1 %v2952_v41  ;;  %v3047_v40 = vld [vmem:[%s3345_s21 + $0x228] ss:$16 sps:$4 sm:$0xff]   ;;  %v3048_v41 = vld [vmem:[%s3345_s21 + $0x244] ss:$16 sps:$4 sm:$0xff]  }
  0x5a   : > { %1574 = vmatprep.mubr.bf16.mxu0 %v2954_v42  ;;  %v3050_v42 = vld [vmem:[%s3345_s21 + $0x24c] ss:$16 sps:$4 sm:$0xff]  }
  0x60   : > { %1286 = vmatmul.mubr.bf16.gmra.mrb[8].mxu1 %v2956_v43  ;;  %v3052_v43 = vld [vmem:[%s3345_s21 + $0x240] ss:$16 sps:$4 sm:$0xff]  }
  0x61   : > { %1575 = vmatmul.mubr.bf16.gmra.mrb[8].mxu0 %v2957_v44  ;;  %1293 = vmatprep.mubr.bf16.mxu1 %v2958_v45  ;;  %v3053_v44 = vld [vmem:[%s3345_s21 + $0x248] ss:$16 sps:$4 sm:$0xff]   ;;  %v3054_v45 = vld [vmem:[%s3345_s21 + $0x264] ss:$16 sps:$4 sm:$0xff]  }
  0x62   : > { %1582 = vmatprep.mubr.bf16.mxu0 %v2960_v46  ;;  %v3056_v46 = vld [vmem:[%s3345_s21 + $0x26c] ss:$16 sps:$4 sm:$0xff]  }
  0x68   : > { %1294 = vmatmul.mubr.bf16.gmra.mrb[12].mxu1 %v2962_v47  ;;  %v3058_v47 = vld [vmem:[%s3345_s21 + $0x260] ss:$16 sps:$4 sm:$0xff]  }
  0x69   : > { %1583 = vmatmul.mubr.bf16.gmra.mrb[12].mxu0 %v2963_v48  ;;  %1301 = vmatprep.mubr.bf16.mxu1 %v2964_v49  ;;  %v3059_v48 = vld [vmem:[%s3345_s21 + $0x268] ss:$16 sps:$4 sm:$0xff]   ;;  %v3060_v49 = vld [vmem:[%s3345_s21 + $0x284] ss:$16 sps:$4 sm:$0xff]  }
  0x6a   : > { %1590 = vmatprep.mubr.bf16.mxu0 %v2966_v50  ;;  %v3062_v50 = vld [vmem:[%s3345_s21 + $0x28c] ss:$16 sps:$4 sm:$0xff]  }
  0x70   : > { %1302 = vmatmul.mubr.bf16.gmra.mrb[16].mxu1 %v2968_v51  ;;  %v3064_v51 = vld [vmem:[%s3345_s21 + $0x280] ss:$16 sps:$4 sm:$0xff]  }
  0x71   : > { %1591 = vmatmul.mubr.bf16.gmra.mrb[16].mxu0 %v2969_v52  ;;  %1309 = vmatprep.mubr.bf16.mxu1 %v2970_v53  ;;  %v3065_v52 = vld [vmem:[%s3345_s21 + $0x288] ss:$16 sps:$4 sm:$0xff]   ;;  %v3066_v53 = vld [vmem:[%s3345_s21 + $0x2a4] ss:$16 sps:$4 sm:$0xff]  }
  0x72   : > { %1598 = vmatprep.mubr.bf16.mxu0 %v2972_v54  ;;  %v3068_v54 = vld [vmem:[%s3345_s21 + $0x2ac] ss:$16 sps:$4 sm:$0xff]  }
  0x78   : > { %1310 = vmatmul.mubr.bf16.gmra.mrb[20].mxu1 %v2974_v55  ;;  %v3070_v55 = vld [vmem:[%s3345_s21 + $0x2a0] ss:$16 sps:$4 sm:$0xff]  }
  0x79   : > { %1599 = vmatmul.mubr.bf16.gmra.mrb[20].mxu0 %v2975_v56  ;;  %1317 = vmatprep.mubr.bf16.mxu1 %v2976_v57  ;;  %v3071_v56 = vld [vmem:[%s3345_s21 + $0x2a8] ss:$16 sps:$4 sm:$0xff]   ;;  %v3072_v57 = vld [vmem:[%s3345_s21 + $0x2c4] ss:$16 sps:$4 sm:$0xff]  }
  0x7a   : > { %1606 = vmatprep.mubr.bf16.mxu0 %v2978_v58  ;;  %v3074_v58 = vld [vmem:[%s3345_s21 + $0x2cc] ss:$16 sps:$4 sm:$0xff]  }
  0x80   : > { %1318 = vmatmul.mubr.bf16.gmra.mrb[24].mxu1 %v2980_v59  ;;  %v3076_v59 = vld [vmem:[%s3345_s21 + $0x2c0] ss:$16 sps:$4 sm:$0xff]  }
  0x81   : > { %1607 = vmatmul.mubr.bf16.gmra.mrb[24].mxu0 %v2981_v60  ;;  %1325 = vmatprep.mubr.bf16.mxu1 %v2982_v61  ;;  %v3077_v60 = vld [vmem:[%s3345_s21 + $0x2c8] ss:$16 sps:$4 sm:$0xff]   ;;  %v3078_v61 = vld [vmem:[%s3345_s21 + $0x2e4] ss:$16 sps:$4 sm:$0xff]  }
  0x82   : > { %1614 = vmatprep.mubr.bf16.mxu0 %v2984_v62  ;;  %v3080_v62 = vld [vmem:[%s3345_s21 + $0x2ec] ss:$16 sps:$4 sm:$0xff]  }
  0x88   : > { %1326 = vmatmul.mubr.bf16.gmra.mrb[28].mxu1 %v2986_v63  ;;  %v3082_v63 = vld [vmem:[%s3345_s21 + $0x2e0] ss:$16 sps:$4 sm:$0xff]  }
  0x89   : > { %1615 = vmatmul.mubr.bf16.gmra.mrb[28].mxu0 %v2987_v0  ;;  %1333 = vmatprep.mubr.bf16.mxu1 %v2988_v1  ;;  %v3083_v0 = vld [vmem:[%s3345_s21 + $0x2e8] ss:$16 sps:$4 sm:$0xff]   ;;  %v3084_v1 = vld [vmem:[%s3345_s21 + $0x304] ss:$16 sps:$4 sm:$0xff]  }
  0x8a   : > { %1622 = vmatprep.mubr.bf16.mxu0 %v2990_v2  ;;  %v3086_v2 = vld [vmem:[%s3345_s21 + $0x30c] ss:$16 sps:$4 sm:$0xff]  }
  0x90   : > { %1334 = vmatmul.mubr.bf16.gmra.mrb[32].mxu1 %v2992_v3  ;;  %v3088_v3 = vld [vmem:[%s3345_s21 + $0x300] ss:$16 sps:$4 sm:$0xff]  }
  0x91   : > { %1623 = vmatmul.mubr.bf16.gmra.mrb[32].mxu0 %v2993_v4  ;;  %1341 = vmatprep.mubr.bf16.mxu1 %v2994_v5  ;;  %v3089_v4 = vld [vmem:[%s3345_s21 + $0x308] ss:$16 sps:$4 sm:$0xff]   ;;  %v3090_v5 = vld [vmem:[%s3345_s21 + $0x324] ss:$16 sps:$4 sm:$0xff]  }
  0x92   : > { %1630 = vmatprep.mubr.bf16.mxu0 %v2996_v6  ;;  %v3092_v6 = vld [vmem:[%s3345_s21 + $0x32c] ss:$16 sps:$4 sm:$0xff]  }
  0x98   : > { %1342 = vmatmul.mubr.bf16.gmra.mrb[36].mxu1 %v2998_v7  ;;  %v3094_v7 = vld [vmem:[%s3345_s21 + $0x320] ss:$16 sps:$4 sm:$0xff]  }
  0x99   : > { %1631 = vmatmul.mubr.bf16.gmra.mrb[36].mxu0 %v2999_v8  ;;  %1349 = vmatprep.mubr.bf16.mxu1 %v3000_v9  ;;  %v3095_v8 = vld [vmem:[%s3345_s21 + $0x328] ss:$16 sps:$4 sm:$0xff]   ;;  %v3096_v9 = vld [vmem:[%s3345_s21 + $0x344] ss:$16 sps:$4 sm:$0xff]  }
  0x9a   : > { %1638 = vmatprep.mubr.bf16.mxu0 %v3002_v10  ;;  %v3098_v10 = vld [vmem:[%s3345_s21 + $0x34c] ss:$16 sps:$4 sm:$0xff]  }
  0xa0   : > { %1350 = vmatmul.mubr.bf16.gmra.mrb[40].mxu1 %v3004_v11  ;;  %v3100_v11 = vld [vmem:[%s3345_s21 + $0x340] ss:$16 sps:$4 sm:$0xff]  }
  0xa1   : > { %1639 = vmatmul.mubr.bf16.gmra.mrb[40].mxu0 %v3005_v12  ;;  %1357 = vmatprep.mubr.bf16.mxu1 %v3006_v13  ;;  %v3101_v12 = vld [vmem:[%s3345_s21 + $0x348] ss:$16 sps:$4 sm:$0xff]   ;;  %v3102_v13 = vld [vmem:[%s3345_s21 + $0x364] ss:$16 sps:$4 sm:$0xff]  }
  0xa2   : > { %1646 = vmatprep.mubr.bf16.mxu0 %v3008_v14  ;;  %v3104_v14 = vld [vmem:[%s3345_s21 + $0x36c] ss:$16 sps:$4 sm:$0xff]  }
  0xa8   : > { %1358 = vmatmul.mubr.bf16.gmra.mrb[44].mxu1 %v3010_v15  ;;  %v3495_v15 = vld [vmem:[%s3491_s24] ss:$0 sm:$0xff] }
  0xa9   : > { %1647 = vmatmul.mubr.bf16.gmra.mrb[44].mxu0 %v3011_v16  ;;  %1365 = vmatprep.mubr.bf16.mxu1 %v3012_v17 }
  0xaa   : > { %1654 = vmatprep.mubr.bf16.mxu0 %v3014_v18 }
  0xb0   : > { %1366 = vmatmul.mubr.bf16.gmra.mrb[48].mxu1 %v3016_v19 }
  0xb1   : > { %1655 = vmatmul.mubr.bf16.gmra.mrb[48].mxu0 %v3017_v20  ;;  %1373 = vmatprep.mubr.bf16.mxu1 %v3018_v21  ;;  %v3106_v20 = vld [vmem:[%s3345_s21 + $0x360] ss:$16 sps:$4 sm:$0xff]  }
  0xb2   : > { %1662 = vmatprep.mubr.bf16.mxu0 %v3020_v22 }
  0xb8   : > { %1374 = vmatmul.mubr.bf16.gmra.mrb[52].mxu1 %v3022_v23  ;;  %v3107_v23 = vld [vmem:[%s3345_s21 + $0x368] ss:$16 sps:$4 sm:$0xff]  }
  0xb9   : > { %1663 = vmatmul.mubr.bf16.gmra.mrb[52].mxu0 %v3023_v24  ;;  %1381 = vmatprep.mubr.bf16.mxu1 %v3024_v25  ;;  %v3108_v24 = vld [vmem:[%s3345_s21 + $0x384] ss:$16 sps:$4 sm:$0xff]  }
  0xba   : > { %1670 = vmatprep.mubr.bf16.mxu0 %v3026_v26 }
  0xc0   : > { %1382 = vmatmul.mubr.bf16.gmra.mrb[56].mxu1 %v3028_v27 }
  0xc1   : > { %1671 = vmatmul.mubr.bf16.gmra.mrb[56].mxu0 %v3029_v28  ;;  %1389 = vmatprep.mubr.bf16.mxu1 %v3030_v29  ;;  %v3110_v29 = vld [vmem:[%s3345_s21 + $0x38c] ss:$16 sps:$4 sm:$0xff]  }
  0xc2   : > { %1678 = vmatprep.mubr.bf16.mxu0 %v3032_v30 }
  0xc8   : > { %1390 = vmatmul.mubr.bf16.gmra.mrb[60].mxu1 %v3034_v31 }
  0xc9   : > { %1679 = vmatmul.mubr.bf16.gmra.mrb[60].mxu0 %v3035_v32  ;;  %1397 = vmatprep.mubr.bf16.mxu1 %v3036_v33 }
  0xca   : > { %1686 = vmatprep.mubr.bf16.mxu0 %v3038_v34 }
  0xd0   : > { %1398 = vmatmul.mubr.bf16.gmra.mrb[64].mxu1 %v3040_v35 }
  0xd1   : > { %1687 = vmatmul.mubr.bf16.gmra.mrb[64].mxu0 %v3041_v36  ;;  %1405 = vmatprep.mubr.bf16.mxu1 %v3042_v37  ;;  %v3112_v36 = vld [vmem:[%s3345_s21 + $0x380] ss:$16 sps:$4 sm:$0xff]  }
  0xd2   : > { %1694 = vmatprep.mubr.bf16.mxu0 %v3044_v38 }
  0xd8   : > { %1406 = vmatmul.mubr.bf16.gmra.mrb[68].mxu1 %v3046_v39  ;;  %v3113_v39 = vld [vmem:[%s3345_s21 + $0x388] ss:$16 sps:$4 sm:$0xff]  }
  0xd9   : > { %1695 = vmatmul.mubr.bf16.gmra.mrb[68].mxu0 %v3047_v40  ;;  %1413 = vmatprep.mubr.bf16.mxu1 %v3048_v41  ;;  %v3114_v40 = vld [vmem:[%s3345_s21 + $0x3a4] ss:$16 sps:$4 sm:$0xff]  }
  0xda   : > { %1702 = vmatprep.mubr.bf16.mxu0 %v3050_v42 }
  0xe0   : > { %1414 = vmatmul.mubr.bf16.gmra.mrb[72].mxu1 %v3052_v43 }
  0xe1   : > { %1703 = vmatmul.mubr.bf16.gmra.mrb[72].mxu0 %v3053_v44  ;;  %1421 = vmatprep.mubr.bf16.mxu1 %v3054_v45  ;;  %v3116_v45 = vld [vmem:[%s3345_s21 + $0x3ac] ss:$16 sps:$4 sm:$0xff]  }
  0xe2   : > { %1710 = vmatprep.mubr.bf16.mxu0 %v3056_v46 }
  0xe8   : > { %1422 = vmatmul.mubr.bf16.gmra.mrb[76].mxu1 %v3058_v47 }
  0xe9   : > { %1711 = vmatmul.mubr.bf16.gmra.mrb[76].mxu0 %v3059_v48  ;;  %1429 = vmatprep.mubr.bf16.mxu1 %v3060_v49 }
  0xea   : > { %1718 = vmatprep.mubr.bf16.mxu0 %v3062_v50 }
  0xf0   : > { %1430 = vmatmul.mubr.bf16.gmra.mrb[80].mxu1 %v3064_v51 }
  0xf1   : > { %1719 = vmatmul.mubr.bf16.gmra.mrb[80].mxu0 %v3065_v52  ;;  %1437 = vmatprep.mubr.bf16.mxu1 %v3066_v53 }
  0xf2   : > { %1726 = vmatprep.mubr.bf16.mxu0 %v3068_v54  ;;  %v3118_v54 = vld [vmem:[%s3345_s21 + $0x3a0] ss:$16 sps:$4 sm:$0xff]  }
  0xf8   : > { %1438 = vmatmul.mubr.bf16.gmra.mrb[84].mxu1 %v3070_v55 }
  0xf9   : > { %1727 = vmatmul.mubr.bf16.gmra.mrb[84].mxu0 %v3071_v56  ;;  %1445 = vmatprep.mubr.bf16.mxu1 %v3072_v57 }
  0xfa   : > { %1734 = vmatprep.mubr.bf16.mxu0 %v3074_v58  ;;  %v3119_v58 = vld [vmem:[%s3345_s21 + $0x3a8] ss:$16 sps:$4 sm:$0xff]  }
 0x100   : > { %1446 = vmatmul.mubr.bf16.gmra.mrb[88].mxu1 %v3076_v59  ;;  %v3120_v59 = vld [vmem:[%s3345_s21 + $0x3c4] ss:$16 sps:$4 sm:$0xff]  }
 0x101   : > { %1735 = vmatmul.mubr.bf16.gmra.mrb[88].mxu0 %v3077_v60  ;;  %1453 = vmatprep.mubr.bf16.mxu1 %v3078_v61 }
 0x102   : > { %1742 = vmatprep.mubr.bf16.mxu0 %v3080_v62 }
 0x108   : > { %1454 = vmatmul.mubr.bf16.gmra.mrb[92].mxu1 %v3082_v63 }
 0x109   : > { %1743 = vmatmul.mubr.bf16.gmra.mrb[92].mxu0 %v3083_v0  ;;  %1461 = vmatprep.mubr.bf16.mxu1 %v3084_v1  ;;  %v3122_v0 = vld [vmem:[%s3345_s21 + $0x3cc] ss:$16 sps:$4 sm:$0xff]  }
 0x10a   : > { %1750 = vmatprep.mubr.bf16.mxu0 %v3086_v2 }
 0x110   : > { %1462 = vmatmul.mubr.bf16.gmra.mrb[96].mxu1 %v3088_v3 }
 0x111   : > { %1751 = vmatmul.mubr.bf16.gmra.mrb[96].mxu0 %v3089_v4  ;;  %1469 = vmatprep.mubr.bf16.mxu1 %v3090_v5 }
 0x112   : > { %1758 = vmatprep.mubr.bf16.mxu0 %v3092_v6 }
 0x118   : > { %1470 = vmatmul.mubr.bf16.gmra.mrb[100].mxu1 %v3094_v7 }
 0x119   : > { %1759 = vmatmul.mubr.bf16.gmra.mrb[100].mxu0 %v3095_v8  ;;  %1477 = vmatprep.mubr.bf16.mxu1 %v3096_v9  ;;  %v3124_v9 = vld [vmem:[%s3345_s21 + $0x3c0] ss:$16 sps:$4 sm:$0xff]  }
 0x11a   : > { %1766 = vmatprep.mubr.bf16.mxu0 %v3098_v10 }
 0x120   : > { %1478 = vmatmul.mubr.bf16.gmra.mrb[104].mxu1 %v3100_v11 }
 0x121   : > { %1767 = vmatmul.mubr.bf16.gmra.mrb[104].mxu0 %v3101_v12  ;;  %1485 = vmatprep.mubr.bf16.mxu1 %v3102_v13  ;;  %v3125_v13 = vld [vmem:[%s3345_s21 + $0x3c8] ss:$16 sps:$4 sm:$0xff]  }
 0x122   : > { %1774 = vmatprep.mubr.bf16.mxu0 %v3104_v14  ;;  %v3126_v14 = vld [vmem:[%s3345_s21 + $0x3e4] ss:$16 sps:$4 sm:$0xff]  }
 0x123   : > { %v1271_v16 = vpop.f32.mrb[0].mxu1 }
 0x124   : > { %v1272_v17 = vadd.f32 %v3495_v15, %v1271_v16  ;;  %v1560_v18 = vpop.f32.mrb[0].mxu0  ;;  %v1273_v19 = vpop.f32.mrb[1].mxu1 }
 0x125   : > { %v1562_v21 = vpop.f32.mrb[1].mxu0  ;;  %v1274_v22 = vpop.f32.mrb[2].mxu1 }
 0x126   : > { %v1561_v25 = vadd.f32 %v1560_v18, %v1272_v17  ;;  %v1275_v26 = vadd.f32 %v3495_v15, %v1274_v22  ;;  %v1563_v27 = vpop.f32.mrb[2].mxu0  ;;  %v1276_v28 = vpop.f32.mrb[3].mxu1 }
 0x127   : > { %v1565_v30 = vpop.f32.mrb[3].mxu0 }
 0x128   : > { %v1564_v31 = vadd.f32 %v1563_v27, %v1275_v26  ;;  %1486 = vmatmul.mubr.bf16.gmra.mrb[108].mxu1 %v3106_v20  ;;  %3132 = vtanh.f32 %v1561_v25  ;;  %v3128_v20 = vld [vmem:[%s3345_s21 + $0x3ec] ss:$16 sps:$4 sm:$0xff]  }
 0x129   : > { %1775 = vmatmul.mubr.bf16.gmra.mrb[108].mxu0 %v3107_v23  ;;  %1493 = vmatprep.mubr.bf16.mxu1 %v3108_v24 }
 0x12a   : > { %3134 = vtanh.f32 %v1564_v31  ;;  %1782 = vmatprep.mubr.bf16.mxu0 %v3110_v29  ;;  %v3130_v29 = vld [vmem:[%s3345_s21 + $0x3e0] ss:$16 sps:$4 sm:$0xff]  }
 0x12b   : > { %v1279_v32 = vpop.f32.mrb[4].mxu1 }
 0x12c   : > { %v1280_v33 = vadd.f32 %v3495_v15, %v1279_v32  ;;  %v1568_v34 = vpop.f32.mrb[4].mxu0  ;;  %v1281_v35 = vpop.f32.mrb[5].mxu1 }
 0x12d   : > { %v1570_v37 = vpop.f32.mrb[5].mxu0  ;;  %v1282_v38 = vpop.f32.mrb[6].mxu1 }
 0x12e   : > { %v1569_v41 = vadd.f32 %v1568_v34, %v1280_v33  ;;  %v1283_v42 = vadd.f32 %v3495_v15, %v1282_v38  ;;  %v1571_v43 = vpop.f32.mrb[6].mxu0  ;;  %v1284_v44 = vpop.f32.mrb[7].mxu1  ;;  %v3131_v33 = vld [vmem:[%s3345_s21 + $0x3e8] ss:$16 sps:$4 sm:$0xff]  }
 0x12f   : > { %v1573_v46 = vpop.f32.mrb[7].mxu0 }
 0x130   : > { %v1572_v47 = vadd.f32 %v1571_v43, %v1283_v42  ;;  %1494 = vmatmul.mubr.bf16.gmra.mrb[112].mxu1 %v3112_v36  ;;  %3136 = vtanh.f32 %v1569_v41 }
 0x131   : > { %1783 = vmatmul.mubr.bf16.gmra.mrb[112].mxu0 %v3113_v39  ;;  %1501 = vmatprep.mubr.bf16.mxu1 %v3114_v40 }
 0x132   : > { %3138 = vtanh.f32 %v1572_v47  ;;  %1790 = vmatprep.mubr.bf16.mxu0 %v3116_v45  ;;  %v3133_v48 = vpop.eup %3132 }
 0x133   : > { %v1287_v49 = vpop.f32.mrb[8].mxu1 }
 0x134   : > { %v3135_v50 = vpop.eup %3134  ;;  %v1288_v51 = vadd.f32 %v3495_v15, %v1287_v49  ;;  %v1576_v52 = vpop.f32.mrb[8].mxu0 }
 0x135   : > { %v1289_v53 = vpop.f32.mrb[9].mxu1  ;;  %v2583_v55 = vpack.c.bf16 %v3135_v50, %v3133_v48  ;;  %v1578_v56 = vpop.f32.mrb[9].mxu0 }
 0x136   : > { %v1290_v57 = vpop.f32.mrb[10].mxu1  ;;  %v1577_v60 = vadd.f32 %v1576_v52, %v1288_v51  ;;  %v1579_v62 = vpop.f32.mrb[10].mxu0 }
 0x137   : > { %v1291_v61 = vadd.f32 %v3495_v15, %v1290_v57  ;;  %v1292_v63 = vpop.f32.mrb[11].mxu1  ;;  %2584 = vst [vmem:[%s3514_s27] sm:$0xff] %v2583_v55   ;;  %v1581_v1 = vpop.f32.mrb[11].mxu0 }
 0x138   : > { %1502 = vmatmul.mubr.bf16.gmra.mrb[116].mxu1 %v3118_v54  ;;  %3140 = vtanh.f32 %v1577_v60 }
 0x139   : > { %v1580_v2 = vadd.f32 %v1579_v62, %v1291_v61  ;;  %1791 = vmatmul.mubr.bf16.gmra.mrb[116].mxu0 %v3119_v58  ;;  %1509 = vmatprep.mubr.bf16.mxu1 %v3120_v59 }
 0x13a   : > { %1798 = vmatprep.mubr.bf16.mxu0 %v3122_v0  ;;  %v3137_v3 = vpop.eup %3136 }
 0x13b   : > { %3142 = vtanh.f32 %v1580_v2  ;;  %v1295_v4 = vpop.f32.mrb[12].mxu1 }
 0x13c   : > { %v3139_v5 = vpop.eup %3138  ;;  %v1296_v6 = vadd.f32 %v3495_v15, %v1295_v4  ;;  %v1584_v7 = vpop.f32.mrb[12].mxu0 }
 0x13d   : > { %v1297_v8 = vpop.f32.mrb[13].mxu1  ;;  %v2588_v10 = vpack.c.bf16 %v3139_v5, %v3137_v3  ;;  %v1586_v11 = vpop.f32.mrb[13].mxu0 }
 0x13e   : > { %v1298_v12 = vpop.f32.mrb[14].mxu1  ;;  %v1585_v16 = vadd.f32 %v1584_v7, %v1296_v6  ;;  %v1587_v18 = vpop.f32.mrb[14].mxu0 }
 0x13f   : > { %v1299_v17 = vadd.f32 %v3495_v15, %v1298_v12  ;;  %v1300_v19 = vpop.f32.mrb[15].mxu1  ;;  %2740 = vst [vmem:[%s3514_s27 + $0x8] sm:$0xff] %v2588_v10   ;;  %v1589_v21 = vpop.f32.mrb[15].mxu0 }
 0x140   : > { %1510 = vmatmul.mubr.bf16.gmra.mrb[120].mxu1 %v3124_v9  ;;  %3144 = vtanh.f32 %v1585_v16 }
 0x141   : > { %v1588_v22 = vadd.f32 %v1587_v18, %v1299_v17  ;;  %1799 = vmatmul.mubr.bf16.gmra.mrb[120].mxu0 %v3125_v13  ;;  %1517 = vmatprep.mubr.bf16.mxu1 %v3126_v14 }
 0x142   : > { %1806 = vmatprep.mubr.bf16.mxu0 %v3128_v20  ;;  %v3141_v23 = vpop.eup %3140 }
 0x143   : > { %3146 = vtanh.f32 %v1588_v22  ;;  %v1303_v24 = vpop.f32.mrb[16].mxu1 }
 0x144   : > { %v1304_v26 = vadd.f32 %v3495_v15, %v1303_v24  ;;  %v1592_v27 = vpop.f32.mrb[16].mxu0  ;;  %v1305_v28 = vpop.f32.mrb[17].mxu1 }
 0x145   : > { %v3143_v25 = vpop.eup %3142  ;;  %v1594_v31 = vpop.f32.mrb[17].mxu0 }
 0x146   : > { %v2593_v30 = vpack.c.bf16 %v3143_v25, %v3141_v23  ;;  %v1306_v32 = vpop.f32.mrb[18].mxu1  ;;  %v1593_v34 = vadd.f32 %v1592_v27, %v1304_v26  ;;  %v1595_v36 = vpop.f32.mrb[18].mxu0 }
 0x147   : > { %v1307_v35 = vadd.f32 %v3495_v15, %v1306_v32  ;;  %v1308_v37 = vpop.f32.mrb[19].mxu1  ;;  %v1597_v38 = vpop.f32.mrb[19].mxu0 }
 0x148   : > { %2741 = vst [vmem:[%s3514_s27 + $0x10] sm:$0xff] %v2593_v30   ;;  %1518 = vmatmul.mubr.bf16.gmra.mrb[124].mxu1 %v3130_v29  ;;  %3148 = vtanh.f32 %v1593_v34 }
 0x149   : > { %v1596_v39 = vadd.f32 %v1595_v36, %v1307_v35  ;;  %1807 = vmatmul.mubr.bf16.gmra.mrb[124].mxu0 %v3131_v33 }
 0x14a   : > { %v3145_v40 = vpop.eup %3144 }
 0x14b   : > { %3150 = vtanh.f32 %v1596_v39  ;;  %v1311_v41 = vpop.f32.mrb[20].mxu1 }
 0x14c   : > { %v1312_v43 = vadd.f32 %v3495_v15, %v1311_v41  ;;  %v1600_v44 = vpop.f32.mrb[20].mxu0  ;;  %v1313_v45 = vpop.f32.mrb[21].mxu1 }
 0x14d   : > { %v3147_v42 = vpop.eup %3146  ;;  %v1602_v47 = vpop.f32.mrb[21].mxu0 }
 0x14e   : > { %v2598_v46 = vpack.c.bf16 %v3147_v42, %v3145_v40  ;;  %v1314_v48 = vpop.f32.mrb[22].mxu1  ;;  %v1601_v49 = vadd.f32 %v1600_v44, %v1312_v43  ;;  %v1603_v51 = vpop.f32.mrb[22].mxu0 }
 0x14f   : > { %v1315_v50 = vadd.f32 %v3495_v15, %v1314_v48  ;;  %v1316_v52 = vpop.f32.mrb[23].mxu1  ;;  %v1605_v53 = vpop.f32.mrb[23].mxu0 }
 0x150   : > { %2742 = vst [vmem:[%s3514_s27 + $0x18] sm:$0xff] %v2598_v46   ;;  %3152 = vtanh.f32 %v1601_v49 }
 0x151   : > { %v1604_v54 = vadd.f32 %v1603_v51, %v1315_v50 }
 0x152   : > { %v3149_v55 = vpop.eup %3148 }
 0x153   : > { %3154 = vtanh.f32 %v1604_v54  ;;  %v1319_v56 = vpop.f32.mrb[24].mxu1 }
 0x154   : > { %v1320_v58 = vadd.f32 %v3495_v15, %v1319_v56  ;;  %v1608_v59 = vpop.f32.mrb[24].mxu0  ;;  %v1321_v60 = vpop.f32.mrb[25].mxu1 }
 0x155   : > { %v3151_v57 = vpop.eup %3150  ;;  %v1610_v62 = vpop.f32.mrb[25].mxu0 }
 0x156   : > { %v2603_v61 = vpack.c.bf16 %v3151_v57, %v3149_v55  ;;  %v1322_v63 = vpop.f32.mrb[26].mxu1  ;;  %v1609_v0 = vadd.f32 %v1608_v59, %v1320_v58  ;;  %v1611_v2 = vpop.f32.mrb[26].mxu0 }
 0x157   : > { %v1323_v1 = vadd.f32 %v3495_v15, %v1322_v63  ;;  %v1324_v3 = vpop.f32.mrb[27].mxu1  ;;  %v1613_v4 = vpop.f32.mrb[27].mxu0 }
 0x158   : > { %2743 = vst [vmem:[%s3514_s27 + $0x20] sm:$0xff] %v2603_v61   ;;  %3156 = vtanh.f32 %v1609_v0 }
 0x159   : > { %v1612_v5 = vadd.f32 %v1611_v2, %v1323_v1 }
 0x15a   : > { %v3153_v6 = vpop.eup %3152 }
 0x15b   : > { %3158 = vtanh.f32 %v1612_v5  ;;  %v1327_v7 = vpop.f32.mrb[28].mxu1 }
 0x15c   : > { %v1328_v9 = vadd.f32 %v3495_v15, %v1327_v7  ;;  %v1616_v10 = vpop.f32.mrb[28].mxu0  ;;  %v1329_v11 = vpop.f32.mrb[29].mxu1 }
 0x15d   : > { %v3155_v8 = vpop.eup %3154  ;;  %v1618_v13 = vpop.f32.mrb[29].mxu0 }
 0x15e   : > { %v2608_v12 = vpack.c.bf16 %v3155_v8, %v3153_v6  ;;  %v1330_v14 = vpop.f32.mrb[30].mxu1  ;;  %v1617_v16 = vadd.f32 %v1616_v10, %v1328_v9  ;;  %v1619_v18 = vpop.f32.mrb[30].mxu0 }
 0x15f   : > { %v1331_v17 = vadd.f32 %v3495_v15, %v1330_v14  ;;  %v1332_v19 = vpop.f32.mrb[31].mxu1  ;;  %v1621_v20 = vpop.f32.mrb[31].mxu0 }
 0x160   : > { %2744 = vst [vmem:[%s3514_s27 + $0x28] sm:$0xff] %v2608_v12   ;;  %3160 = vtanh.f32 %v1617_v16 }
 0x161   : > { %v1620_v21 = vadd.f32 %v1619_v18, %v1331_v17 }
 0x162   : > { %v3157_v22 = vpop.eup %3156 }
 0x163   : > { %3162 = vtanh.f32 %v1620_v21  ;;  %v1335_v23 = vpop.f32.mrb[32].mxu1 }
 0x164   : > { %v1336_v25 = vadd.f32 %v3495_v15, %v1335_v23  ;;  %v1624_v26 = vpop.f32.mrb[32].mxu0  ;;  %v1337_v27 = vpop.f32.mrb[33].mxu1 }
 0x165   : > { %v3159_v24 = vpop.eup %3158  ;;  %v1626_v29 = vpop.f32.mrb[33].mxu0 }
 0x166   : > { %v2613_v28 = vpack.c.bf16 %v3159_v24, %v3157_v22  ;;  %v1338_v30 = vpop.f32.mrb[34].mxu1  ;;  %v1625_v31 = vadd.f32 %v1624_v26, %v1336_v25  ;;  %v1627_v33 = vpop.f32.mrb[34].mxu0 }
 0x167   : > { %v1339_v32 = vadd.f32 %v3495_v15, %v1338_v30  ;;  %v1340_v34 = vpop.f32.mrb[35].mxu1  ;;  %v1629_v35 = vpop.f32.mrb[35].mxu0 }
 0x168   : > { %2745 = vst [vmem:[%s3514_s27 + $0x30] sm:$0xff] %v2613_v28   ;;  %3164 = vtanh.f32 %v1625_v31 }
 0x169   : > { %v1628_v36 = vadd.f32 %v1627_v33, %v1339_v32 }
 0x16a   : > { %v3161_v37 = vpop.eup %3160 }
 0x16b   : > { %3166 = vtanh.f32 %v1628_v36  ;;  %v1343_v38 = vpop.f32.mrb[36].mxu1 }
 0x16c   : > { %v1344_v40 = vadd.f32 %v3495_v15, %v1343_v38  ;;  %v1632_v41 = vpop.f32.mrb[36].mxu0  ;;  %v1345_v42 = vpop.f32.mrb[37].mxu1 }
 0x16d   : > { %v3163_v39 = vpop.eup %3162  ;;  %v1634_v44 = vpop.f32.mrb[37].mxu0 }
 0x16e   : > { %v2618_v43 = vpack.c.bf16 %v3163_v39, %v3161_v37  ;;  %v1346_v45 = vpop.f32.mrb[38].mxu1  ;;  %v1633_v46 = vadd.f32 %v1632_v41, %v1344_v40  ;;  %v1635_v48 = vpop.f32.mrb[38].mxu0 }
 0x16f   : > { %v1347_v47 = vadd.f32 %v3495_v15, %v1346_v45  ;;  %v1348_v49 = vpop.f32.mrb[39].mxu1  ;;  %v1637_v50 = vpop.f32.mrb[39].mxu0 }
 0x170   : > { %2746 = vst [vmem:[%s3514_s27 + $0x38] sm:$0xff] %v2618_v43   ;;  %3168 = vtanh.f32 %v1633_v46 }
 0x171   : > { %v1636_v51 = vadd.f32 %v1635_v48, %v1347_v47 }
 0x172   : > { %v3165_v52 = vpop.eup %3164 }
 0x173   : > { %3170 = vtanh.f32 %v1636_v51  ;;  %v1351_v53 = vpop.f32.mrb[40].mxu1 }
 0x174   : > { %v1352_v55 = vadd.f32 %v3495_v15, %v1351_v53  ;;  %v1640_v56 = vpop.f32.mrb[40].mxu0  ;;  %v1353_v57 = vpop.f32.mrb[41].mxu1 }
 0x175   : > { %v3167_v54 = vpop.eup %3166  ;;  %v1642_v59 = vpop.f32.mrb[41].mxu0 }
 0x176   : > { %v2623_v58 = vpack.c.bf16 %v3167_v54, %v3165_v52  ;;  %v1354_v60 = vpop.f32.mrb[42].mxu1  ;;  %v1641_v61 = vadd.f32 %v1640_v56, %v1352_v55  ;;  %v1643_v63 = vpop.f32.mrb[42].mxu0 }
 0x177   : > { %v1355_v62 = vadd.f32 %v3495_v15, %v1354_v60  ;;  %v1356_v0 = vpop.f32.mrb[43].mxu1  ;;  %v1645_v1 = vpop.f32.mrb[43].mxu0 }
 0x178   : > { %2747 = vst [vmem:[%s3514_s27 + $0x40] sm:$0xff] %v2623_v58   ;;  %3172 = vtanh.f32 %v1641_v61 }
 0x179   : > { %v1644_v2 = vadd.f32 %v1643_v63, %v1355_v62 }
 0x17a   : > { %v3169_v3 = vpop.eup %3168 }
 0x17b   : > { %3174 = vtanh.f32 %v1644_v2  ;;  %v1359_v4 = vpop.f32.mrb[44].mxu1 }
 0x17c   : > { %v1360_v6 = vadd.f32 %v3495_v15, %v1359_v4  ;;  %v1648_v7 = vpop.f32.mrb[44].mxu0  ;;  %v1361_v8 = vpop.f32.mrb[45].mxu1 }
 0x17d   : > { %v3171_v5 = vpop.eup %3170  ;;  %v1650_v10 = vpop.f32.mrb[45].mxu0 }
 0x17e   : > { %v2628_v9 = vpack.c.bf16 %v3171_v5, %v3169_v3  ;;  %v1362_v11 = vpop.f32.mrb[46].mxu1  ;;  %v1649_v12 = vadd.f32 %v1648_v7, %v1360_v6  ;;  %v1651_v14 = vpop.f32.mrb[46].mxu0 }
 0x17f   : > { %v1363_v13 = vadd.f32 %v3495_v15, %v1362_v11  ;;  %v1364_v16 = vpop.f32.mrb[47].mxu1  ;;  %v1653_v17 = vpop.f32.mrb[47].mxu0 }
 0x180   : > { %2748 = vst [vmem:[%s3514_s27 + $0x48] sm:$0xff] %v2628_v9   ;;  %3176 = vtanh.f32 %v1649_v12 }
 0x181   : > { %v1652_v18 = vadd.f32 %v1651_v14, %v1363_v13 }
 0x182   : > { %v3173_v19 = vpop.eup %3172 }
 0x183   : > { %3178 = vtanh.f32 %v1652_v18  ;;  %v1367_v20 = vpop.f32.mrb[48].mxu1 }
 0x184   : > { %v1368_v22 = vadd.f32 %v3495_v15, %v1367_v20  ;;  %v1656_v23 = vpop.f32.mrb[48].mxu0  ;;  %v1369_v24 = vpop.f32.mrb[49].mxu1 }
 0x185   : > { %v3175_v21 = vpop.eup %3174  ;;  %v1658_v26 = vpop.f32.mrb[49].mxu0 }
 0x186   : > { %v2633_v25 = vpack.c.bf16 %v3175_v21, %v3173_v19  ;;  %v1370_v27 = vpop.f32.mrb[50].mxu1  ;;  %v1657_v28 = vadd.f32 %v1656_v23, %v1368_v22  ;;  %v1659_v30 = vpop.f32.mrb[50].mxu0 }
 0x187   : > { %v1371_v29 = vadd.f32 %v3495_v15, %v1370_v27  ;;  %v1372_v31 = vpop.f32.mrb[51].mxu1  ;;  %v1661_v32 = vpop.f32.mrb[51].mxu0 }
 0x188   : > { %2749 = vst [vmem:[%s3514_s27 + $0x50] sm:$0xff] %v2633_v25   ;;  %3180 = vtanh.f32 %v1657_v28 }
 0x189   : > { %v1660_v33 = vadd.f32 %v1659_v30, %v1371_v29 }
 0x18a   : > { %v3177_v34 = vpop.eup %3176 }
 0x18b   : > { %3182 = vtanh.f32 %v1660_v33  ;;  %v1375_v35 = vpop.f32.mrb[52].mxu1 }
 0x18c   : > { %v1376_v37 = vadd.f32 %v3495_v15, %v1375_v35  ;;  %v1664_v38 = vpop.f32.mrb[52].mxu0  ;;  %v1377_v39 = vpop.f32.mrb[53].mxu1 }
 0x18d   : > { %v3179_v36 = vpop.eup %3178  ;;  %v1666_v41 = vpop.f32.mrb[53].mxu0 }
 0x18e   : > { %v2638_v40 = vpack.c.bf16 %v3179_v36, %v3177_v34  ;;  %v1378_v42 = vpop.f32.mrb[54].mxu1  ;;  %v1665_v43 = vadd.f32 %v1664_v38, %v1376_v37  ;;  %v1667_v45 = vpop.f32.mrb[54].mxu0 }
 0x18f   : > { %v1379_v44 = vadd.f32 %v3495_v15, %v1378_v42  ;;  %v1380_v46 = vpop.f32.mrb[55].mxu1  ;;  %v1669_v47 = vpop.f32.mrb[55].mxu0 }
 0x190   : > { %2750 = vst [vmem:[%s3514_s27 + $0x58] sm:$0xff] %v2638_v40   ;;  %3184 = vtanh.f32 %v1665_v43 }
 0x191   : > { %v1668_v48 = vadd.f32 %v1667_v45, %v1379_v44 }
 0x192   : > { %v3181_v49 = vpop.eup %3180 }
 0x193   : > { %3186 = vtanh.f32 %v1668_v48  ;;  %v1383_v50 = vpop.f32.mrb[56].mxu1 }
 0x194   : > { %v1384_v52 = vadd.f32 %v3495_v15, %v1383_v50  ;;  %v1672_v53 = vpop.f32.mrb[56].mxu0  ;;  %v1385_v54 = vpop.f32.mrb[57].mxu1 }
 0x195   : > { %v3183_v51 = vpop.eup %3182  ;;  %v1674_v56 = vpop.f32.mrb[57].mxu0 }
 0x196   : > { %v2643_v55 = vpack.c.bf16 %v3183_v51, %v3181_v49  ;;  %v1386_v57 = vpop.f32.mrb[58].mxu1  ;;  %v1673_v58 = vadd.f32 %v1672_v53, %v1384_v52  ;;  %v1675_v60 = vpop.f32.mrb[58].mxu0 }
 0x197   : > { %v1387_v59 = vadd.f32 %v3495_v15, %v1386_v57  ;;  %v1388_v61 = vpop.f32.mrb[59].mxu1  ;;  %v1677_v62 = vpop.f32.mrb[59].mxu0 }
 0x198   : > { %2751 = vst [vmem:[%s3514_s27 + $0x60] sm:$0xff] %v2643_v55   ;;  %3188 = vtanh.f32 %v1673_v58 }
 0x199   : > { %v1676_v63 = vadd.f32 %v1675_v60, %v1387_v59 }
 0x19a   : > { %v3185_v0 = vpop.eup %3184 }
 0x19b   : > { %3190 = vtanh.f32 %v1676_v63  ;;  %v1391_v1 = vpop.f32.mrb[60].mxu1 }
 0x19c   : > { %v1392_v3 = vadd.f32 %v3495_v15, %v1391_v1  ;;  %v1680_v4 = vpop.f32.mrb[60].mxu0  ;;  %v1393_v5 = vpop.f32.mrb[61].mxu1 }
 0x19d   : > { %v3187_v2 = vpop.eup %3186  ;;  %v1682_v7 = vpop.f32.mrb[61].mxu0 }
 0x19e   : > { %v2648_v6 = vpack.c.bf16 %v3187_v2, %v3185_v0  ;;  %v1394_v8 = vpop.f32.mrb[62].mxu1  ;;  %v1681_v9 = vadd.f32 %v1680_v4, %v1392_v3  ;;  %v1683_v11 = vpop.f32.mrb[62].mxu0 }
 0x19f   : > { %v1395_v10 = vadd.f32 %v3495_v15, %v1394_v8  ;;  %v1396_v12 = vpop.f32.mrb[63].mxu1  ;;  %v1685_v13 = vpop.f32.mrb[63].mxu0 }
 0x1a0   : > { %2752 = vst [vmem:[%s3514_s27 + $0x68] sm:$0xff] %v2648_v6   ;;  %3192 = vtanh.f32 %v1681_v9 }
 0x1a1   : > { %v1684_v14 = vadd.f32 %v1683_v11, %v1395_v10 }
 0x1a2   : > { %v3189_v16 = vpop.eup %3188 }
 0x1a3   : > { %3194 = vtanh.f32 %v1684_v14  ;;  %v1399_v17 = vpop.f32.mrb[64].mxu1 }
 0x1a4   : > { %v1400_v19 = vadd.f32 %v3495_v15, %v1399_v17  ;;  %v1688_v20 = vpop.f32.mrb[64].mxu0  ;;  %v1401_v21 = vpop.f32.mrb[65].mxu1 }
 0x1a5   : > { %v3191_v18 = vpop.eup %3190  ;;  %v1690_v23 = vpop.f32.mrb[65].mxu0 }
 0x1a6   : > { %v2653_v22 = vpack.c.bf16 %v3191_v18, %v3189_v16  ;;  %v1402_v24 = vpop.f32.mrb[66].mxu1  ;;  %v1689_v25 = vadd.f32 %v1688_v20, %v1400_v19  ;;  %v1691_v27 = vpop.f32.mrb[66].mxu0 }
 0x1a7   : > { %v1403_v26 = vadd.f32 %v3495_v15, %v1402_v24  ;;  %v1404_v28 = vpop.f32.mrb[67].mxu1  ;;  %v1693_v29 = vpop.f32.mrb[67].mxu0 }
 0x1a8   : > { %2753 = vst [vmem:[%s3514_s27 + $0x70] sm:$0xff] %v2653_v22   ;;  %3196 = vtanh.f32 %v1689_v25 }
 0x1a9   : > { %v1692_v30 = vadd.f32 %v1691_v27, %v1403_v26 }
 0x1aa   : > { %v3193_v31 = vpop.eup %3192 }
 0x1ab   : > { %3198 = vtanh.f32 %v1692_v30  ;;  %v1407_v32 = vpop.f32.mrb[68].mxu1 }
 0x1ac   : > { %v1408_v34 = vadd.f32 %v3495_v15, %v1407_v32  ;;  %v1696_v35 = vpop.f32.mrb[68].mxu0  ;;  %v1409_v36 = vpop.f32.mrb[69].mxu1 }
 0x1ad   : > { %v3195_v33 = vpop.eup %3194  ;;  %v1698_v38 = vpop.f32.mrb[69].mxu0 }
 0x1ae   : > { %v2658_v37 = vpack.c.bf16 %v3195_v33, %v3193_v31  ;;  %v1410_v39 = vpop.f32.mrb[70].mxu1  ;;  %v1697_v40 = vadd.f32 %v1696_v35, %v1408_v34  ;;  %v1699_v42 = vpop.f32.mrb[70].mxu0 }
 0x1af   : > { %v1411_v41 = vadd.f32 %v3495_v15, %v1410_v39  ;;  %v1412_v43 = vpop.f32.mrb[71].mxu1  ;;  %v1701_v44 = vpop.f32.mrb[71].mxu0 }
 0x1b0   : > { %2754 = vst [vmem:[%s3514_s27 + $0x78] sm:$0xff] %v2658_v37   ;;  %3200 = vtanh.f32 %v1697_v40 }
 0x1b1   : > { %v1700_v45 = vadd.f32 %v1699_v42, %v1411_v41 }
 0x1b2   : > { %v3197_v46 = vpop.eup %3196 }
 0x1b3   : > { %3202 = vtanh.f32 %v1700_v45  ;;  %v1415_v47 = vpop.f32.mrb[72].mxu1 }
 0x1b4   : > { %v1416_v49 = vadd.f32 %v3495_v15, %v1415_v47  ;;  %v1704_v50 = vpop.f32.mrb[72].mxu0  ;;  %v1417_v51 = vpop.f32.mrb[73].mxu1 }
 0x1b5   : > { %v3199_v48 = vpop.eup %3198  ;;  %v1706_v53 = vpop.f32.mrb[73].mxu0 }
 0x1b6   : > { %v2663_v52 = vpack.c.bf16 %v3199_v48, %v3197_v46  ;;  %v1418_v54 = vpop.f32.mrb[74].mxu1  ;;  %v1705_v55 = vadd.f32 %v1704_v50, %v1416_v49  ;;  %v1707_v57 = vpop.f32.mrb[74].mxu0 }
 0x1b7   : > { %v1419_v56 = vadd.f32 %v3495_v15, %v1418_v54  ;;  %v1420_v58 = vpop.f32.mrb[75].mxu1  ;;  %v1709_v59 = vpop.f32.mrb[75].mxu0 }
 0x1b8   : > { %2755 = vst [vmem:[%s3514_s27 + $0x80] sm:$0xff] %v2663_v52   ;;  %3204 = vtanh.f32 %v1705_v55 }
 0x1b9   : > { %v1708_v60 = vadd.f32 %v1707_v57, %v1419_v56 }
 0x1ba   : > { %v3201_v61 = vpop.eup %3200 }
 0x1bb   : > { %3206 = vtanh.f32 %v1708_v60  ;;  %v1423_v62 = vpop.f32.mrb[76].mxu1 }
 0x1bc   : > { %v1424_v0 = vadd.f32 %v3495_v15, %v1423_v62  ;;  %v1712_v1 = vpop.f32.mrb[76].mxu0  ;;  %v1425_v2 = vpop.f32.mrb[77].mxu1 }
 0x1bd   : > { %v3203_v63 = vpop.eup %3202  ;;  %v1714_v4 = vpop.f32.mrb[77].mxu0 }
 0x1be   : > { %v2668_v3 = vpack.c.bf16 %v3203_v63, %v3201_v61  ;;  %v1426_v5 = vpop.f32.mrb[78].mxu1  ;;  %v1713_v6 = vadd.f32 %v1712_v1, %v1424_v0  ;;  %v1715_v8 = vpop.f32.mrb[78].mxu0 }
 0x1bf   : > { %v1427_v7 = vadd.f32 %v3495_v15, %v1426_v5  ;;  %v1428_v9 = vpop.f32.mrb[79].mxu1  ;;  %v1717_v10 = vpop.f32.mrb[79].mxu0 }
 0x1c0   : > { %2756 = vst [vmem:[%s3514_s27 + $0x88] sm:$0xff] %v2668_v3   ;;  %3208 = vtanh.f32 %v1713_v6 }
 0x1c1   : > { %v1716_v11 = vadd.f32 %v1715_v8, %v1427_v7 }
 0x1c2   : > { %v3205_v12 = vpop.eup %3204 }
 0x1c3   : > { %3210 = vtanh.f32 %v1716_v11  ;;  %v1431_v13 = vpop.f32.mrb[80].mxu1 }
 0x1c4   : > { %v1432_v16 = vadd.f32 %v3495_v15, %v1431_v13  ;;  %v1720_v17 = vpop.f32.mrb[80].mxu0  ;;  %v1433_v18 = vpop.f32.mrb[81].mxu1 }
 0x1c5   : > { %v3207_v14 = vpop.eup %3206  ;;  %v1722_v20 = vpop.f32.mrb[81].mxu0 }
 0x1c6   : > { %v2673_v19 = vpack.c.bf16 %v3207_v14, %v3205_v12  ;;  %v1434_v21 = vpop.f32.mrb[82].mxu1  ;;  %v1721_v22 = vadd.f32 %v1720_v17, %v1432_v16  ;;  %v1723_v24 = vpop.f32.mrb[82].mxu0 }
 0x1c7   : > { %v1435_v23 = vadd.f32 %v3495_v15, %v1434_v21  ;;  %v1436_v25 = vpop.f32.mrb[83].mxu1  ;;  %v1725_v26 = vpop.f32.mrb[83].mxu0 }
 0x1c8   : > { %2757 = vst [vmem:[%s3514_s27 + $0x90] sm:$0xff] %v2673_v19   ;;  %3212 = vtanh.f32 %v1721_v22 }
 0x1c9   : > { %v1724_v27 = vadd.f32 %v1723_v24, %v1435_v23 }
 0x1ca   : > { %v3209_v28 = vpop.eup %3208 }
 0x1cb   : > { %3214 = vtanh.f32 %v1724_v27  ;;  %v1439_v29 = vpop.f32.mrb[84].mxu1 }
 0x1cc   : > { %v1440_v31 = vadd.f32 %v3495_v15, %v1439_v29  ;;  %v1728_v32 = vpop.f32.mrb[84].mxu0  ;;  %v1441_v33 = vpop.f32.mrb[85].mxu1 }
 0x1cd   : > { %v3211_v30 = vpop.eup %3210  ;;  %v1730_v35 = vpop.f32.mrb[85].mxu0 }
 0x1ce   : > { %v2678_v34 = vpack.c.bf16 %v3211_v30, %v3209_v28  ;;  %v1442_v36 = vpop.f32.mrb[86].mxu1  ;;  %v1729_v37 = vadd.f32 %v1728_v32, %v1440_v31  ;;  %v1731_v39 = vpop.f32.mrb[86].mxu0 }
 0x1cf   : > { %v1443_v38 = vadd.f32 %v3495_v15, %v1442_v36  ;;  %v1444_v40 = vpop.f32.mrb[87].mxu1  ;;  %v1733_v41 = vpop.f32.mrb[87].mxu0 }
 0x1d0   : > { %2758 = vst [vmem:[%s3514_s27 + $0x98] sm:$0xff] %v2678_v34   ;;  %3216 = vtanh.f32 %v1729_v37 }
 0x1d1   : > { %v1732_v42 = vadd.f32 %v1731_v39, %v1443_v38 }
 0x1d2   : > { %v3213_v43 = vpop.eup %3212 }
 0x1d3   : > { %3218 = vtanh.f32 %v1732_v42  ;;  %v1447_v44 = vpop.f32.mrb[88].mxu1 }
 0x1d4   : > { %v1448_v46 = vadd.f32 %v3495_v15, %v1447_v44  ;;  %v1736_v47 = vpop.f32.mrb[88].mxu0  ;;  %v1449_v48 = vpop.f32.mrb[89].mxu1 }
 0x1d5   : > { %v3215_v45 = vpop.eup %3214  ;;  %v1738_v50 = vpop.f32.mrb[89].mxu0 }
 0x1d6   : > { %v2683_v49 = vpack.c.bf16 %v3215_v45, %v3213_v43  ;;  %v1450_v51 = vpop.f32.mrb[90].mxu1  ;;  %v1737_v52 = vadd.f32 %v1736_v47, %v1448_v46  ;;  %v1739_v54 = vpop.f32.mrb[90].mxu0 }
 0x1d7   : > { %v1451_v53 = vadd.f32 %v3495_v15, %v1450_v51  ;;  %v1452_v55 = vpop.f32.mrb[91].mxu1  ;;  %v1741_v56 = vpop.f32.mrb[91].mxu0 }
 0x1d8   : > { %2759 = vst [vmem:[%s3514_s27 + $0xa0] sm:$0xff] %v2683_v49   ;;  %3220 = vtanh.f32 %v1737_v52 }
 0x1d9   : > { %v1740_v57 = vadd.f32 %v1739_v54, %v1451_v53 }
 0x1da   : > { %v3217_v58 = vpop.eup %3216 }
 0x1db   : > { %3222 = vtanh.f32 %v1740_v57  ;;  %v1455_v59 = vpop.f32.mrb[92].mxu1 }
 0x1dc   : > { %v1456_v61 = vadd.f32 %v3495_v15, %v1455_v59  ;;  %v1744_v62 = vpop.f32.mrb[92].mxu0  ;;  %v1457_v63 = vpop.f32.mrb[93].mxu1 }
 0x1dd   : > { %v3219_v60 = vpop.eup %3218  ;;  %v1746_v1 = vpop.f32.mrb[93].mxu0 }
 0x1de   : > { %v2688_v0 = vpack.c.bf16 %v3219_v60, %v3217_v58  ;;  %v1458_v2 = vpop.f32.mrb[94].mxu1  ;;  %v1745_v3 = vadd.f32 %v1744_v62, %v1456_v61  ;;  %v1747_v5 = vpop.f32.mrb[94].mxu0  ;;  %v3602_v58 = vld [vmem:[%s3491_s24] ss:$0 sm:$0xff] }
 0x1df   : > { %v1459_v4 = vadd.f32 %v3495_v15, %v1458_v2  ;;  %v1460_v6 = vpop.f32.mrb[95].mxu1  ;;  %v1749_v7 = vpop.f32.mrb[95].mxu0 }
 0x1e0   : > { %2760 = vst [vmem:[%s3514_s27 + $0xa8] sm:$0xff] %v2688_v0   ;;  %3224 = vtanh.f32 %v1745_v3 }
 0x1e1   : > { %v1748_v8 = vadd.f32 %v1747_v5, %v1459_v4 }
 0x1e2   : > { %v3221_v9 = vpop.eup %3220 }
 0x1e3   : > { %3226 = vtanh.f32 %v1748_v8  ;;  %v1463_v10 = vpop.f32.mrb[96].mxu1 }
 0x1e4   : > { %v1464_v12 = vadd.f32 %v3495_v15, %v1463_v10  ;;  %v1752_v13 = vpop.f32.mrb[96].mxu0  ;;  %v1465_v14 = vpop.f32.mrb[97].mxu1 }
 0x1e5   : > { %v3223_v11 = vpop.eup %3222  ;;  %v1754_v17 = vpop.f32.mrb[97].mxu0 }
 0x1e6   : > { %v2693_v16 = vpack.c.bf16 %v3223_v11, %v3221_v9  ;;  %v1466_v18 = vpop.f32.mrb[98].mxu1  ;;  %v1753_v19 = vadd.f32 %v1752_v13, %v1464_v12  ;;  %v1755_v21 = vpop.f32.mrb[98].mxu0 }
 0x1e7   : > { %v1467_v20 = vadd.f32 %v3495_v15, %v1466_v18  ;;  %v1468_v22 = vpop.f32.mrb[99].mxu1  ;;  %v1757_v23 = vpop.f32.mrb[99].mxu0 }
 0x1e8   : > { %2761 = vst [vmem:[%s3514_s27 + $0xb0] sm:$0xff] %v2693_v16   ;;  %3228 = vtanh.f32 %v1753_v19 }
 0x1e9   : > { %v1756_v24 = vadd.f32 %v1755_v21, %v1467_v20 }
 0x1ea   : > { %v3225_v25 = vpop.eup %3224 }
 0x1eb   : > { %3230 = vtanh.f32 %v1756_v24  ;;  %v1471_v26 = vpop.f32.mrb[100].mxu1 }
 0x1ec   : > { %v1472_v28 = vadd.f32 %v3495_v15, %v1471_v26  ;;  %v1760_v29 = vpop.f32.mrb[100].mxu0  ;;  %v1473_v30 = vpop.f32.mrb[101].mxu1 }
 0x1ed   : > { %v3227_v27 = vpop.eup %3226  ;;  %v1762_v32 = vpop.f32.mrb[101].mxu0 }
 0x1ee   : > { %v2698_v31 = vpack.c.bf16 %v3227_v27, %v3225_v25  ;;  %v1474_v33 = vpop.f32.mrb[102].mxu1  ;;  %v1761_v34 = vadd.f32 %v1760_v29, %v1472_v28  ;;  %v1763_v36 = vpop.f32.mrb[102].mxu0 }
 0x1ef   : > { %v1475_v35 = vadd.f32 %v3495_v15, %v1474_v33  ;;  %v1476_v37 = vpop.f32.mrb[103].mxu1  ;;  %v1765_v38 = vpop.f32.mrb[103].mxu0 }
 0x1f0   : > { %2762 = vst [vmem:[%s3514_s27 + $0xb8] sm:$0xff] %v2698_v31   ;;  %3232 = vtanh.f32 %v1761_v34 }
 0x1f1   : > { %v1764_v39 = vadd.f32 %v1763_v36, %v1475_v35 }
 0x1f2   : > { %v3229_v40 = vpop.eup %3228 }
 0x1f3   : > { %3234 = vtanh.f32 %v1764_v39  ;;  %v1479_v41 = vpop.f32.mrb[104].mxu1 }
 0x1f4   : > { %v1480_v43 = vadd.f32 %v3495_v15, %v1479_v41  ;;  %v1768_v44 = vpop.f32.mrb[104].mxu0  ;;  %v1481_v45 = vpop.f32.mrb[105].mxu1 }
 0x1f5   : > { %v3231_v42 = vpop.eup %3230  ;;  %v1770_v47 = vpop.f32.mrb[105].mxu0 }
 0x1f6   : > { %v2703_v46 = vpack.c.bf16 %v3231_v42, %v3229_v40  ;;  %v1482_v48 = vpop.f32.mrb[106].mxu1  ;;  %v1769_v49 = vadd.f32 %v1768_v44, %v1480_v43  ;;  %v1771_v51 = vpop.f32.mrb[106].mxu0 }
 0x1f7   : > { %v1483_v50 = vadd.f32 %v3495_v15, %v1482_v48  ;;  %v1484_v52 = vpop.f32.mrb[107].mxu1  ;;  %v1773_v53 = vpop.f32.mrb[107].mxu0 }
 0x1f8   : > { %2763 = vst [vmem:[%s3514_s27 + $0xc0] sm:$0xff] %v2703_v46   ;;  %3236 = vtanh.f32 %v1769_v49 }
 0x1f9   : > { %v1772_v54 = vadd.f32 %v1771_v51, %v1483_v50 }
 0x1fa   : > { %v3233_v55 = vpop.eup %3232 }
 0x1fb   : > { %3238 = vtanh.f32 %v1772_v54  ;;  %v1487_v56 = vpop.f32.mrb[108].mxu1 }
 0x1fc   : > { %v1488_v59 = vadd.f32 %v3602_v58, %v1487_v56  ;;  %v1776_v60 = vpop.f32.mrb[108].mxu0  ;;  %v1489_v61 = vpop.f32.mrb[109].mxu1 }
 0x1fd   : > { %v3235_v57 = vpop.eup %3234  ;;  %v1778_v63 = vpop.f32.mrb[109].mxu0 }
 0x1fe   : > { %v2708_v62 = vpack.c.bf16 %v3235_v57, %v3233_v55  ;;  %v1490_v15 = vpop.f32.mrb[110].mxu1  ;;  %v1777_v0 = vadd.f32 %v1776_v60, %v1488_v59  ;;  %v1779_v2 = vpop.f32.mrb[110].mxu0 }
 0x1ff   : > { %v1491_v1 = vadd.f32 %v3602_v58, %v1490_v15  ;;  %v1492_v3 = vpop.f32.mrb[111].mxu1  ;;  %v1781_v4 = vpop.f32.mrb[111].mxu0 }
 0x200   : > { %2764 = vst [vmem:[%s3514_s27 + $0xc8] sm:$0xff] %v2708_v62   ;;  %3240 = vtanh.f32 %v1777_v0 }
 0x201   : > { %v1780_v5 = vadd.f32 %v1779_v2, %v1491_v1 }
 0x202   : > { %v3237_v6 = vpop.eup %3236 }
 0x203   : > { %3242 = vtanh.f32 %v1780_v5  ;;  %v1495_v7 = vpop.f32.mrb[112].mxu1 }
 0x204   : > { %v1496_v9 = vadd.f32 %v3602_v58, %v1495_v7  ;;  %v1784_v10 = vpop.f32.mrb[112].mxu0  ;;  %v1497_v11 = vpop.f32.mrb[113].mxu1 }
 0x205   : > { %v3239_v8 = vpop.eup %3238  ;;  %v1786_v13 = vpop.f32.mrb[113].mxu0 }
 0x206   : > { %v2713_v12 = vpack.c.bf16 %v3239_v8, %v3237_v6  ;;  %v1498_v14 = vpop.f32.mrb[114].mxu1  ;;  %v1785_v16 = vadd.f32 %v1784_v10, %v1496_v9  ;;  %v1787_v18 = vpop.f32.mrb[114].mxu0 }
 0x207   : > { %v1499_v17 = vadd.f32 %v3602_v58, %v1498_v14  ;;  %v1500_v19 = vpop.f32.mrb[115].mxu1  ;;  %v1789_v20 = vpop.f32.mrb[115].mxu0 }
 0x208   : > { %2765 = vst [vmem:[%s3514_s27 + $0xd0] sm:$0xff] %v2713_v12   ;;  %3244 = vtanh.f32 %v1785_v16 }
 0x209   : > { %v1788_v21 = vadd.f32 %v1787_v18, %v1499_v17 }
 0x20a   : > { %v3241_v22 = vpop.eup %3240 }
 0x20b   : > { %3246 = vtanh.f32 %v1788_v21  ;;  %v1503_v23 = vpop.f32.mrb[116].mxu1 }
 0x20c   : > { %v1504_v25 = vadd.f32 %v3602_v58, %v1503_v23  ;;  %v1792_v26 = vpop.f32.mrb[116].mxu0  ;;  %v1505_v27 = vpop.f32.mrb[117].mxu1 }
 0x20d   : > { %v3243_v24 = vpop.eup %3242  ;;  %v1794_v29 = vpop.f32.mrb[117].mxu0 }
 0x20e   : > { %v2718_v28 = vpack.c.bf16 %v3243_v24, %v3241_v22  ;;  %v1506_v30 = vpop.f32.mrb[118].mxu1  ;;  %v1793_v31 = vadd.f32 %v1792_v26, %v1504_v25  ;;  %v1795_v33 = vpop.f32.mrb[118].mxu0 }
 0x20f   : > { %v1507_v32 = vadd.f32 %v3602_v58, %v1506_v30  ;;  %v1508_v34 = vpop.f32.mrb[119].mxu1  ;;  %v1797_v35 = vpop.f32.mrb[119].mxu0 }
 0x210   : > { %2766 = vst [vmem:[%s3514_s27 + $0xd8] sm:$0xff] %v2718_v28   ;;  %3248 = vtanh.f32 %v1793_v31 }
 0x211   : > { %v1796_v36 = vadd.f32 %v1795_v33, %v1507_v32 }
 0x212   : > { %v3245_v37 = vpop.eup %3244 }
 0x213   : > { %3250 = vtanh.f32 %v1796_v36  ;;  %v1511_v38 = vpop.f32.mrb[120].mxu1 }
 0x214   : > { %v1512_v40 = vadd.f32 %v3602_v58, %v1511_v38  ;;  %v1800_v41 = vpop.f32.mrb[120].mxu0  ;;  %v1513_v42 = vpop.f32.mrb[121].mxu1 }
 0x215   : > { %v3247_v39 = vpop.eup %3246  ;;  %v1802_v44 = vpop.f32.mrb[121].mxu0 }
 0x216   : > { %v2723_v43 = vpack.c.bf16 %v3247_v39, %v3245_v37  ;;  %v1514_v45 = vpop.f32.mrb[122].mxu1  ;;  %v1801_v46 = vadd.f32 %v1800_v41, %v1512_v40  ;;  %v1803_v48 = vpop.f32.mrb[122].mxu0 }
 0x217   : > { %v1515_v47 = vadd.f32 %v3602_v58, %v1514_v45  ;;  %v1516_v49 = vpop.f32.mrb[123].mxu1  ;;  %v1805_v50 = vpop.f32.mrb[123].mxu0 }
 0x218   : > { %2767 = vst [vmem:[%s3514_s27 + $0xe0] sm:$0xff] %v2723_v43   ;;  %3252 = vtanh.f32 %v1801_v46 }
 0x219   : > { %v1804_v51 = vadd.f32 %v1803_v48, %v1515_v47 }
 0x21a   : > { %v3249_v52 = vpop.eup %3248 }
 0x21b   : > { %3254 = vtanh.f32 %v1804_v51  ;;  %v1519_v53 = vpop.f32.mrb[124].mxu1 }
 0x21c   : > { %v1520_v55 = vadd.f32 %v3602_v58, %v1519_v53  ;;  %v1808_v56 = vpop.f32.mrb[124].mxu0  ;;  %v1521_v57 = vpop.f32.mrb[125].mxu1 }
 0x21d   : > { %v3251_v54 = vpop.eup %3250  ;;  %v1810_v60 = vpop.f32.mrb[125].mxu0 }
 0x21e   : > { %v2728_v59 = vpack.c.bf16 %v3251_v54, %v3249_v52  ;;  %v1522_v61 = vpop.f32.mrb[126].mxu1  ;;  %v1809_v62 = vadd.f32 %v1808_v56, %v1520_v55  ;;  %v1811_v15 = vpop.f32.mrb[126].mxu0 }
 0x21f   : > { %v1523_v63 = vadd.f32 %v3602_v58, %v1522_v61  ;;  %v1524_v0 = vpop.f32.mrb[127].mxu1  ;;  %v1813_v1 = vpop.f32.mrb[127].mxu0 }
 0x220   : > { %2768 = vst [vmem:[%s3514_s27 + $0xe8] sm:$0xff] %v2728_v59   ;;  %3256 = vtanh.f32 %v1809_v62 }
 0x221   : > { %v1812_v2 = vadd.f32 %v1811_v15, %v1523_v63 }
 0x222   : > { %v3253_v3 = vpop.eup %3252 }
 0x223   : > { %3258 = vtanh.f32 %v1812_v2 }
 0x225   : > { %v3255_v4 = vpop.eup %3254 }
 0x226   : > { %v2733_v5 = vpack.c.bf16 %v3255_v4, %v3253_v3 }
 0x228   : > { %2769 = vst [vmem:[%s3514_s27 + $0xf0] sm:$0xff] %v2733_v5  }
 0x22a   : > { %v3257_v6 = vpop.eup %3256 }
 0x22d   : > { %v3259_v7 = vpop.eup %3258 }
 0x22e   : > { %v2738_v8 = vpack.c.bf16 %v3259_v7, %v3257_v6 }
 0x230   : > { %2770 = vst [vmem:[%s3514_s27 + $0xf8] sm:$0xff] %v2738_v8  }
 0x231 PF: > { %s13_s12 = sadd.s32 1, %s3267_s12  }
 0x232   : > { %p10_p4 = scmp.ge.s32.totalorder %s13_s12, 4  }
 0x234   :  { %12 = sbr.rel (!%p10_p4) target bundleno = 1 (0x1), region = 68 }

</bundles_post_ra>
